<compile_context>
chip_gen: v6e
topology: v6e:2x2x1
jax: 0.10.0
libtpu: 0.0.40
codegen_flags: <defaults>
</compile_context>

<pallas_src>
import functools

import jax
import jax.numpy as jnp
from jax.experimental import pallas as pl
from jax.experimental.pallas import tpu as pltpu

D_IN = 512            # BoxTerm / PositionTerm input_dimension (module default)
D_OUT = 256           # output_dimension (module default)
OUT_SIZE = 7          # AppearanceTerm output_size (module default)
K = OUT_SIZE ** 2     # 49 softmax channels
KD = K * D_OUT        # 12544 = 98 * 128
BOX_LANE_TILE = 1792  # 14 * 128, divides KD (12544 / 1792 = 7)


# ---------------------------------------------------------------------------
# glue: sinusoidal embedding, identical to the torch `embedding` helper
# ---------------------------------------------------------------------------
def sinusoidal_embedding(z, c=D_IN):
    i = jnp.arange(1, c, 2, dtype=jnp.float32)   # sin divisors 1000**(i/c), i odd
    j = jnp.arange(0, c, 2, dtype=jnp.float32)   # cos divisors 1000**(j/c), j even
    return jnp.concatenate(
        [jnp.sin(z / (1000.0 ** (i / c))), jnp.cos(z / (1000.0 ** (j / c)))], axis=-1)


def _hw_tiling(hw, n):
    """Pad HW to a multiple of 128 (lane-dense stores) and pick the hw tile."""
    hw_pad = -(-hw // 128) * 128
    tile = 128
    for t in (4096, 2048, 1024, 512, 256, 128):   # sweep knob (v6e: can go to 8192)
        if hw_pad % t == 0:
            tile = t
            break
    # v7x megacore: keep both TensorCores busy (parallel extent >= 2)
    while tile > 128 and (hw_pad // tile) * n < 2:
        tile //= 2
    return hw_pad, tile


def _box_vmem_limit(r):
    blk = (r * 4 * D_IN * 2            # eps_box (bf16)
           + 4 * D_IN * D_IN * 2       # V_box^T
           + D_IN * BOX_LANE_TILE * 2  # W_flat^T lane tile
           + r * BOX_LANE_TILE * 2)    # bf16 out tile
    return int(min(48 << 20, max(16 << 20, 4 * blk)))   # 2x double-buffered footprint


def _roipool_vmem_limit(rb, c, hw_tile, cgeo, out_bytes):
    blk = (rb * K * cgeo * 2           # [Gh|Gw] roi block (bf16)
           + cgeo * hw_tile * 2        # selector tile (bf16)
           + c * hw_tile * 2           # x tile (bf16)
           + K * c * 2 + K * 4         # conv_w, conv_b
           + rb * K * hw_tile * out_bytes)   # output tile
    footprint = 2 * blk + K * hw_tile * 4    # double-buffered blocks + app scratch
    # footprint-derived cap, kept well under v7x's 64 MiB physical VMEM
    return int(min(48 << 20, max(16 << 20, 2 * footprint)))


# ---------------------------------------------------------------------------
# Pallas kernels
# ---------------------------------------------------------------------------
def _boxterm_kernel(eps_ref, vboxT_ref, wflatT_ref, out_ref):
    # eps_ref: (R, 4*D_IN) bf16   vboxT_ref: (4*D_IN, D_IN) bf16
    # wflatT_ref: (D_IN, BOX_LANE_TILE) bf16   out_ref: (R, BOX_LANE_TILE) bf16
    # bv is tiny (R x 512); recomputing it per lane-tile keeps the lane axis "parallel".
    bv = jnp.dot(eps_ref[...], vboxT_ref[...], preferred_element_type=jnp.float32)
    out_ref[...] = jnp.dot(bv.astype(jnp.bfloat16), wflatT_ref[...],
                           preferred_element_type=jnp.float32).astype(out_ref.dtype)


def _roipool_kernel(ghw_ref, sel_ref, x_ref, cw_ref, cb_ref, out_ref, app_ref):
    # ghw_ref: (RB, K, H+W) bf16   [Gh | Gw] for the RB rois of this block
    # sel_ref: (H+W, T) bf16       0/1 row/col selector for this hw tile (pad-masked)
    # x_ref:   (C, T) bf16         image features for this (image, hw tile)
    # cw_ref:  (K, C) bf16         1x1-conv weight      cb_ref: (K, 1) f32 bias
    # out_ref: (RB, K, T)          softmax weights      app_ref: (K, T) f32 scratch
    #
    # NOTE: app_ref reuse requires the roi-block axis to be the INNERMOST ("arbitrary")
    # grid axis, so program_id(2) == 0 marks the first roi block of a new (tile, image).
    @pl.when(pl.program_id(2) == 0)
    def _():
        # de-fused appearance term + bias, computed once per (hw_tile, image)
        app_ref[...] = jnp.dot(cw_ref[...], x_ref[...],
                               preferred_element_type=jnp.float32) + cb_ref[...]

    rb = out_ref.shape[0]
    for j in range(rb):   # static unroll; rb <= 6 (RB*K ~ 256 MXU rows per grid step)
        # separable geo via one thin selector matmul (exact: selector entries are 0/1)
        geo = jnp.dot(ghw_ref[j], sel_ref[...], preferred_element_type=jnp.float32)
        logits = geo + app_ref[...]
        m = jnp.max(logits, axis=0, keepdims=True)   # Softmax2d == softmax over K
        e = jnp.exp(logits - m)
        out_ref[j] = (e / jnp.sum(e, axis=0, keepdims=True)).astype(out_ref.dtype)


# ---------------------------------------------------------------------------
# Pallas wrappers
# ---------------------------------------------------------------------------
def box_term_pallas(eps_box, vboxT, wflatT):
    """u_flat[r, k*256+d] = (W_box[k] @ V_box @ eps_box[r])[d]  -> (R, K*256) bf16."""
    r = eps_box.shape[0]
    return pl.pallas_call(
        _boxterm_kernel,
        out_shape=jax.ShapeDtypeStruct((r, KD), jnp.bfloat16),
        grid_spec=pltpu.PrefetchScalarGridSpec(
            num_scalar_prefetch=0,
            grid=(KD // BOX_LANE_TILE,),
            in_specs=[pl.BlockSpec((r, 4 * D_IN), lambda j: (0, 0)),
                      pl.BlockSpec((4 * D_IN, D_IN), lambda j: (0, 0)),
                      pl.BlockSpec((D_IN, BOX_LANE_TILE), lambda j: (0, j))],
            out_specs=pl.BlockSpec((r, BOX_LANE_TILE), lambda j: (0, j))),
        compiler_params=pltpu.CompilerParams(
            dimension_semantics=("parallel",),
            vmem_limit_bytes=_box_vmem_limit(r)),
    )(eps_box, vboxT, wflatT)


def roipool_weights_pallas(ghw, sel, x_flat, conv_w, conv_b, *, rb, hw_tile, out_dtype):
    """softmax_K( app_n + Gh_r(row) + Gw_r(col) )  -> (R_pad, N, K, HW_pad)."""
    r_pad, _, cgeo = ghw.shape
    n_tiles = sel.shape[0]
    n, c, hw_pad = x_flat.shape
    out_bytes = jnp.dtype(out_dtype).itemsize
    return pl.pallas_call(
        _roipool_kernel,
        out_shape=jax.ShapeDtypeStruct((r_pad, n, K, hw_pad), out_dtype),
        grid_spec=pltpu.PrefetchScalarGridSpec(
            num_scalar_prefetch=0,
            grid=(n_tiles, n, r_pad // rb),       # roi-block axis innermost -> app reuse
            in_specs=[pl.BlockSpec((rb, K, cgeo), lambda t, i, j: (j, 0, 0)),
                      pl.BlockSpec((None, cgeo, hw_tile), lambda t, i, j: (t, 0, 0)),
                      pl.BlockSpec((None, c, hw_tile), lambda t, i, j: (i, 0, t)),
                      pl.BlockSpec((K, c), lambda t, i, j: (0, 0)),
                      pl.BlockSpec((K, 1), lambda t, i, j: (0, 0))],
            out_specs=pl.BlockSpec((rb, None, K, hw_tile),
                                   lambda t, i, j: (j, i, 0, t)),
            scratch_shapes=[pltpu.VMEM((K, hw_tile), jnp.float32)]),
        # TODO(synk): sweep pipeline_mode=pl.Buffered(3) on the ghw / out specs (few %).
        compiler_params=pltpu.CompilerParams(
            dimension_semantics=("parallel", "parallel", "arbitrary"),
            vmem_limit_bytes=_roipool_vmem_limit(rb, c, hw_tile, cgeo, out_bytes)),
    )(ghw, sel, x_flat, conv_w, conv_b)


# ---------------------------------------------------------------------------
# full forward (mirrors LearnableRoIPool.forward)
# ---------------------------------------------------------------------------
@functools.partial(jax.jit, static_argnames=("out_dtype",))
def _device_forward(x, rois, params, out_dtype=jnp.bfloat16):
    n, c, h, w = x.shape
    hw = h * w
    r = rois.shape[0]
    hw_pad, hw_tile = _hw_tiling(hw, n)
    rb = min(r, -(-256 // K))             # roi block: target RB*K >= 256 MXU rows
    r_pad = -(-r // rb) * rb
    emb = lambda z: sinusoidal_embedding(z, D_IN)

    # --- glue: box sinusoidal embeddings ---
    eps_box = jax.vmap(jax.vmap(emb))(rois[:, 1:5]).reshape(r, 4 * D_IN)      # (R, 2048)

    # parameter re-layout + bf16 cast (done at init in a real module)
    vboxT = params["v_box"].T.astype(jnp.bfloat16)                            # (2048, 512)
    wflatT = params["w_box"].reshape(KD, D_IN).T.astype(jnp.bfloat16)         # (512, 12544)

    # --- box term (Pallas, bf16 out; no f32 round-trip of u) ---
    u = box_term_pallas(eps_box.astype(jnp.bfloat16), vboxT, wflatT)          # (R, K*256)
    u = u.reshape(r, K, D_OUT)

    # --- separable position/geo term: geo_r[k, p] = Gh[r,k,row(p)] + Gw[r,k,col(p)] ---
    emb_h = jax.vmap(emb)(jnp.arange(h, dtype=jnp.float32))                   # (H, 512)
    emb_w = jax.vmap(emb)(jnp.arange(w, dtype=jnp.float32))                   # (W, 512)
    a_h = jnp.dot(params["w_im"][:, :D_IN], emb_h.T)                          # (256, H)
    a_w = jnp.dot(params["w_im"][:, D_IN:], emb_w.T)                          # (256, W)
    ab = jnp.concatenate([a_h, a_w], axis=1)                                  # (256, H+W)
    ghw = jnp.einsum("rkd,dc->rkc", u.astype(jnp.float32), ab)                # (R, K, H+W)
    ghw = jnp.pad(ghw, ((0, r_pad - r), (0, 0), (0, 0))).astype(jnp.bfloat16)
    ghw = jax.lax.stop_gradient(ghw)

    # --- 0/1 row/col selectors per hw tile (lane-dense, padded tail masked to zero) ---
    n_tiles = hw_pad // hw_tile
    p = jnp.arange(hw_pad, dtype=jnp.int32).reshape(n_tiles, hw_tile)
    valid = (p < hw)[:, None, :]
    sel_h = ((p // w)[:, None, :] == jnp.arange(h, dtype=jnp.int32)[None, :, None]) & valid
    sel_w = ((p % w)[:, None, :] == jnp.arange(w, dtype=jnp.int32)[None, :, None]) & valid
    sel = jnp.concatenate([sel_h, sel_w], axis=1).astype(jnp.bfloat16)        # (T#, H+W, T)

    # --- appearance inputs ---
    x_flat = jnp.pad(x.reshape(n, c, hw),
                     ((0, 0), (0, 0), (0, hw_pad - hw))).astype(jnp.bfloat16)
    conv_w = params["conv_w"].astype(jnp.bfloat16)
    conv_b = params["conv_b"].astype(jnp.float32).reshape(K, 1)

    out = roipool_weights_pallas(ghw, sel, x_flat, conv_w, conv_b,
                                 rb=rb, hw_tile=hw_tile, out_dtype=out_dtype)
    out = out[:r, :, :, :hw].reshape(r, n, K, h, w)
    return out


def learnable_roi_pool_forward(x, rois, params, out_dtype=jnp.bfloat16):
    n = x.shape[0]
    out = _device_forward(x, rois, params, out_dtype=out_dtype)
    # glue: reproduce the PyTorch list-of-[index, weight] structure.
    # Single device->host copy of all roi indices (no per-roi sync).
    roi_idx = [int(v) for v in jax.device_get(rois[:, 0])]
    weights = []
    for i in range(n):
        for rr, idx in enumerate(roi_idx):
            if idx == i:
                weights.append((i, out[rr]))          # each weight is (N, K, H, W)
    return weights


# ---------------------------------------------------------------------------
# pure-jnp reference (same bf16 operand rounding, f32 accumulation) for checking
# ---------------------------------------------------------------------------
def _reference_forward(x, rois, params, out_dtype=jnp.bfloat16):
    n, c, h, w = x.shape
    hw = h * w
    r = rois.shape[0]
    bf = jnp.bfloat16
    emb = lambda z: sinusoidal_embedding(z, D_IN)
    eps_box = jax.vmap(jax.vmap(emb))(rois[:, 1:5]).reshape(r, 4 * D_IN)
    bv = jnp.dot(eps_box.astype(bf), params["v_box"].T.astype(bf),
                 preferred_element_type=jnp.float32)                          # (R, 512)
    u = jnp.einsum("rc,kdc->rkd", bv.astype(bf), params["w_box"].astype(bf),
                   preferred_element_type=jnp.float32).astype(bf)             # (R, K, 256)
    emb_h = jax.vmap(emb)(jnp.arange(h, dtype=jnp.float32))
    emb_w = jax.vmap(emb)(jnp.arange(w, dtype=jnp.float32))
    a_h = jnp.dot(params["w_im"][:, :D_IN], emb_h.T)                          # (256, H)
    a_w = jnp.dot(params["w_im"][:, D_IN:], emb_w.T)                          # (256, W)
    gh = jnp.einsum("rkd,dh->rkh", u.astype(jnp.float32), a_h).astype(bf).astype(jnp.float32)
    gw = jnp.einsum("rkd,dw->rkw", u.astype(jnp.float32), a_w).astype(bf).astype(jnp.float32)
    geo = gh[:, :, :, None] + gw[:, :, None, :]                               # (R, K, H, W)
    app = jnp.einsum("kc,ncp->nkp", params["conv_w"].astype(bf),
                     x.reshape(n, c, hw).astype(bf),
                     preferred_element_type=jnp.float32) \
        + params["conv_b"][None, :, None].astype(jnp.float32)                 # (N, K, HW)
    logits = geo.reshape(r, 1, K, hw) + app[None]                             # (R, N, K, HW)
    out = jax.nn.softmax(logits, axis=2)
    return out.astype(out_dtype).astype(jnp.float32).reshape(r, n, K, h, w)


# ---------------------------------------------------------------------------
if __name__ == "__main__":
    key = jax.random.PRNGKey(0)
    N, C, H, W = 2, 4, 16, 16
    k_x, k_v, k_wb, k_wim, k_cw, k_cb = jax.random.split(key, 6)

    x = jax.random.normal(k_x, (N, C, H, W), jnp.float32)
    rois = jnp.array([[0, 2.1, 2.3, 3.5, 3.8],
                      [1, 2.2, 2.4, 3.5, 3.9]], jnp.float32)

    # deterministic parameter init (module uses torch.randn; scaled for sane logits)
    params = dict(
        v_box=0.02 * jax.random.normal(k_v, (D_IN, 4 * D_IN), jnp.float32),
        w_box=0.02 * jax.random.normal(k_wb, (K, D_OUT, D_IN), jnp.float32),
        w_im=0.02 * jax.random.normal(k_wim, (D_OUT, 2 * D_IN), jnp.float32),
        conv_w=0.1 * jax.random.normal(k_cw, (K, C), jnp.float32),
        conv_b=0.1 * jax.random.normal(k_cb, (K,), jnp.float32),
    )

    weights = learnable_roi_pool_forward(x, rois, params)
    for _, wmap in weights:
        jax.block_until_ready(wmap)

    assert len(weights) == 2
    assert weights[0][1].shape == (N, K, H, W)

    # each weight map is a channel softmax -> sums to ~1 over K (bf16 output tolerance)
    s = jnp.sum(weights[0][1].astype(jnp.float32), axis=1)
    assert jnp.allclose(s, jnp.ones_like(s), atol=5e-3), "softmax normalization failed"

    # matches a pure-jnp reference that uses identical bf16 operand rounding
    ref = _reference_forward(x, rois, params)
    roi_idx = [int(v) for v in jax.device_get(rois[:, 0])]
    expected = [(i, ref[rr]) for i in range(N)
                for rr, idx in enumerate(roi_idx) if idx == i]
    assert len(expected) == len(weights)
    for (ei, ew), (wi, ww) in zip(expected, weights):
        assert ei == wi
        err = float(jnp.max(jnp.abs(ew - ww.astype(jnp.float32))))
        assert err < 2e-2, f"mismatch vs reference: max abs err {err}"

    print("KERNEL_OK")
</pallas_src>

<mosaic_0001>
module attributes {stable_mosaic.version = 11 : i64} {
  func.func @_boxterm_kernel(%arg0: i32, %arg1: memref<2x2048xbf16, #tpu.memory_space<vmem>>, %arg2: memref<2048x512xbf16, #tpu.memory_space<vmem>>, %arg3: memref<512x1792xbf16, #tpu.memory_space<vmem>>, %arg4: memref<2x1792xbf16, #tpu.memory_space<vmem>>) attributes {dimension_semantics = [#tpu.dimension_semantics<parallel>], iteration_bounds = array<i64: 7>, scalar_prefetch = 0 : i64, scratch_operands = 0 : i64, tpu.core_type = #tpu.core_type<tc>, window_params = [{pipeline_mode = #tpu.pipeline_mode<synchronous>, transform_indices = @transform_0, window_bounds = array<i64: 2, 2048>}, {pipeline_mode = #tpu.pipeline_mode<synchronous>, transform_indices = @transform_1, window_bounds = array<i64: 2048, 512>}, {transform_indices = @transform_2, window_bounds = array<i64: 512, 1792>}, {transform_indices = @transform_3, window_bounds = array<i64: 2, 1792>}]} {
    %c0 = arith.constant 0 : index
    %c0_0 = arith.constant 0 : index
    %0 = vector.load %arg1[%c0, %c0_0] : memref<2x2048xbf16, #tpu.memory_space<vmem>>, vector<2x2048xbf16>
    %c0_1 = arith.constant 0 : index
    %c0_2 = arith.constant 0 : index
    %1 = vector.load %arg2[%c0_1, %c0_2] : memref<2048x512xbf16, #tpu.memory_space<vmem>>, vector<2048x512xbf16>
    %cst = arith.constant dense<0.000000e+00> : vector<2x512xf32>
    %2 = tpu.matmul %0, %1, %cst {dimension_numbers = #tpu.dot_dimension_numbers<[1], [0], [0], [1], [0, 0, 1, 1], [], []>} : vector<2x2048xbf16>, vector<2048x512xbf16>, vector<2x512xf32> -> vector<2x512xf32>
    %3 = arith.truncf %2 : vector<2x512xf32> to vector<2x512xbf16>
    %c0_3 = arith.constant 0 : index
    %c0_4 = arith.constant 0 : index
    %4 = vector.load %arg3[%c0_3, %c0_4] : memref<512x1792xbf16, #tpu.memory_space<vmem>>, vector<512x1792xbf16>
    %cst_5 = arith.constant dense<0.000000e+00> : vector<2x1792xf32>
    %5 = tpu.matmul %3, %4, %cst_5 {dimension_numbers = #tpu.dot_dimension_numbers<[1], [0], [0], [1], [0, 0, 1, 1], [], []>} : vector<2x512xbf16>, vector<512x1792xbf16>, vector<2x1792xf32> -> vector<2x1792xf32>
    %6 = arith.truncf %5 : vector<2x1792xf32> to vector<2x1792xbf16>
    %c0_6 = arith.constant 0 : index
    %c0_7 = arith.constant 0 : index
    %7 = vector.load %arg4[%c0_6, %c0_7] : memref<2x1792xbf16, #tpu.memory_space<vmem>>, vector<2x1792xbf16>
    tpu.vector_store %arg4[%c0_6, %c0_7], %6 {strides = array<i32>} : memref<2x1792xbf16, #tpu.memory_space<vmem>>, vector<2x1792xbf16>,
    return
  }
  func.func @transform_0(%arg0: i32) -> (i32, i32) {
    %c0_i32 = arith.constant 0 : i32
    %c0_i32_0 = arith.constant 0 : i32
    %c0_i32_1 = arith.constant 0 : i32
    return %c0_i32, %c0_i32_0 : i32, i32
  }
  func.func @transform_1(%arg0: i32) -> (i32, i32) {
    %c0_i32 = arith.constant 0 : i32
    %c0_i32_0 = arith.constant 0 : i32
    %c0_i32_1 = arith.constant 0 : i32
    return %c0_i32, %c0_i32_0 : i32, i32
  }
  func.func @transform_2(%arg0: i32) -> (i32, i32) {
    %c0_i32 = arith.constant 0 : i32
    %c0_i32_0 = arith.constant 0 : i32
    return %c0_i32, %arg0 : i32, i32
  }
  func.func @transform_3(%arg0: i32) -> (i32, i32) {
    %c0_i32 = arith.constant 0 : i32
    %c0_i32_0 = arith.constant 0 : i32
    return %c0_i32, %arg0 : i32, i32
  }
}

module attributes {stable_mosaic.version = 11 : i64} {
  func.func @_roipool_kernel(%arg0: i32, %arg1: i32, %arg2: i32, %arg3: memref<2x49x32xbf16, #tpu.memory_space<vmem>>, %arg4: memref<1x32x256xbf16, #tpu.memory_space<vmem>>, %arg5: memref<1x4x256xbf16, #tpu.memory_space<vmem>>, %arg6: memref<49x4xbf16, #tpu.memory_space<vmem>>, %arg7: memref<49x1xf32, #tpu.memory_space<vmem>>, %arg8: memref<2x1x49x256xbf16, #tpu.memory_space<vmem>>, %arg9: memref<49x256xf32, #tpu.memory_space<vmem>>) attributes {dimension_semantics = [#tpu.dimension_semantics<parallel>, #tpu.dimension_semantics<parallel>, #tpu.dimension_semantics<arbitrary>], iteration_bounds = array<i64: 1, 2, 1>, scalar_prefetch = 0 : i64, scratch_operands = 1 : i64, tpu.core_type = #tpu.core_type<tc>, window_params = [{transform_indices = @transform_0, window_bounds = array<i64: 2, 49, 32>}, {transform_indices = @transform_1, window_bounds = array<i64: 1, 32, 256>}, {transform_indices = @transform_2, window_bounds = array<i64: 1, 4, 256>}, {pipeline_mode = #tpu.pipeline_mode<synchronous>, transform_indices = @transform_3, window_bounds = array<i64: 49, 4>}, {pipeline_mode = #tpu.pipeline_mode<synchronous>, transform_indices = @transform_4, window_bounds = array<i64: 49, 1>}, {transform_indices = @transform_5, window_bounds = array<i64: 2, 1, 49, 256>}]} {
    %c0_i32 = arith.constant 0 : i32
    %0 = arith.cmpi eq, %arg2, %c0_i32 : i32
    %1 = arith.extui %0 : i1 to i32
    %c0_i32_0 = arith.constant 0 : i32
    %2 = arith.cmpi ne, %1, %c0_i32_0 : i32
    scf.if %2 {
      %c0_28 = arith.constant 0 : index
      %c0_29 = arith.constant 0 : index
      %43 = vector.load %arg6[%c0_28, %c0_29] : memref<49x4xbf16, #tpu.memory_space<vmem>>, vector<49x4xbf16>
      %c0_30 = arith.constant 0 : index
      %c0_31 = arith.constant 0 : index
      %c0_32 = arith.constant 0 : index
      %44 = vector.load %arg5[%c0_30, %c0_31, %c0_32] : memref<1x4x256xbf16, #tpu.memory_space<vmem>>, vector<1x4x256xbf16>
      %45 = vector.shape_cast %44 : vector<1x4x256xbf16> to vector<4x256xbf16>
      %cst_33 = arith.constant dense<0.000000e+00> : vector<49x256xf32>
      %46 = tpu.matmul %43, %45, %cst_33 {dimension_numbers = #tpu.dot_dimension_numbers<[1], [0], [0], [1], [0, 0, 1, 1], [], []>} : vector<49x4xbf16>, vector<4x256xbf16>, vector<49x256xf32> -> vector<49x256xf32>
      %c0_34 = arith.constant 0 : index
      %c0_35 = arith.constant 0 : index
      %47 = vector.load %arg7[%c0_34, %c0_35] : memref<49x1xf32, #tpu.memory_space<vmem>>, vector<49x1xf32>
      %48 = vector.broadcast %47 : vector<49x1xf32> to vector<49x256xf32>
      %49 = arith.addf %46, %48 : vector<49x256xf32>
      %c0_36 = arith.constant 0 : index
      %c0_37 = arith.constant 0 : index
      %50 = vector.load %arg9[%c0_36, %c0_37] : memref<49x256xf32, #tpu.memory_space<vmem>>, vector<49x256xf32>
      tpu.vector_store %arg9[%c0_36, %c0_37], %49 {strides = array<i32>} : memref<49x256xf32, #tpu.memory_space<vmem>>, vector<49x256xf32>,
    } else {
    }
    %c0 = arith.constant 0 : index
    %c0_1 = arith.constant 0 : index
    %c0_2 = arith.constant 0 : index
    %3 = vector.load %arg3[%c0, %c0_1, %c0_2] : memref<2x49x32xbf16, #tpu.memory_space<vmem>>, vector<1x49x32xbf16>
    %4 = vector.shape_cast %3 : vector<1x49x32xbf16> to vector<49x32xbf16>
    %c0_3 = arith.constant 0 : index
    %c0_4 = arith.constant 0 : index
    %c0_5 = arith.constant 0 : index
    %5 = vector.load %arg4[%c0_3, %c0_4, %c0_5] : memref<1x32x256xbf16, #tpu.memory_space<vmem>>, vector<1x32x256xbf16>
    %6 = vector.shape_cast %5 : vector<1x32x256xbf16> to vector<32x256xbf16>
    %cst = arith.constant dense<0.000000e+00> : vector<49x256xf32>
    %7 = tpu.matmul %4, %6, %cst {dimension_numbers = #tpu.dot_dimension_numbers<[1], [0], [0], [1], [0, 0, 1, 1], [], []>} : vector<49x32xbf16>, vector<32x256xbf16>, vector<49x256xf32> -> vector<49x256xf32>
    %c0_6 = arith.constant 0 : index
    %c0_7 = arith.constant 0 : index
    %8 = vector.load %arg9[%c0_6, %c0_7] : memref<49x256xf32, #tpu.memory_space<vmem>>, vector<49x256xf32>
    %9 = arith.addf %7, %8 : vector<49x256xf32>
    %cst_8 = arith.constant dense<0xFF800000> : vector<256xf32>
    %10 = vector.multi_reduction <maximumf>, %9, %cst_8 [0] : vector<49x256xf32> to vector<256xf32>
    %11 = vector.shape_cast %10 : vector<256xf32> to vector<1x256xf32>
    %12 = vector.broadcast %11 : vector<1x256xf32> to vector<49x256xf32>
    %13 = arith.subf %9, %12 : vector<49x256xf32>
    %14 = math.exp %13 : vector<49x256xf32>
    %cst_9 = arith.constant dense<0.000000e+00> : vector<256xf32>
    %15 = vector.multi_reduction <add>, %14, %cst_9 [0] : vector<49x256xf32> to vector<256xf32>
    %16 = vector.shape_cast %15 : vector<256xf32> to vector<1x256xf32>
    %17 = vector.broadcast %16 : vector<1x256xf32> to vector<49x256xf32>
    %18 = arith.divf %14, %17 : vector<49x256xf32>
    %19 = arith.truncf %18 : vector<49x256xf32> to vector<49x256xbf16>
    %c0_10 = arith.constant 0 : index
    %c0_11 = arith.constant 0 : index
    %c0_12 = arith.constant 0 : index
    %c0_13 = arith.constant 0 : index
    %20 = vector.load %arg8[%c0_10, %c0_11, %c0_12, %c0_13] : memref<2x1x49x256xbf16, #tpu.memory_space<vmem>>, vector<1x1x49x256xbf16>
    %21 = vector.shape_cast %20 : vector<1x1x49x256xbf16> to vector<49x256xbf16>
    %22 = vector.shape_cast %19 : vector<49x256xbf16> to vector<1x1x49x256xbf16>
    tpu.vector_store %arg8[%c0_10, %c0_11, %c0_12, %c0_13], %22 {strides = array<i32>} : memref<2x1x49x256xbf16, #tpu.memory_space<vmem>>, vector<1x1x49x256xbf16>,
    %c1 = arith.constant 1 : index
    %c0_14 = arith.constant 0 : index
    %c0_15 = arith.constant 0 : index
    %23 = vector.load %arg3[%c1, %c0_14, %c0_15] : memref<2x49x32xbf16, #tpu.memory_space<vmem>>, vector<1x49x32xbf16>
    %24 = vector.shape_cast %23 : vector<1x49x32xbf16> to vector<49x32xbf16>
    %c0_16 = arith.constant 0 : index
    %c0_17 = arith.constant 0 : index
    %c0_18 = arith.constant 0 : index
    %25 = vector.load %arg4[%c0_16, %c0_17, %c0_18] : memref<1x32x256xbf16, #tpu.memory_space<vmem>>, vector<1x32x256xbf16>
    %26 = vector.shape_cast %25 : vector<1x32x256xbf16> to vector<32x256xbf16>
    %cst_19 = arith.constant dense<0.000000e+00> : vector<49x256xf32>
    %27 = tpu.matmul %24, %26, %cst_19 {dimension_numbers = #tpu.dot_dimension_numbers<[1], [0], [0], [1], [0, 0, 1, 1], [], []>} : vector<49x32xbf16>, vector<32x256xbf16>, vector<49x256xf32> -> vector<49x256xf32>
    %c0_20 = arith.constant 0 : index
    %c0_21 = arith.constant 0 : index
    %28 = vector.load %arg9[%c0_20, %c0_21] : memref<49x256xf32, #tpu.memory_space<vmem>>, vector<49x256xf32>
    %29 = arith.addf %27, %28 : vector<49x256xf32>
    %cst_22 = arith.constant dense<0xFF800000> : vector<256xf32>
    %30 = vector.multi_reduction <maximumf>, %29, %cst_22 [0] : vector<49x256xf32> to vector<256xf32>
    %31 = vector.shape_cast %30 : vector<256xf32> to vector<1x256xf32>
    %32 = vector.broadcast %31 : vector<1x256xf32> to vector<49x256xf32>
    %33 = arith.subf %29, %32 : vector<49x256xf32>
    %34 = math.exp %33 : vector<49x256xf32>
    %cst_23 = arith.constant dense<0.000000e+00> : vector<256xf32>
    %35 = vector.multi_reduction <add>, %34, %cst_23 [0] : vector<49x256xf32> to vector<256xf32>
    %36 = vector.shape_cast %35 : vector<256xf32> to vector<1x256xf32>
    %37 = vector.broadcast %36 : vector<1x256xf32> to vector<49x256xf32>
    %38 = arith.divf %34, %37 : vector<49x256xf32>
    %39 = arith.truncf %38 : vector<49x256xf32> to vector<49x256xbf16>
    %c1_24 = arith.constant 1 : index
    %c0_25 = arith.constant 0 : index
    %c0_26 = arith.constant 0 : index
    %c0_27 = arith.constant 0 : index
    %40 = vector.load %arg8[%c1_24, %c0_25, %c0_26, %c0_27] : memref<2x1x49x256xbf16, #tpu.memory_space<vmem>>, vector<1x1x49x256xbf16>
    %41 = vector.shape_cast %40 : vector<1x1x49x256xbf16> to vector<49x256xbf16>
    %42 = vector.shape_cast %39 : vector<49x256xbf16> to vector<1x1x49x256xbf16>
    tpu.vector_store %arg8[%c1_24, %c0_25, %c0_26, %c0_27], %42 {strides = array<i32>} : memref<2x1x49x256xbf16, #tpu.memory_space<vmem>>, vector<1x1x49x256xbf16>,
    return
  }
  func.func @transform_0(%arg0: i32, %arg1: i32, %arg2: i32) -> (i32, i32, i32) {
    %c0_i32 = arith.constant 0 : i32
    %c0_i32_0 = arith.constant 0 : i32
    %c0_i32_1 = arith.constant 0 : i32
    return %arg2, %c0_i32, %c0_i32_0 : i32, i32, i32
  }
  func.func @transform_1(%arg0: i32, %arg1: i32, %arg2: i32) -> (i32, i32, i32) {
    %c0_i32 = arith.constant 0 : i32
    %c0_i32_0 = arith.constant 0 : i32
    %c0_i32_1 = arith.constant 0 : i32
    return %arg0, %c0_i32, %c0_i32_0 : i32, i32, i32
  }
  func.func @transform_2(%arg0: i32, %arg1: i32, %arg2: i32) -> (i32, i32, i32) {
    %c0_i32 = arith.constant 0 : i32
    %c0_i32_0 = arith.constant 0 : i32
    return %arg1, %c0_i32, %arg0 : i32, i32, i32
  }
  func.func @transform_3(%arg0: i32, %arg1: i32, %arg2: i32) -> (i32, i32) {
    %c0_i32 = arith.constant 0 : i32
    %c0_i32_0 = arith.constant 0 : i32
    %c0_i32_1 = arith.constant 0 : i32
    return %c0_i32, %c0_i32_0 : i32, i32
  }
  func.func @transform_4(%arg0: i32, %arg1: i32, %arg2: i32) -> (i32, i32) {
    %c0_i32 = arith.constant 0 : i32
    %c0_i32_0 = arith.constant 0 : i32
    %c0_i32_1 = arith.constant 0 : i32
    return %c0_i32, %c0_i32_0 : i32, i32
  }
  func.func @transform_5(%arg0: i32, %arg1: i32, %arg2: i32) -> (i32, i32, i32, i32) {
    %c0_i32 = arith.constant 0 : i32
    %c0_i32_0 = arith.constant 0 : i32
    return %arg2, %arg1, %c0_i32, %arg0 : i32, i32, i32, i32
  }
}

</mosaic_0001>

<bundles_post_ra>
// kernel: _device_forward.2
= control target key start
LH: loop header
LB: loop body
LE: loop exit
PB: predicated region body
PF: predicated region fallthrough
CT: control target
= control target key end

     0   :  { %s10864_s12 = smov 0   ;;  %s10866_s13 = smov 0   ;;  %s14079_s0 = inlined_call_operand.vmem [shape: bf16[2,2048], index: 0, kind: input, shape index: {}]   ;;  %s14080_s1 = inlined_call_operand.vmem [shape: bf16[2048,512], index: 1, kind: input, shape index: {}]   ;;  %s14081_s2 = inlined_call_operand.vmem [shape: bf16[512,12544], index: 2, kind: input, shape index: {}]   ;;  %s14082_s3 = inlined_call_operand.vmem [shape: bf16[2,12544], index: 3, kind: output, shape index: {}]  }
   0x1   :  { %s10868_s14 = smov 0  }
   0x2 LB: > { %s8374_s15 = sadd.s32 4294967295, %s10841_s14   ;;  %s10881_s16 = sadd.s32 1, %s10841_s14   ;;  %s10841_s14 = sphi %s10868_s14, %s14085_s14   ;;  %s10837_s13 = sphi %s10866_s13, %s14084_s13   ;;  %s10833_s12 = sphi %s10864_s12, %s14083_s12  }
   0x3   : > { %s59_s17 = ssub.s32 %s10841_s14, %s10881_s16  ;;  %s62_s18 = sadd.s32 1, %s10837_s13 }
   0x4   : > { %p60_p0 = scmp.eq.s32.totalorder %s59_s17, 0  ;;  %p69_p1 = scmp.ne.s32.totalorder %s10837_s13, %s10833_s12 }
   0x5   : > { %p70_p2 = scmp.eq.s32.totalorder %s10841_s14, 0  ;;  %p8377_p4 = scmp.ge.s32.totalorder %s10841_s14, 7 }
   0x6   : > { %s10890_s19 = scalar_select %p60_p0, %s10837_s13, %s62_s18  }
   0x7   : > { %p71_p3 = por %p70_p2, %p69_p1  ;;  %127 = sbr.rel (%p8377_p4) target bundleno = 241 (0xf1), region = 24 }
   0xc   : > { %130 = sbr.rel (!%p71_p3) target bundleno = 241 (0xf1), region = 28  ;;  %s132_s20 = sand.u32 (%p71_p3), 1, %s10837_s13  }
   0xd   : > { %s9349_s21 = smul.u32 (%p71_p3), 56, %s10841_s14 }
   0xe   : > { %s9350_s22 = smul.u32 (%p71_p3), 3584, %s132_s20 }
   0xf   : > { %s10898_s25 = scalar_lea.vmem (%p71_p3), %s14081_s2, %s9349_s21 }
  0x10   : > { %v150_v0 = vld [vmem:[%s10898_s25] sm:$0xff] (%p71_p3)  ;;  %v152_v1 = vld [vmem:[%s10898_s25 + $0x8] sm:$0xff] (%p71_p3)  ;;  %v154_v2 = vld [vmem:[%s10898_s25 + $0x10] sm:$0xff] (%p71_p3)  ;;  %s10903_s26 = scalar_lea.vmem (%p71_p3), [#allocation2], %s9350_s22 }
  0x11   : > { %151 = vst [vmem:[%s10903_s26] sm:$0xff] %v150_v0  ;;  %153 = vst [vmem:[%s10903_s26 + $0x8] sm:$0xff] %v152_v1  ;;  %v156_v3 = vld [vmem:[%s10898_s25 + $0x18] sm:$0xff]  ;;  %v158_v4 = vld [vmem:[%s10898_s25 + $0x20] sm:$0xff] }
  0x12   : > { %155 = vst [vmem:[%s10903_s26 + $0x10] sm:$0xff] %v154_v2  ;;  %v160_v5 = vld [vmem:[%s10898_s25 + $0x28] sm:$0xff]  ;;  %157 = vst [vmem:[%s10903_s26 + $0x18] sm:$0xff] %v156_v3  ;;  %v162_v6 = vld [vmem:[%s10898_s25 + $0x30] sm:$0xff] }
  0x13   : > { %159 = vst [vmem:[%s10903_s26 + $0x20] sm:$0xff] %v158_v4  ;;  %161 = vst [vmem:[%s10903_s26 + $0x28] sm:$0xff] %v160_v5  ;;  %v164_v7 = vld [vmem:[%s10898_s25 + $0x188] sm:$0xff]  ;;  %v166_v8 = vld [vmem:[%s10898_s25 + $0x190] sm:$0xff] }
  0x14   : > { %163 = vst [vmem:[%s10903_s26 + $0x30] sm:$0xff] %v162_v6  ;;  %165 = vst [vmem:[%s10903_s26 + $0x38] sm:$0xff] %v164_v7  ;;  %v168_v9 = vld [vmem:[%s10898_s25 + $0x198] sm:$0xff]  ;;  %v170_v10 = vld [vmem:[%s10898_s25 + $0x1a0] sm:$0xff] }
  0x15   : > { %167 = vst [vmem:[%s10903_s26 + $0x40] sm:$0xff] %v166_v8  ;;  %v172_v11 = vld [vmem:[%s10898_s25 + $0x1a8] sm:$0xff]  ;;  %169 = vst [vmem:[%s10903_s26 + $0x48] sm:$0xff] %v168_v9  ;;  %v174_v12 = vld [vmem:[%s10898_s25 + $0x1b0] sm:$0xff] }
  0x16   : > { %171 = vst [vmem:[%s10903_s26 + $0x50] sm:$0xff] %v170_v10  ;;  %173 = vst [vmem:[%s10903_s26 + $0x58] sm:$0xff] %v172_v11  ;;  %v176_v13 = vld [vmem:[%s10898_s25 + $0x1b8] sm:$0xff]  ;;  %v178_v14 = vld [vmem:[%s10898_s25 + $0x310] sm:$0xff] }
  0x17   : > { %175 = vst [vmem:[%s10903_s26 + $0x60] sm:$0xff] %v174_v12  ;;  %177 = vst [vmem:[%s10903_s26 + $0x68] sm:$0xff] %v176_v13  ;;  %v180_v15 = vld [vmem:[%s10898_s25 + $0x318] sm:$0xff]  ;;  %v182_v16 = vld [vmem:[%s10898_s25 + $0x320] sm:$0xff] }
  0x18   : > { %179 = vst [vmem:[%s10903_s26 + $0x70] sm:$0xff] %v178_v14  ;;  %v184_v17 = vld [vmem:[%s10898_s25 + $0x328] sm:$0xff]  ;;  %181 = vst [vmem:[%s10903_s26 + $0x78] sm:$0xff] %v180_v15  ;;  %v186_v18 = vld [vmem:[%s10898_s25 + $0x330] sm:$0xff] }
  0x19   : > { %183 = vst [vmem:[%s10903_s26 + $0x80] sm:$0xff] %v182_v16  ;;  %185 = vst [vmem:[%s10903_s26 + $0x88] sm:$0xff] %v184_v17  ;;  %v188_v19 = vld [vmem:[%s10898_s25 + $0x338] sm:$0xff]  ;;  %v190_v20 = vld [vmem:[%s10898_s25 + $0x340] sm:$0xff] }
  0x1a   : > { %187 = vst [vmem:[%s10903_s26 + $0x90] sm:$0xff] %v186_v18  ;;  %189 = vst [vmem:[%s10903_s26 + $0x98] sm:$0xff] %v188_v19  ;;  %v192_v21 = vld [vmem:[%s10898_s25 + $0x498] sm:$0xff]  ;;  %v194_v22 = vld [vmem:[%s10898_s25 + $0x4a0] sm:$0xff] }
  0x1b   : > { %191 = vst [vmem:[%s10903_s26 + $0xa0] sm:$0xff] %v190_v20  ;;  %v196_v23 = vld [vmem:[%s10898_s25 + $0x4a8] sm:$0xff]  ;;  %193 = vst [vmem:[%s10903_s26 + $0xa8] sm:$0xff] %v192_v21  ;;  %v198_v24 = vld [vmem:[%s10898_s25 + $0x4b0] sm:$0xff] }
  0x1c   : > { %195 = vst [vmem:[%s10903_s26 + $0xb0] sm:$0xff] %v194_v22  ;;  %197 = vst [vmem:[%s10903_s26 + $0xb8] sm:$0xff] %v196_v23  ;;  %v200_v25 = vld [vmem:[%s10898_s25 + $0x4b8] sm:$0xff]  ;;  %v202_v26 = vld [vmem:[%s10898_s25 + $0x4c0] sm:$0xff] }
  0x1d   : > { %199 = vst [vmem:[%s10903_s26 + $0xc0] sm:$0xff] %v198_v24  ;;  %201 = vst [vmem:[%s10903_s26 + $0xc8] sm:$0xff] %v200_v25  ;;  %v204_v27 = vld [vmem:[%s10898_s25 + $0x4c8] sm:$0xff]  ;;  %v206_v28 = vld [vmem:[%s10898_s25 + $0x620] sm:$0xff] }
  0x1e   : > { %203 = vst [vmem:[%s10903_s26 + $0xd0] sm:$0xff] %v202_v26  ;;  %v208_v29 = vld [vmem:[%s10898_s25 + $0x628] sm:$0xff]  ;;  %205 = vst [vmem:[%s10903_s26 + $0xd8] sm:$0xff] %v204_v27  ;;  %v210_v30 = vld [vmem:[%s10898_s25 + $0x630] sm:$0xff] }
  0x1f   : > { %207 = vst [vmem:[%s10903_s26 + $0xe0] sm:$0xff] %v206_v28  ;;  %209 = vst [vmem:[%s10903_s26 + $0xe8] sm:$0xff] %v208_v29  ;;  %v212_v31 = vld [vmem:[%s10898_s25 + $0x638] sm:$0xff]  ;;  %v214_v32 = vld [vmem:[%s10898_s25 + $0x640] sm:$0xff] }
  0x20   : > { %211 = vst [vmem:[%s10903_s26 + $0xf0] sm:$0xff] %v210_v30  ;;  %213 = vst [vmem:[%s10903_s26 + $0xf8] sm:$0xff] %v212_v31  ;;  %v216_v33 = vld [vmem:[%s10898_s25 + $0x648] sm:$0xff]  ;;  %v218_v34 = vld [vmem:[%s10898_s25 + $0x650] sm:$0xff] }
  0x21   : > { %215 = vst [vmem:[%s10903_s26 + $0x100] sm:$0xff] %v214_v32  ;;  %v220_v35 = vld [vmem:[%s10898_s25 + $0x7a8] sm:$0xff]  ;;  %217 = vst [vmem:[%s10903_s26 + $0x108] sm:$0xff] %v216_v33  ;;  %v222_v36 = vld [vmem:[%s10898_s25 + $0x7b0] sm:$0xff] }
  0x22   : > { %219 = vst [vmem:[%s10903_s26 + $0x110] sm:$0xff] %v218_v34  ;;  %221 = vst [vmem:[%s10903_s26 + $0x118] sm:$0xff] %v220_v35  ;;  %v224_v37 = vld [vmem:[%s10898_s25 + $0x7b8] sm:$0xff]  ;;  %v226_v38 = vld [vmem:[%s10898_s25 + $0x7c0] sm:$0xff] }
  0x23   : > { %223 = vst [vmem:[%s10903_s26 + $0x120] sm:$0xff] %v222_v36  ;;  %225 = vst [vmem:[%s10903_s26 + $0x128] sm:$0xff] %v224_v37  ;;  %v228_v39 = vld [vmem:[%s10898_s25 + $0x7c8] sm:$0xff]  ;;  %v230_v40 = vld [vmem:[%s10898_s25 + $0x7d0] sm:$0xff] }
  0x24   : > { %227 = vst [vmem:[%s10903_s26 + $0x130] sm:$0xff] %v226_v38  ;;  %v232_v41 = vld [vmem:[%s10898_s25 + $0x7d8] sm:$0xff]  ;;  %229 = vst [vmem:[%s10903_s26 + $0x138] sm:$0xff] %v228_v39  ;;  %v234_v42 = vld [vmem:[%s10898_s25 + $0x930] sm:$0xff] }
  0x25   : > { %231 = vst [vmem:[%s10903_s26 + $0x140] sm:$0xff] %v230_v40  ;;  %233 = vst [vmem:[%s10903_s26 + $0x148] sm:$0xff] %v232_v41  ;;  %v236_v43 = vld [vmem:[%s10898_s25 + $0x938] sm:$0xff]  ;;  %v238_v44 = vld [vmem:[%s10898_s25 + $0x940] sm:$0xff] }
  0x26   : > { %235 = vst [vmem:[%s10903_s26 + $0x150] sm:$0xff] %v234_v42  ;;  %237 = vst [vmem:[%s10903_s26 + $0x158] sm:$0xff] %v236_v43  ;;  %v240_v45 = vld [vmem:[%s10898_s25 + $0x948] sm:$0xff]  ;;  %v242_v46 = vld [vmem:[%s10898_s25 + $0x950] sm:$0xff] }
  0x27   : > { %239 = vst [vmem:[%s10903_s26 + $0x160] sm:$0xff] %v238_v44  ;;  %v244_v47 = vld [vmem:[%s10898_s25 + $0x958] sm:$0xff]  ;;  %241 = vst [vmem:[%s10903_s26 + $0x168] sm:$0xff] %v240_v45  ;;  %v246_v48 = vld [vmem:[%s10898_s25 + $0x960] sm:$0xff] }
  0x28   : > { %243 = vst [vmem:[%s10903_s26 + $0x170] sm:$0xff] %v242_v46  ;;  %245 = vst [vmem:[%s10903_s26 + $0x178] sm:$0xff] %v244_v47  ;;  %v248_v49 = vld [vmem:[%s10898_s25 + $0xab8] sm:$0xff]  ;;  %v250_v50 = vld [vmem:[%s10898_s25 + $0xac0] sm:$0xff] }
  0x29   : > { %247 = vst [vmem:[%s10903_s26 + $0x180] sm:$0xff] %v246_v48  ;;  %249 = vst [vmem:[%s10903_s26 + $0x188] sm:$0xff] %v248_v49  ;;  %v252_v51 = vld [vmem:[%s10898_s25 + $0xac8] sm:$0xff]  ;;  %v254_v52 = vld [vmem:[%s10898_s25 + $0xad0] sm:$0xff] }
  0x2a   : > { %251 = vst [vmem:[%s10903_s26 + $0x190] sm:$0xff] %v250_v50  ;;  %v256_v53 = vld [vmem:[%s10898_s25 + $0xad8] sm:$0xff]  ;;  %253 = vst [vmem:[%s10903_s26 + $0x198] sm:$0xff] %v252_v51  ;;  %v258_v54 = vld [vmem:[%s10898_s25 + $0xae0] sm:$0xff] }
  0x2b   : > { %255 = vst [vmem:[%s10903_s26 + $0x1a0] sm:$0xff] %v254_v52  ;;  %257 = vst [vmem:[%s10903_s26 + $0x1a8] sm:$0xff] %v256_v53  ;;  %v260_v55 = vld [vmem:[%s10898_s25 + $0xae8] sm:$0xff]  ;;  %v262_v56 = vld [vmem:[%s10898_s25 + $0xc40] sm:$0xff] }
  0x2c   : > { %259 = vst [vmem:[%s10903_s26 + $0x1b0] sm:$0xff] %v258_v54  ;;  %261 = vst [vmem:[%s10903_s26 + $0x1b8] sm:$0xff] %v260_v55  ;;  %v264_v57 = vld [vmem:[%s10898_s25 + $0xc48] sm:$0xff]  ;;  %v266_v58 = vld [vmem:[%s10898_s25 + $0xc50] sm:$0xff] }
  0x2d   : > { %263 = vst [vmem:[%s10903_s26 + $0x1c0] sm:$0xff] %v262_v56  ;;  %v268_v59 = vld [vmem:[%s10898_s25 + $0xc58] sm:$0xff]  ;;  %265 = vst [vmem:[%s10903_s26 + $0x1c8] sm:$0xff] %v264_v57  ;;  %v270_v60 = vld [vmem:[%s10898_s25 + $0xc60] sm:$0xff] }
  0x2e   : > { %267 = vst [vmem:[%s10903_s26 + $0x1d0] sm:$0xff] %v266_v58  ;;  %269 = vst [vmem:[%s10903_s26 + $0x1d8] sm:$0xff] %v268_v59  ;;  %v272_v61 = vld [vmem:[%s10898_s25 + $0xc68] sm:$0xff]  ;;  %v274_v62 = vld [vmem:[%s10898_s25 + $0xc70] sm:$0xff] }
  0x2f   : > { %271 = vst [vmem:[%s10903_s26 + $0x1e0] sm:$0xff] %v270_v60  ;;  %273 = vst [vmem:[%s10903_s26 + $0x1e8] sm:$0xff] %v272_v61  ;;  %v276_v63 = vld [vmem:[%s10898_s25 + $0xdc8] sm:$0xff]  ;;  %v278_v0 = vld [vmem:[%s10898_s25 + $0xdd0] sm:$0xff] }
  0x30   : > { %275 = vst [vmem:[%s10903_s26 + $0x1f0] sm:$0xff] %v274_v62  ;;  %v280_v1 = vld [vmem:[%s10898_s25 + $0xdd8] sm:$0xff]  ;;  %277 = vst [vmem:[%s10903_s26 + $0x1f8] sm:$0xff] %v276_v63  ;;  %v282_v2 = vld [vmem:[%s10898_s25 + $0xde0] sm:$0xff] }
  0x31   : > { %279 = vst [vmem:[%s10903_s26 + $0x200] sm:$0xff] %v278_v0  ;;  %281 = vst [vmem:[%s10903_s26 + $0x208] sm:$0xff] %v280_v1  ;;  %v284_v3 = vld [vmem:[%s10898_s25 + $0xde8] sm:$0xff]  ;;  %v286_v4 = vld [vmem:[%s10898_s25 + $0xdf0] sm:$0xff] }
  0x32   : > { %283 = vst [vmem:[%s10903_s26 + $0x210] sm:$0xff] %v282_v2  ;;  %285 = vst [vmem:[%s10903_s26 + $0x218] sm:$0xff] %v284_v3  ;;  %v288_v5 = vld [vmem:[%s10898_s25 + $0xdf8] sm:$0xff]  ;;  %v290_v6 = vld [vmem:[%s10898_s25 + $0xf50] sm:$0xff] }
  0x33   : > { %287 = vst [vmem:[%s10903_s26 + $0x220] sm:$0xff] %v286_v4  ;;  %v292_v7 = vld [vmem:[%s10898_s25 + $0xf58] sm:$0xff]  ;;  %289 = vst [vmem:[%s10903_s26 + $0x228] sm:$0xff] %v288_v5  ;;  %v294_v8 = vld [vmem:[%s10898_s25 + $0xf60] sm:$0xff] }
  0x34   : > { %291 = vst [vmem:[%s10903_s26 + $0x230] sm:$0xff] %v290_v6  ;;  %293 = vst [vmem:[%s10903_s26 + $0x238] sm:$0xff] %v292_v7  ;;  %v296_v9 = vld [vmem:[%s10898_s25 + $0xf68] sm:$0xff]  ;;  %v298_v10 = vld [vmem:[%s10898_s25 + $0xf70] sm:$0xff] }
  0x35   : > { %295 = vst [vmem:[%s10903_s26 + $0x240] sm:$0xff] %v294_v8  ;;  %297 = vst [vmem:[%s10903_s26 + $0x248] sm:$0xff] %v296_v9  ;;  %v300_v11 = vld [vmem:[%s10898_s25 + $0xf78] sm:$0xff]  ;;  %v302_v12 = vld [vmem:[%s10898_s25 + $0xf80] sm:$0xff] }
  0x36   : > { %299 = vst [vmem:[%s10903_s26 + $0x250] sm:$0xff] %v298_v10  ;;  %v304_v13 = vld [vmem:[%s10898_s25 + $0x10d8] sm:$0xff]  ;;  %301 = vst [vmem:[%s10903_s26 + $0x258] sm:$0xff] %v300_v11  ;;  %v306_v14 = vld [vmem:[%s10898_s25 + $0x10e0] sm:$0xff] }
  0x37   : > { %303 = vst [vmem:[%s10903_s26 + $0x260] sm:$0xff] %v302_v12  ;;  %305 = vst [vmem:[%s10903_s26 + $0x268] sm:$0xff] %v304_v13  ;;  %v308_v15 = vld [vmem:[%s10898_s25 + $0x10e8] sm:$0xff]  ;;  %v310_v16 = vld [vmem:[%s10898_s25 + $0x10f0] sm:$0xff] }
  0x38   : > { %307 = vst [vmem:[%s10903_s26 + $0x270] sm:$0xff] %v306_v14  ;;  %309 = vst [vmem:[%s10903_s26 + $0x278] sm:$0xff] %v308_v15  ;;  %v312_v17 = vld [vmem:[%s10898_s25 + $0x10f8] sm:$0xff]  ;;  %v314_v18 = vld [vmem:[%s10898_s25 + $0x1100] sm:$0xff] }
  0x39   : > { %311 = vst [vmem:[%s10903_s26 + $0x280] sm:$0xff] %v310_v16  ;;  %v316_v19 = vld [vmem:[%s10898_s25 + $0x1108] sm:$0xff]  ;;  %313 = vst [vmem:[%s10903_s26 + $0x288] sm:$0xff] %v312_v17  ;;  %v318_v20 = vld [vmem:[%s10898_s25 + $0x1260] sm:$0xff] }
  0x3a   : > { %315 = vst [vmem:[%s10903_s26 + $0x290] sm:$0xff] %v314_v18  ;;  %317 = vst [vmem:[%s10903_s26 + $0x298] sm:$0xff] %v316_v19  ;;  %v320_v21 = vld [vmem:[%s10898_s25 + $0x1268] sm:$0xff]  ;;  %v322_v22 = vld [vmem:[%s10898_s25 + $0x1270] sm:$0xff] }
  0x3b   : > { %319 = vst [vmem:[%s10903_s26 + $0x2a0] sm:$0xff] %v318_v20  ;;  %321 = vst [vmem:[%s10903_s26 + $0x2a8] sm:$0xff] %v320_v21  ;;  %v324_v23 = vld [vmem:[%s10898_s25 + $0x1278] sm:$0xff]  ;;  %v326_v24 = vld [vmem:[%s10898_s25 + $0x1280] sm:$0xff] }
  0x3c   : > { %323 = vst [vmem:[%s10903_s26 + $0x2b0] sm:$0xff] %v322_v22  ;;  %v328_v25 = vld [vmem:[%s10898_s25 + $0x1288] sm:$0xff]  ;;  %325 = vst [vmem:[%s10903_s26 + $0x2b8] sm:$0xff] %v324_v23  ;;  %v330_v26 = vld [vmem:[%s10898_s25 + $0x1290] sm:$0xff] }
  0x3d   : > { %327 = vst [vmem:[%s10903_s26 + $0x2c0] sm:$0xff] %v326_v24  ;;  %329 = vst [vmem:[%s10903_s26 + $0x2c8] sm:$0xff] %v328_v25  ;;  %v332_v27 = vld [vmem:[%s10898_s25 + $0x13e8] sm:$0xff]  ;;  %v334_v28 = vld [vmem:[%s10898_s25 + $0x13f0] sm:$0xff] }
  0x3e   : > { %331 = vst [vmem:[%s10903_s26 + $0x2d0] sm:$0xff] %v330_v26  ;;  %333 = vst [vmem:[%s10903_s26 + $0x2d8] sm:$0xff] %v332_v27  ;;  %v336_v29 = vld [vmem:[%s10898_s25 + $0x13f8] sm:$0xff]  ;;  %v338_v30 = vld [vmem:[%s10898_s25 + $0x1400] sm:$0xff] }
  0x3f   : > { %335 = vst [vmem:[%s10903_s26 + $0x2e0] sm:$0xff] %v334_v28  ;;  %v340_v31 = vld [vmem:[%s10898_s25 + $0x1408] sm:$0xff]  ;;  %337 = vst [vmem:[%s10903_s26 + $0x2e8] sm:$0xff] %v336_v29  ;;  %v342_v32 = vld [vmem:[%s10898_s25 + $0x1410] sm:$0xff] }
  0x40   : > { %339 = vst [vmem:[%s10903_s26 + $0x2f0] sm:$0xff] %v338_v30  ;;  %341 = vst [vmem:[%s10903_s26 + $0x2f8] sm:$0xff] %v340_v31  ;;  %v344_v33 = vld [vmem:[%s10898_s25 + $0x1418] sm:$0xff]  ;;  %v346_v34 = vld [vmem:[%s10898_s25 + $0x1570] sm:$0xff] }
  0x41   : > { %343 = vst [vmem:[%s10903_s26 + $0x300] sm:$0xff] %v342_v32  ;;  %345 = vst [vmem:[%s10903_s26 + $0x308] sm:$0xff] %v344_v33  ;;  %v348_v35 = vld [vmem:[%s10898_s25 + $0x1578] sm:$0xff]  ;;  %v350_v36 = vld [vmem:[%s10898_s25 + $0x1580] sm:$0xff] }
  0x42   : > { %347 = vst [vmem:[%s10903_s26 + $0x310] sm:$0xff] %v346_v34  ;;  %v352_v37 = vld [vmem:[%s10898_s25 + $0x1588] sm:$0xff]  ;;  %349 = vst [vmem:[%s10903_s26 + $0x318] sm:$0xff] %v348_v35  ;;  %v354_v38 = vld [vmem:[%s10898_s25 + $0x1590] sm:$0xff] }
  0x43   : > { %351 = vst [vmem:[%s10903_s26 + $0x320] sm:$0xff] %v350_v36  ;;  %353 = vst [vmem:[%s10903_s26 + $0x328] sm:$0xff] %v352_v37  ;;  %v356_v39 = vld [vmem:[%s10898_s25 + $0x1598] sm:$0xff]  ;;  %v358_v40 = vld [vmem:[%s10898_s25 + $0x15a0] sm:$0xff] }
  0x44   : > { %355 = vst [vmem:[%s10903_s26 + $0x330] sm:$0xff] %v354_v38  ;;  %357 = vst [vmem:[%s10903_s26 + $0x338] sm:$0xff] %v356_v39  ;;  %v360_v41 = vld [vmem:[%s10898_s25 + $0x16f8] sm:$0xff]  ;;  %v362_v42 = vld [vmem:[%s10898_s25 + $0x1700] sm:$0xff] }
  0x45   : > { %359 = vst [vmem:[%s10903_s26 + $0x340] sm:$0xff] %v358_v40  ;;  %v364_v43 = vld [vmem:[%s10898_s25 + $0x1708] sm:$0xff]  ;;  %361 = vst [vmem:[%s10903_s26 + $0x348] sm:$0xff] %v360_v41  ;;  %v366_v44 = vld [vmem:[%s10898_s25 + $0x1710] sm:$0xff] }
  0x46   : > { %363 = vst [vmem:[%s10903_s26 + $0x350] sm:$0xff] %v362_v42  ;;  %365 = vst [vmem:[%s10903_s26 + $0x358] sm:$0xff] %v364_v43  ;;  %v368_v45 = vld [vmem:[%s10898_s25 + $0x1718] sm:$0xff]  ;;  %v370_v46 = vld [vmem:[%s10898_s25 + $0x1720] sm:$0xff] }
  0x47   : > { %367 = vst [vmem:[%s10903_s26 + $0x360] sm:$0xff] %v366_v44  ;;  %369 = vst [vmem:[%s10903_s26 + $0x368] sm:$0xff] %v368_v45  ;;  %v372_v47 = vld [vmem:[%s10898_s25 + $0x1728] sm:$0xff]  ;;  %v374_v48 = vld [vmem:[%s10898_s25 + $0x1880] sm:$0xff] }
  0x48   : > { %371 = vst [vmem:[%s10903_s26 + $0x370] sm:$0xff] %v370_v46  ;;  %v376_v49 = vld [vmem:[%s10898_s25 + $0x1888] sm:$0xff]  ;;  %373 = vst [vmem:[%s10903_s26 + $0x378] sm:$0xff] %v372_v47  ;;  %v378_v50 = vld [vmem:[%s10898_s25 + $0x1890] sm:$0xff] }
  0x49   : > { %375 = vst [vmem:[%s10903_s26 + $0x380] sm:$0xff] %v374_v48  ;;  %377 = vst [vmem:[%s10903_s26 + $0x388] sm:$0xff] %v376_v49  ;;  %v380_v51 = vld [vmem:[%s10898_s25 + $0x1898] sm:$0xff]  ;;  %v382_v52 = vld [vmem:[%s10898_s25 + $0x18a0] sm:$0xff] }
  0x4a   : > { %379 = vst [vmem:[%s10903_s26 + $0x390] sm:$0xff] %v378_v50  ;;  %381 = vst [vmem:[%s10903_s26 + $0x398] sm:$0xff] %v380_v51  ;;  %v384_v53 = vld [vmem:[%s10898_s25 + $0x18a8] sm:$0xff]  ;;  %v386_v54 = vld [vmem:[%s10898_s25 + $0x18b0] sm:$0xff] }
  0x4b   : > { %383 = vst [vmem:[%s10903_s26 + $0x3a0] sm:$0xff] %v382_v52  ;;  %v388_v55 = vld [vmem:[%s10898_s25 + $0x1a08] sm:$0xff]  ;;  %385 = vst [vmem:[%s10903_s26 + $0x3a8] sm:$0xff] %v384_v53  ;;  %v390_v56 = vld [vmem:[%s10898_s25 + $0x1a10] sm:$0xff] }
  0x4c   : > { %387 = vst [vmem:[%s10903_s26 + $0x3b0] sm:$0xff] %v386_v54  ;;  %389 = vst [vmem:[%s10903_s26 + $0x3b8] sm:$0xff] %v388_v55  ;;  %v392_v57 = vld [vmem:[%s10898_s25 + $0x1a18] sm:$0xff]  ;;  %v394_v58 = vld [vmem:[%s10898_s25 + $0x1a20] sm:$0xff] }
  0x4d   : > { %391 = vst [vmem:[%s10903_s26 + $0x3c0] sm:$0xff] %v390_v56  ;;  %393 = vst [vmem:[%s10903_s26 + $0x3c8] sm:$0xff] %v392_v57  ;;  %v396_v59 = vld [vmem:[%s10898_s25 + $0x1a28] sm:$0xff]  ;;  %v398_v60 = vld [vmem:[%s10898_s25 + $0x1a30] sm:$0xff] }
  0x4e   : > { %395 = vst [vmem:[%s10903_s26 + $0x3d0] sm:$0xff] %v394_v58  ;;  %v400_v61 = vld [vmem:[%s10898_s25 + $0x1a38] sm:$0xff]  ;;  %397 = vst [vmem:[%s10903_s26 + $0x3d8] sm:$0xff] %v396_v59  ;;  %v402_v62 = vld [vmem:[%s10898_s25 + $0x1b90] sm:$0xff] }
  0x4f   : > { %399 = vst [vmem:[%s10903_s26 + $0x3e0] sm:$0xff] %v398_v60  ;;  %401 = vst [vmem:[%s10903_s26 + $0x3e8] sm:$0xff] %v400_v61  ;;  %v404_v63 = vld [vmem:[%s10898_s25 + $0x1b98] sm:$0xff]  ;;  %v406_v0 = vld [vmem:[%s10898_s25 + $0x1ba0] sm:$0xff] }
  0x50   : > { %403 = vst [vmem:[%s10903_s26 + $0x3f0] sm:$0xff] %v402_v62  ;;  %405 = vst [vmem:[%s10903_s26 + $0x3f8] sm:$0xff] %v404_v63  ;;  %v408_v1 = vld [vmem:[%s10898_s25 + $0x1ba8] sm:$0xff]  ;;  %v410_v2 = vld [vmem:[%s10898_s25 + $0x1bb0] sm:$0xff] }
  0x51   : > { %407 = vst [vmem:[%s10903_s26 + $0x400] sm:$0xff] %v406_v0  ;;  %v412_v3 = vld [vmem:[%s10898_s25 + $0x1bb8] sm:$0xff]  ;;  %409 = vst [vmem:[%s10903_s26 + $0x408] sm:$0xff] %v408_v1  ;;  %v414_v4 = vld [vmem:[%s10898_s25 + $0x1bc0] sm:$0xff] }
  0x52   : > { %411 = vst [vmem:[%s10903_s26 + $0x410] sm:$0xff] %v410_v2  ;;  %413 = vst [vmem:[%s10903_s26 + $0x418] sm:$0xff] %v412_v3  ;;  %v416_v5 = vld [vmem:[%s10898_s25 + $0x1d18] sm:$0xff]  ;;  %v418_v6 = vld [vmem:[%s10898_s25 + $0x1d20] sm:$0xff] }
  0x53   : > { %415 = vst [vmem:[%s10903_s26 + $0x420] sm:$0xff] %v414_v4  ;;  %417 = vst [vmem:[%s10903_s26 + $0x428] sm:$0xff] %v416_v5  ;;  %v420_v7 = vld [vmem:[%s10898_s25 + $0x1d28] sm:$0xff]  ;;  %v422_v8 = vld [vmem:[%s10898_s25 + $0x1d30] sm:$0xff] }
  0x54   : > { %419 = vst [vmem:[%s10903_s26 + $0x430] sm:$0xff] %v418_v6  ;;  %v424_v9 = vld [vmem:[%s10898_s25 + $0x1d38] sm:$0xff]  ;;  %421 = vst [vmem:[%s10903_s26 + $0x438] sm:$0xff] %v420_v7  ;;  %v426_v10 = vld [vmem:[%s10898_s25 + $0x1d40] sm:$0xff] }
  0x55   : > { %423 = vst [vmem:[%s10903_s26 + $0x440] sm:$0xff] %v422_v8  ;;  %425 = vst [vmem:[%s10903_s26 + $0x448] sm:$0xff] %v424_v9  ;;  %v428_v11 = vld [vmem:[%s10898_s25 + $0x1d48] sm:$0xff]  ;;  %v430_v12 = vld [vmem:[%s10898_s25 + $0x1ea0] sm:$0xff] }
  0x56   : > { %427 = vst [vmem:[%s10903_s26 + $0x450] sm:$0xff] %v426_v10  ;;  %429 = vst [vmem:[%s10903_s26 + $0x458] sm:$0xff] %v428_v11  ;;  %v432_v13 = vld [vmem:[%s10898_s25 + $0x1ea8] sm:$0xff]  ;;  %v434_v14 = vld [vmem:[%s10898_s25 + $0x1eb0] sm:$0xff] }
  0x57   : > { %431 = vst [vmem:[%s10903_s26 + $0x460] sm:$0xff] %v430_v12  ;;  %v436_v15 = vld [vmem:[%s10898_s25 + $0x1eb8] sm:$0xff]  ;;  %433 = vst [vmem:[%s10903_s26 + $0x468] sm:$0xff] %v432_v13  ;;  %v438_v16 = vld [vmem:[%s10898_s25 + $0x1ec0] sm:$0xff] }
  0x58   : > { %435 = vst [vmem:[%s10903_s26 + $0x470] sm:$0xff] %v434_v14  ;;  %437 = vst [vmem:[%s10903_s26 + $0x478] sm:$0xff] %v436_v15  ;;  %v440_v17 = vld [vmem:[%s10898_s25 + $0x1ec8] sm:$0xff]  ;;  %v442_v18 = vld [vmem:[%s10898_s25 + $0x1ed0] sm:$0xff] }
  0x59   : > { %439 = vst [vmem:[%s10903_s26 + $0x480] sm:$0xff] %v438_v16  ;;  %441 = vst [vmem:[%s10903_s26 + $0x488] sm:$0xff] %v440_v17  ;;  %v444_v19 = vld [vmem:[%s10898_s25 + $0x2028] sm:$0xff]  ;;  %v446_v20 = vld [vmem:[%s10898_s25 + $0x2030] sm:$0xff] }
  0x5a   : > { %443 = vst [vmem:[%s10903_s26 + $0x490] sm:$0xff] %v442_v18  ;;  %v448_v21 = vld [vmem:[%s10898_s25 + $0x2038] sm:$0xff]  ;;  %445 = vst [vmem:[%s10903_s26 + $0x498] sm:$0xff] %v444_v19  ;;  %v450_v22 = vld [vmem:[%s10898_s25 + $0x2040] sm:$0xff] }
  0x5b   : > { %447 = vst [vmem:[%s10903_s26 + $0x4a0] sm:$0xff] %v446_v20  ;;  %449 = vst [vmem:[%s10903_s26 + $0x4a8] sm:$0xff] %v448_v21  ;;  %v452_v23 = vld [vmem:[%s10898_s25 + $0x2048] sm:$0xff]  ;;  %v454_v24 = vld [vmem:[%s10898_s25 + $0x2050] sm:$0xff] }
  0x5c   : > { %451 = vst [vmem:[%s10903_s26 + $0x4b0] sm:$0xff] %v450_v22  ;;  %453 = vst [vmem:[%s10903_s26 + $0x4b8] sm:$0xff] %v452_v23  ;;  %v456_v25 = vld [vmem:[%s10898_s25 + $0x2058] sm:$0xff]  ;;  %v458_v26 = vld [vmem:[%s10898_s25 + $0x21b0] sm:$0xff] }
  0x5d   : > { %455 = vst [vmem:[%s10903_s26 + $0x4c0] sm:$0xff] %v454_v24  ;;  %v460_v27 = vld [vmem:[%s10898_s25 + $0x21b8] sm:$0xff]  ;;  %457 = vst [vmem:[%s10903_s26 + $0x4c8] sm:$0xff] %v456_v25  ;;  %v462_v28 = vld [vmem:[%s10898_s25 + $0x21c0] sm:$0xff] }
  0x5e   : > { %459 = vst [vmem:[%s10903_s26 + $0x4d0] sm:$0xff] %v458_v26  ;;  %461 = vst [vmem:[%s10903_s26 + $0x4d8] sm:$0xff] %v460_v27  ;;  %v464_v29 = vld [vmem:[%s10898_s25 + $0x21c8] sm:$0xff]  ;;  %v466_v30 = vld [vmem:[%s10898_s25 + $0x21d0] sm:$0xff] }
  0x5f   : > { %463 = vst [vmem:[%s10903_s26 + $0x4e0] sm:$0xff] %v462_v28  ;;  %465 = vst [vmem:[%s10903_s26 + $0x4e8] sm:$0xff] %v464_v29  ;;  %v468_v31 = vld [vmem:[%s10898_s25 + $0x21d8] sm:$0xff]  ;;  %v470_v32 = vld [vmem:[%s10898_s25 + $0x21e0] sm:$0xff] }
  0x60   : > { %467 = vst [vmem:[%s10903_s26 + $0x4f0] sm:$0xff] %v466_v30  ;;  %v472_v33 = vld [vmem:[%s10898_s25 + $0x2338] sm:$0xff]  ;;  %469 = vst [vmem:[%s10903_s26 + $0x4f8] sm:$0xff] %v468_v31  ;;  %v474_v34 = vld [vmem:[%s10898_s25 + $0x2340] sm:$0xff] }
  0x61   : > { %471 = vst [vmem:[%s10903_s26 + $0x500] sm:$0xff] %v470_v32  ;;  %473 = vst [vmem:[%s10903_s26 + $0x508] sm:$0xff] %v472_v33  ;;  %v476_v35 = vld [vmem:[%s10898_s25 + $0x2348] sm:$0xff]  ;;  %v478_v36 = vld [vmem:[%s10898_s25 + $0x2350] sm:$0xff] }
  0x62   : > { %475 = vst [vmem:[%s10903_s26 + $0x510] sm:$0xff] %v474_v34  ;;  %477 = vst [vmem:[%s10903_s26 + $0x518] sm:$0xff] %v476_v35  ;;  %v480_v37 = vld [vmem:[%s10898_s25 + $0x2358] sm:$0xff]  ;;  %v482_v38 = vld [vmem:[%s10898_s25 + $0x2360] sm:$0xff] }
  0x63   : > { %479 = vst [vmem:[%s10903_s26 + $0x520] sm:$0xff] %v478_v36  ;;  %v484_v39 = vld [vmem:[%s10898_s25 + $0x2368] sm:$0xff]  ;;  %481 = vst [vmem:[%s10903_s26 + $0x528] sm:$0xff] %v480_v37  ;;  %v486_v40 = vld [vmem:[%s10898_s25 + $0x24c0] sm:$0xff] }
  0x64   : > { %483 = vst [vmem:[%s10903_s26 + $0x530] sm:$0xff] %v482_v38  ;;  %485 = vst [vmem:[%s10903_s26 + $0x538] sm:$0xff] %v484_v39  ;;  %v488_v41 = vld [vmem:[%s10898_s25 + $0x24c8] sm:$0xff]  ;;  %v490_v42 = vld [vmem:[%s10898_s25 + $0x24d0] sm:$0xff] }
  0x65   : > { %487 = vst [vmem:[%s10903_s26 + $0x540] sm:$0xff] %v486_v40  ;;  %489 = vst [vmem:[%s10903_s26 + $0x548] sm:$0xff] %v488_v41  ;;  %v492_v43 = vld [vmem:[%s10898_s25 + $0x24d8] sm:$0xff]  ;;  %v494_v44 = vld [vmem:[%s10898_s25 + $0x24e0] sm:$0xff] }
  0x66   : > { %491 = vst [vmem:[%s10903_s26 + $0x550] sm:$0xff] %v490_v42  ;;  %v496_v45 = vld [vmem:[%s10898_s25 + $0x24e8] sm:$0xff]  ;;  %493 = vst [vmem:[%s10903_s26 + $0x558] sm:$0xff] %v492_v43  ;;  %v498_v46 = vld [vmem:[%s10898_s25 + $0x24f0] sm:$0xff] }
  0x67   : > { %495 = vst [vmem:[%s10903_s26 + $0x560] sm:$0xff] %v494_v44  ;;  %497 = vst [vmem:[%s10903_s26 + $0x568] sm:$0xff] %v496_v45  ;;  %v500_v47 = vld [vmem:[%s10898_s25 + $0x2648] sm:$0xff]  ;;  %v502_v48 = vld [vmem:[%s10898_s25 + $0x2650] sm:$0xff] }
  0x68   : > { %499 = vst [vmem:[%s10903_s26 + $0x570] sm:$0xff] %v498_v46  ;;  %501 = vst [vmem:[%s10903_s26 + $0x578] sm:$0xff] %v500_v47  ;;  %v504_v49 = vld [vmem:[%s10898_s25 + $0x2658] sm:$0xff]  ;;  %v506_v50 = vld [vmem:[%s10898_s25 + $0x2660] sm:$0xff] }
  0x69   : > { %503 = vst [vmem:[%s10903_s26 + $0x580] sm:$0xff] %v502_v48  ;;  %v508_v51 = vld [vmem:[%s10898_s25 + $0x2668] sm:$0xff]  ;;  %505 = vst [vmem:[%s10903_s26 + $0x588] sm:$0xff] %v504_v49  ;;  %v510_v52 = vld [vmem:[%s10898_s25 + $0x2670] sm:$0xff] }
  0x6a   : > { %507 = vst [vmem:[%s10903_s26 + $0x590] sm:$0xff] %v506_v50  ;;  %509 = vst [vmem:[%s10903_s26 + $0x598] sm:$0xff] %v508_v51  ;;  %v512_v53 = vld [vmem:[%s10898_s25 + $0x2678] sm:$0xff]  ;;  %v514_v54 = vld [vmem:[%s10898_s25 + $0x27d0] sm:$0xff] }
  0x6b   : > { %511 = vst [vmem:[%s10903_s26 + $0x5a0] sm:$0xff] %v510_v52  ;;  %513 = vst [vmem:[%s10903_s26 + $0x5a8] sm:$0xff] %v512_v53  ;;  %v516_v55 = vld [vmem:[%s10898_s25 + $0x27d8] sm:$0xff]  ;;  %v518_v56 = vld [vmem:[%s10898_s25 + $0x27e0] sm:$0xff] }
  0x6c   : > { %515 = vst [vmem:[%s10903_s26 + $0x5b0] sm:$0xff] %v514_v54  ;;  %v520_v57 = vld [vmem:[%s10898_s25 + $0x27e8] sm:$0xff]  ;;  %517 = vst [vmem:[%s10903_s26 + $0x5b8] sm:$0xff] %v516_v55  ;;  %v522_v58 = vld [vmem:[%s10898_s25 + $0x27f0] sm:$0xff] }
  0x6d   : > { %519 = vst [vmem:[%s10903_s26 + $0x5c0] sm:$0xff] %v518_v56  ;;  %521 = vst [vmem:[%s10903_s26 + $0x5c8] sm:$0xff] %v520_v57  ;;  %v524_v59 = vld [vmem:[%s10898_s25 + $0x27f8] sm:$0xff]  ;;  %v526_v60 = vld [vmem:[%s10898_s25 + $0x2800] sm:$0xff] }
  0x6e   : > { %523 = vst [vmem:[%s10903_s26 + $0x5d0] sm:$0xff] %v522_v58  ;;  %525 = vst [vmem:[%s10903_s26 + $0x5d8] sm:$0xff] %v524_v59  ;;  %v528_v61 = vld [vmem:[%s10898_s25 + $0x2958] sm:$0xff]  ;;  %v530_v62 = vld [vmem:[%s10898_s25 + $0x2960] sm:$0xff] }
  0x6f   : > { %527 = vst [vmem:[%s10903_s26 + $0x5e0] sm:$0xff] %v526_v60  ;;  %v532_v63 = vld [vmem:[%s10898_s25 + $0x2968] sm:$0xff]  ;;  %529 = vst [vmem:[%s10903_s26 + $0x5e8] sm:$0xff] %v528_v61  ;;  %v534_v0 = vld [vmem:[%s10898_s25 + $0x2970] sm:$0xff] }
  0x70   : > { %531 = vst [vmem:[%s10903_s26 + $0x5f0] sm:$0xff] %v530_v62  ;;  %533 = vst [vmem:[%s10903_s26 + $0x5f8] sm:$0xff] %v532_v63  ;;  %v536_v1 = vld [vmem:[%s10898_s25 + $0x2978] sm:$0xff]  ;;  %v538_v2 = vld [vmem:[%s10898_s25 + $0x2980] sm:$0xff] }
  0x71   : > { %535 = vst [vmem:[%s10903_s26 + $0x600] sm:$0xff] %v534_v0  ;;  %537 = vst [vmem:[%s10903_s26 + $0x608] sm:$0xff] %v536_v1  ;;  %v540_v3 = vld [vmem:[%s10898_s25 + $0x2988] sm:$0xff]  ;;  %v542_v4 = vld [vmem:[%s10898_s25 + $0x2ae0] sm:$0xff] }
  0x72   : > { %539 = vst [vmem:[%s10903_s26 + $0x610] sm:$0xff] %v538_v2  ;;  %v544_v5 = vld [vmem:[%s10898_s25 + $0x2ae8] sm:$0xff]  ;;  %541 = vst [vmem:[%s10903_s26 + $0x618] sm:$0xff] %v540_v3  ;;  %v546_v6 = vld [vmem:[%s10898_s25 + $0x2af0] sm:$0xff] }
  0x73   : > { %543 = vst [vmem:[%s10903_s26 + $0x620] sm:$0xff] %v542_v4  ;;  %545 = vst [vmem:[%s10903_s26 + $0x628] sm:$0xff] %v544_v5  ;;  %v548_v7 = vld [vmem:[%s10898_s25 + $0x2af8] sm:$0xff]  ;;  %v550_v8 = vld [vmem:[%s10898_s25 + $0x2b00] sm:$0xff] }
  0x74   : > { %547 = vst [vmem:[%s10903_s26 + $0x630] sm:$0xff] %v546_v6  ;;  %549 = vst [vmem:[%s10903_s26 + $0x638] sm:$0xff] %v548_v7  ;;  %v552_v9 = vld [vmem:[%s10898_s25 + $0x2b08] sm:$0xff]  ;;  %v554_v10 = vld [vmem:[%s10898_s25 + $0x2b10] sm:$0xff] }
  0x75   : > { %551 = vst [vmem:[%s10903_s26 + $0x640] sm:$0xff] %v550_v8  ;;  %v556_v11 = vld [vmem:[%s10898_s25 + $0x2c68] sm:$0xff]  ;;  %553 = vst [vmem:[%s10903_s26 + $0x648] sm:$0xff] %v552_v9  ;;  %v558_v12 = vld [vmem:[%s10898_s25 + $0x2c70] sm:$0xff] }
  0x76   : > { %555 = vst [vmem:[%s10903_s26 + $0x650] sm:$0xff] %v554_v10  ;;  %557 = vst [vmem:[%s10903_s26 + $0x658] sm:$0xff] %v556_v11  ;;  %v560_v13 = vld [vmem:[%s10898_s25 + $0x2c78] sm:$0xff]  ;;  %v562_v14 = vld [vmem:[%s10898_s25 + $0x2c80] sm:$0xff] }
  0x77   : > { %559 = vst [vmem:[%s10903_s26 + $0x660] sm:$0xff] %v558_v12  ;;  %561 = vst [vmem:[%s10903_s26 + $0x668] sm:$0xff] %v560_v13  ;;  %v564_v15 = vld [vmem:[%s10898_s25 + $0x2c88] sm:$0xff]  ;;  %v566_v16 = vld [vmem:[%s10898_s25 + $0x2c90] sm:$0xff] }
  0x78   : > { %563 = vst [vmem:[%s10903_s26 + $0x670] sm:$0xff] %v562_v14  ;;  %v568_v17 = vld [vmem:[%s10898_s25 + $0x2c98] sm:$0xff]  ;;  %565 = vst [vmem:[%s10903_s26 + $0x678] sm:$0xff] %v564_v15  ;;  %v570_v18 = vld [vmem:[%s10898_s25 + $0x2df0] sm:$0xff] }
  0x79   : > { %567 = vst [vmem:[%s10903_s26 + $0x680] sm:$0xff] %v566_v16  ;;  %569 = vst [vmem:[%s10903_s26 + $0x688] sm:$0xff] %v568_v17  ;;  %v572_v19 = vld [vmem:[%s10898_s25 + $0x2df8] sm:$0xff]  ;;  %v574_v20 = vld [vmem:[%s10898_s25 + $0x2e00] sm:$0xff] }
  0x7a   : > { %571 = vst [vmem:[%s10903_s26 + $0x690] sm:$0xff] %v570_v18  ;;  %573 = vst [vmem:[%s10903_s26 + $0x698] sm:$0xff] %v572_v19  ;;  %v576_v21 = vld [vmem:[%s10898_s25 + $0x2e08] sm:$0xff]  ;;  %v578_v22 = vld [vmem:[%s10898_s25 + $0x2e10] sm:$0xff] }
  0x7b   : > { %575 = vst [vmem:[%s10903_s26 + $0x6a0] sm:$0xff] %v574_v20  ;;  %v580_v23 = vld [vmem:[%s10898_s25 + $0x2e18] sm:$0xff]  ;;  %577 = vst [vmem:[%s10903_s26 + $0x6a8] sm:$0xff] %v576_v21  ;;  %v582_v24 = vld [vmem:[%s10898_s25 + $0x2e20] sm:$0xff] }
  0x7c   : > { %579 = vst [vmem:[%s10903_s26 + $0x6b0] sm:$0xff] %v578_v22  ;;  %581 = vst [vmem:[%s10903_s26 + $0x6b8] sm:$0xff] %v580_v23  ;;  %v584_v25 = vld [vmem:[%s10898_s25 + $0x2f78] sm:$0xff]  ;;  %v586_v26 = vld [vmem:[%s10898_s25 + $0x2f80] sm:$0xff] }
  0x7d   : > { %583 = vst [vmem:[%s10903_s26 + $0x6c0] sm:$0xff] %v582_v24  ;;  %585 = vst [vmem:[%s10903_s26 + $0x6c8] sm:$0xff] %v584_v25  ;;  %v588_v27 = vld [vmem:[%s10898_s25 + $0x2f88] sm:$0xff]  ;;  %v590_v28 = vld [vmem:[%s10898_s25 + $0x2f90] sm:$0xff] }
  0x7e   : > { %587 = vst [vmem:[%s10903_s26 + $0x6d0] sm:$0xff] %v586_v26  ;;  %v592_v29 = vld [vmem:[%s10898_s25 + $0x2f98] sm:$0xff]  ;;  %589 = vst [vmem:[%s10903_s26 + $0x6d8] sm:$0xff] %v588_v27  ;;  %v594_v30 = vld [vmem:[%s10898_s25 + $0x2fa0] sm:$0xff] }
  0x7f   : > { %591 = vst [vmem:[%s10903_s26 + $0x6e0] sm:$0xff] %v590_v28  ;;  %593 = vst [vmem:[%s10903_s26 + $0x6e8] sm:$0xff] %v592_v29  ;;  %v596_v31 = vld [vmem:[%s10898_s25 + $0x2fa8] sm:$0xff]  ;;  %v598_v32 = vld [vmem:[%s10898_s25 + $0x3100] sm:$0xff] }
  0x80   : > { %595 = vst [vmem:[%s10903_s26 + $0x6f0] sm:$0xff] %v594_v30  ;;  %597 = vst [vmem:[%s10903_s26 + $0x6f8] sm:$0xff] %v596_v31  ;;  %v600_v33 = vld [vmem:[%s10898_s25 + $0x3108] sm:$0xff]  ;;  %v602_v34 = vld [vmem:[%s10898_s25 + $0x3110] sm:$0xff] }
  0x81   : > { %599 = vst [vmem:[%s10903_s26 + $0x700] sm:$0xff] %v598_v32  ;;  %v604_v35 = vld [vmem:[%s10898_s25 + $0x3118] sm:$0xff]  ;;  %601 = vst [vmem:[%s10903_s26 + $0x708] sm:$0xff] %v600_v33  ;;  %v606_v36 = vld [vmem:[%s10898_s25 + $0x3120] sm:$0xff] }
  0x82   : > { %603 = vst [vmem:[%s10903_s26 + $0x710] sm:$0xff] %v602_v34  ;;  %605 = vst [vmem:[%s10903_s26 + $0x718] sm:$0xff] %v604_v35  ;;  %v608_v37 = vld [vmem:[%s10898_s25 + $0x3128] sm:$0xff]  ;;  %v610_v38 = vld [vmem:[%s10898_s25 + $0x3130] sm:$0xff] }
  0x83   : > { %607 = vst [vmem:[%s10903_s26 + $0x720] sm:$0xff] %v606_v36  ;;  %609 = vst [vmem:[%s10903_s26 + $0x728] sm:$0xff] %v608_v37  ;;  %v612_v39 = vld [vmem:[%s10898_s25 + $0x3288] sm:$0xff]  ;;  %v614_v40 = vld [vmem:[%s10898_s25 + $0x3290] sm:$0xff] }
  0x84   : > { %611 = vst [vmem:[%s10903_s26 + $0x730] sm:$0xff] %v610_v38  ;;  %v616_v41 = vld [vmem:[%s10898_s25 + $0x3298] sm:$0xff]  ;;  %613 = vst [vmem:[%s10903_s26 + $0x738] sm:$0xff] %v612_v39  ;;  %v618_v42 = vld [vmem:[%s10898_s25 + $0x32a0] sm:$0xff] }
  0x85   : > { %615 = vst [vmem:[%s10903_s26 + $0x740] sm:$0xff] %v614_v40  ;;  %617 = vst [vmem:[%s10903_s26 + $0x748] sm:$0xff] %v616_v41  ;;  %v620_v43 = vld [vmem:[%s10898_s25 + $0x32a8] sm:$0xff]  ;;  %v622_v44 = vld [vmem:[%s10898_s25 + $0x32b0] sm:$0xff] }
  0x86   : > { %619 = vst [vmem:[%s10903_s26 + $0x750] sm:$0xff] %v618_v42  ;;  %621 = vst [vmem:[%s10903_s26 + $0x758] sm:$0xff] %v620_v43  ;;  %v624_v45 = vld [vmem:[%s10898_s25 + $0x32b8] sm:$0xff]  ;;  %v626_v46 = vld [vmem:[%s10898_s25 + $0x3410] sm:$0xff] }
  0x87   : > { %623 = vst [vmem:[%s10903_s26 + $0x760] sm:$0xff] %v622_v44  ;;  %v628_v47 = vld [vmem:[%s10898_s25 + $0x3418] sm:$0xff]  ;;  %625 = vst [vmem:[%s10903_s26 + $0x768] sm:$0xff] %v624_v45  ;;  %v630_v48 = vld [vmem:[%s10898_s25 + $0x3420] sm:$0xff] }
  0x88   : > { %627 = vst [vmem:[%s10903_s26 + $0x770] sm:$0xff] %v626_v46  ;;  %629 = vst [vmem:[%s10903_s26 + $0x778] sm:$0xff] %v628_v47  ;;  %v632_v49 = vld [vmem:[%s10898_s25 + $0x3428] sm:$0xff]  ;;  %v634_v50 = vld [vmem:[%s10898_s25 + $0x3430] sm:$0xff] }
  0x89   : > { %631 = vst [vmem:[%s10903_s26 + $0x780] sm:$0xff] %v630_v48  ;;  %633 = vst [vmem:[%s10903_s26 + $0x788] sm:$0xff] %v632_v49  ;;  %v636_v51 = vld [vmem:[%s10898_s25 + $0x3438] sm:$0xff]  ;;  %v638_v52 = vld [vmem:[%s10898_s25 + $0x3440] sm:$0xff] }
  0x8a   : > { %635 = vst [vmem:[%s10903_s26 + $0x790] sm:$0xff] %v634_v50  ;;  %v640_v53 = vld [vmem:[%s10898_s25 + $0x3598] sm:$0xff]  ;;  %637 = vst [vmem:[%s10903_s26 + $0x798] sm:$0xff] %v636_v51  ;;  %v642_v54 = vld [vmem:[%s10898_s25 + $0x35a0] sm:$0xff] }
  0x8b   : > { %639 = vst [vmem:[%s10903_s26 + $0x7a0] sm:$0xff] %v638_v52  ;;  %641 = vst [vmem:[%s10903_s26 + $0x7a8] sm:$0xff] %v640_v53  ;;  %v644_v55 = vld [vmem:[%s10898_s25 + $0x35a8] sm:$0xff]  ;;  %v646_v56 = vld [vmem:[%s10898_s25 + $0x35b0] sm:$0xff] }
  0x8c   : > { %643 = vst [vmem:[%s10903_s26 + $0x7b0] sm:$0xff] %v642_v54  ;;  %645 = vst [vmem:[%s10903_s26 + $0x7b8] sm:$0xff] %v644_v55  ;;  %v648_v57 = vld [vmem:[%s10898_s25 + $0x35b8] sm:$0xff]  ;;  %v650_v58 = vld [vmem:[%s10898_s25 + $0x35c0] sm:$0xff] }
  0x8d   : > { %647 = vst [vmem:[%s10903_s26 + $0x7c0] sm:$0xff] %v646_v56  ;;  %v652_v59 = vld [vmem:[%s10898_s25 + $0x35c8] sm:$0xff]  ;;  %649 = vst [vmem:[%s10903_s26 + $0x7c8] sm:$0xff] %v648_v57  ;;  %v654_v60 = vld [vmem:[%s10898_s25 + $0x3720] sm:$0xff] }
  0x8e   : > { %651 = vst [vmem:[%s10903_s26 + $0x7d0] sm:$0xff] %v650_v58  ;;  %653 = vst [vmem:[%s10903_s26 + $0x7d8] sm:$0xff] %v652_v59  ;;  %v656_v61 = vld [vmem:[%s10898_s25 + $0x3728] sm:$0xff]  ;;  %v658_v62 = vld [vmem:[%s10898_s25 + $0x3730] sm:$0xff] }
  0x8f   : > { %655 = vst [vmem:[%s10903_s26 + $0x7e0] sm:$0xff] %v654_v60  ;;  %657 = vst [vmem:[%s10903_s26 + $0x7e8] sm:$0xff] %v656_v61  ;;  %v660_v63 = vld [vmem:[%s10898_s25 + $0x3738] sm:$0xff]  ;;  %v662_v0 = vld [vmem:[%s10898_s25 + $0x3740] sm:$0xff] }
  0x90   : > { %659 = vst [vmem:[%s10903_s26 + $0x7f0] sm:$0xff] %v658_v62  ;;  %v664_v1 = vld [vmem:[%s10898_s25 + $0x3748] sm:$0xff]  ;;  %661 = vst [vmem:[%s10903_s26 + $0x7f8] sm:$0xff] %v660_v63  ;;  %v666_v2 = vld [vmem:[%s10898_s25 + $0x3750] sm:$0xff] }
  0x91   : > { %663 = vst [vmem:[%s10903_s26 + $0x800] sm:$0xff] %v662_v0  ;;  %665 = vst [vmem:[%s10903_s26 + $0x808] sm:$0xff] %v664_v1  ;;  %v668_v3 = vld [vmem:[%s10898_s25 + $0x38a8] sm:$0xff]  ;;  %v670_v4 = vld [vmem:[%s10898_s25 + $0x38b0] sm:$0xff] }
  0x92   : > { %667 = vst [vmem:[%s10903_s26 + $0x810] sm:$0xff] %v666_v2  ;;  %669 = vst [vmem:[%s10903_s26 + $0x818] sm:$0xff] %v668_v3  ;;  %v672_v5 = vld [vmem:[%s10898_s25 + $0x38b8] sm:$0xff]  ;;  %v674_v6 = vld [vmem:[%s10898_s25 + $0x38c0] sm:$0xff] }
  0x93   : > { %671 = vst [vmem:[%s10903_s26 + $0x820] sm:$0xff] %v670_v4  ;;  %v676_v7 = vld [vmem:[%s10898_s25 + $0x38c8] sm:$0xff]  ;;  %673 = vst [vmem:[%s10903_s26 + $0x828] sm:$0xff] %v672_v5  ;;  %v678_v8 = vld [vmem:[%s10898_s25 + $0x38d0] sm:$0xff] }
  0x94   : > { %675 = vst [vmem:[%s10903_s26 + $0x830] sm:$0xff] %v674_v6  ;;  %677 = vst [vmem:[%s10903_s26 + $0x838] sm:$0xff] %v676_v7  ;;  %v680_v9 = vld [vmem:[%s10898_s25 + $0x38d8] sm:$0xff]  ;;  %v682_v10 = vld [vmem:[%s10898_s25 + $0x3a30] sm:$0xff] }
  0x95   : > { %679 = vst [vmem:[%s10903_s26 + $0x840] sm:$0xff] %v678_v8  ;;  %681 = vst [vmem:[%s10903_s26 + $0x848] sm:$0xff] %v680_v9  ;;  %v684_v11 = vld [vmem:[%s10898_s25 + $0x3a38] sm:$0xff]  ;;  %v686_v12 = vld [vmem:[%s10898_s25 + $0x3a40] sm:$0xff] }
  0x96   : > { %683 = vst [vmem:[%s10903_s26 + $0x850] sm:$0xff] %v682_v10  ;;  %v688_v13 = vld [vmem:[%s10898_s25 + $0x3a48] sm:$0xff]  ;;  %685 = vst [vmem:[%s10903_s26 + $0x858] sm:$0xff] %v684_v11  ;;  %v690_v14 = vld [vmem:[%s10898_s25 + $0x3a50] sm:$0xff] }
  0x97   : > { %687 = vst [vmem:[%s10903_s26 + $0x860] sm:$0xff] %v686_v12  ;;  %689 = vst [vmem:[%s10903_s26 + $0x868] sm:$0xff] %v688_v13  ;;  %v692_v15 = vld [vmem:[%s10898_s25 + $0x3a58] sm:$0xff]  ;;  %v694_v16 = vld [vmem:[%s10898_s25 + $0x3a60] sm:$0xff] }
  0x98   : > { %691 = vst [vmem:[%s10903_s26 + $0x870] sm:$0xff] %v690_v14  ;;  %693 = vst [vmem:[%s10903_s26 + $0x878] sm:$0xff] %v692_v15  ;;  %v696_v17 = vld [vmem:[%s10898_s25 + $0x3bb8] sm:$0xff]  ;;  %v698_v18 = vld [vmem:[%s10898_s25 + $0x3bc0] sm:$0xff] }
  0x99   : > { %695 = vst [vmem:[%s10903_s26 + $0x880] sm:$0xff] %v694_v16  ;;  %v700_v19 = vld [vmem:[%s10898_s25 + $0x3bc8] sm:$0xff]  ;;  %697 = vst [vmem:[%s10903_s26 + $0x888] sm:$0xff] %v696_v17  ;;  %v702_v20 = vld [vmem:[%s10898_s25 + $0x3bd0] sm:$0xff] }
  0x9a   : > { %699 = vst [vmem:[%s10903_s26 + $0x890] sm:$0xff] %v698_v18  ;;  %701 = vst [vmem:[%s10903_s26 + $0x898] sm:$0xff] %v700_v19  ;;  %v704_v21 = vld [vmem:[%s10898_s25 + $0x3bd8] sm:$0xff]  ;;  %v706_v22 = vld [vmem:[%s10898_s25 + $0x3be0] sm:$0xff] }
  0x9b   : > { %703 = vst [vmem:[%s10903_s26 + $0x8a0] sm:$0xff] %v702_v20  ;;  %705 = vst [vmem:[%s10903_s26 + $0x8a8] sm:$0xff] %v704_v21  ;;  %v708_v23 = vld [vmem:[%s10898_s25 + $0x3be8] sm:$0xff]  ;;  %v710_v24 = vld [vmem:[%s10898_s25 + $0x3d40] sm:$0xff] }
  0x9c   : > { %707 = vst [vmem:[%s10903_s26 + $0x8b0] sm:$0xff] %v706_v22  ;;  %v712_v25 = vld [vmem:[%s10898_s25 + $0x3d48] sm:$0xff]  ;;  %709 = vst [vmem:[%s10903_s26 + $0x8b8] sm:$0xff] %v708_v23  ;;  %v714_v26 = vld [vmem:[%s10898_s25 + $0x3d50] sm:$0xff] }
  0x9d   : > { %711 = vst [vmem:[%s10903_s26 + $0x8c0] sm:$0xff] %v710_v24  ;;  %713 = vst [vmem:[%s10903_s26 + $0x8c8] sm:$0xff] %v712_v25  ;;  %v716_v27 = vld [vmem:[%s10898_s25 + $0x3d58] sm:$0xff]  ;;  %v718_v28 = vld [vmem:[%s10898_s25 + $0x3d60] sm:$0xff] }
  0x9e   : > { %715 = vst [vmem:[%s10903_s26 + $0x8d0] sm:$0xff] %v714_v26  ;;  %717 = vst [vmem:[%s10903_s26 + $0x8d8] sm:$0xff] %v716_v27  ;;  %v720_v29 = vld [vmem:[%s10898_s25 + $0x3d68] sm:$0xff]  ;;  %v722_v30 = vld [vmem:[%s10898_s25 + $0x3d70] sm:$0xff] }
  0x9f   : > { %719 = vst [vmem:[%s10903_s26 + $0x8e0] sm:$0xff] %v718_v28  ;;  %v724_v31 = vld [vmem:[%s10898_s25 + $0x3ec8] sm:$0xff]  ;;  %721 = vst [vmem:[%s10903_s26 + $0x8e8] sm:$0xff] %v720_v29  ;;  %v726_v32 = vld [vmem:[%s10898_s25 + $0x3ed0] sm:$0xff] }
  0xa0   : > { %723 = vst [vmem:[%s10903_s26 + $0x8f0] sm:$0xff] %v722_v30  ;;  %725 = vst [vmem:[%s10903_s26 + $0x8f8] sm:$0xff] %v724_v31  ;;  %v728_v33 = vld [vmem:[%s10898_s25 + $0x3ed8] sm:$0xff]  ;;  %v730_v34 = vld [vmem:[%s10898_s25 + $0x3ee0] sm:$0xff] }
  0xa1   : > { %727 = vst [vmem:[%s10903_s26 + $0x900] sm:$0xff] %v726_v32  ;;  %729 = vst [vmem:[%s10903_s26 + $0x908] sm:$0xff] %v728_v33  ;;  %v732_v35 = vld [vmem:[%s10898_s25 + $0x3ee8] sm:$0xff]  ;;  %v734_v36 = vld [vmem:[%s10898_s25 + $0x3ef0] sm:$0xff] }
  0xa2   : > { %731 = vst [vmem:[%s10903_s26 + $0x910] sm:$0xff] %v730_v34  ;;  %v736_v37 = vld [vmem:[%s10898_s25 + $0x3ef8] sm:$0xff]  ;;  %733 = vst [vmem:[%s10903_s26 + $0x918] sm:$0xff] %v732_v35  ;;  %v738_v38 = vld [vmem:[%s10898_s25 + $0x4050] sm:$0xff] }
  0xa3   : > { %735 = vst [vmem:[%s10903_s26 + $0x920] sm:$0xff] %v734_v36  ;;  %737 = vst [vmem:[%s10903_s26 + $0x928] sm:$0xff] %v736_v37  ;;  %v740_v39 = vld [vmem:[%s10898_s25 + $0x4058] sm:$0xff]  ;;  %v742_v40 = vld [vmem:[%s10898_s25 + $0x4060] sm:$0xff] }
  0xa4   : > { %739 = vst [vmem:[%s10903_s26 + $0x930] sm:$0xff] %v738_v38  ;;  %741 = vst [vmem:[%s10903_s26 + $0x938] sm:$0xff] %v740_v39  ;;  %v744_v41 = vld [vmem:[%s10898_s25 + $0x4068] sm:$0xff]  ;;  %v746_v42 = vld [vmem:[%s10898_s25 + $0x4070] sm:$0xff] }
  0xa5   : > { %743 = vst [vmem:[%s10903_s26 + $0x940] sm:$0xff] %v742_v40  ;;  %v748_v43 = vld [vmem:[%s10898_s25 + $0x4078] sm:$0xff]  ;;  %745 = vst [vmem:[%s10903_s26 + $0x948] sm:$0xff] %v744_v41  ;;  %v750_v44 = vld [vmem:[%s10898_s25 + $0x4080] sm:$0xff] }
  0xa6   : > { %747 = vst [vmem:[%s10903_s26 + $0x950] sm:$0xff] %v746_v42  ;;  %749 = vst [vmem:[%s10903_s26 + $0x958] sm:$0xff] %v748_v43  ;;  %v752_v45 = vld [vmem:[%s10898_s25 + $0x41d8] sm:$0xff]  ;;  %v754_v46 = vld [vmem:[%s10898_s25 + $0x41e0] sm:$0xff] }
  0xa7   : > { %751 = vst [vmem:[%s10903_s26 + $0x960] sm:$0xff] %v750_v44  ;;  %753 = vst [vmem:[%s10903_s26 + $0x968] sm:$0xff] %v752_v45  ;;  %v756_v47 = vld [vmem:[%s10898_s25 + $0x41e8] sm:$0xff]  ;;  %v758_v48 = vld [vmem:[%s10898_s25 + $0x41f0] sm:$0xff] }
  0xa8   : > { %755 = vst [vmem:[%s10903_s26 + $0x970] sm:$0xff] %v754_v46  ;;  %v760_v49 = vld [vmem:[%s10898_s25 + $0x41f8] sm:$0xff]  ;;  %757 = vst [vmem:[%s10903_s26 + $0x978] sm:$0xff] %v756_v47  ;;  %v762_v50 = vld [vmem:[%s10898_s25 + $0x4200] sm:$0xff] }
  0xa9   : > { %759 = vst [vmem:[%s10903_s26 + $0x980] sm:$0xff] %v758_v48  ;;  %761 = vst [vmem:[%s10903_s26 + $0x988] sm:$0xff] %v760_v49  ;;  %v764_v51 = vld [vmem:[%s10898_s25 + $0x4208] sm:$0xff]  ;;  %v766_v52 = vld [vmem:[%s10898_s25 + $0x4360] sm:$0xff] }
  0xaa   : > { %763 = vst [vmem:[%s10903_s26 + $0x990] sm:$0xff] %v762_v50  ;;  %765 = vst [vmem:[%s10903_s26 + $0x998] sm:$0xff] %v764_v51  ;;  %v768_v53 = vld [vmem:[%s10898_s25 + $0x4368] sm:$0xff]  ;;  %v770_v54 = vld [vmem:[%s10898_s25 + $0x4370] sm:$0xff] }
  0xab   : > { %767 = vst [vmem:[%s10903_s26 + $0x9a0] sm:$0xff] %v766_v52  ;;  %v772_v55 = vld [vmem:[%s10898_s25 + $0x4378] sm:$0xff]  ;;  %769 = vst [vmem:[%s10903_s26 + $0x9a8] sm:$0xff] %v768_v53  ;;  %v774_v56 = vld [vmem:[%s10898_s25 + $0x4380] sm:$0xff] }
  0xac   : > { %771 = vst [vmem:[%s10903_s26 + $0x9b0] sm:$0xff] %v770_v54  ;;  %773 = vst [vmem:[%s10903_s26 + $0x9b8] sm:$0xff] %v772_v55  ;;  %v776_v57 = vld [vmem:[%s10898_s25 + $0x4388] sm:$0xff]  ;;  %v778_v58 = vld [vmem:[%s10898_s25 + $0x4390] sm:$0xff] }
  0xad   : > { %775 = vst [vmem:[%s10903_s26 + $0x9c0] sm:$0xff] %v774_v56  ;;  %777 = vst [vmem:[%s10903_s26 + $0x9c8] sm:$0xff] %v776_v57  ;;  %v780_v59 = vld [vmem:[%s10898_s25 + $0x44e8] sm:$0xff]  ;;  %v782_v60 = vld [vmem:[%s10898_s25 + $0x44f0] sm:$0xff] }
  0xae   : > { %779 = vst [vmem:[%s10903_s26 + $0x9d0] sm:$0xff] %v778_v58  ;;  %v784_v61 = vld [vmem:[%s10898_s25 + $0x44f8] sm:$0xff]  ;;  %781 = vst [vmem:[%s10903_s26 + $0x9d8] sm:$0xff] %v780_v59  ;;  %v786_v62 = vld [vmem:[%s10898_s25 + $0x4500] sm:$0xff] }
  0xaf   : > { %783 = vst [vmem:[%s10903_s26 + $0x9e0] sm:$0xff] %v782_v60  ;;  %785 = vst [vmem:[%s10903_s26 + $0x9e8] sm:$0xff] %v784_v61  ;;  %v788_v63 = vld [vmem:[%s10898_s25 + $0x4508] sm:$0xff]  ;;  %v790_v0 = vld [vmem:[%s10898_s25 + $0x4510] sm:$0xff] }
  0xb0   : > { %787 = vst [vmem:[%s10903_s26 + $0x9f0] sm:$0xff] %v786_v62  ;;  %789 = vst [vmem:[%s10903_s26 + $0x9f8] sm:$0xff] %v788_v63  ;;  %v792_v1 = vld [vmem:[%s10898_s25 + $0x4518] sm:$0xff]  ;;  %v794_v2 = vld [vmem:[%s10898_s25 + $0x4670] sm:$0xff] }
  0xb1   : > { %791 = vst [vmem:[%s10903_s26 + $0xa00] sm:$0xff] %v790_v0  ;;  %v796_v3 = vld [vmem:[%s10898_s25 + $0x4678] sm:$0xff]  ;;  %793 = vst [vmem:[%s10903_s26 + $0xa08] sm:$0xff] %v792_v1  ;;  %v798_v4 = vld [vmem:[%s10898_s25 + $0x4680] sm:$0xff] }
  0xb2   : > { %795 = vst [vmem:[%s10903_s26 + $0xa10] sm:$0xff] %v794_v2  ;;  %797 = vst [vmem:[%s10903_s26 + $0xa18] sm:$0xff] %v796_v3  ;;  %v800_v5 = vld [vmem:[%s10898_s25 + $0x4688] sm:$0xff]  ;;  %v802_v6 = vld [vmem:[%s10898_s25 + $0x4690] sm:$0xff] }
  0xb3   : > { %799 = vst [vmem:[%s10903_s26 + $0xa20] sm:$0xff] %v798_v4  ;;  %801 = vst [vmem:[%s10903_s26 + $0xa28] sm:$0xff] %v800_v5  ;;  %v804_v7 = vld [vmem:[%s10898_s25 + $0x4698] sm:$0xff]  ;;  %v806_v8 = vld [vmem:[%s10898_s25 + $0x46a0] sm:$0xff] }
  0xb4   : > { %803 = vst [vmem:[%s10903_s26 + $0xa30] sm:$0xff] %v802_v6  ;;  %v808_v9 = vld [vmem:[%s10898_s25 + $0x47f8] sm:$0xff]  ;;  %805 = vst [vmem:[%s10903_s26 + $0xa38] sm:$0xff] %v804_v7  ;;  %v810_v10 = vld [vmem:[%s10898_s25 + $0x4800] sm:$0xff] }
  0xb5   : > { %807 = vst [vmem:[%s10903_s26 + $0xa40] sm:$0xff] %v806_v8  ;;  %809 = vst [vmem:[%s10903_s26 + $0xa48] sm:$0xff] %v808_v9  ;;  %v812_v11 = vld [vmem:[%s10898_s25 + $0x4808] sm:$0xff]  ;;  %v814_v12 = vld [vmem:[%s10898_s25 + $0x4810] sm:$0xff] }
  0xb6   : > { %811 = vst [vmem:[%s10903_s26 + $0xa50] sm:$0xff] %v810_v10  ;;  %813 = vst [vmem:[%s10903_s26 + $0xa58] sm:$0xff] %v812_v11  ;;  %v816_v13 = vld [vmem:[%s10898_s25 + $0x4818] sm:$0xff]  ;;  %v818_v14 = vld [vmem:[%s10898_s25 + $0x4820] sm:$0xff] }
  0xb7   : > { %815 = vst [vmem:[%s10903_s26 + $0xa60] sm:$0xff] %v814_v12  ;;  %v820_v15 = vld [vmem:[%s10898_s25 + $0x4828] sm:$0xff]  ;;  %817 = vst [vmem:[%s10903_s26 + $0xa68] sm:$0xff] %v816_v13  ;;  %v822_v16 = vld [vmem:[%s10898_s25 + $0x4980] sm:$0xff] }
  0xb8   : > { %819 = vst [vmem:[%s10903_s26 + $0xa70] sm:$0xff] %v818_v14  ;;  %821 = vst [vmem:[%s10903_s26 + $0xa78] sm:$0xff] %v820_v15  ;;  %v824_v17 = vld [vmem:[%s10898_s25 + $0x4988] sm:$0xff]  ;;  %v826_v18 = vld [vmem:[%s10898_s25 + $0x4990] sm:$0xff] }
  0xb9   : > { %823 = vst [vmem:[%s10903_s26 + $0xa80] sm:$0xff] %v822_v16  ;;  %825 = vst [vmem:[%s10903_s26 + $0xa88] sm:$0xff] %v824_v17  ;;  %v828_v19 = vld [vmem:[%s10898_s25 + $0x4998] sm:$0xff]  ;;  %v830_v20 = vld [vmem:[%s10898_s25 + $0x49a0] sm:$0xff] }
  0xba   : > { %827 = vst [vmem:[%s10903_s26 + $0xa90] sm:$0xff] %v826_v18  ;;  %v832_v21 = vld [vmem:[%s10898_s25 + $0x49a8] sm:$0xff]  ;;  %829 = vst [vmem:[%s10903_s26 + $0xa98] sm:$0xff] %v828_v19  ;;  %v834_v22 = vld [vmem:[%s10898_s25 + $0x49b0] sm:$0xff] }
  0xbb   : > { %831 = vst [vmem:[%s10903_s26 + $0xaa0] sm:$0xff] %v830_v20  ;;  %833 = vst [vmem:[%s10903_s26 + $0xaa8] sm:$0xff] %v832_v21  ;;  %v836_v23 = vld [vmem:[%s10898_s25 + $0x4b08] sm:$0xff]  ;;  %v838_v24 = vld [vmem:[%s10898_s25 + $0x4b10] sm:$0xff] }
  0xbc   : > { %835 = vst [vmem:[%s10903_s26 + $0xab0] sm:$0xff] %v834_v22  ;;  %837 = vst [vmem:[%s10903_s26 + $0xab8] sm:$0xff] %v836_v23  ;;  %v840_v25 = vld [vmem:[%s10898_s25 + $0x4b18] sm:$0xff]  ;;  %v842_v26 = vld [vmem:[%s10898_s25 + $0x4b20] sm:$0xff] }
  0xbd   : > { %839 = vst [vmem:[%s10903_s26 + $0xac0] sm:$0xff] %v838_v24  ;;  %v844_v27 = vld [vmem:[%s10898_s25 + $0x4b28] sm:$0xff]  ;;  %841 = vst [vmem:[%s10903_s26 + $0xac8] sm:$0xff] %v840_v25  ;;  %v846_v28 = vld [vmem:[%s10898_s25 + $0x4b30] sm:$0xff] }
  0xbe   : > { %843 = vst [vmem:[%s10903_s26 + $0xad0] sm:$0xff] %v842_v26  ;;  %845 = vst [vmem:[%s10903_s26 + $0xad8] sm:$0xff] %v844_v27  ;;  %v848_v29 = vld [vmem:[%s10898_s25 + $0x4b38] sm:$0xff]  ;;  %v850_v30 = vld [vmem:[%s10898_s25 + $0x4c90] sm:$0xff] }
  0xbf   : > { %847 = vst [vmem:[%s10903_s26 + $0xae0] sm:$0xff] %v846_v28  ;;  %849 = vst [vmem:[%s10903_s26 + $0xae8] sm:$0xff] %v848_v29  ;;  %v852_v31 = vld [vmem:[%s10898_s25 + $0x4c98] sm:$0xff]  ;;  %v854_v32 = vld [vmem:[%s10898_s25 + $0x4ca0] sm:$0xff] }
  0xc0   : > { %851 = vst [vmem:[%s10903_s26 + $0xaf0] sm:$0xff] %v850_v30  ;;  %v856_v33 = vld [vmem:[%s10898_s25 + $0x4ca8] sm:$0xff]  ;;  %853 = vst [vmem:[%s10903_s26 + $0xaf8] sm:$0xff] %v852_v31  ;;  %v858_v34 = vld [vmem:[%s10898_s25 + $0x4cb0] sm:$0xff] }
  0xc1   : > { %855 = vst [vmem:[%s10903_s26 + $0xb00] sm:$0xff] %v854_v32  ;;  %857 = vst [vmem:[%s10903_s26 + $0xb08] sm:$0xff] %v856_v33  ;;  %v860_v35 = vld [vmem:[%s10898_s25 + $0x4cb8] sm:$0xff]  ;;  %v862_v36 = vld [vmem:[%s10898_s25 + $0x4cc0] sm:$0xff] }
  0xc2   : > { %859 = vst [vmem:[%s10903_s26 + $0xb10] sm:$0xff] %v858_v34  ;;  %861 = vst [vmem:[%s10903_s26 + $0xb18] sm:$0xff] %v860_v35  ;;  %v864_v37 = vld [vmem:[%s10898_s25 + $0x4e18] sm:$0xff]  ;;  %v866_v38 = vld [vmem:[%s10898_s25 + $0x4e20] sm:$0xff] }
  0xc3   : > { %863 = vst [vmem:[%s10903_s26 + $0xb20] sm:$0xff] %v862_v36  ;;  %v868_v39 = vld [vmem:[%s10898_s25 + $0x4e28] sm:$0xff]  ;;  %865 = vst [vmem:[%s10903_s26 + $0xb28] sm:$0xff] %v864_v37  ;;  %v870_v40 = vld [vmem:[%s10898_s25 + $0x4e30] sm:$0xff] }
  0xc4   : > { %867 = vst [vmem:[%s10903_s26 + $0xb30] sm:$0xff] %v866_v38  ;;  %869 = vst [vmem:[%s10903_s26 + $0xb38] sm:$0xff] %v868_v39  ;;  %v872_v41 = vld [vmem:[%s10898_s25 + $0x4e38] sm:$0xff]  ;;  %v874_v42 = vld [vmem:[%s10898_s25 + $0x4e40] sm:$0xff] }
  0xc5   : > { %871 = vst [vmem:[%s10903_s26 + $0xb40] sm:$0xff] %v870_v40  ;;  %873 = vst [vmem:[%s10903_s26 + $0xb48] sm:$0xff] %v872_v41  ;;  %v876_v43 = vld [vmem:[%s10898_s25 + $0x4e48] sm:$0xff]  ;;  %v878_v44 = vld [vmem:[%s10898_s25 + $0x4fa0] sm:$0xff] }
  0xc6   : > { %875 = vst [vmem:[%s10903_s26 + $0xb50] sm:$0xff] %v874_v42  ;;  %v880_v45 = vld [vmem:[%s10898_s25 + $0x4fa8] sm:$0xff]  ;;  %877 = vst [vmem:[%s10903_s26 + $0xb58] sm:$0xff] %v876_v43  ;;  %v882_v46 = vld [vmem:[%s10898_s25 + $0x4fb0] sm:$0xff] }
  0xc7   : > { %879 = vst [vmem:[%s10903_s26 + $0xb60] sm:$0xff] %v878_v44  ;;  %881 = vst [vmem:[%s10903_s26 + $0xb68] sm:$0xff] %v880_v45  ;;  %v884_v47 = vld [vmem:[%s10898_s25 + $0x4fb8] sm:$0xff]  ;;  %v886_v48 = vld [vmem:[%s10898_s25 + $0x4fc0] sm:$0xff] }
  0xc8   : > { %883 = vst [vmem:[%s10903_s26 + $0xb70] sm:$0xff] %v882_v46  ;;  %885 = vst [vmem:[%s10903_s26 + $0xb78] sm:$0xff] %v884_v47  ;;  %v888_v49 = vld [vmem:[%s10898_s25 + $0x4fc8] sm:$0xff]  ;;  %v890_v50 = vld [vmem:[%s10898_s25 + $0x4fd0] sm:$0xff] }
  0xc9   : > { %887 = vst [vmem:[%s10903_s26 + $0xb80] sm:$0xff] %v886_v48  ;;  %v892_v51 = vld [vmem:[%s10898_s25 + $0x5128] sm:$0xff]  ;;  %889 = vst [vmem:[%s10903_s26 + $0xb88] sm:$0xff] %v888_v49  ;;  %v894_v52 = vld [vmem:[%s10898_s25 + $0x5130] sm:$0xff] }
  0xca   : > { %891 = vst [vmem:[%s10903_s26 + $0xb90] sm:$0xff] %v890_v50  ;;  %893 = vst [vmem:[%s10903_s26 + $0xb98] sm:$0xff] %v892_v51  ;;  %v896_v53 = vld [vmem:[%s10898_s25 + $0x5138] sm:$0xff]  ;;  %v898_v54 = vld [vmem:[%s10898_s25 + $0x5140] sm:$0xff] }
  0xcb   : > { %895 = vst [vmem:[%s10903_s26 + $0xba0] sm:$0xff] %v894_v52  ;;  %897 = vst [vmem:[%s10903_s26 + $0xba8] sm:$0xff] %v896_v53  ;;  %v900_v55 = vld [vmem:[%s10898_s25 + $0x5148] sm:$0xff]  ;;  %v902_v56 = vld [vmem:[%s10898_s25 + $0x5150] sm:$0xff] }
  0xcc   : > { %899 = vst [vmem:[%s10903_s26 + $0xbb0] sm:$0xff] %v898_v54  ;;  %v904_v57 = vld [vmem:[%s10898_s25 + $0x5158] sm:$0xff]  ;;  %901 = vst [vmem:[%s10903_s26 + $0xbb8] sm:$0xff] %v900_v55  ;;  %v906_v58 = vld [vmem:[%s10898_s25 + $0x52b0] sm:$0xff] }
  0xcd   : > { %903 = vst [vmem:[%s10903_s26 + $0xbc0] sm:$0xff] %v902_v56  ;;  %905 = vst [vmem:[%s10903_s26 + $0xbc8] sm:$0xff] %v904_v57  ;;  %v908_v59 = vld [vmem:[%s10898_s25 + $0x52b8] sm:$0xff]  ;;  %v910_v60 = vld [vmem:[%s10898_s25 + $0x52c0] sm:$0xff] }
  0xce   : > { %907 = vst [vmem:[%s10903_s26 + $0xbd0] sm:$0xff] %v906_v58  ;;  %909 = vst [vmem:[%s10903_s26 + $0xbd8] sm:$0xff] %v908_v59  ;;  %v912_v61 = vld [vmem:[%s10898_s25 + $0x52c8] sm:$0xff]  ;;  %v914_v62 = vld [vmem:[%s10898_s25 + $0x52d0] sm:$0xff] }
  0xcf   : > { %911 = vst [vmem:[%s10903_s26 + $0xbe0] sm:$0xff] %v910_v60  ;;  %v916_v63 = vld [vmem:[%s10898_s25 + $0x52d8] sm:$0xff]  ;;  %913 = vst [vmem:[%s10903_s26 + $0xbe8] sm:$0xff] %v912_v61  ;;  %v918_v0 = vld [vmem:[%s10898_s25 + $0x52e0] sm:$0xff] }
  0xd0   : > { %915 = vst [vmem:[%s10903_s26 + $0xbf0] sm:$0xff] %v914_v62  ;;  %917 = vst [vmem:[%s10903_s26 + $0xbf8] sm:$0xff] %v916_v63  ;;  %v920_v1 = vld [vmem:[%s10898_s25 + $0x5438] sm:$0xff]  ;;  %v922_v2 = vld [vmem:[%s10898_s25 + $0x5440] sm:$0xff] }
  0xd1   : > { %919 = vst [vmem:[%s10903_s26 + $0xc00] sm:$0xff] %v918_v0  ;;  %921 = vst [vmem:[%s10903_s26 + $0xc08] sm:$0xff] %v920_v1  ;;  %v924_v3 = vld [vmem:[%s10898_s25 + $0x5448] sm:$0xff]  ;;  %v926_v4 = vld [vmem:[%s10898_s25 + $0x5450] sm:$0xff] }
  0xd2   : > { %923 = vst [vmem:[%s10903_s26 + $0xc10] sm:$0xff] %v922_v2  ;;  %v928_v5 = vld [vmem:[%s10898_s25 + $0x5458] sm:$0xff]  ;;  %925 = vst [vmem:[%s10903_s26 + $0xc18] sm:$0xff] %v924_v3  ;;  %v930_v6 = vld [vmem:[%s10898_s25 + $0x5460] sm:$0xff] }
  0xd3   : > { %927 = vst [vmem:[%s10903_s26 + $0xc20] sm:$0xff] %v926_v4  ;;  %929 = vst [vmem:[%s10903_s26 + $0xc28] sm:$0xff] %v928_v5  ;;  %v932_v7 = vld [vmem:[%s10898_s25 + $0x5468] sm:$0xff]  ;;  %v934_v8 = vld [vmem:[%s10898_s25 + $0x55c0] sm:$0xff] }
  0xd4   : > { %931 = vst [vmem:[%s10903_s26 + $0xc30] sm:$0xff] %v930_v6  ;;  %933 = vst [vmem:[%s10903_s26 + $0xc38] sm:$0xff] %v932_v7  ;;  %v936_v9 = vld [vmem:[%s10898_s25 + $0x55c8] sm:$0xff]  ;;  %v938_v10 = vld [vmem:[%s10898_s25 + $0x55d0] sm:$0xff] }
  0xd5   : > { %935 = vst [vmem:[%s10903_s26 + $0xc40] sm:$0xff] %v934_v8  ;;  %v940_v11 = vld [vmem:[%s10898_s25 + $0x55d8] sm:$0xff]  ;;  %937 = vst [vmem:[%s10903_s26 + $0xc48] sm:$0xff] %v936_v9  ;;  %v942_v12 = vld [vmem:[%s10898_s25 + $0x55e0] sm:$0xff] }
  0xd6   : > { %939 = vst [vmem:[%s10903_s26 + $0xc50] sm:$0xff] %v938_v10  ;;  %941 = vst [vmem:[%s10903_s26 + $0xc58] sm:$0xff] %v940_v11  ;;  %v944_v13 = vld [vmem:[%s10898_s25 + $0x55e8] sm:$0xff]  ;;  %v946_v14 = vld [vmem:[%s10898_s25 + $0x55f0] sm:$0xff] }
  0xd7   : > { %943 = vst [vmem:[%s10903_s26 + $0xc60] sm:$0xff] %v942_v12  ;;  %945 = vst [vmem:[%s10903_s26 + $0xc68] sm:$0xff] %v944_v13  ;;  %v948_v15 = vld [vmem:[%s10898_s25 + $0x5748] sm:$0xff]  ;;  %v950_v16 = vld [vmem:[%s10898_s25 + $0x5750] sm:$0xff] }
  0xd8   : > { %947 = vst [vmem:[%s10903_s26 + $0xc70] sm:$0xff] %v946_v14  ;;  %v952_v17 = vld [vmem:[%s10898_s25 + $0x5758] sm:$0xff]  ;;  %949 = vst [vmem:[%s10903_s26 + $0xc78] sm:$0xff] %v948_v15  ;;  %v954_v18 = vld [vmem:[%s10898_s25 + $0x5760] sm:$0xff] }
  0xd9   : > { %951 = vst [vmem:[%s10903_s26 + $0xc80] sm:$0xff] %v950_v16  ;;  %953 = vst [vmem:[%s10903_s26 + $0xc88] sm:$0xff] %v952_v17  ;;  %v956_v19 = vld [vmem:[%s10898_s25 + $0x5768] sm:$0xff]  ;;  %v958_v20 = vld [vmem:[%s10898_s25 + $0x5770] sm:$0xff] }
  0xda   : > { %955 = vst [vmem:[%s10903_s26 + $0xc90] sm:$0xff] %v954_v18  ;;  %957 = vst [vmem:[%s10903_s26 + $0xc98] sm:$0xff] %v956_v19  ;;  %v960_v21 = vld [vmem:[%s10898_s25 + $0x5778] sm:$0xff]  ;;  %v962_v22 = vld [vmem:[%s10898_s25 + $0x58d0] sm:$0xff] }
  0xdb   : > { %959 = vst [vmem:[%s10903_s26 + $0xca0] sm:$0xff] %v958_v20  ;;  %v964_v23 = vld [vmem:[%s10898_s25 + $0x58d8] sm:$0xff]  ;;  %961 = vst [vmem:[%s10903_s26 + $0xca8] sm:$0xff] %v960_v21  ;;  %v966_v24 = vld [vmem:[%s10898_s25 + $0x58e0] sm:$0xff] }
  0xdc   : > { %963 = vst [vmem:[%s10903_s26 + $0xcb0] sm:$0xff] %v962_v22  ;;  %965 = vst [vmem:[%s10903_s26 + $0xcb8] sm:$0xff] %v964_v23  ;;  %v968_v25 = vld [vmem:[%s10898_s25 + $0x58e8] sm:$0xff]  ;;  %v970_v26 = vld [vmem:[%s10898_s25 + $0x58f0] sm:$0xff] }
  0xdd   : > { %967 = vst [vmem:[%s10903_s26 + $0xcc0] sm:$0xff] %v966_v24  ;;  %969 = vst [vmem:[%s10903_s26 + $0xcc8] sm:$0xff] %v968_v25  ;;  %v972_v27 = vld [vmem:[%s10898_s25 + $0x58f8] sm:$0xff]  ;;  %v974_v28 = vld [vmem:[%s10898_s25 + $0x5900] sm:$0xff] }
  0xde   : > { %971 = vst [vmem:[%s10903_s26 + $0xcd0] sm:$0xff] %v970_v26  ;;  %v976_v29 = vld [vmem:[%s10898_s25 + $0x5a58] sm:$0xff]  ;;  %973 = vst [vmem:[%s10903_s26 + $0xcd8] sm:$0xff] %v972_v27  ;;  %v978_v30 = vld [vmem:[%s10898_s25 + $0x5a60] sm:$0xff] }
  0xdf   : > { %975 = vst [vmem:[%s10903_s26 + $0xce0] sm:$0xff] %v974_v28  ;;  %977 = vst [vmem:[%s10903_s26 + $0xce8] sm:$0xff] %v976_v29  ;;  %v980_v31 = vld [vmem:[%s10898_s25 + $0x5a68] sm:$0xff]  ;;  %v982_v32 = vld [vmem:[%s10898_s25 + $0x5a70] sm:$0xff] }
  0xe0   : > { %979 = vst [vmem:[%s10903_s26 + $0xcf0] sm:$0xff] %v978_v30  ;;  %981 = vst [vmem:[%s10903_s26 + $0xcf8] sm:$0xff] %v980_v31  ;;  %v984_v33 = vld [vmem:[%s10898_s25 + $0x5a78] sm:$0xff]  ;;  %v986_v34 = vld [vmem:[%s10898_s25 + $0x5a80] sm:$0xff] }
  0xe1   : > { %983 = vst [vmem:[%s10903_s26 + $0xd00] sm:$0xff] %v982_v32  ;;  %v988_v35 = vld [vmem:[%s10898_s25 + $0x5a88] sm:$0xff]  ;;  %985 = vst [vmem:[%s10903_s26 + $0xd08] sm:$0xff] %v984_v33  ;;  %v990_v36 = vld [vmem:[%s10898_s25 + $0x5be0] sm:$0xff] }
  0xe2   : > { %987 = vst [vmem:[%s10903_s26 + $0xd10] sm:$0xff] %v986_v34  ;;  %989 = vst [vmem:[%s10903_s26 + $0xd18] sm:$0xff] %v988_v35  ;;  %v992_v37 = vld [vmem:[%s10898_s25 + $0x5be8] sm:$0xff]  ;;  %v994_v38 = vld [vmem:[%s10898_s25 + $0x5bf0] sm:$0xff] }
  0xe3   : > { %991 = vst [vmem:[%s10903_s26 + $0xd20] sm:$0xff] %v990_v36  ;;  %993 = vst [vmem:[%s10903_s26 + $0xd28] sm:$0xff] %v992_v37  ;;  %v996_v39 = vld [vmem:[%s10898_s25 + $0x5bf8] sm:$0xff]  ;;  %v998_v40 = vld [vmem:[%s10898_s25 + $0x5c00] sm:$0xff] }
  0xe4   : > { %995 = vst [vmem:[%s10903_s26 + $0xd30] sm:$0xff] %v994_v38  ;;  %v1000_v41 = vld [vmem:[%s10898_s25 + $0x5c08] sm:$0xff]  ;;  %997 = vst [vmem:[%s10903_s26 + $0xd38] sm:$0xff] %v996_v39  ;;  %v1002_v42 = vld [vmem:[%s10898_s25 + $0x5c10] sm:$0xff] }
  0xe5   : > { %999 = vst [vmem:[%s10903_s26 + $0xd40] sm:$0xff] %v998_v40  ;;  %1001 = vst [vmem:[%s10903_s26 + $0xd48] sm:$0xff] %v1000_v41  ;;  %v1004_v43 = vld [vmem:[%s10898_s25 + $0x5d68] sm:$0xff]  ;;  %v1006_v44 = vld [vmem:[%s10898_s25 + $0x5d70] sm:$0xff] }
  0xe6   : > { %1003 = vst [vmem:[%s10903_s26 + $0xd50] sm:$0xff] %v1002_v42  ;;  %1005 = vst [vmem:[%s10903_s26 + $0xd58] sm:$0xff] %v1004_v43  ;;  %v1008_v45 = vld [vmem:[%s10898_s25 + $0x5d78] sm:$0xff]  ;;  %v1010_v46 = vld [vmem:[%s10898_s25 + $0x5d80] sm:$0xff] }
  0xe7   : > { %1007 = vst [vmem:[%s10903_s26 + $0xd60] sm:$0xff] %v1006_v44  ;;  %v1012_v47 = vld [vmem:[%s10898_s25 + $0x5d88] sm:$0xff]  ;;  %1009 = vst [vmem:[%s10903_s26 + $0xd68] sm:$0xff] %v1008_v45  ;;  %v1014_v48 = vld [vmem:[%s10898_s25 + $0x5d90] sm:$0xff] }
  0xe8   : > { %1011 = vst [vmem:[%s10903_s26 + $0xd70] sm:$0xff] %v1010_v46  ;;  %1013 = vst [vmem:[%s10903_s26 + $0xd78] sm:$0xff] %v1012_v47  ;;  %v1016_v49 = vld [vmem:[%s10898_s25 + $0x5d98] sm:$0xff]  ;;  %v1018_v50 = vld [vmem:[%s10898_s25 + $0x5ef0] sm:$0xff] }
  0xe9   : > { %1015 = vst [vmem:[%s10903_s26 + $0xd80] sm:$0xff] %v1014_v48  ;;  %1017 = vst [vmem:[%s10903_s26 + $0xd88] sm:$0xff] %v1016_v49  ;;  %v1020_v51 = vld [vmem:[%s10898_s25 + $0x5ef8] sm:$0xff]  ;;  %v1022_v52 = vld [vmem:[%s10898_s25 + $0x5f00] sm:$0xff] }
  0xea   : > { %1019 = vst [vmem:[%s10903_s26 + $0xd90] sm:$0xff] %v1018_v50  ;;  %v1024_v53 = vld [vmem:[%s10898_s25 + $0x5f08] sm:$0xff]  ;;  %1021 = vst [vmem:[%s10903_s26 + $0xd98] sm:$0xff] %v1020_v51  ;;  %v1026_v54 = vld [vmem:[%s10898_s25 + $0x5f10] sm:$0xff] }
  0xeb   : > { %1023 = vst [vmem:[%s10903_s26 + $0xda0] sm:$0xff] %v1022_v52  ;;  %1025 = vst [vmem:[%s10903_s26 + $0xda8] sm:$0xff] %v1024_v53  ;;  %v1028_v55 = vld [vmem:[%s10898_s25 + $0x5f18] sm:$0xff]  ;;  %v1030_v56 = vld [vmem:[%s10898_s25 + $0x5f20] sm:$0xff] }
  0xec   : > { %1027 = vst [vmem:[%s10903_s26 + $0xdb0] sm:$0xff] %v1026_v54  ;;  %1029 = vst [vmem:[%s10903_s26 + $0xdb8] sm:$0xff] %v1028_v55  ;;  %v1032_v57 = vld [vmem:[%s10898_s25 + $0x6078] sm:$0xff]  ;;  %v1034_v58 = vld [vmem:[%s10898_s25 + $0x6080] sm:$0xff] }
  0xed   : > { %1031 = vst [vmem:[%s10903_s26 + $0xdc0] sm:$0xff] %v1030_v56  ;;  %v1036_v59 = vld [vmem:[%s10898_s25 + $0x6088] sm:$0xff]  ;;  %1033 = vst [vmem:[%s10903_s26 + $0xdc8] sm:$0xff] %v1032_v57  ;;  %v1038_v60 = vld [vmem:[%s10898_s25 + $0x6090] sm:$0xff] }
  0xee   : > { %1035 = vst [vmem:[%s10903_s26 + $0xdd0] sm:$0xff] %v1034_v58  ;;  %1037 = vst [vmem:[%s10903_s26 + $0xdd8] sm:$0xff] %v1036_v59  ;;  %v1040_v61 = vld [vmem:[%s10898_s25 + $0x6098] sm:$0xff]  ;;  %v1042_v62 = vld [vmem:[%s10898_s25 + $0x60a0] sm:$0xff] }
  0xef   : > { %1039 = vst [vmem:[%s10903_s26 + $0xde0] sm:$0xff] %v1038_v60  ;;  %1041 = vst [vmem:[%s10903_s26 + $0xde8] sm:$0xff] %v1040_v61  ;;  %v1044_v63 = vld [vmem:[%s10898_s25 + $0x60a8] sm:$0xff] }
  0xf0   : > { %1043 = vst [vmem:[%s10903_s26 + $0xdf0] sm:$0xff] %v1042_v62  ;;  %1045 = vst [vmem:[%s10903_s26 + $0xdf8] sm:$0xff] %v1044_v63 }
  0xf1 PF: > { %p8379_p5 = scmp.ge.s32.totalorder %s10841_s14, 1  ;;  %p1050_p6 = scmp.lt.s32.totalorder %s10841_s14, 8 }
  0xf3   : > { %p1051_p7 = pnand %p8379_p5, %p1050_p6 }
  0xf4   : > { %s1057_s26 = sand.u32 (!%p1051_p7), 1, %s10833_s12   ;;  %s1080_s28 = smul.u32 (!%p1051_p7), 14, %s8374_s15 }
  0xf5   : > { %1054 = sbr.rel (%p1051_p7) target bundleno = 1555 (0x613), region = 51 }
  0xf6   : > { %s9351_s27 = smul.u32 (!%p1051_p7), 3584, %s1057_s26  ;;  %p1081_p8 = scmp.lt.s32.totalorder (!%p1051_p7), %s1080_s28, 97 }
  0xf8   : > { %s13091_s12 = scalar_lea.vmem (!%p1051_p7), [#allocation2], %s9351_s27 }
  0xfa   : > { %v9377_v0 = vld [vmem:[%s14080_s1 + $0xe4] ss:$16 sps:$4 sm:$0xff]   ;;  %v9381_v2 = vld [vmem:[%s14080_s1 + $0xe0] ss:$16 sps:$4 sm:$0xff]   ;;  %v10843_v36 = vmov 1966171168   ;;  %v1605_v38 = vlaneseq }
  0xfb   : > { %v9379_v1 = vld [vmem:[%s14080_s1 + $0x2e4] ss:$16 sps:$4 sm:$0xff]   ;;  %4275 = vmatprep.subr.bf16.mxu0 %v9377_v0  ;;  %v9382_v3 = vld [vmem:[%s14080_s1 + $0x2e0] ss:$16 sps:$4 sm:$0xff]   ;;  %v1603_v37 = vunpack.c.l.s4 %v10843_v36  ;;  %s14087_s28 = smov (!%p1081_p8, %s1080_s28), 97 }
  0xfc   : > { %4316 = vmatprep.subr.bf16.mxu1 %v9379_v1  ;;  %v9383_v4 = vld [vmem:[%s14080_s1 + $0xc4] ss:$16 sps:$4 sm:$0xff]   ;;  %4276 = vmatpush1.bf16.msra.mxu0 %v9381_v2  ;;  %v9387_v6 = vld [vmem:[%s14080_s1 + $0xc0] ss:$16 sps:$4 sm:$0xff]   ;;  %v1606_v43 = vshrl.u32 %v1605_v38, 7 }
  0xfd   : > { %4317 = vmatpush1.bf16.msra.mxu1 %v9382_v3  ;;  %v9385_v5 = vld [vmem:[%s14080_s1 + $0x2c4] ss:$16 sps:$4 sm:$0xff]   ;;  %4277 = vmatprep.subr.bf16.mxu0 %v9383_v4  ;;  %v9388_v7 = vld [vmem:[%s14080_s1 + $0x2c0] ss:$16 sps:$4 sm:$0xff]   ;;  %v1604_v42 = vunpack.c.0.s8 %v1603_v37 }
  0xfe   : > { %4318 = vmatprep.subr.bf16.mxu1 %v9385_v5  ;;  %v9389_v8 = vld [vmem:[%s14080_s1 + $0xa4] ss:$16 sps:$4 sm:$0xff]   ;;  %v9393_v10 = vld [vmem:[%s14080_s1 + $0xa0] ss:$16 sps:$4 sm:$0xff]  }
  0xff   : > { %v9391_v9 = vld [vmem:[%s14080_s1 + $0x2a4] ss:$16 sps:$4 sm:$0xff]   ;;  %v9394_v11 = vld [vmem:[%s14080_s1 + $0x2a0] ss:$16 sps:$4 sm:$0xff]   ;;  %v11932_v49 = vsub.s32 %v1604_v42, %v1606_v43 }
 0x100   : > { %4278 = vmatpush1.bf16.msra.mxu0 %v9387_v6  ;;  %v9395_v12 = vld [vmem:[%s14080_s1 + $0x84] ss:$16 sps:$4 sm:$0xff]   ;;  %v9399_v14 = vld [vmem:[%s14080_s1 + $0x80] ss:$16 sps:$4 sm:$0xff]  }
 0x101   : > { %4319 = vmatpush1.bf16.msra.mxu1 %v9388_v7  ;;  %4279 = vmatprep.subr.bf16.mxu0 %v9389_v8  ;;  %v9397_v13 = vld [vmem:[%s14080_s1 + $0x284] ss:$16 sps:$4 sm:$0xff]   ;;  %v9400_v15 = vld [vmem:[%s14080_s1 + $0x280] ss:$16 sps:$4 sm:$0xff]  }
 0x102   : > { %4320 = vmatprep.subr.bf16.mxu1 %v9391_v9  ;;  %v9401_v16 = vld [vmem:[%s14080_s1 + $0x64] ss:$16 sps:$4 sm:$0xff]   ;;  %v9405_v18 = vld [vmem:[%s14080_s1 + $0x60] ss:$16 sps:$4 sm:$0xff]  }
 0x103   : > { %v9403_v17 = vld [vmem:[%s14080_s1 + $0x264] ss:$16 sps:$4 sm:$0xff]   ;;  %v9406_v19 = vld [vmem:[%s14080_s1 + $0x260] ss:$16 sps:$4 sm:$0xff]  }
 0x104   : > { %4280 = vmatpush1.bf16.msra.mxu0 %v9393_v10  ;;  %v9407_v20 = vld [vmem:[%s14080_s1 + $0x44] ss:$16 sps:$4 sm:$0xff]   ;;  %v9411_v22 = vld [vmem:[%s14080_s1 + $0x40] ss:$16 sps:$4 sm:$0xff]  }
 0x105   : > { %4321 = vmatpush1.bf16.msra.mxu1 %v9394_v11  ;;  %4281 = vmatprep.subr.bf16.mxu0 %v9395_v12  ;;  %v9409_v21 = vld [vmem:[%s14080_s1 + $0x244] ss:$16 sps:$4 sm:$0xff]   ;;  %v9412_v23 = vld [vmem:[%s14080_s1 + $0x240] ss:$16 sps:$4 sm:$0xff]  }
 0x106   : > { %4322 = vmatprep.subr.bf16.mxu1 %v9397_v13  ;;  %v9413_v24 = vld [vmem:[%s14080_s1 + $0x24] ss:$16 sps:$4 sm:$0xff]   ;;  %v9417_v26 = vld [vmem:[%s14080_s1 + $0x20] ss:$16 sps:$4 sm:$0xff]  }
 0x107   : > { %v9415_v25 = vld [vmem:[%s14080_s1 + $0x224] ss:$16 sps:$4 sm:$0xff]   ;;  %v9418_v27 = vld [vmem:[%s14080_s1 + $0x220] ss:$16 sps:$4 sm:$0xff]  }
 0x108   : > { %4282 = vmatpush1.bf16.msra.mxu0 %v9399_v14  ;;  %v9419_v28 = vld [vmem:[%s14080_s1 + $0x4] ss:$16 sps:$4 sm:$0xff]   ;;  %v9423_v30 = vld [vmem:[%s14080_s1] ss:$16 sps:$4 sm:$0xff]  }
 0x109   : > { %4323 = vmatpush1.bf16.msra.mxu1 %v9400_v15  ;;  %4283 = vmatprep.subr.bf16.mxu0 %v9401_v16  ;;  %v9421_v29 = vld [vmem:[%s14080_s1 + $0x204] ss:$16 sps:$4 sm:$0xff]   ;;  %v9424_v31 = vld [vmem:[%s14080_s1 + $0x200] ss:$16 sps:$4 sm:$0xff]  }
 0x10a   : > { %4324 = vmatprep.subr.bf16.mxu1 %v9403_v17  ;;  %v9425_v32 = vld [vmem:[%s14080_s1 + $0x1e4] ss:$16 sps:$4 sm:$0xff]   ;;  %v9429_v34 = vld [vmem:[%s14080_s1 + $0x1e0] ss:$16 sps:$4 sm:$0xff]  }
 0x10b   : > { %v9427_v33 = vld [vmem:[%s14080_s1 + $0x3e4] ss:$16 sps:$4 sm:$0xff]   ;;  %v9430_v35 = vld [vmem:[%s14080_s1 + $0x3e0] ss:$16 sps:$4 sm:$0xff]  }
 0x10c   : > { %4284 = vmatpush1.bf16.msra.mxu0 %v9405_v18  ;;  %v9431_v39 = vld [vmem:[%s14080_s1 + $0x1c4] ss:$16 sps:$4 sm:$0xff]   ;;  %v9435_v41 = vld [vmem:[%s14080_s1 + $0x1c0] ss:$16 sps:$4 sm:$0xff]  }
 0x10d   : > { %4325 = vmatpush1.bf16.msra.mxu1 %v9406_v19  ;;  %4285 = vmatprep.subr.bf16.mxu0 %v9407_v20  ;;  %v9433_v40 = vld [vmem:[%s14080_s1 + $0x3c4] ss:$16 sps:$4 sm:$0xff]   ;;  %v9436_v44 = vld [vmem:[%s14080_s1 + $0x3c0] ss:$16 sps:$4 sm:$0xff]  }
 0x10e   : > { %4326 = vmatprep.subr.bf16.mxu1 %v9409_v21  ;;  %v9437_v45 = vld [vmem:[%s14080_s1 + $0x1a4] ss:$16 sps:$4 sm:$0xff]   ;;  %v9441_v47 = vld [vmem:[%s14080_s1 + $0x1a0] ss:$16 sps:$4 sm:$0xff]  }
 0x10f   : > { %v9439_v46 = vld [vmem:[%s14080_s1 + $0x3a4] ss:$16 sps:$4 sm:$0xff]   ;;  %v9442_v48 = vld [vmem:[%s14080_s1 + $0x3a0] ss:$16 sps:$4 sm:$0xff]  }
 0x110   : > { %4286 = vmatpush1.bf16.msra.mxu0 %v9411_v22  ;;  %v9443_v50 = vld [vmem:[%s14080_s1 + $0x184] ss:$16 sps:$4 sm:$0xff]   ;;  %v9447_v53 = vld [vmem:[%s14080_s1 + $0x180] ss:$16 sps:$4 sm:$0xff]  }
 0x111   : > { %4327 = vmatpush1.bf16.msra.mxu1 %v9412_v23  ;;  %4287 = vmatprep.subr.bf16.mxu0 %v9413_v24  ;;  %v9445_v51 = vld [vmem:[%s14080_s1 + $0x384] ss:$16 sps:$4 sm:$0xff]   ;;  %v9448_v55 = vld [vmem:[%s14080_s1 + $0x380] ss:$16 sps:$4 sm:$0xff]  }
 0x112   : > { %4328 = vmatprep.subr.bf16.mxu1 %v9415_v25  ;;  %v1085_v52 = vld [vmem:[%s14079_s0] sm:$0xff] }
 0x113   : > { %v1608_v54 = vrot.slane %v1085_v52, %v11932_v49  ;;  %v9449_v56 = vld [vmem:[%s14080_s1 + $0x164] ss:$16 sps:$4 sm:$0xff]   ;;  %v9453_v59 = vld [vmem:[%s14080_s1 + $0x160] ss:$16 sps:$4 sm:$0xff]   ;;  %v1601_v1 = vcombine.high %v1085_v52, %v1085_v52 }
 0x114   : > { %4288 = vmatpush1.bf16.msra.mxu0 %v9417_v26  ;;  %v9451_v57 = vld [vmem:[%s14080_s1 + $0x364] ss:$16 sps:$4 sm:$0xff]   ;;  %v9454_v61 = vld [vmem:[%s14080_s1 + $0x360] ss:$16 sps:$4 sm:$0xff]  }
 0x115   : > { %4329 = vmatpush1.bf16.msra.mxu1 %v9418_v27  ;;  %4289 = vmatprep.subr.bf16.mxu0 %v9419_v28  ;;  %v1616_v58 = vcombine.high %v1608_v54, %v1608_v54  ;;  %v9455_v62 = vld [vmem:[%s14080_s1 + $0x144] ss:$16 sps:$4 sm:$0xff]   ;;  %v9459_v2 = vld [vmem:[%s14080_s1 + $0x140] ss:$16 sps:$4 sm:$0xff]   ;;  %v11990_v6 = vrot.slane %v1601_v1, %v11932_v49  ;;  %v12010_v13 = vrot.slane %v1608_v54, %v11932_v49 }
 0x116   : > { %4330 = vmatprep.subr.bf16.mxu1 %v9421_v29  ;;  %v9457_v63 = vld [vmem:[%s14080_s1 + $0x344] ss:$16 sps:$4 sm:$0xff]   ;;  %v9460_v3 = vld [vmem:[%s14080_s1 + $0x340] ss:$16 sps:$4 sm:$0xff]  }
 0x117   : > { %v11960_v60 = vrot.slane %v1616_v58, %v11932_v49  ;;  %v9461_v4 = vld [vmem:[%s14080_s1 + $0x124] ss:$16 sps:$4 sm:$0xff]   ;;  %v9465_v7 = vld [vmem:[%s14080_s1 + $0x120] ss:$16 sps:$4 sm:$0xff]   ;;  %v1617_v11 = vcombine.high %v11990_v6, %v11990_v6  ;;  %v12026_v18 = vcombine.high %v12010_v13, %v12010_v13 }
 0x118   : > { %4290 = vmatpush1.bf16.msra.mxu0 %v9423_v30  ;;  %v9463_v5 = vld [vmem:[%s14080_s1 + $0x324] ss:$16 sps:$4 sm:$0xff]   ;;  %v9466_v8 = vld [vmem:[%s14080_s1 + $0x320] ss:$16 sps:$4 sm:$0xff]  }
 0x119   : > { %4331 = vmatpush1.bf16.msra.mxu1 %v9424_v31  ;;  %4291 = vmatprep.subr.bf16.mxu0 %v9425_v32  ;;  %v11973_v0 = vcombine.high %v11960_v60, %v11960_v60  ;;  %v9467_v9 = vld [vmem:[%s14080_s1 + $0x104] ss:$16 sps:$4 sm:$0xff]   ;;  %v9471_v12 = vld [vmem:[%s14080_s1 + $0x100] ss:$16 sps:$4 sm:$0xff]   ;;  %v12022_v17 = vrot.slane %v1617_v11, %v11932_v49 }
 0x11a   : > { %4332 = vmatprep.subr.bf16.mxu1 %v9427_v33  ;;  %4307 = vmatprep.mubr.bf16.mxu0 %v11960_v60  ;;  %v9469_v10 = vld [vmem:[%s14080_s1 + $0x304] ss:$16 sps:$4 sm:$0xff]   ;;  %v9472_v14 = vld [vmem:[%s14080_s1 + $0x300] ss:$16 sps:$4 sm:$0xff]  }
 0x11b   : > { %4348 = vmatprep.mubr.bf16.mxu1 %v11973_v0  ;;  %v9475_v15 = vld [vmem:[%s14080_s1 + $0x4e4] ss:$16 sps:$4 sm:$0xff]   ;;  %v9473_v19 = vld [vmem:[%s14080_s1 + $0x4e0] ss:$16 sps:$4 sm:$0xff]   ;;  %v12042_v23 = vcombine.high %v12022_v17, %v12022_v17 }
 0x11c   : > { %4292 = vmatpush2.bf16.msra.mxu0 %v9429_v34  ;;  %v9478_v16 = vld [vmem:[%s14080_s1 + $0x6e4] ss:$16 sps:$4 sm:$0xff]   ;;  %v9476_v20 = vld [vmem:[%s14080_s1 + $0x6e0] ss:$16 sps:$4 sm:$0xff]  }
 0x11d   : > { %4333 = vmatpush2.bf16.msra.mxu1 %v9430_v35  ;;  %4293 = vmatprep.subr.bf16.mxu0 %v9431_v39  ;;  %v9481_v21 = vld [vmem:[%s14080_s1 + $0x4c4] ss:$16 sps:$4 sm:$0xff]   ;;  %v9479_v24 = vld [vmem:[%s14080_s1 + $0x4c0] ss:$16 sps:$4 sm:$0xff]  }
 0x11e   : > { %4334 = vmatprep.subr.bf16.mxu1 %v9433_v40  ;;  %v9484_v22 = vld [vmem:[%s14080_s1 + $0x6c4] ss:$16 sps:$4 sm:$0xff]   ;;  %v9482_v25 = vld [vmem:[%s14080_s1 + $0x6c0] ss:$16 sps:$4 sm:$0xff]  }
 0x11f   : > { %v9487_v26 = vld [vmem:[%s14080_s1 + $0x4a4] ss:$16 sps:$4 sm:$0xff]   ;;  %v9485_v28 = vld [vmem:[%s14080_s1 + $0x4a0] ss:$16 sps:$4 sm:$0xff]  }
 0x120   : > { %4294 = vmatpush2.bf16.msra.mxu0 %v9435_v41  ;;  %v9490_v27 = vld [vmem:[%s14080_s1 + $0x6a4] ss:$16 sps:$4 sm:$0xff]   ;;  %v9488_v29 = vld [vmem:[%s14080_s1 + $0x6a0] ss:$16 sps:$4 sm:$0xff]  }
 0x121   : > { %4335 = vmatpush2.bf16.msra.mxu1 %v9436_v44  ;;  %4295 = vmatprep.subr.bf16.mxu0 %v9437_v45  ;;  %v9493_v30 = vld [vmem:[%s14080_s1 + $0x484] ss:$16 sps:$4 sm:$0xff]   ;;  %v9491_v32 = vld [vmem:[%s14080_s1 + $0x480] ss:$16 sps:$4 sm:$0xff]  }
 0x122   : > { %4336 = vmatprep.subr.bf16.mxu1 %v9439_v46  ;;  %v9496_v31 = vld [vmem:[%s14080_s1 + $0x684] ss:$16 sps:$4 sm:$0xff]   ;;  %v9494_v33 = vld [vmem:[%s14080_s1 + $0x680] ss:$16 sps:$4 sm:$0xff]  }
 0x123   : > { %v9499_v34 = vld [vmem:[%s14080_s1 + $0x464] ss:$16 sps:$4 sm:$0xff]   ;;  %v9497_v36 = vld [vmem:[%s14080_s1 + $0x460] ss:$16 sps:$4 sm:$0xff]  }
 0x124   : > { %4296 = vmatpush2.bf16.msra.mxu0 %v9441_v47  ;;  %v9502_v35 = vld [vmem:[%s14080_s1 + $0x664] ss:$16 sps:$4 sm:$0xff]   ;;  %v9500_v37 = vld [vmem:[%s14080_s1 + $0x660] ss:$16 sps:$4 sm:$0xff]  }
 0x125   : > { %4337 = vmatpush2.bf16.msra.mxu1 %v9442_v48  ;;  %4297 = vmatprep.subr.bf16.mxu0 %v9443_v50  ;;  %v9505_v38 = vld [vmem:[%s14080_s1 + $0x444] ss:$16 sps:$4 sm:$0xff]   ;;  %v9503_v40 = vld [vmem:[%s14080_s1 + $0x440] ss:$16 sps:$4 sm:$0xff]  }
 0x126   : > { %4338 = vmatprep.subr.bf16.mxu1 %v9445_v51  ;;  %v9508_v39 = vld [vmem:[%s14080_s1 + $0x644] ss:$16 sps:$4 sm:$0xff]   ;;  %v9506_v41 = vld [vmem:[%s14080_s1 + $0x640] ss:$16 sps:$4 sm:$0xff]  }
 0x127   : > { %v9511_v42 = vld [vmem:[%s14080_s1 + $0x424] ss:$16 sps:$4 sm:$0xff]   ;;  %v9509_v44 = vld [vmem:[%s14080_s1 + $0x420] ss:$16 sps:$4 sm:$0xff]  }
 0x128   : > { %4298 = vmatpush2.bf16.msra.mxu0 %v9447_v53  ;;  %v9514_v43 = vld [vmem:[%s14080_s1 + $0x624] ss:$16 sps:$4 sm:$0xff]   ;;  %v9512_v45 = vld [vmem:[%s14080_s1 + $0x620] ss:$16 sps:$4 sm:$0xff]  }
 0x129   : > { %4339 = vmatpush2.bf16.msra.mxu1 %v9448_v55  ;;  %4299 = vmatprep.subr.bf16.mxu0 %v9449_v56  ;;  %v9517_v46 = vld [vmem:[%s14080_s1 + $0x404] ss:$16 sps:$4 sm:$0xff]   ;;  %v9515_v48 = vld [vmem:[%s14080_s1 + $0x400] ss:$16 sps:$4 sm:$0xff]  }
 0x12a   : > { %4340 = vmatprep.subr.bf16.mxu1 %v9451_v57  ;;  %v9520_v47 = vld [vmem:[%s14080_s1 + $0x604] ss:$16 sps:$4 sm:$0xff]   ;;  %v9518_v50 = vld [vmem:[%s14080_s1 + $0x600] ss:$16 sps:$4 sm:$0xff]  }
 0x12b   : > { %v9523_v51 = vld [vmem:[%s14080_s1 + $0x5e4] ss:$16 sps:$4 sm:$0xff]   ;;  %v9521_v53 = vld [vmem:[%s14080_s1 + $0x5e0] ss:$16 sps:$4 sm:$0xff]  }
 0x12c   : > { %4300 = vmatpush2.bf16.msra.mxu0 %v9453_v59  ;;  %v9526_v52 = vld [vmem:[%s14080_s1 + $0x7e4] ss:$16 sps:$4 sm:$0xff]   ;;  %v9524_v54 = vld [vmem:[%s14080_s1 + $0x7e0] ss:$16 sps:$4 sm:$0xff]  }
 0x12d   : > { %4341 = vmatpush2.bf16.msra.mxu1 %v9454_v61  ;;  %4301 = vmatprep.subr.bf16.mxu0 %v9455_v62  ;;  %v9529_v55 = vld [vmem:[%s14080_s1 + $0x5c4] ss:$16 sps:$4 sm:$0xff]   ;;  %v9527_v57 = vld [vmem:[%s14080_s1 + $0x5c0] ss:$16 sps:$4 sm:$0xff]  }
 0x12e   : > { %4342 = vmatprep.subr.bf16.mxu1 %v9457_v63  ;;  %v9532_v56 = vld [vmem:[%s14080_s1 + $0x7c4] ss:$16 sps:$4 sm:$0xff]   ;;  %v9530_v58 = vld [vmem:[%s14080_s1 + $0x7c0] ss:$16 sps:$4 sm:$0xff]  }
 0x12f   : > { %v9535_v59 = vld [vmem:[%s14080_s1 + $0x5a4] ss:$16 sps:$4 sm:$0xff]   ;;  %v9533_v62 = vld [vmem:[%s14080_s1 + $0x5a0] ss:$16 sps:$4 sm:$0xff]  }
 0x130   : > { %4302 = vmatpush2.bf16.msra.mxu0 %v9459_v2  ;;  %v9538_v61 = vld [vmem:[%s14080_s1 + $0x7a4] ss:$16 sps:$4 sm:$0xff]   ;;  %v9536_v63 = vld [vmem:[%s14080_s1 + $0x7a0] ss:$16 sps:$4 sm:$0xff]  }
 0x131   : > { %4343 = vmatpush2.bf16.msra.mxu1 %v9460_v3  ;;  %4303 = vmatprep.subr.bf16.mxu0 %v9461_v4  ;;  %v9541_v1 = vld [vmem:[%s14080_s1 + $0x584] ss:$16 sps:$4 sm:$0xff]   ;;  %v9539_v3 = vld [vmem:[%s14080_s1 + $0x580] ss:$16 sps:$4 sm:$0xff]  }
 0x132   : > { %4344 = vmatprep.subr.bf16.mxu1 %v9463_v5  ;;  %v9544_v2 = vld [vmem:[%s14080_s1 + $0x784] ss:$16 sps:$4 sm:$0xff]   ;;  %v9542_v4 = vld [vmem:[%s14080_s1 + $0x780] ss:$16 sps:$4 sm:$0xff]  }
 0x133   : > { %v9547_v5 = vld [vmem:[%s14080_s1 + $0x564] ss:$16 sps:$4 sm:$0xff]  }
 0x134   : > { %4304 = vmatpush2.bf16.msra.mxu0 %v9465_v7  ;;  %v9550_v7 = vld [vmem:[%s14080_s1 + $0x764] ss:$16 sps:$4 sm:$0xff]  }
 0x135   : > { %4345 = vmatpush2.bf16.msra.mxu1 %v9466_v8  ;;  %4305 = vmatprep.subr.bf16.mxu0 %v9467_v9  ;;  %v9545_v8 = vld [vmem:[%s14080_s1 + $0x560] ss:$16 sps:$4 sm:$0xff]   ;;  %v9556_v11 = vld [vmem:[%s14080_s1 + $0x744] ss:$16 sps:$4 sm:$0xff]  }
 0x136   : > { %4346 = vmatprep.subr.bf16.mxu1 %v9469_v10  ;;  %v9548_v9 = vld [vmem:[%s14080_s1 + $0x760] ss:$16 sps:$4 sm:$0xff]   ;;  %v9553_v10 = vld [vmem:[%s14080_s1 + $0x544] ss:$16 sps:$4 sm:$0xff]  }
 0x138   : > { %4306 = vmatpush2.bf16.msra.mxu0 %v9471_v12  ;;  %v9551_v12 = vld [vmem:[%s14080_s1 + $0x540] ss:$16 sps:$4 sm:$0xff]  }
 0x139   : > { %4347 = vmatpush2.bf16.msra.mxu1 %v9472_v14  ;;  %4357 = vmatprep.subr.bf16.mxu0 %v9475_v15  ;;  %v9554_v14 = vld [vmem:[%s14080_s1 + $0x740] ss:$16 sps:$4 sm:$0xff]   ;;  %v9559_v15 = vld [vmem:[%s14080_s1 + $0x524] ss:$16 sps:$4 sm:$0xff]  }
 0x13a   : > { %4398 = vmatprep.subr.bf16.mxu1 %v9478_v16  ;;  %v9562_v16 = vld [vmem:[%s14080_s1 + $0x724] ss:$16 sps:$4 sm:$0xff]  }
 0x13b   : > { %4308 = vmatmul.mubr.bf16.vlgmr.msra.gmra.mxu0 %v12010_v13 }
 0x13c   : > { %4349 = vmatmul.mubr.bf16.vlgmr.msra.gmra.mxu1 %v12026_v18  ;;  %4358 = vmatpush1.bf16.msra.mxu0 %v9473_v19  ;;  %v9557_v19 = vld [vmem:[%s14080_s1 + $0x520] ss:$16 sps:$4 sm:$0xff]  }
 0x13d   : > { %4399 = vmatpush1.bf16.msra.mxu1 %v9476_v20  ;;  %4359 = vmatprep.subr.bf16.mxu0 %v9481_v21  ;;  %v9560_v20 = vld [vmem:[%s14080_s1 + $0x720] ss:$16 sps:$4 sm:$0xff]   ;;  %v9565_v21 = vld [vmem:[%s14080_s1 + $0x504] ss:$16 sps:$4 sm:$0xff]  }
 0x13e   : > { %4400 = vmatprep.subr.bf16.mxu1 %v9484_v22  ;;  %4389 = vmatprep.mubr.bf16.mxu0 %v12022_v17  ;;  %v9568_v22 = vld [vmem:[%s14080_s1 + $0x704] ss:$16 sps:$4 sm:$0xff]  }
 0x13f   : > { %4430 = vmatprep.mubr.bf16.mxu1 %v12042_v23 }
 0x140   : > { %4360 = vmatpush1.bf16.msra.mxu0 %v9479_v24  ;;  %v9563_v24 = vld [vmem:[%s14080_s1 + $0x500] ss:$16 sps:$4 sm:$0xff]  }
 0x141   : > { %4401 = vmatpush1.bf16.msra.mxu1 %v9482_v25  ;;  %4361 = vmatprep.subr.bf16.mxu0 %v9487_v26  ;;  %v12221_v25 = vrot.slane %v11990_v6, %v11932_v49  ;;  %v9566_v26 = vld [vmem:[%s14080_s1 + $0x700] ss:$16 sps:$4 sm:$0xff]  }
 0x142   : > { %4402 = vmatprep.subr.bf16.mxu1 %v9490_v27  ;;  %v9572_v27 = vld [vmem:[%s14080_s1 + $0x8e4] ss:$16 sps:$4 sm:$0xff]  }
 0x143   : > { %v12234_v6 = vcombine.high %v12221_v25, %v12221_v25 }
 0x144   : > { %4362 = vmatpush1.bf16.msra.mxu0 %v9485_v28  ;;  %v9575_v28 = vld [vmem:[%s14080_s1 + $0xae4] ss:$16 sps:$4 sm:$0xff]  }
 0x145   : > { %4403 = vmatpush1.bf16.msra.mxu1 %v9488_v29  ;;  %4363 = vmatprep.subr.bf16.mxu0 %v9493_v30  ;;  %v9570_v29 = vld [vmem:[%s14080_s1 + $0x8e0] ss:$16 sps:$4 sm:$0xff]  }
 0x146   : > { %4404 = vmatprep.subr.bf16.mxu1 %v9496_v31  ;;  %v9573_v30 = vld [vmem:[%s14080_s1 + $0xae0] ss:$16 sps:$4 sm:$0xff]   ;;  %v12245_v31 = vld [vmem:[%s14079_s0 + $0x8] sm:$0xff] }
 0x148   : > { %4364 = vmatpush1.bf16.msra.mxu0 %v9491_v32  ;;  %v9578_v32 = vld [vmem:[%s14080_s1 + $0x8c4] ss:$16 sps:$4 sm:$0xff]  }
 0x149   : > { %4405 = vmatpush1.bf16.msra.mxu1 %v9494_v33  ;;  %4365 = vmatprep.subr.bf16.mxu0 %v9499_v34  ;;  %v9581_v33 = vld [vmem:[%s14080_s1 + $0xac4] ss:$16 sps:$4 sm:$0xff]   ;;  %v12255_v34 = vrot.slane %v12245_v31, %v11932_v49 }
 0x14a   : > { %4406 = vmatprep.subr.bf16.mxu1 %v9502_v35 }
 0x14b   : > { %v1665_v35 = vcombine.high %v12255_v34, %v12255_v34 }
 0x14c   : > { %4366 = vmatpush1.bf16.msra.mxu0 %v9497_v36  ;;  %v9576_v36 = vld [vmem:[%s14080_s1 + $0x8c0] ss:$16 sps:$4 sm:$0xff]  }
 0x14d   : > { %4407 = vmatpush1.bf16.msra.mxu1 %v9500_v37  ;;  %4367 = vmatprep.subr.bf16.mxu0 %v9505_v38  ;;  %v9579_v37 = vld [vmem:[%s14080_s1 + $0xac0] ss:$16 sps:$4 sm:$0xff]   ;;  %v9584_v38 = vld [vmem:[%s14080_s1 + $0x8a4] ss:$16 sps:$4 sm:$0xff]  }
 0x14e   : > { %4408 = vmatprep.subr.bf16.mxu1 %v9508_v39  ;;  %v9587_v39 = vld [vmem:[%s14080_s1 + $0xaa4] ss:$16 sps:$4 sm:$0xff]  }
 0x150   : > { %4368 = vmatpush1.bf16.msra.mxu0 %v9503_v40  ;;  %v12274_v40 = vrot.slane %v1665_v35, %v11932_v49  ;;  %v9651_v35 = vld [vmem:[%s14080_s1 + $0xb40] ss:$16 sps:$4 sm:$0xff]  }
 0x151   : > { %4409 = vmatpush1.bf16.msra.mxu1 %v9506_v41  ;;  %4369 = vmatprep.subr.bf16.mxu0 %v9511_v42  ;;  %v9582_v42 = vld [vmem:[%s14080_s1 + $0x8a0] ss:$16 sps:$4 sm:$0xff]  }
 0x152   : > { %4410 = vmatprep.subr.bf16.mxu1 %v9514_v43  ;;  %v12279_v41 = vcombine.high %v12274_v40, %v12274_v40  ;;  %v9585_v43 = vld [vmem:[%s14080_s1 + $0xaa0] ss:$16 sps:$4 sm:$0xff]  }
 0x154   : > { %4370 = vmatpush1.bf16.msra.mxu0 %v9509_v44  ;;  %v9590_v44 = vld [vmem:[%s14080_s1 + $0x884] ss:$16 sps:$4 sm:$0xff]  }
 0x155   : > { %4411 = vmatpush1.bf16.msra.mxu1 %v9512_v45  ;;  %4371 = vmatprep.subr.bf16.mxu0 %v9517_v46  ;;  %v9593_v45 = vld [vmem:[%s14080_s1 + $0xa84] ss:$16 sps:$4 sm:$0xff]   ;;  %v9588_v46 = vld [vmem:[%s14080_s1 + $0x880] ss:$16 sps:$4 sm:$0xff]  }
 0x156   : > { %4412 = vmatprep.subr.bf16.mxu1 %v9520_v47  ;;  %v9591_v47 = vld [vmem:[%s14080_s1 + $0xa80] ss:$16 sps:$4 sm:$0xff]  }
 0x158   : > { %4372 = vmatpush1.bf16.msra.mxu0 %v9515_v48  ;;  %v9596_v48 = vld [vmem:[%s14080_s1 + $0x864] ss:$16 sps:$4 sm:$0xff]  }
 0x159   : > { %4413 = vmatpush1.bf16.msra.mxu1 %v9518_v50  ;;  %4373 = vmatprep.subr.bf16.mxu0 %v9523_v51  ;;  %v9599_v50 = vld [vmem:[%s14080_s1 + $0xa64] ss:$16 sps:$4 sm:$0xff]   ;;  %v9594_v51 = vld [vmem:[%s14080_s1 + $0x860] ss:$16 sps:$4 sm:$0xff]  }
 0x15a   : > { %4414 = vmatprep.subr.bf16.mxu1 %v9526_v52  ;;  %v9597_v52 = vld [vmem:[%s14080_s1 + $0xa60] ss:$16 sps:$4 sm:$0xff]  }
 0x15c   : > { %4374 = vmatpush2.bf16.msra.mxu0 %v9521_v53  ;;  %v9602_v53 = vld [vmem:[%s14080_s1 + $0x844] ss:$16 sps:$4 sm:$0xff]  }
 0x15d   : > { %4415 = vmatpush2.bf16.msra.mxu1 %v9524_v54  ;;  %4375 = vmatprep.subr.bf16.mxu0 %v9529_v55  ;;  %v9605_v54 = vld [vmem:[%s14080_s1 + $0xa44] ss:$16 sps:$4 sm:$0xff]   ;;  %v9600_v55 = vld [vmem:[%s14080_s1 + $0x840] ss:$16 sps:$4 sm:$0xff]  }
 0x15e   : > { %4416 = vmatprep.subr.bf16.mxu1 %v9532_v56  ;;  %v9603_v56 = vld [vmem:[%s14080_s1 + $0xa40] ss:$16 sps:$4 sm:$0xff]  }
 0x160   : > { %4376 = vmatpush2.bf16.msra.mxu0 %v9527_v57  ;;  %v9608_v57 = vld [vmem:[%s14080_s1 + $0x824] ss:$16 sps:$4 sm:$0xff]  }
 0x161   : > { %4417 = vmatpush2.bf16.msra.mxu1 %v9530_v58  ;;  %4377 = vmatprep.subr.bf16.mxu0 %v9535_v59  ;;  %v9611_v58 = vld [vmem:[%s14080_s1 + $0xa24] ss:$16 sps:$4 sm:$0xff]   ;;  %v9606_v59 = vld [vmem:[%s14080_s1 + $0x820] ss:$16 sps:$4 sm:$0xff]  }
 0x162   : > { %4418 = vmatprep.subr.bf16.mxu1 %v9538_v61  ;;  %v9609_v61 = vld [vmem:[%s14080_s1 + $0xa20] ss:$16 sps:$4 sm:$0xff]  }
 0x164   : > { %4378 = vmatpush2.bf16.msra.mxu0 %v9533_v62  ;;  %v9614_v62 = vld [vmem:[%s14080_s1 + $0x804] ss:$16 sps:$4 sm:$0xff]  }
 0x165   : > { %4419 = vmatpush2.bf16.msra.mxu1 %v9536_v63  ;;  %4379 = vmatprep.subr.bf16.mxu0 %v9541_v1  ;;  %v9617_v63 = vld [vmem:[%s14080_s1 + $0xa04] ss:$16 sps:$4 sm:$0xff]   ;;  %v9612_v1 = vld [vmem:[%s14080_s1 + $0x800] ss:$16 sps:$4 sm:$0xff]  }
 0x166   : > { %4420 = vmatprep.subr.bf16.mxu1 %v9544_v2  ;;  %v9615_v2 = vld [vmem:[%s14080_s1 + $0xa00] ss:$16 sps:$4 sm:$0xff]  }
 0x168   : > { %4380 = vmatpush2.bf16.msra.mxu0 %v9539_v3  ;;  %v9620_v3 = vld [vmem:[%s14080_s1 + $0x9e4] ss:$16 sps:$4 sm:$0xff]  }
 0x169   : > { %4421 = vmatpush2.bf16.msra.mxu1 %v9542_v4  ;;  %4381 = vmatprep.subr.bf16.mxu0 %v9547_v5  ;;  %v9623_v4 = vld [vmem:[%s14080_s1 + $0xbe4] ss:$16 sps:$4 sm:$0xff]   ;;  %v9618_v5 = vld [vmem:[%s14080_s1 + $0x9e0] ss:$16 sps:$4 sm:$0xff]  }
 0x16a   : > { %4422 = vmatprep.subr.bf16.mxu1 %v9550_v7  ;;  %v9621_v7 = vld [vmem:[%s14080_s1 + $0xbe0] ss:$16 sps:$4 sm:$0xff]  }
 0x16c   : > { %4382 = vmatpush2.bf16.msra.mxu0 %v9545_v8  ;;  %v9626_v8 = vld [vmem:[%s14080_s1 + $0x9c4] ss:$16 sps:$4 sm:$0xff]  }
 0x16d   : > { %4423 = vmatpush2.bf16.msra.mxu1 %v9548_v9  ;;  %4383 = vmatprep.subr.bf16.mxu0 %v9553_v10  ;;  %v9629_v9 = vld [vmem:[%s14080_s1 + $0xbc4] ss:$16 sps:$4 sm:$0xff]   ;;  %v9624_v10 = vld [vmem:[%s14080_s1 + $0x9c0] ss:$16 sps:$4 sm:$0xff]  }
 0x16e   : > { %4424 = vmatprep.subr.bf16.mxu1 %v9556_v11  ;;  %v9627_v11 = vld [vmem:[%s14080_s1 + $0xbc0] ss:$16 sps:$4 sm:$0xff]  }
 0x170   : > { %4384 = vmatpush2.bf16.msra.mxu0 %v9551_v12  ;;  %v9632_v12 = vld [vmem:[%s14080_s1 + $0x9a4] ss:$16 sps:$4 sm:$0xff]  }
 0x171   : > { %4425 = vmatpush2.bf16.msra.mxu1 %v9554_v14  ;;  %4385 = vmatprep.subr.bf16.mxu0 %v9559_v15  ;;  %v9635_v14 = vld [vmem:[%s14080_s1 + $0xba4] ss:$16 sps:$4 sm:$0xff]   ;;  %v9630_v15 = vld [vmem:[%s14080_s1 + $0x9a0] ss:$16 sps:$4 sm:$0xff]  }
 0x172   : > { %4426 = vmatprep.subr.bf16.mxu1 %v9562_v16  ;;  %v9633_v16 = vld [vmem:[%s14080_s1 + $0xba0] ss:$16 sps:$4 sm:$0xff]  }
 0x174   : > { %4386 = vmatpush2.bf16.msra.mxu0 %v9557_v19  ;;  %v9638_v19 = vld [vmem:[%s14080_s1 + $0x984] ss:$16 sps:$4 sm:$0xff]  }
 0x175   : > { %4427 = vmatpush2.bf16.msra.mxu1 %v9560_v20  ;;  %4387 = vmatprep.subr.bf16.mxu0 %v9565_v21  ;;  %v9641_v20 = vld [vmem:[%s14080_s1 + $0xb84] ss:$16 sps:$4 sm:$0xff]   ;;  %v9636_v21 = vld [vmem:[%s14080_s1 + $0x980] ss:$16 sps:$4 sm:$0xff]  }
 0x176   : > { %4428 = vmatprep.subr.bf16.mxu1 %v9568_v22  ;;  %v9639_v22 = vld [vmem:[%s14080_s1 + $0xb80] ss:$16 sps:$4 sm:$0xff]  }
 0x178   : > { %4388 = vmatpush2.bf16.msra.mxu0 %v9563_v24  ;;  %v9644_v24 = vld [vmem:[%s14080_s1 + $0x964] ss:$16 sps:$4 sm:$0xff]  }
 0x179   : > { %4429 = vmatpush2.bf16.msra.mxu1 %v9566_v26  ;;  %4439 = vmatprep.subr.bf16.mxu0 %v9572_v27  ;;  %v9647_v26 = vld [vmem:[%s14080_s1 + $0xb64] ss:$16 sps:$4 sm:$0xff]   ;;  %v9642_v27 = vld [vmem:[%s14080_s1 + $0x960] ss:$16 sps:$4 sm:$0xff]  }
 0x17a   : > { %4480 = vmatprep.subr.bf16.mxu1 %v9575_v28  ;;  %v9645_v28 = vld [vmem:[%s14080_s1 + $0xb60] ss:$16 sps:$4 sm:$0xff]  }
 0x17b   : > { %4390 = vmatmul.mubr.bf16.vlgmr.msra.gmra.mxu0 %v12221_v25 }
 0x17c   : > { %4431 = vmatmul.mubr.bf16.vlgmr.msra.gmra.mxu1 %v12234_v6  ;;  %4440 = vmatpush1.bf16.msra.mxu0 %v9570_v29  ;;  %v9650_v29 = vld [vmem:[%s14080_s1 + $0x944] ss:$16 sps:$4 sm:$0xff]  }
 0x17d   : > { %4481 = vmatpush1.bf16.msra.mxu1 %v9573_v30  ;;  %4441 = vmatprep.subr.bf16.mxu0 %v9578_v32  ;;  %v9653_v30 = vld [vmem:[%s14080_s1 + $0xb44] ss:$16 sps:$4 sm:$0xff]   ;;  %v1650_v32 = vcombine.high %v12245_v31, %v12245_v31 }
 0x17e   : > { %4482 = vmatprep.subr.bf16.mxu1 %v9581_v33  ;;  %4471 = vmatprep.mubr.bf16.mxu0 %v12274_v40  ;;  %v9648_v33 = vld [vmem:[%s14080_s1 + $0x940] ss:$16 sps:$4 sm:$0xff]   ;;  %v9659_v31 = vld [vmem:[%s14080_s1 + $0xb24] ss:$16 sps:$4 sm:$0xff]  }
 0x17f   : > { %4512 = vmatprep.mubr.bf16.mxu1 %v12279_v41 }
 0x180   : > { %4442 = vmatpush1.bf16.msra.mxu0 %v9576_v36  ;;  %v9656_v36 = vld [vmem:[%s14080_s1 + $0x924] ss:$16 sps:$4 sm:$0xff]  }
 0x181   : > { %4483 = vmatpush1.bf16.msra.mxu1 %v9579_v37  ;;  %4443 = vmatprep.subr.bf16.mxu0 %v9584_v38  ;;  %v12429_v37 = vrot.slane %v1650_v32, %v11932_v49  ;;  %v9654_v38 = vld [vmem:[%s14080_s1 + $0x920] ss:$16 sps:$4 sm:$0xff]   ;;  %v9722_v32 = vld [vmem:[%s14080_s1 + $0xdc4] ss:$16 sps:$4 sm:$0xff]  }
 0x182   : > { %4484 = vmatprep.subr.bf16.mxu1 %v9587_v39  ;;  %v9657_v39 = vld [vmem:[%s14080_s1 + $0xb20] ss:$16 sps:$4 sm:$0xff]  }
 0x184   : > { %4444 = vmatpush1.bf16.msra.mxu0 %v9582_v42  ;;  %v9662_v42 = vld [vmem:[%s14080_s1 + $0x904] ss:$16 sps:$4 sm:$0xff]  }
 0x185   : > { %4485 = vmatpush1.bf16.msra.mxu1 %v9585_v43  ;;  %4445 = vmatprep.subr.bf16.mxu0 %v9590_v44  ;;  %v9665_v43 = vld [vmem:[%s14080_s1 + $0xb04] ss:$16 sps:$4 sm:$0xff]   ;;  %v1666_v44 = vcombine.high %v12429_v37, %v12429_v37 }
 0x186   : > { %4486 = vmatprep.subr.bf16.mxu1 %v9593_v45  ;;  %v12447_v45 = vrot.slane %v12255_v34, %v11932_v49  ;;  %v9671_v34 = vld [vmem:[%s14080_s1 + $0xee4] ss:$16 sps:$4 sm:$0xff]  }
 0x188   : > { %4446 = vmatpush1.bf16.msra.mxu0 %v9588_v46  ;;  %v9660_v46 = vld [vmem:[%s14080_s1 + $0x900] ss:$16 sps:$4 sm:$0xff]  }
 0x189   : > { %4487 = vmatpush1.bf16.msra.mxu1 %v9591_v47  ;;  %4447 = vmatprep.subr.bf16.mxu0 %v9596_v48  ;;  %v9663_v47 = vld [vmem:[%s14080_s1 + $0xb00] ss:$16 sps:$4 sm:$0xff]   ;;  %v9668_v48 = vld [vmem:[%s14080_s1 + $0xce4] ss:$16 sps:$4 sm:$0xff]  }
 0x18a   : > { %4488 = vmatprep.subr.bf16.mxu1 %v9599_v50  ;;  %v12462_v50 = vrot.slane %v1666_v44, %v11932_v49  ;;  %v9737_v44 = vld [vmem:[%s14080_s1 + $0xf84] ss:$16 sps:$4 sm:$0xff]  }
 0x18c   : > { %4448 = vmatpush1.bf16.msra.mxu0 %v9594_v51  ;;  %v12466_v51 = vcombine.high %v12447_v45, %v12447_v45 }
 0x18d   : > { %4489 = vmatpush1.bf16.msra.mxu1 %v9597_v52  ;;  %4449 = vmatprep.subr.bf16.mxu0 %v9602_v53  ;;  %v9666_v52 = vld [vmem:[%s14080_s1 + $0xce0] ss:$16 sps:$4 sm:$0xff]  }
 0x18e   : > { %4490 = vmatprep.subr.bf16.mxu1 %v9605_v54  ;;  %v9669_v53 = vld [vmem:[%s14080_s1 + $0xee0] ss:$16 sps:$4 sm:$0xff]   ;;  %v9674_v54 = vld [vmem:[%s14080_s1 + $0xcc4] ss:$16 sps:$4 sm:$0xff]  }
 0x190   : > { %4450 = vmatpush1.bf16.msra.mxu0 %v9600_v55  ;;  %v9677_v55 = vld [vmem:[%s14080_s1 + $0xec4] ss:$16 sps:$4 sm:$0xff]  }
 0x191   : > { %4491 = vmatpush1.bf16.msra.mxu1 %v9603_v56  ;;  %4451 = vmatprep.subr.bf16.mxu0 %v9608_v57  ;;  %v12482_v56 = vcombine.high %v12462_v50, %v12462_v50  ;;  %v9672_v57 = vld [vmem:[%s14080_s1 + $0xcc0] ss:$16 sps:$4 sm:$0xff]  }
 0x192   : > { %4492 = vmatprep.subr.bf16.mxu1 %v9611_v58  ;;  %v9675_v58 = vld [vmem:[%s14080_s1 + $0xec0] ss:$16 sps:$4 sm:$0xff]  }
 0x194   : > { %4452 = vmatpush1.bf16.msra.mxu0 %v9606_v59  ;;  %v9680_v59 = vld [vmem:[%s14080_s1 + $0xca4] ss:$16 sps:$4 sm:$0xff]  }
 0x195   : > { %4493 = vmatpush1.bf16.msra.mxu1 %v9609_v61  ;;  %4453 = vmatprep.subr.bf16.mxu0 %v9614_v62  ;;  %v9683_v61 = vld [vmem:[%s14080_s1 + $0xea4] ss:$16 sps:$4 sm:$0xff]   ;;  %v9678_v62 = vld [vmem:[%s14080_s1 + $0xca0] ss:$16 sps:$4 sm:$0xff]  }
 0x196   : > { %4494 = vmatprep.subr.bf16.mxu1 %v9617_v63  ;;  %v9681_v63 = vld [vmem:[%s14080_s1 + $0xea0] ss:$16 sps:$4 sm:$0xff]  }
 0x198   : > { %4454 = vmatpush1.bf16.msra.mxu0 %v9612_v1  ;;  %v9686_v1 = vld [vmem:[%s14080_s1 + $0xc84] ss:$16 sps:$4 sm:$0xff]  }
 0x199   : > { %4495 = vmatpush1.bf16.msra.mxu1 %v9615_v2  ;;  %4455 = vmatprep.subr.bf16.mxu0 %v9620_v3  ;;  %v9689_v2 = vld [vmem:[%s14080_s1 + $0xe84] ss:$16 sps:$4 sm:$0xff]   ;;  %v9684_v3 = vld [vmem:[%s14080_s1 + $0xc80] ss:$16 sps:$4 sm:$0xff]  }
 0x19a   : > { %4496 = vmatprep.subr.bf16.mxu1 %v9623_v4  ;;  %v9687_v4 = vld [vmem:[%s14080_s1 + $0xe80] ss:$16 sps:$4 sm:$0xff]  }
 0x19c   : > { %4456 = vmatpush2.bf16.msra.mxu0 %v9618_v5  ;;  %v9692_v5 = vld [vmem:[%s14080_s1 + $0xc64] ss:$16 sps:$4 sm:$0xff]  }
 0x19d   : > { %4497 = vmatpush2.bf16.msra.mxu1 %v9621_v7  ;;  %4457 = vmatprep.subr.bf16.mxu0 %v9626_v8  ;;  %v9695_v7 = vld [vmem:[%s14080_s1 + $0xe64] ss:$16 sps:$4 sm:$0xff]   ;;  %v9690_v8 = vld [vmem:[%s14080_s1 + $0xc60] ss:$16 sps:$4 sm:$0xff]  }
 0x19e   : > { %4498 = vmatprep.subr.bf16.mxu1 %v9629_v9  ;;  %v9693_v9 = vld [vmem:[%s14080_s1 + $0xe60] ss:$16 sps:$4 sm:$0xff]  }
 0x1a0   : > { %4458 = vmatpush2.bf16.msra.mxu0 %v9624_v10  ;;  %v9698_v10 = vld [vmem:[%s14080_s1 + $0xc44] ss:$16 sps:$4 sm:$0xff]  }
 0x1a1   : > { %4499 = vmatpush2.bf16.msra.mxu1 %v9627_v11  ;;  %4459 = vmatprep.subr.bf16.mxu0 %v9632_v12  ;;  %v9701_v11 = vld [vmem:[%s14080_s1 + $0xe44] ss:$16 sps:$4 sm:$0xff]   ;;  %v9696_v12 = vld [vmem:[%s14080_s1 + $0xc40] ss:$16 sps:$4 sm:$0xff]  }
 0x1a2   : > { %4500 = vmatprep.subr.bf16.mxu1 %v9635_v14  ;;  %v9699_v14 = vld [vmem:[%s14080_s1 + $0xe40] ss:$16 sps:$4 sm:$0xff]  }
 0x1a4   : > { %4460 = vmatpush2.bf16.msra.mxu0 %v9630_v15  ;;  %v9704_v15 = vld [vmem:[%s14080_s1 + $0xc24] ss:$16 sps:$4 sm:$0xff]  }
 0x1a5   : > { %4501 = vmatpush2.bf16.msra.mxu1 %v9633_v16  ;;  %4461 = vmatprep.subr.bf16.mxu0 %v9638_v19  ;;  %v9707_v16 = vld [vmem:[%s14080_s1 + $0xe24] ss:$16 sps:$4 sm:$0xff]   ;;  %v9702_v19 = vld [vmem:[%s14080_s1 + $0xc20] ss:$16 sps:$4 sm:$0xff]  }
 0x1a6   : > { %4502 = vmatprep.subr.bf16.mxu1 %v9641_v20  ;;  %v9705_v20 = vld [vmem:[%s14080_s1 + $0xe20] ss:$16 sps:$4 sm:$0xff]  }
 0x1a8   : > { %4462 = vmatpush2.bf16.msra.mxu0 %v9636_v21  ;;  %v9710_v21 = vld [vmem:[%s14080_s1 + $0xc04] ss:$16 sps:$4 sm:$0xff]  }
 0x1a9   : > { %4503 = vmatpush2.bf16.msra.mxu1 %v9639_v22  ;;  %4463 = vmatprep.subr.bf16.mxu0 %v9644_v24  ;;  %v9713_v22 = vld [vmem:[%s14080_s1 + $0xe04] ss:$16 sps:$4 sm:$0xff]   ;;  %v9708_v24 = vld [vmem:[%s14080_s1 + $0xc00] ss:$16 sps:$4 sm:$0xff]  }
 0x1aa   : > { %4504 = vmatprep.subr.bf16.mxu1 %v9647_v26  ;;  %v9711_v26 = vld [vmem:[%s14080_s1 + $0xe00] ss:$16 sps:$4 sm:$0xff]  }
 0x1ac   : > { %4464 = vmatpush2.bf16.msra.mxu0 %v9642_v27  ;;  %v9716_v27 = vld [vmem:[%s14080_s1 + $0xde4] ss:$16 sps:$4 sm:$0xff]  }
 0x1ad   : > { %4505 = vmatpush2.bf16.msra.mxu1 %v9645_v28  ;;  %4465 = vmatprep.subr.bf16.mxu0 %v9650_v29  ;;  %v9719_v28 = vld [vmem:[%s14080_s1 + $0xfe4] ss:$16 sps:$4 sm:$0xff]   ;;  %v9714_v29 = vld [vmem:[%s14080_s1 + $0xde0] ss:$16 sps:$4 sm:$0xff]  }
 0x1ae   : > { %4506 = vmatprep.subr.bf16.mxu1 %v9653_v30  ;;  %v9717_v30 = vld [vmem:[%s14080_s1 + $0xfe0] ss:$16 sps:$4 sm:$0xff]  }
 0x1b0   : > { %4466 = vmatpush2.bf16.msra.mxu0 %v9648_v33  ;;  %v9725_v33 = vld [vmem:[%s14080_s1 + $0xfc4] ss:$16 sps:$4 sm:$0xff]  }
 0x1b1   : > { %4507 = vmatpush2.bf16.msra.mxu1 %v9651_v35  ;;  %4467 = vmatprep.subr.bf16.mxu0 %v9656_v36  ;;  %v9720_v35 = vld [vmem:[%s14080_s1 + $0xdc0] ss:$16 sps:$4 sm:$0xff]  }
 0x1b2   : > { %4508 = vmatprep.subr.bf16.mxu1 %v9659_v31  ;;  %v9723_v36 = vld [vmem:[%s14080_s1 + $0xfc0] ss:$16 sps:$4 sm:$0xff]   ;;  %v9728_v31 = vld [vmem:[%s14080_s1 + $0xda4] ss:$16 sps:$4 sm:$0xff]  }
 0x1b4   : > { %4468 = vmatpush2.bf16.msra.mxu0 %v9654_v38  ;;  %v9731_v38 = vld [vmem:[%s14080_s1 + $0xfa4] ss:$16 sps:$4 sm:$0xff]  }
 0x1b5   : > { %4509 = vmatpush2.bf16.msra.mxu1 %v9657_v39  ;;  %4469 = vmatprep.subr.bf16.mxu0 %v9662_v42  ;;  %v9726_v39 = vld [vmem:[%s14080_s1 + $0xda0] ss:$16 sps:$4 sm:$0xff]  }
 0x1b6   : > { %4510 = vmatprep.subr.bf16.mxu1 %v9665_v43  ;;  %v9729_v42 = vld [vmem:[%s14080_s1 + $0xfa0] ss:$16 sps:$4 sm:$0xff]   ;;  %v9734_v43 = vld [vmem:[%s14080_s1 + $0xd84] ss:$16 sps:$4 sm:$0xff]  }
 0x1b8   : > { %4470 = vmatpush2.bf16.msra.mxu0 %v9660_v46  ;;  %v9732_v46 = vld [vmem:[%s14080_s1 + $0xd80] ss:$16 sps:$4 sm:$0xff]  }
 0x1b9   : > { %4511 = vmatpush2.bf16.msra.mxu1 %v9663_v47  ;;  %4521 = vmatprep.subr.bf16.mxu0 %v9668_v48  ;;  %v9735_v47 = vld [vmem:[%s14080_s1 + $0xf80] ss:$16 sps:$4 sm:$0xff]   ;;  %v9740_v48 = vld [vmem:[%s14080_s1 + $0xd64] ss:$16 sps:$4 sm:$0xff]  }
 0x1ba   : > { %4562 = vmatprep.subr.bf16.mxu1 %v9671_v34  ;;  %v9743_v34 = vld [vmem:[%s14080_s1 + $0xf64] ss:$16 sps:$4 sm:$0xff]  }
 0x1bb   : > { %4472 = vmatmul.mubr.bf16.vlgmr.msra.gmra.mxu0 %v12447_v45 }
 0x1bc   : > { %4513 = vmatmul.mubr.bf16.vlgmr.msra.gmra.mxu1 %v12466_v51  ;;  %4522 = vmatpush1.bf16.msra.mxu0 %v9666_v52  ;;  %v9738_v52 = vld [vmem:[%s14080_s1 + $0xd60] ss:$16 sps:$4 sm:$0xff]  }
 0x1bd   : > { %4563 = vmatpush1.bf16.msra.mxu1 %v9669_v53  ;;  %4523 = vmatprep.subr.bf16.mxu0 %v9674_v54  ;;  %v9741_v53 = vld [vmem:[%s14080_s1 + $0xf60] ss:$16 sps:$4 sm:$0xff]   ;;  %v9746_v54 = vld [vmem:[%s14080_s1 + $0xd44] ss:$16 sps:$4 sm:$0xff]  }
 0x1be   : > { %4564 = vmatprep.subr.bf16.mxu1 %v9677_v55  ;;  %4553 = vmatprep.mubr.bf16.mxu0 %v12462_v50  ;;  %v9749_v55 = vld [vmem:[%s14080_s1 + $0xf44] ss:$16 sps:$4 sm:$0xff]  }
 0x1bf   : > { %4594 = vmatprep.mubr.bf16.mxu1 %v12482_v56 }
 0x1c0   : > { %4524 = vmatpush1.bf16.msra.mxu0 %v9672_v57  ;;  %v9744_v57 = vld [vmem:[%s14080_s1 + $0xd40] ss:$16 sps:$4 sm:$0xff]  }
 0x1c1   : > { %4565 = vmatpush1.bf16.msra.mxu1 %v9675_v58  ;;  %4525 = vmatprep.subr.bf16.mxu0 %v9680_v59  ;;  %v9747_v58 = vld [vmem:[%s14080_s1 + $0xf40] ss:$16 sps:$4 sm:$0xff]   ;;  %v9752_v59 = vld [vmem:[%s14080_s1 + $0xd24] ss:$16 sps:$4 sm:$0xff]  }
 0x1c2   : > { %4566 = vmatprep.subr.bf16.mxu1 %v9683_v61  ;;  %v9755_v61 = vld [vmem:[%s14080_s1 + $0xf24] ss:$16 sps:$4 sm:$0xff]  }
 0x1c4   : > { %4526 = vmatpush1.bf16.msra.mxu0 %v9678_v62  ;;  %v9750_v62 = vld [vmem:[%s14080_s1 + $0xd20] ss:$16 sps:$4 sm:$0xff]  }
 0x1c5   : > { %4567 = vmatpush1.bf16.msra.mxu1 %v9681_v63  ;;  %4527 = vmatprep.subr.bf16.mxu0 %v9686_v1  ;;  %v9753_v63 = vld [vmem:[%s14080_s1 + $0xf20] ss:$16 sps:$4 sm:$0xff]   ;;  %v9758_v1 = vld [vmem:[%s14080_s1 + $0xd04] ss:$16 sps:$4 sm:$0xff]  }
 0x1c6   : > { %4568 = vmatprep.subr.bf16.mxu1 %v9689_v2  ;;  %v9761_v2 = vld [vmem:[%s14080_s1 + $0xf04] ss:$16 sps:$4 sm:$0xff]  }
 0x1c8   : > { %4528 = vmatpush1.bf16.msra.mxu0 %v9684_v3  ;;  %v12658_v3 = vrot.slane %v12429_v37, %v11932_v49  ;;  %v9768_v37 = vld [vmem:[%s14080_s1 + $0x2ec] ss:$16 sps:$4 sm:$0xff]  }
 0x1c9   : > { %4569 = vmatpush1.bf16.msra.mxu1 %v9687_v4  ;;  %4529 = vmatprep.subr.bf16.mxu0 %v9692_v5  ;;  %v9756_v4 = vld [vmem:[%s14080_s1 + $0xd00] ss:$16 sps:$4 sm:$0xff]  }
 0x1ca   : > { %4570 = vmatprep.subr.bf16.mxu1 %v9695_v7  ;;  %v9759_v5 = vld [vmem:[%s14080_s1 + $0xf00] ss:$16 sps:$4 sm:$0xff]   ;;  %v9765_v7 = vld [vmem:[%s14080_s1 + $0xec] ss:$16 sps:$4 sm:$0xff]  }
 0x1cc   : > { %4530 = vmatpush1.bf16.msra.mxu0 %v9690_v8  ;;  %v12674_v8 = vcombine.high %v12658_v3, %v12658_v3 }
 0x1cd   : > { %4571 = vmatpush1.bf16.msra.mxu1 %v9693_v9  ;;  %4531 = vmatprep.subr.bf16.mxu0 %v9698_v10  ;;  %v9763_v9 = vld [vmem:[%s14080_s1 + $0xe8] ss:$16 sps:$4 sm:$0xff]  }
 0x1ce   : > { %4572 = vmatprep.subr.bf16.mxu1 %v9701_v11  ;;  %v9766_v10 = vld [vmem:[%s14080_s1 + $0x2e8] ss:$16 sps:$4 sm:$0xff]   ;;  %v9771_v11 = vld [vmem:[%s14080_s1 + $0xcc] ss:$16 sps:$4 sm:$0xff]  }
 0x1d0   : > { %4532 = vmatpush1.bf16.msra.mxu0 %v9696_v12  ;;  %v9774_v12 = vld [vmem:[%s14080_s1 + $0x2cc] ss:$16 sps:$4 sm:$0xff]  }
 0x1d1   : > { %4573 = vmatpush1.bf16.msra.mxu1 %v9699_v14  ;;  %4533 = vmatprep.subr.bf16.mxu0 %v9704_v15  ;;  %v9769_v14 = vld [vmem:[%s14080_s1 + $0xc8] ss:$16 sps:$4 sm:$0xff]  }
 0x1d2   : > { %4574 = vmatprep.subr.bf16.mxu1 %v9707_v16 }
 0x1d4   : > { %4534 = vmatpush1.bf16.msra.mxu0 %v9702_v19  ;;  %v9772_v19 = vld [vmem:[%s14080_s1 + $0x2c8] ss:$16 sps:$4 sm:$0xff]  }
 0x1d5   : > { %4575 = vmatpush1.bf16.msra.mxu1 %v9705_v20  ;;  %4535 = vmatprep.subr.bf16.mxu0 %v9710_v21 }
 0x1d6   : > { %4576 = vmatprep.subr.bf16.mxu1 %v9713_v22 }
 0x1d8   : > { %4536 = vmatpush1.bf16.msra.mxu0 %v9708_v24  ;;  %v9777_v24 = vld [vmem:[%s14080_s1 + $0xac] ss:$16 sps:$4 sm:$0xff]  }
 0x1d9   : > { %4577 = vmatpush1.bf16.msra.mxu1 %v9711_v26  ;;  %4537 = vmatprep.subr.bf16.mxu0 %v9716_v27  ;;  %v9780_v26 = vld [vmem:[%s14080_s1 + $0x2ac] ss:$16 sps:$4 sm:$0xff]  }
 0x1da   : > { %4578 = vmatprep.subr.bf16.mxu1 %v9719_v28  ;;  %v9775_v28 = vld [vmem:[%s14080_s1 + $0xa8] ss:$16 sps:$4 sm:$0xff]  }
 0x1dc   : > { %4538 = vmatpush2.bf16.msra.mxu0 %v9714_v29  ;;  %v9778_v29 = vld [vmem:[%s14080_s1 + $0x2a8] ss:$16 sps:$4 sm:$0xff]  }
 0x1dd   : > { %4579 = vmatpush2.bf16.msra.mxu1 %v9717_v30  ;;  %4539 = vmatprep.subr.bf16.mxu0 %v9722_v32 }
 0x1de   : > { %4580 = vmatprep.subr.bf16.mxu1 %v9725_v33 }
 0x1e0   : > { %4540 = vmatpush2.bf16.msra.mxu0 %v9720_v35 }
 0x1e1   : > { %4581 = vmatpush2.bf16.msra.mxu1 %v9723_v36  ;;  %4541 = vmatprep.subr.bf16.mxu0 %v9728_v31  ;;  %v9783_v36 = vld [vmem:[%s14080_s1 + $0x8c] ss:$16 sps:$4 sm:$0xff]  }
 0x1e2   : > { %4582 = vmatprep.subr.bf16.mxu1 %v9731_v38  ;;  %v9786_v31 = vld [vmem:[%s14080_s1 + $0x28c] ss:$16 sps:$4 sm:$0xff]  }
 0x1e3   : > { %v9789_v38 = vld [vmem:[%s14080_s1 + $0x6c] ss:$16 sps:$4 sm:$0xff]  }
 0x1e4   : > { %4542 = vmatpush2.bf16.msra.mxu0 %v9726_v39  ;;  %v9792_v39 = vld [vmem:[%s14080_s1 + $0x26c] ss:$16 sps:$4 sm:$0xff]  }
 0x1e5   : > { %4583 = vmatpush2.bf16.msra.mxu1 %v9729_v42  ;;  %4543 = vmatprep.subr.bf16.mxu0 %v9734_v43  ;;  %v9787_v42 = vld [vmem:[%s14080_s1 + $0x68] ss:$16 sps:$4 sm:$0xff]  }
 0x1e6   : > { %4584 = vmatprep.subr.bf16.mxu1 %v9737_v44  ;;  %v9790_v43 = vld [vmem:[%s14080_s1 + $0x268] ss:$16 sps:$4 sm:$0xff]   ;;  %v9795_v44 = vld [vmem:[%s14080_s1 + $0x4c] ss:$16 sps:$4 sm:$0xff]  }
 0x1e8   : > { %4544 = vmatpush2.bf16.msra.mxu0 %v9732_v46  ;;  %v9798_v46 = vld [vmem:[%s14080_s1 + $0x24c] ss:$16 sps:$4 sm:$0xff]  }
 0x1e9   : > { %4585 = vmatpush2.bf16.msra.mxu1 %v9735_v47  ;;  %4545 = vmatprep.subr.bf16.mxu0 %v9740_v48  ;;  %v9793_v47 = vld [vmem:[%s14080_s1 + $0x48] ss:$16 sps:$4 sm:$0xff]  }
 0x1ea   : > { %4586 = vmatprep.subr.bf16.mxu1 %v9743_v34  ;;  %v9796_v48 = vld [vmem:[%s14080_s1 + $0x248] ss:$16 sps:$4 sm:$0xff]   ;;  %v9801_v34 = vld [vmem:[%s14080_s1 + $0x2c] ss:$16 sps:$4 sm:$0xff]  }
 0x1ec   : > { %4546 = vmatpush2.bf16.msra.mxu0 %v9738_v52  ;;  %v9804_v52 = vld [vmem:[%s14080_s1 + $0x22c] ss:$16 sps:$4 sm:$0xff]  }
 0x1ed   : > { %4587 = vmatpush2.bf16.msra.mxu1 %v9741_v53  ;;  %4547 = vmatprep.subr.bf16.mxu0 %v9746_v54  ;;  %v9799_v53 = vld [vmem:[%s14080_s1 + $0x28] ss:$16 sps:$4 sm:$0xff]  }
 0x1ee   : > { %4588 = vmatprep.subr.bf16.mxu1 %v9749_v55  ;;  %v9802_v54 = vld [vmem:[%s14080_s1 + $0x228] ss:$16 sps:$4 sm:$0xff]   ;;  %v9807_v55 = vld [vmem:[%s14080_s1 + $0xc] ss:$16 sps:$4 sm:$0xff]  }
 0x1f0   : > { %4548 = vmatpush2.bf16.msra.mxu0 %v9744_v57  ;;  %v9810_v57 = vld [vmem:[%s14080_s1 + $0x20c] ss:$16 sps:$4 sm:$0xff]  }
 0x1f1   : > { %4589 = vmatpush2.bf16.msra.mxu1 %v9747_v58  ;;  %4549 = vmatprep.subr.bf16.mxu0 %v9752_v59  ;;  %v9805_v58 = vld [vmem:[%s14080_s1 + $0x8] ss:$16 sps:$4 sm:$0xff]  }
 0x1f2   : > { %4590 = vmatprep.subr.bf16.mxu1 %v9755_v61  ;;  %v9808_v59 = vld [vmem:[%s14080_s1 + $0x208] ss:$16 sps:$4 sm:$0xff]   ;;  %v9813_v61 = vld [vmem:[%s14080_s1 + $0x1ec] ss:$16 sps:$4 sm:$0xff]  }
 0x1f4   : > { %4550 = vmatpush2.bf16.msra.mxu0 %v9750_v62  ;;  %v9816_v62 = vld [vmem:[%s14080_s1 + $0x3ec] ss:$16 sps:$4 sm:$0xff]  }
 0x1f5   : > { %4591 = vmatpush2.bf16.msra.mxu1 %v9753_v63  ;;  %4551 = vmatprep.subr.bf16.mxu0 %v9758_v1  ;;  %v9811_v63 = vld [vmem:[%s14080_s1 + $0x1e8] ss:$16 sps:$4 sm:$0xff]  }
 0x1f6   : > { %4592 = vmatprep.subr.bf16.mxu1 %v9761_v2  ;;  %v9814_v1 = vld [vmem:[%s14080_s1 + $0x3e8] ss:$16 sps:$4 sm:$0xff]   ;;  %v9819_v2 = vld [vmem:[%s14080_s1 + $0x1cc] ss:$16 sps:$4 sm:$0xff]  }
 0x1f8   : > { %4552 = vmatpush2.bf16.msra.mxu0 %v9756_v4  ;;  %v9822_v4 = vld [vmem:[%s14080_s1 + $0x3cc] ss:$16 sps:$4 sm:$0xff]  }
 0x1f9   : > { %4593 = vmatpush2.bf16.msra.mxu1 %v9759_v5  ;;  %4603 = vmatprep.subr.bf16.mxu0 %v9765_v7  ;;  %v9817_v5 = vld [vmem:[%s14080_s1 + $0x1c8] ss:$16 sps:$4 sm:$0xff]  }
 0x1fa   : > { %4644 = vmatprep.subr.bf16.mxu1 %v9768_v37  ;;  %v9820_v7 = vld [vmem:[%s14080_s1 + $0x3c8] ss:$16 sps:$4 sm:$0xff]   ;;  %v9825_v37 = vld [vmem:[%s14080_s1 + $0x1ac] ss:$16 sps:$4 sm:$0xff]  }
 0x1fb   : > { %v4309_v15 = vpop.f32.mrf.mxu0  ;;  %4554 = vmatmul.mubr.bf16.vlgmr.msra.gmra.mxu0 %v12658_v3 }
 0x1fc   : > { %v4350_v16 = vpop.f32.mrf.mxu1  ;;  %4595 = vmatmul.mubr.bf16.vlgmr.msra.gmra.mxu1 %v12674_v8  ;;  %4604 = vmatpush1.bf16.msra.mxu0 %v9763_v9  ;;  %v9828_v9 = vld [vmem:[%s14080_s1 + $0x3ac] ss:$16 sps:$4 sm:$0xff]  }
 0x1fd   : > { %v12696_v20 = vadd.f32 %v4350_v16, %v4309_v15  ;;  %4645 = vmatpush1.bf16.msra.mxu1 %v9766_v10  ;;  %v4311_v21 = vpop.f32.mrf.mxu0  ;;  %4605 = vmatprep.subr.bf16.mxu0 %v9771_v11  ;;  %v9823_v10 = vld [vmem:[%s14080_s1 + $0x1a8] ss:$16 sps:$4 sm:$0xff]  }
 0x1fe   : > { %v4352_v22 = vpop.f32.mrf.mxu1  ;;  %4646 = vmatprep.subr.bf16.mxu1 %v9774_v12  ;;  %4635 = vmatprep.mubr.bf16.mxu0 %v11960_v60  ;;  %v9781_v60 = vld [vmem:[%s14080_s1 + $0x88] ss:$16 sps:$4 sm:$0xff]   ;;  %v9831_v12 = vld [vmem:[%s14080_s1 + $0x18c] ss:$16 sps:$4 sm:$0xff]  }
 0x1ff   : > { %v12704_v27 = vadd.f32 %v4352_v22, %v4311_v21  ;;  %4676 = vmatprep.mubr.bf16.mxu1 %v11973_v0  ;;  %v4313_v30 = vpop.f32.mrf.mxu0  ;;  %v9784_v0 = vld [vmem:[%s14080_s1 + $0x288] ss:$16 sps:$4 sm:$0xff]   ;;  %v9840_v21 = vld [vmem:[%s14080_s1 + $0x36c] ss:$16 sps:$4 sm:$0xff]  }
 0x200   : > { %v4354_v32 = vpop.f32.mrf.mxu1  ;;  %4606 = vmatpush1.bf16.msra.mxu0 %v9769_v14  ;;  %v9826_v11 = vld [vmem:[%s14080_s1 + $0x3a8] ss:$16 sps:$4 sm:$0xff]   ;;  %v9834_v14 = vld [vmem:[%s14080_s1 + $0x38c] ss:$16 sps:$4 sm:$0xff]  }
 0x201   : > { %4647 = vmatpush1.bf16.msra.mxu1 %v9772_v19  ;;  %v4314_v33 = vpop.f32.mrf.mxu0  ;;  %4607 = vmatprep.subr.bf16.mxu0 %v9777_v24  ;;  %v9829_v15 = vld [vmem:[%s14080_s1 + $0x188] ss:$16 sps:$4 sm:$0xff]   ;;  %v9837_v19 = vld [vmem:[%s14080_s1 + $0x16c] ss:$16 sps:$4 sm:$0xff]  }
 0x202   : > { %v4355_v35 = vpop.f32.mrf.mxu1  ;;  %4648 = vmatprep.subr.bf16.mxu1 %v9780_v26  ;;  %v9832_v16 = vld [vmem:[%s14080_s1 + $0x388] ss:$16 sps:$4 sm:$0xff]   ;;  %v9843_v26 = vld [vmem:[%s14080_s1 + $0x14c] ss:$16 sps:$4 sm:$0xff]  }
 0x203   : > { %v9835_v22 = vld [vmem:[%s14080_s1 + $0x168] ss:$16 sps:$4 sm:$0xff]   ;;  %v9849_v32 = vld [vmem:[%s14080_s1 + $0x12c] ss:$16 sps:$4 sm:$0xff]  }
 0x204   : > { %4608 = vmatpush1.bf16.msra.mxu0 %v9775_v28  ;;  %v9838_v24 = vld [vmem:[%s14080_s1 + $0x368] ss:$16 sps:$4 sm:$0xff]   ;;  %v9846_v28 = vld [vmem:[%s14080_s1 + $0x34c] ss:$16 sps:$4 sm:$0xff]  }
 0x205   : > { %4649 = vmatpush1.bf16.msra.mxu1 %v9778_v29  ;;  %4609 = vmatprep.subr.bf16.mxu0 %v9783_v36  ;;  %v9841_v29 = vld [vmem:[%s14080_s1 + $0x148] ss:$16 sps:$4 sm:$0xff]   ;;  %v9852_v33 = vld [vmem:[%s14080_s1 + $0x32c] ss:$16 sps:$4 sm:$0xff]  }
 0x206   : > { %4650 = vmatprep.subr.bf16.mxu1 %v9786_v31  ;;  %v9844_v30 = vld [vmem:[%s14080_s1 + $0x348] ss:$16 sps:$4 sm:$0xff]   ;;  %v9855_v31 = vld [vmem:[%s14080_s1 + $0x10c] ss:$16 sps:$4 sm:$0xff]  }
 0x207   : > { %v9847_v35 = vld [vmem:[%s14080_s1 + $0x128] ss:$16 sps:$4 sm:$0xff]  }
 0x208   : > { %4610 = vmatpush1.bf16.msra.mxu0 %v9781_v60  ;;  %v9850_v36 = vld [vmem:[%s14080_s1 + $0x328] ss:$16 sps:$4 sm:$0xff]   ;;  %v9858_v60 = vld [vmem:[%s14080_s1 + $0x30c] ss:$16 sps:$4 sm:$0xff]  }
 0x209   : > { %4651 = vmatpush1.bf16.msra.mxu1 %v9784_v0  ;;  %4611 = vmatprep.subr.bf16.mxu0 %v9789_v38  ;;  %v9853_v0 = vld [vmem:[%s14080_s1 + $0x108] ss:$16 sps:$4 sm:$0xff]  }
 0x20a   : > { %4652 = vmatprep.subr.bf16.mxu1 %v9792_v39  ;;  %v9856_v38 = vld [vmem:[%s14080_s1 + $0x308] ss:$16 sps:$4 sm:$0xff]   ;;  %v9861_v39 = vld [vmem:[%s14080_s1 + $0x4ec] ss:$16 sps:$4 sm:$0xff]  }
 0x20c   : > { %4612 = vmatpush1.bf16.msra.mxu0 %v9787_v42  ;;  %v9864_v42 = vld [vmem:[%s14080_s1 + $0x6ec] ss:$16 sps:$4 sm:$0xff]  }
 0x20d   : > { %4653 = vmatpush1.bf16.msra.mxu1 %v9790_v43  ;;  %4613 = vmatprep.subr.bf16.mxu0 %v9795_v44  ;;  %v9859_v43 = vld [vmem:[%s14080_s1 + $0x4e8] ss:$16 sps:$4 sm:$0xff]  }
 0x20e   : > { %4654 = vmatprep.subr.bf16.mxu1 %v9798_v46  ;;  %v9862_v44 = vld [vmem:[%s14080_s1 + $0x6e8] ss:$16 sps:$4 sm:$0xff]   ;;  %v9867_v46 = vld [vmem:[%s14080_s1 + $0x4cc] ss:$16 sps:$4 sm:$0xff]  }
 0x210   : > { %4614 = vmatpush1.bf16.msra.mxu0 %v9793_v47  ;;  %v9870_v47 = vld [vmem:[%s14080_s1 + $0x6cc] ss:$16 sps:$4 sm:$0xff]  }
 0x211   : > { %4655 = vmatpush1.bf16.msra.mxu1 %v9796_v48  ;;  %4615 = vmatprep.subr.bf16.mxu0 %v9801_v34 }
 0x212   : > { %4656 = vmatprep.subr.bf16.mxu1 %v9804_v52 }
 0x214   : > { %4616 = vmatpush1.bf16.msra.mxu0 %v9799_v53  ;;  %v9865_v53 = vld [vmem:[%s14080_s1 + $0x4c8] ss:$16 sps:$4 sm:$0xff]  }
 0x215   : > { %4657 = vmatpush1.bf16.msra.mxu1 %v9802_v54  ;;  %4617 = vmatprep.subr.bf16.mxu0 %v9807_v55  ;;  %v9868_v54 = vld [vmem:[%s14080_s1 + $0x6c8] ss:$16 sps:$4 sm:$0xff]  }
 0x216   : > { %4658 = vmatprep.subr.bf16.mxu1 %v9810_v57 }
 0x218   : > { %4618 = vmatpush1.bf16.msra.mxu0 %v9805_v58 }
 0x219   : > { %4659 = vmatpush1.bf16.msra.mxu1 %v9808_v59  ;;  %4619 = vmatprep.subr.bf16.mxu0 %v9813_v61 }
 0x21a   : > { %4660 = vmatprep.subr.bf16.mxu1 %v9816_v62 }
 0x21c   : > { %4620 = vmatpush2.bf16.msra.mxu0 %v9811_v63  ;;  %v9871_v63 = vld [vmem:[%s14080_s1 + $0x4a8] ss:$16 sps:$4 sm:$0xff]  }
 0x21d   : > { %4661 = vmatpush2.bf16.msra.mxu1 %v9814_v1  ;;  %4621 = vmatprep.subr.bf16.mxu0 %v9819_v2  ;;  %v9874_v1 = vld [vmem:[%s14080_s1 + $0x6a8] ss:$16 sps:$4 sm:$0xff]  }
 0x21e   : > { %4662 = vmatprep.subr.bf16.mxu1 %v9822_v4  ;;  %v9877_v4 = vld [vmem:[%s14080_s1 + $0x488] ss:$16 sps:$4 sm:$0xff]  }
 0x220   : > { %4622 = vmatpush2.bf16.msra.mxu0 %v9817_v5  ;;  %v9880_v5 = vld [vmem:[%s14080_s1 + $0x688] ss:$16 sps:$4 sm:$0xff]  }
 0x221   : > { %4663 = vmatpush2.bf16.msra.mxu1 %v9820_v7  ;;  %4623 = vmatprep.subr.bf16.mxu0 %v9825_v37  ;;  %v9885_v7 = vld [vmem:[%s14080_s1 + $0x46c] ss:$16 sps:$4 sm:$0xff]  }
 0x222   : > { %4664 = vmatprep.subr.bf16.mxu1 %v9828_v9  ;;  %v9888_v37 = vld [vmem:[%s14080_s1 + $0x66c] ss:$16 sps:$4 sm:$0xff]   ;;  %v9883_v9 = vld [vmem:[%s14080_s1 + $0x468] ss:$16 sps:$4 sm:$0xff]  }
 0x224   : > { %4624 = vmatpush2.bf16.msra.mxu0 %v9823_v10  ;;  %v9886_v10 = vld [vmem:[%s14080_s1 + $0x668] ss:$16 sps:$4 sm:$0xff]  }
 0x225   : > { %4665 = vmatpush2.bf16.msra.mxu1 %v9826_v11  ;;  %4625 = vmatprep.subr.bf16.mxu0 %v9831_v12  ;;  %v9891_v11 = vld [vmem:[%s14080_s1 + $0x44c] ss:$16 sps:$4 sm:$0xff]  }
 0x226   : > { %4666 = vmatprep.subr.bf16.mxu1 %v9834_v14  ;;  %v9894_v12 = vld [vmem:[%s14080_s1 + $0x64c] ss:$16 sps:$4 sm:$0xff]   ;;  %v9889_v14 = vld [vmem:[%s14080_s1 + $0x448] ss:$16 sps:$4 sm:$0xff]  }
 0x228   : > { %4626 = vmatpush2.bf16.msra.mxu0 %v9829_v15  ;;  %v9892_v15 = vld [vmem:[%s14080_s1 + $0x648] ss:$16 sps:$4 sm:$0xff]  }
 0x229   : > { %4667 = vmatpush2.bf16.msra.mxu1 %v9832_v16  ;;  %4627 = vmatprep.subr.bf16.mxu0 %v9837_v19  ;;  %v9897_v16 = vld [vmem:[%s14080_s1 + $0x42c] ss:$16 sps:$4 sm:$0xff]  }
 0x22a   : > { %4668 = vmatprep.subr.bf16.mxu1 %v9840_v21  ;;  %v9900_v19 = vld [vmem:[%s14080_s1 + $0x62c] ss:$16 sps:$4 sm:$0xff]   ;;  %v9895_v21 = vld [vmem:[%s14080_s1 + $0x428] ss:$16 sps:$4 sm:$0xff]  }
 0x22c   : > { %4628 = vmatpush2.bf16.msra.mxu0 %v9835_v22  ;;  %v9898_v22 = vld [vmem:[%s14080_s1 + $0x628] ss:$16 sps:$4 sm:$0xff]  }
 0x22d   : > { %4669 = vmatpush2.bf16.msra.mxu1 %v9838_v24  ;;  %4629 = vmatprep.subr.bf16.mxu0 %v9843_v26  ;;  %v9903_v24 = vld [vmem:[%s14080_s1 + $0x40c] ss:$16 sps:$4 sm:$0xff]  }
 0x22e   : > { %4670 = vmatprep.subr.bf16.mxu1 %v9846_v28  ;;  %v9906_v26 = vld [vmem:[%s14080_s1 + $0x60c] ss:$16 sps:$4 sm:$0xff]   ;;  %v9901_v28 = vld [vmem:[%s14080_s1 + $0x408] ss:$16 sps:$4 sm:$0xff]  }
 0x230   : > { %4630 = vmatpush2.bf16.msra.mxu0 %v9841_v29  ;;  %v9904_v29 = vld [vmem:[%s14080_s1 + $0x608] ss:$16 sps:$4 sm:$0xff]  }
 0x231   : > { %4671 = vmatpush2.bf16.msra.mxu1 %v9844_v30  ;;  %4631 = vmatprep.subr.bf16.mxu0 %v9849_v32  ;;  %v9909_v30 = vld [vmem:[%s14080_s1 + $0x5ec] ss:$16 sps:$4 sm:$0xff]  }
 0x232   : > { %4672 = vmatprep.subr.bf16.mxu1 %v9852_v33  ;;  %v9912_v32 = vld [vmem:[%s14080_s1 + $0x7ec] ss:$16 sps:$4 sm:$0xff]   ;;  %v9907_v33 = vld [vmem:[%s14080_s1 + $0x5e8] ss:$16 sps:$4 sm:$0xff]  }
 0x234   : > { %4632 = vmatpush2.bf16.msra.mxu0 %v9847_v35  ;;  %v9910_v35 = vld [vmem:[%s14080_s1 + $0x7e8] ss:$16 sps:$4 sm:$0xff]  }
 0x235   : > { %4673 = vmatpush2.bf16.msra.mxu1 %v9850_v36  ;;  %4633 = vmatprep.subr.bf16.mxu0 %v9855_v31  ;;  %v9915_v36 = vld [vmem:[%s14080_s1 + $0x5cc] ss:$16 sps:$4 sm:$0xff]  }
 0x236   : > { %4674 = vmatprep.subr.bf16.mxu1 %v9858_v60  ;;  %v9918_v31 = vld [vmem:[%s14080_s1 + $0x7cc] ss:$16 sps:$4 sm:$0xff]   ;;  %v9913_v60 = vld [vmem:[%s14080_s1 + $0x5c8] ss:$16 sps:$4 sm:$0xff]  }
 0x238   : > { %4634 = vmatpush2.bf16.msra.mxu0 %v9853_v0  ;;  %v9916_v0 = vld [vmem:[%s14080_s1 + $0x7c8] ss:$16 sps:$4 sm:$0xff]  }
 0x239   : > { %4675 = vmatpush2.bf16.msra.mxu1 %v9856_v38  ;;  %4685 = vmatprep.subr.bf16.mxu0 %v9861_v39  ;;  %v9921_v38 = vld [vmem:[%s14080_s1 + $0x5ac] ss:$16 sps:$4 sm:$0xff]  }
 0x23a   : > { %4726 = vmatprep.subr.bf16.mxu1 %v9864_v42  ;;  %v9924_v39 = vld [vmem:[%s14080_s1 + $0x7ac] ss:$16 sps:$4 sm:$0xff]   ;;  %v9919_v42 = vld [vmem:[%s14080_s1 + $0x5a8] ss:$16 sps:$4 sm:$0xff]  }
 0x23b   : > { %v4391_v48 = vpop.f32.mrf.mxu0  ;;  %4636 = vmatmul.mubr.bf16.vlgmr.msra.gmra.mxu0 %v12010_v13  ;;  %v9873_v13 = vld [vmem:[%s14080_s1 + $0x4ac] ss:$16 sps:$4 sm:$0xff]  }
 0x23c   : > { %v4432_v34 = vpop.f32.mrf.mxu1  ;;  %4677 = vmatmul.mubr.bf16.vlgmr.msra.gmra.mxu1 %v12026_v18  ;;  %v4392_v52 = vadd.f32 %v4391_v48, %v12696_v20  ;;  %4686 = vmatpush1.bf16.msra.mxu0 %v9859_v43  ;;  %v9876_v18 = vld [vmem:[%s14080_s1 + $0x6ac] ss:$16 sps:$4 sm:$0xff]   ;;  %v9922_v43 = vld [vmem:[%s14080_s1 + $0x7a8] ss:$16 sps:$4 sm:$0xff]  }
 0x23d   : > { %4727 = vmatpush1.bf16.msra.mxu1 %v9862_v44  ;;  %v4393_v55 = vpop.f32.mrf.mxu0  ;;  %4687 = vmatprep.subr.bf16.mxu0 %v9867_v46  ;;  %v9927_v44 = vld [vmem:[%s14080_s1 + $0x58c] ss:$16 sps:$4 sm:$0xff]   ;;  %v9928_v48 = vld [vmem:[%s14080_s1 + $0x788] ss:$16 sps:$4 sm:$0xff]  }
 0x23e   : > { %v4434_v57 = vpop.f32.mrf.mxu1  ;;  %4728 = vmatprep.subr.bf16.mxu1 %v9870_v47  ;;  %v12903_v20 = vadd.f32 %v4432_v34, %v4392_v52  ;;  %v4394_v58 = vadd.f32 %v4393_v55, %v12704_v27  ;;  %4717 = vmatprep.mubr.bf16.mxu0 %v12022_v17  ;;  %v9879_v17 = vld [vmem:[%s14080_s1 + $0x48c] ss:$16 sps:$4 sm:$0xff]   ;;  %v9925_v47 = vld [vmem:[%s14080_s1 + $0x588] ss:$16 sps:$4 sm:$0xff]  }
 0x23f   : > { %4758 = vmatprep.mubr.bf16.mxu1 %v12042_v23  ;;  %v4395_v59 = vpop.f32.mrf.mxu0  ;;  %v9882_v23 = vld [vmem:[%s14080_s1 + $0x68c] ss:$16 sps:$4 sm:$0xff]  }
 0x240   : > { %v4436_v61 = vpop.f32.mrf.mxu1  ;;  %v12908_v62 = vadd.f32 %v4434_v57, %v4394_v58  ;;  %4688 = vmatpush1.bf16.msra.mxu0 %v9865_v53  ;;  %v9930_v46 = vld [vmem:[%s14080_s1 + $0x78c] ss:$16 sps:$4 sm:$0xff]   ;;  %v9931_v53 = vld [vmem:[%s14080_s1 + $0x568] ss:$16 sps:$4 sm:$0xff]  }
 0x241   : > { %4729 = vmatpush1.bf16.msra.mxu1 %v9868_v54  ;;  %v4396_v2 = vpop.f32.mrf.mxu0  ;;  %4689 = vmatprep.subr.bf16.mxu0 %v9873_v13  ;;  %v9933_v34 = vld [vmem:[%s14080_s1 + $0x56c] ss:$16 sps:$4 sm:$0xff]   ;;  %v9934_v54 = vld [vmem:[%s14080_s1 + $0x768] ss:$16 sps:$4 sm:$0xff]  }
 0x242   : > { %v4437_v27 = vpop.f32.mrf.mxu1  ;;  %4730 = vmatprep.subr.bf16.mxu1 %v9876_v18  ;;  %v9936_v52 = vld [vmem:[%s14080_s1 + $0x76c] ss:$16 sps:$4 sm:$0xff]   ;;  %v9937_v13 = vld [vmem:[%s14080_s1 + $0x548] ss:$16 sps:$4 sm:$0xff]  }
 0x243   : > { %v9939_v55 = vld [vmem:[%s14080_s1 + $0x54c] ss:$16 sps:$4 sm:$0xff]   ;;  %v9940_v18 = vld [vmem:[%s14080_s1 + $0x748] ss:$16 sps:$4 sm:$0xff]  }
 0x244   : > { %4690 = vmatpush1.bf16.msra.mxu0 %v9871_v63  ;;  %v9942_v57 = vld [vmem:[%s14080_s1 + $0x74c] ss:$16 sps:$4 sm:$0xff]   ;;  %v9943_v61 = vld [vmem:[%s14080_s1 + $0x528] ss:$16 sps:$4 sm:$0xff]  }
 0x245   : > { %4731 = vmatpush1.bf16.msra.mxu1 %v9874_v1  ;;  %4691 = vmatprep.subr.bf16.mxu0 %v9879_v17  ;;  %v9945_v58 = vld [vmem:[%s14080_s1 + $0x52c] ss:$16 sps:$4 sm:$0xff]   ;;  %v9946_v63 = vld [vmem:[%s14080_s1 + $0x728] ss:$16 sps:$4 sm:$0xff]  }
 0x246   : > { %4732 = vmatprep.subr.bf16.mxu1 %v9882_v23  ;;  %v9948_v59 = vld [vmem:[%s14080_s1 + $0x72c] ss:$16 sps:$4 sm:$0xff]   ;;  %v9949_v27 = vld [vmem:[%s14080_s1 + $0x508] ss:$16 sps:$4 sm:$0xff]  }
 0x247   : > { %v9951_v1 = vld [vmem:[%s14080_s1 + $0x50c] ss:$16 sps:$4 sm:$0xff]   ;;  %v9952_v17 = vld [vmem:[%s14080_s1 + $0x708] ss:$16 sps:$4 sm:$0xff]  }
 0x248   : > { %4692 = vmatpush1.bf16.msra.mxu0 %v9877_v4  ;;  %v9954_v2 = vld [vmem:[%s14080_s1 + $0x70c] ss:$16 sps:$4 sm:$0xff]  }
 0x249   : > { %4733 = vmatpush1.bf16.msra.mxu1 %v9880_v5  ;;  %4693 = vmatprep.subr.bf16.mxu0 %v9885_v7  ;;  %v9957_v23 = vld [vmem:[%s14080_s1 + $0x8ec] ss:$16 sps:$4 sm:$0xff]   ;;  %v9955_v5 = vld [vmem:[%s14080_s1 + $0x8e8] ss:$16 sps:$4 sm:$0xff]  }
 0x24a   : > { %4734 = vmatprep.subr.bf16.mxu1 %v9888_v37  ;;  %v9960_v4 = vld [vmem:[%s14080_s1 + $0xaec] ss:$16 sps:$4 sm:$0xff]   ;;  %v9958_v7 = vld [vmem:[%s14080_s1 + $0xae8] ss:$16 sps:$4 sm:$0xff]  }
 0x24b   : > { %v9963_v37 = vld [vmem:[%s14080_s1 + $0x8cc] ss:$16 sps:$4 sm:$0xff]  }
 0x24c   : > { %4694 = vmatpush1.bf16.msra.mxu0 %v9883_v9  ;;  %v9966_v9 = vld [vmem:[%s14080_s1 + $0xacc] ss:$16 sps:$4 sm:$0xff]  }
 0x24d   : > { %4735 = vmatpush1.bf16.msra.mxu1 %v9886_v10  ;;  %4695 = vmatprep.subr.bf16.mxu0 %v9891_v11  ;;  %v9961_v10 = vld [vmem:[%s14080_s1 + $0x8c8] ss:$16 sps:$4 sm:$0xff]  }
 0x24e   : > { %4736 = vmatprep.subr.bf16.mxu1 %v9894_v12  ;;  %v9964_v11 = vld [vmem:[%s14080_s1 + $0xac8] ss:$16 sps:$4 sm:$0xff]  }
 0x250   : > { %4696 = vmatpush1.bf16.msra.mxu0 %v9889_v14 }
 0x251   : > { %4737 = vmatpush1.bf16.msra.mxu1 %v9892_v15  ;;  %4697 = vmatprep.subr.bf16.mxu0 %v9897_v16  ;;  %v9969_v15 = vld [vmem:[%s14080_s1 + $0x8ac] ss:$16 sps:$4 sm:$0xff]  }
 0x252   : > { %4738 = vmatprep.subr.bf16.mxu1 %v9900_v19 }
 0x254   : > { %4698 = vmatpush1.bf16.msra.mxu0 %v9895_v21 }
 0x255   : > { %4739 = vmatpush1.bf16.msra.mxu1 %v9898_v22  ;;  %4699 = vmatprep.subr.bf16.mxu0 %v9903_v24  ;;  %v9972_v22 = vld [vmem:[%s14080_s1 + $0xaac] ss:$16 sps:$4 sm:$0xff]  }
 0x256   : > { %4740 = vmatprep.subr.bf16.mxu1 %v9906_v26 }
 0x258   : > { %4700 = vmatpush1.bf16.msra.mxu0 %v9901_v28 }
 0x259   : > { %4741 = vmatpush1.bf16.msra.mxu1 %v9904_v29  ;;  %4701 = vmatprep.subr.bf16.mxu0 %v9909_v30 }
 0x25a   : > { %4742 = vmatprep.subr.bf16.mxu1 %v9912_v32  ;;  %v9975_v32 = vld [vmem:[%s14080_s1 + $0x88c] ss:$16 sps:$4 sm:$0xff]  }
 0x25c   : > { %4702 = vmatpush2.bf16.msra.mxu0 %v9907_v33  ;;  %v9976_v33 = vld [vmem:[%s14080_s1 + $0xa88] ss:$16 sps:$4 sm:$0xff]  }
 0x25d   : > { %4743 = vmatpush2.bf16.msra.mxu1 %v9910_v35  ;;  %4703 = vmatprep.subr.bf16.mxu0 %v9915_v36  ;;  %v9981_v35 = vld [vmem:[%s14080_s1 + $0x86c] ss:$16 sps:$4 sm:$0xff]  }
 0x25e   : > { %4744 = vmatprep.subr.bf16.mxu1 %v9918_v31  ;;  %v9984_v36 = vld [vmem:[%s14080_s1 + $0xa6c] ss:$16 sps:$4 sm:$0xff]   ;;  %v9979_v31 = vld [vmem:[%s14080_s1 + $0x868] ss:$16 sps:$4 sm:$0xff]  }
 0x260   : > { %4704 = vmatpush2.bf16.msra.mxu0 %v9913_v60  ;;  %v9982_v60 = vld [vmem:[%s14080_s1 + $0xa68] ss:$16 sps:$4 sm:$0xff]  }
 0x261   : > { %4745 = vmatpush2.bf16.msra.mxu1 %v9916_v0  ;;  %4705 = vmatprep.subr.bf16.mxu0 %v9921_v38  ;;  %v9987_v0 = vld [vmem:[%s14080_s1 + $0x84c] ss:$16 sps:$4 sm:$0xff]  }
 0x262   : > { %4746 = vmatprep.subr.bf16.mxu1 %v9924_v39  ;;  %v9990_v38 = vld [vmem:[%s14080_s1 + $0xa4c] ss:$16 sps:$4 sm:$0xff]   ;;  %v9985_v39 = vld [vmem:[%s14080_s1 + $0x848] ss:$16 sps:$4 sm:$0xff]  }
 0x264   : > { %4706 = vmatpush2.bf16.msra.mxu0 %v9919_v42  ;;  %v9988_v42 = vld [vmem:[%s14080_s1 + $0xa48] ss:$16 sps:$4 sm:$0xff]  }
 0x265   : > { %4747 = vmatpush2.bf16.msra.mxu1 %v9922_v43  ;;  %4707 = vmatprep.subr.bf16.mxu0 %v9927_v44  ;;  %v9993_v43 = vld [vmem:[%s14080_s1 + $0x82c] ss:$16 sps:$4 sm:$0xff]  }
 0x266   : > { %4748 = vmatprep.subr.bf16.mxu1 %v9930_v46  ;;  %v9996_v44 = vld [vmem:[%s14080_s1 + $0xa2c] ss:$16 sps:$4 sm:$0xff]   ;;  %v9991_v46 = vld [vmem:[%s14080_s1 + $0x828] ss:$16 sps:$4 sm:$0xff]  }
 0x268   : > { %4708 = vmatpush2.bf16.msra.mxu0 %v9925_v47  ;;  %v9994_v47 = vld [vmem:[%s14080_s1 + $0xa28] ss:$16 sps:$4 sm:$0xff]  }
 0x269   : > { %4749 = vmatpush2.bf16.msra.mxu1 %v9928_v48  ;;  %4709 = vmatprep.subr.bf16.mxu0 %v9933_v34  ;;  %v9999_v48 = vld [vmem:[%s14080_s1 + $0x80c] ss:$16 sps:$4 sm:$0xff]  }
 0x26a   : > { %4750 = vmatprep.subr.bf16.mxu1 %v9936_v52  ;;  %v10002_v34 = vld [vmem:[%s14080_s1 + $0xa0c] ss:$16 sps:$4 sm:$0xff]   ;;  %v9997_v52 = vld [vmem:[%s14080_s1 + $0x808] ss:$16 sps:$4 sm:$0xff]  }
 0x26c   : > { %4710 = vmatpush2.bf16.msra.mxu0 %v9931_v53  ;;  %v10000_v53 = vld [vmem:[%s14080_s1 + $0xa08] ss:$16 sps:$4 sm:$0xff]  }
 0x26d   : > { %4751 = vmatpush2.bf16.msra.mxu1 %v9934_v54  ;;  %4711 = vmatprep.subr.bf16.mxu0 %v9939_v55  ;;  %v10005_v54 = vld [vmem:[%s14080_s1 + $0x9ec] ss:$16 sps:$4 sm:$0xff]  }
 0x26e   : > { %4752 = vmatprep.subr.bf16.mxu1 %v9942_v57  ;;  %v10008_v55 = vld [vmem:[%s14080_s1 + $0xbec] ss:$16 sps:$4 sm:$0xff]   ;;  %v10003_v57 = vld [vmem:[%s14080_s1 + $0x9e8] ss:$16 sps:$4 sm:$0xff]  }
 0x270   : > { %4712 = vmatpush2.bf16.msra.mxu0 %v9937_v13  ;;  %v10006_v13 = vld [vmem:[%s14080_s1 + $0xbe8] ss:$16 sps:$4 sm:$0xff]  }
 0x271   : > { %4753 = vmatpush2.bf16.msra.mxu1 %v9940_v18  ;;  %4713 = vmatprep.subr.bf16.mxu0 %v9945_v58  ;;  %v10011_v18 = vld [vmem:[%s14080_s1 + $0x9cc] ss:$16 sps:$4 sm:$0xff]  }
 0x272   : > { %4754 = vmatprep.subr.bf16.mxu1 %v9948_v59  ;;  %v10014_v58 = vld [vmem:[%s14080_s1 + $0xbcc] ss:$16 sps:$4 sm:$0xff]   ;;  %v10009_v59 = vld [vmem:[%s14080_s1 + $0x9c8] ss:$16 sps:$4 sm:$0xff]  }
 0x274   : > { %4714 = vmatpush2.bf16.msra.mxu0 %v9943_v61  ;;  %v10012_v61 = vld [vmem:[%s14080_s1 + $0xbc8] ss:$16 sps:$4 sm:$0xff]  }
 0x275   : > { %4755 = vmatpush2.bf16.msra.mxu1 %v9946_v63  ;;  %4715 = vmatprep.subr.bf16.mxu0 %v9951_v1  ;;  %v10017_v63 = vld [vmem:[%s14080_s1 + $0x9ac] ss:$16 sps:$4 sm:$0xff]  }
 0x276   : > { %4756 = vmatprep.subr.bf16.mxu1 %v9954_v2  ;;  %v10020_v1 = vld [vmem:[%s14080_s1 + $0xbac] ss:$16 sps:$4 sm:$0xff]   ;;  %v10015_v2 = vld [vmem:[%s14080_s1 + $0x9a8] ss:$16 sps:$4 sm:$0xff]  }
 0x278   : > { %4716 = vmatpush2.bf16.msra.mxu0 %v9949_v27  ;;  %v10018_v27 = vld [vmem:[%s14080_s1 + $0xba8] ss:$16 sps:$4 sm:$0xff]  }
 0x279   : > { %4757 = vmatpush2.bf16.msra.mxu1 %v9952_v17  ;;  %4767 = vmatprep.subr.bf16.mxu0 %v9957_v23  ;;  %v10023_v17 = vld [vmem:[%s14080_s1 + $0x98c] ss:$16 sps:$4 sm:$0xff]  }
 0x27a   : > { %4808 = vmatprep.subr.bf16.mxu1 %v9960_v4  ;;  %v10026_v23 = vld [vmem:[%s14080_s1 + $0xb8c] ss:$16 sps:$4 sm:$0xff]   ;;  %v10021_v4 = vld [vmem:[%s14080_s1 + $0x988] ss:$16 sps:$4 sm:$0xff]  }
 0x27b   : > { %v4473_v12 = vpop.f32.mrf.mxu0  ;;  %4718 = vmatmul.mubr.bf16.vlgmr.msra.gmra.mxu0 %v12221_v25 }
 0x27c   : > { %v4514_v14 = vpop.f32.mrf.mxu1  ;;  %4759 = vmatmul.mubr.bf16.vlgmr.msra.gmra.mxu1 %v12234_v6  ;;  %v4474_v16 = vadd.f32 %v4473_v12, %v12903_v20  ;;  %4768 = vmatpush1.bf16.msra.mxu0 %v9955_v5  ;;  %v9967_v6 = vld [vmem:[%s14080_s1 + $0x8a8] ss:$16 sps:$4 sm:$0xff]   ;;  %v10038_v12 = vld [vmem:[%s14080_s1 + $0xb4c] ss:$16 sps:$4 sm:$0xff]  }
 0x27d   : > { %4809 = vmatpush1.bf16.msra.mxu1 %v9958_v7  ;;  %v4475_v19 = vpop.f32.mrf.mxu0  ;;  %4769 = vmatprep.subr.bf16.mxu0 %v9963_v37  ;;  %v9970_v20 = vld [vmem:[%s14080_s1 + $0xaa8] ss:$16 sps:$4 sm:$0xff]   ;;  %v10029_v7 = vld [vmem:[%s14080_s1 + $0x96c] ss:$16 sps:$4 sm:$0xff]  }
 0x27e   : > { %v4516_v21 = vpop.f32.mrf.mxu1  ;;  %4810 = vmatprep.subr.bf16.mxu1 %v9966_v9  ;;  %v13108_v24 = vadd.f32 %v4514_v14, %v4474_v16  ;;  %v4476_v25 = vadd.f32 %v4475_v19, %v12908_v62  ;;  %4799 = vmatprep.mubr.bf16.mxu0 %v12274_v40  ;;  %v9978_v40 = vld [vmem:[%s14080_s1 + $0xa8c] ss:$16 sps:$4 sm:$0xff]   ;;  %v10024_v5 = vld [vmem:[%s14080_s1 + $0xb88] ss:$16 sps:$4 sm:$0xff]  }
 0x27f   : > { %4840 = vmatprep.mubr.bf16.mxu1 %v12279_v41  ;;  %v4477_v26 = vpop.f32.mrf.mxu0  ;;  %v9973_v41 = vld [vmem:[%s14080_s1 + $0x888] ss:$16 sps:$4 sm:$0xff]   ;;  %v10032_v37 = vld [vmem:[%s14080_s1 + $0xb6c] ss:$16 sps:$4 sm:$0xff]  }
 0x280   : > { %v4518_v28 = vpop.f32.mrf.mxu1  ;;  %v13119_v29 = vadd.f32 %v4516_v21, %v4476_v25  ;;  %4770 = vmatpush1.bf16.msra.mxu0 %v9961_v10  ;;  %v10027_v9 = vld [vmem:[%s14080_s1 + $0x968] ss:$16 sps:$4 sm:$0xff]   ;;  %v10041_v16 = vld [vmem:[%s14080_s1 + $0x92c] ss:$16 sps:$4 sm:$0xff]  }
 0x281   : > { %4811 = vmatpush1.bf16.msra.mxu1 %v9964_v11  ;;  %v4478_v30 = vpop.f32.mrf.mxu0  ;;  %4771 = vmatprep.subr.bf16.mxu0 %v9969_v15  ;;  %v10030_v10 = vld [vmem:[%s14080_s1 + $0xb68] ss:$16 sps:$4 sm:$0xff]   ;;  %v10035_v11 = vld [vmem:[%s14080_s1 + $0x94c] ss:$16 sps:$4 sm:$0xff]  }
 0x282   : > { %v4519_v62 = vpop.f32.mrf.mxu1  ;;  %4812 = vmatprep.subr.bf16.mxu1 %v9972_v22  ;;  %v10033_v14 = vld [vmem:[%s14080_s1 + $0x948] ss:$16 sps:$4 sm:$0xff]   ;;  %v10044_v19 = vld [vmem:[%s14080_s1 + $0xb2c] ss:$16 sps:$4 sm:$0xff]  }
 0x283   : > { %v10036_v15 = vld [vmem:[%s14080_s1 + $0xb48] ss:$16 sps:$4 sm:$0xff]   ;;  %v10047_v25 = vld [vmem:[%s14080_s1 + $0x90c] ss:$16 sps:$4 sm:$0xff]  }
 0x284   : > { %4772 = vmatpush1.bf16.msra.mxu0 %v9967_v6  ;;  %v10039_v21 = vld [vmem:[%s14080_s1 + $0x928] ss:$16 sps:$4 sm:$0xff]   ;;  %v10050_v6 = vld [vmem:[%s14080_s1 + $0xb0c] ss:$16 sps:$4 sm:$0xff]  }
 0x285   : > { %4813 = vmatpush1.bf16.msra.mxu1 %v9970_v20  ;;  %4773 = vmatprep.subr.bf16.mxu0 %v9975_v32  ;;  %v10042_v22 = vld [vmem:[%s14080_s1 + $0xb28] ss:$16 sps:$4 sm:$0xff]   ;;  %v10053_v28 = vld [vmem:[%s14080_s1 + $0xcec] ss:$16 sps:$4 sm:$0xff]  }
 0x286   : > { %4814 = vmatprep.subr.bf16.mxu1 %v9978_v40  ;;  %v10045_v20 = vld [vmem:[%s14080_s1 + $0x908] ss:$16 sps:$4 sm:$0xff]   ;;  %v10056_v30 = vld [vmem:[%s14080_s1 + $0xeec] ss:$16 sps:$4 sm:$0xff]  }
 0x287   : > { %v10048_v26 = vld [vmem:[%s14080_s1 + $0xb08] ss:$16 sps:$4 sm:$0xff]   ;;  %v10059_v40 = vld [vmem:[%s14080_s1 + $0xccc] ss:$16 sps:$4 sm:$0xff]  }
 0x288   : > { %4774 = vmatpush1.bf16.msra.mxu0 %v9973_v41  ;;  %v10051_v62 = vld [vmem:[%s14080_s1 + $0xce8] ss:$16 sps:$4 sm:$0xff]   ;;  %v10062_v41 = vld [vmem:[%s14080_s1 + $0xecc] ss:$16 sps:$4 sm:$0xff]  }
 0x289   : > { %4815 = vmatpush1.bf16.msra.mxu1 %v9976_v33  ;;  %4775 = vmatprep.subr.bf16.mxu0 %v9981_v35  ;;  %v10054_v32 = vld [vmem:[%s14080_s1 + $0xee8] ss:$16 sps:$4 sm:$0xff]  }
 0x28a   : > { %4816 = vmatprep.subr.bf16.mxu1 %v9984_v36  ;;  %v10057_v33 = vld [vmem:[%s14080_s1 + $0xcc8] ss:$16 sps:$4 sm:$0xff]  }
 0x28b   : > { %v10060_v35 = vld [vmem:[%s14080_s1 + $0xec8] ss:$16 sps:$4 sm:$0xff]  }
 0x28c   : > { %4776 = vmatpush1.bf16.msra.mxu0 %v9979_v31 }
 0x28d   : > { %4817 = vmatpush1.bf16.msra.mxu1 %v9982_v60  ;;  %4777 = vmatprep.subr.bf16.mxu0 %v9987_v0  ;;  %v10065_v60 = vld [vmem:[%s14080_s1 + $0xcac] ss:$16 sps:$4 sm:$0xff]  }
 0x28e   : > { %4818 = vmatprep.subr.bf16.mxu1 %v9990_v38 }
 0x290   : > { %4778 = vmatpush1.bf16.msra.mxu0 %v9985_v39 }
 0x291   : > { %4819 = vmatpush1.bf16.msra.mxu1 %v9988_v42  ;;  %4779 = vmatprep.subr.bf16.mxu0 %v9993_v43 }
 0x292   : > { %4820 = vmatprep.subr.bf16.mxu1 %v9996_v44 }
 0x294   : > { %4780 = vmatpush1.bf16.msra.mxu0 %v9991_v46 }
 0x295   : > { %4821 = vmatpush1.bf16.msra.mxu1 %v9994_v47  ;;  %4781 = vmatprep.subr.bf16.mxu0 %v9999_v48  ;;  %v10071_v48 = vld [vmem:[%s14080_s1 + $0xc8c] ss:$16 sps:$4 sm:$0xff]  }
 0x296   : > { %4822 = vmatprep.subr.bf16.mxu1 %v10002_v34  ;;  %v10074_v34 = vld [vmem:[%s14080_s1 + $0xe8c] ss:$16 sps:$4 sm:$0xff]  }
 0x298   : > { %4782 = vmatpush1.bf16.msra.mxu0 %v9997_v52  ;;  %v10077_v52 = vld [vmem:[%s14080_s1 + $0xc6c] ss:$16 sps:$4 sm:$0xff]  }
 0x299   : > { %4823 = vmatpush1.bf16.msra.mxu1 %v10000_v53  ;;  %4783 = vmatprep.subr.bf16.mxu0 %v10005_v54  ;;  %v10080_v53 = vld [vmem:[%s14080_s1 + $0xe6c] ss:$16 sps:$4 sm:$0xff]   ;;  %v10075_v54 = vld [vmem:[%s14080_s1 + $0xc68] ss:$16 sps:$4 sm:$0xff]  }
 0x29a   : > { %4824 = vmatprep.subr.bf16.mxu1 %v10008_v55  ;;  %v10078_v55 = vld [vmem:[%s14080_s1 + $0xe68] ss:$16 sps:$4 sm:$0xff]  }
 0x29c   : > { %4784 = vmatpush2.bf16.msra.mxu0 %v10003_v57  ;;  %v10083_v57 = vld [vmem:[%s14080_s1 + $0xc4c] ss:$16 sps:$4 sm:$0xff]  }
 0x29d   : > { %4825 = vmatpush2.bf16.msra.mxu1 %v10006_v13  ;;  %4785 = vmatprep.subr.bf16.mxu0 %v10011_v18  ;;  %v10086_v13 = vld [vmem:[%s14080_s1 + $0xe4c] ss:$16 sps:$4 sm:$0xff]   ;;  %v10081_v18 = vld [vmem:[%s14080_s1 + $0xc48] ss:$16 sps:$4 sm:$0xff]  }
 0x29e   : > { %4826 = vmatprep.subr.bf16.mxu1 %v10014_v58  ;;  %v10084_v58 = vld [vmem:[%s14080_s1 + $0xe48] ss:$16 sps:$4 sm:$0xff]  }
 0x2a0   : > { %4786 = vmatpush2.bf16.msra.mxu0 %v10009_v59  ;;  %v10089_v59 = vld [vmem:[%s14080_s1 + $0xc2c] ss:$16 sps:$4 sm:$0xff]  }
 0x2a1   : > { %4827 = vmatpush2.bf16.msra.mxu1 %v10012_v61  ;;  %4787 = vmatprep.subr.bf16.mxu0 %v10017_v63  ;;  %v10092_v61 = vld [vmem:[%s14080_s1 + $0xe2c] ss:$16 sps:$4 sm:$0xff]   ;;  %v10087_v63 = vld [vmem:[%s14080_s1 + $0xc28] ss:$16 sps:$4 sm:$0xff]  }
 0x2a2   : > { %4828 = vmatprep.subr.bf16.mxu1 %v10020_v1  ;;  %v10090_v1 = vld [vmem:[%s14080_s1 + $0xe28] ss:$16 sps:$4 sm:$0xff]  }
 0x2a4   : > { %4788 = vmatpush2.bf16.msra.mxu0 %v10015_v2  ;;  %v10095_v2 = vld [vmem:[%s14080_s1 + $0xc0c] ss:$16 sps:$4 sm:$0xff]  }
 0x2a5   : > { %4829 = vmatpush2.bf16.msra.mxu1 %v10018_v27  ;;  %4789 = vmatprep.subr.bf16.mxu0 %v10023_v17  ;;  %v10098_v27 = vld [vmem:[%s14080_s1 + $0xe0c] ss:$16 sps:$4 sm:$0xff]   ;;  %v10093_v17 = vld [vmem:[%s14080_s1 + $0xc08] ss:$16 sps:$4 sm:$0xff]  }
 0x2a6   : > { %4830 = vmatprep.subr.bf16.mxu1 %v10026_v23  ;;  %v10096_v23 = vld [vmem:[%s14080_s1 + $0xe08] ss:$16 sps:$4 sm:$0xff]  }
 0x2a8   : > { %4790 = vmatpush2.bf16.msra.mxu0 %v10021_v4  ;;  %v10101_v4 = vld [vmem:[%s14080_s1 + $0xdec] ss:$16 sps:$4 sm:$0xff]  }
 0x2a9   : > { %4831 = vmatpush2.bf16.msra.mxu1 %v10024_v5  ;;  %4791 = vmatprep.subr.bf16.mxu0 %v10029_v7  ;;  %v10104_v5 = vld [vmem:[%s14080_s1 + $0xfec] ss:$16 sps:$4 sm:$0xff]   ;;  %v10099_v7 = vld [vmem:[%s14080_s1 + $0xde8] ss:$16 sps:$4 sm:$0xff]  }
 0x2aa   : > { %4832 = vmatprep.subr.bf16.mxu1 %v10032_v37  ;;  %v10102_v37 = vld [vmem:[%s14080_s1 + $0xfe8] ss:$16 sps:$4 sm:$0xff]  }
 0x2ac   : > { %4792 = vmatpush2.bf16.msra.mxu0 %v10027_v9  ;;  %v10107_v9 = vld [vmem:[%s14080_s1 + $0xdcc] ss:$16 sps:$4 sm:$0xff]  }
 0x2ad   : > { %4833 = vmatpush2.bf16.msra.mxu1 %v10030_v10  ;;  %4793 = vmatprep.subr.bf16.mxu0 %v10035_v11  ;;  %v10110_v10 = vld [vmem:[%s14080_s1 + $0xfcc] ss:$16 sps:$4 sm:$0xff]   ;;  %v10105_v11 = vld [vmem:[%s14080_s1 + $0xdc8] ss:$16 sps:$4 sm:$0xff]  }
 0x2ae   : > { %4834 = vmatprep.subr.bf16.mxu1 %v10038_v12  ;;  %v10108_v12 = vld [vmem:[%s14080_s1 + $0xfc8] ss:$16 sps:$4 sm:$0xff]  }
 0x2b0   : > { %4794 = vmatpush2.bf16.msra.mxu0 %v10033_v14  ;;  %v10113_v14 = vld [vmem:[%s14080_s1 + $0xdac] ss:$16 sps:$4 sm:$0xff]  }
 0x2b1   : > { %4835 = vmatpush2.bf16.msra.mxu1 %v10036_v15  ;;  %4795 = vmatprep.subr.bf16.mxu0 %v10041_v16  ;;  %v10116_v15 = vld [vmem:[%s14080_s1 + $0xfac] ss:$16 sps:$4 sm:$0xff]   ;;  %v10111_v16 = vld [vmem:[%s14080_s1 + $0xda8] ss:$16 sps:$4 sm:$0xff]  }
 0x2b2   : > { %4836 = vmatprep.subr.bf16.mxu1 %v10044_v19  ;;  %v10114_v19 = vld [vmem:[%s14080_s1 + $0xfa8] ss:$16 sps:$4 sm:$0xff]  }
 0x2b4   : > { %4796 = vmatpush2.bf16.msra.mxu0 %v10039_v21  ;;  %v10119_v21 = vld [vmem:[%s14080_s1 + $0xd8c] ss:$16 sps:$4 sm:$0xff]  }
 0x2b5   : > { %4837 = vmatpush2.bf16.msra.mxu1 %v10042_v22  ;;  %4797 = vmatprep.subr.bf16.mxu0 %v10047_v25  ;;  %v10122_v22 = vld [vmem:[%s14080_s1 + $0xf8c] ss:$16 sps:$4 sm:$0xff]   ;;  %v10117_v25 = vld [vmem:[%s14080_s1 + $0xd88] ss:$16 sps:$4 sm:$0xff]  }
 0x2b6   : > { %4838 = vmatprep.subr.bf16.mxu1 %v10050_v6  ;;  %v10120_v6 = vld [vmem:[%s14080_s1 + $0xf88] ss:$16 sps:$4 sm:$0xff]  }
 0x2b8   : > { %4798 = vmatpush2.bf16.msra.mxu0 %v10045_v20  ;;  %v10125_v20 = vld [vmem:[%s14080_s1 + $0xd6c] ss:$16 sps:$4 sm:$0xff]  }
 0x2b9   : > { %4839 = vmatpush2.bf16.msra.mxu1 %v10048_v26  ;;  %4849 = vmatprep.subr.bf16.mxu0 %v10053_v28  ;;  %v10128_v26 = vld [vmem:[%s14080_s1 + $0xf6c] ss:$16 sps:$4 sm:$0xff]   ;;  %v10123_v28 = vld [vmem:[%s14080_s1 + $0xd68] ss:$16 sps:$4 sm:$0xff]  }
 0x2ba   : > { %4890 = vmatprep.subr.bf16.mxu1 %v10056_v30  ;;  %v10126_v30 = vld [vmem:[%s14080_s1 + $0xf68] ss:$16 sps:$4 sm:$0xff]  }
 0x2bb   : > { %v4555_v36 = vpop.f32.mrf.mxu0  ;;  %4800 = vmatmul.mubr.bf16.vlgmr.msra.gmra.mxu0 %v12447_v45  ;;  %v10068_v45 = vld [vmem:[%s14080_s1 + $0xeac] ss:$16 sps:$4 sm:$0xff]  }
 0x2bc   : > { %v4596_v31 = vpop.f32.mrf.mxu1  ;;  %4841 = vmatmul.mubr.bf16.vlgmr.msra.gmra.mxu1 %v12466_v51  ;;  %v4556_v0 = vadd.f32 %v4555_v36, %v13108_v24  ;;  %4850 = vmatpush1.bf16.msra.mxu0 %v10051_v62  ;;  %v10063_v51 = vld [vmem:[%s14080_s1 + $0xca8] ss:$16 sps:$4 sm:$0xff]   ;;  %v10131_v62 = vld [vmem:[%s14080_s1 + $0xd4c] ss:$16 sps:$4 sm:$0xff]  }
 0x2bd   : > { %4891 = vmatpush1.bf16.msra.mxu1 %v10054_v32  ;;  %v13307_v38 = vpop.f32.mrf.mxu0  ;;  %4851 = vmatprep.subr.bf16.mxu0 %v10059_v40  ;;  %v10066_v24 = vld [vmem:[%s14080_s1 + $0xea8] ss:$16 sps:$4 sm:$0xff]   ;;  %v10134_v32 = vld [vmem:[%s14080_s1 + $0xf4c] ss:$16 sps:$4 sm:$0xff]  }
 0x2be   : > { %v13309_v39 = vpop.f32.mrf.mxu1  ;;  %4892 = vmatprep.subr.bf16.mxu1 %v10062_v41  ;;  %v13314_v42 = vadd.f32 %v4596_v31, %v4556_v0  ;;  %4881 = vmatprep.mubr.bf16.mxu0 %v12462_v50  ;;  %v10069_v50 = vld [vmem:[%s14080_s1 + $0xc88] ss:$16 sps:$4 sm:$0xff]   ;;  %v10146_v0 = vld [vmem:[%s14080_s1 + $0xf0c] ss:$16 sps:$4 sm:$0xff]  }
 0x2bf   : > { %4922 = vmatprep.mubr.bf16.mxu1 %v12482_v56  ;;  %v4559_v43 = vpop.f32.mrf.mxu0  ;;  %v10072_v56 = vld [vmem:[%s14080_s1 + $0xe88] ss:$16 sps:$4 sm:$0xff]  }
 0x2c0   : > { %v4600_v44 = vpop.f32.mrf.mxu1  ;;  %4852 = vmatpush1.bf16.msra.mxu0 %v10057_v33  ;;  %v10129_v40 = vld [vmem:[%s14080_s1 + $0xd48] ss:$16 sps:$4 sm:$0xff]   ;;  %v10137_v33 = vld [vmem:[%s14080_s1 + $0xd2c] ss:$16 sps:$4 sm:$0xff]  }
 0x2c1   : > { %4893 = vmatpush1.bf16.msra.mxu1 %v10060_v35  ;;  %v4560_v46 = vpop.f32.mrf.mxu0  ;;  %4853 = vmatprep.subr.bf16.mxu0 %v10065_v60  ;;  %v10132_v41 = vld [vmem:[%s14080_s1 + $0xf48] ss:$16 sps:$4 sm:$0xff]   ;;  %v10140_v35 = vld [vmem:[%s14080_s1 + $0xf2c] ss:$16 sps:$4 sm:$0xff]  }
 0x2c2   : > { %v4601_v47 = vpop.f32.mrf.mxu1  ;;  %4894 = vmatprep.subr.bf16.mxu1 %v10068_v45  ;;  %v10135_v36 = vld [vmem:[%s14080_s1 + $0xd28] ss:$16 sps:$4 sm:$0xff]   ;;  %v10143_v60 = vld [vmem:[%s14080_s1 + $0xd0c] ss:$16 sps:$4 sm:$0xff]   ;;  %v4558_v45 = vadd.f32 %v13307_v38, %v13119_v29 }
 0x2c3   : > { %v10138_v31 = vld [vmem:[%s14080_s1 + $0xf28] ss:$16 sps:$4 sm:$0xff]   ;;  %v10149_v43 = vld [vmem:[%s13091_s12 + $0x314] ss:$56 sps:$4 sm:$0xff]   ;;  %v10152_v29 = vld [vmem:[%s13091_s12 + $0x2a4] ss:$56 sps:$4 sm:$0xff]  }
 0x2c4   : > { %4854 = vmatpush1.bf16.msra.mxu0 %v10063_v51  ;;  %v10141_v51 = vld [vmem:[%s14080_s1 + $0xd08] ss:$16 sps:$4 sm:$0xff]   ;;  %v4599_v44 = vadd.f32 %v13309_v39, %v4558_v45 }
 0x2c5   : > { %4895 = vmatpush1.bf16.msra.mxu1 %v10066_v24  ;;  %4855 = vmatprep.subr.bf16.mxu0 %v10071_v48  ;;  %v10144_v24 = vld [vmem:[%s14080_s1 + $0xf08] ss:$16 sps:$4 sm:$0xff]  }
 0x2c6   : > { %4896 = vmatprep.subr.bf16.mxu1 %v10074_v34  ;;  %v10147_v46 = vld [vmem:[%s13091_s12 + $0x310] ss:$56 sps:$4 sm:$0xff]   ;;  %v13486_v38 = vpack.c.bf16 %v4599_v44, %v4599_v44  ;;  %v10150_v47 = vld [vmem:[%s13091_s12 + $0x2a0] ss:$56 sps:$4 sm:$0xff]  }
 0x2c7   : > { %v10312_v45 = vld [vmem:[%s13091_s12 + $0xcb0] ss:$56 sps:$4 sm:$0xff]   ;;  %v10318_v44 = vld [vmem:[%s13091_s12 + $0xc40] ss:$56 sps:$4 sm:$0xff]  }
 0x2c8   : > { %4856 = vmatpush1.bf16.msra.mxu0 %v10069_v50 }
 0x2c9   : > { %4897 = vmatpush1.bf16.msra.mxu1 %v10072_v56  ;;  %4857 = vmatprep.subr.bf16.mxu0 %v10077_v52  ;;  %v10155_v52 = vld [vmem:[%s13091_s12 + $0x234] ss:$56 sps:$4 sm:$0xff]  }
 0x2ca   : > { %4898 = vmatprep.subr.bf16.mxu1 %v10080_v53 }
 0x2cc   : > { %4858 = vmatpush1.bf16.msra.mxu0 %v10075_v54  ;;  %v10153_v54 = vld [vmem:[%s13091_s12 + $0x230] ss:$56 sps:$4 sm:$0xff]  }
 0x2cd   : > { %4899 = vmatpush1.bf16.msra.mxu1 %v10078_v55  ;;  %4859 = vmatprep.subr.bf16.mxu0 %v10083_v57 }
 0x2ce   : > { %4900 = vmatprep.subr.bf16.mxu1 %v10086_v13  ;;  %v10158_v13 = vld [vmem:[%s13091_s12 + $0x1c4] ss:$56 sps:$4 sm:$0xff]  }
 0x2d0   : > { %4860 = vmatpush1.bf16.msra.mxu0 %v10081_v18  ;;  %v10252_v18 = vld [vmem:[%s13091_s12 + $0xa10] ss:$56 sps:$4 sm:$0xff]  }
 0x2d1   : > { %4901 = vmatpush1.bf16.msra.mxu1 %v10084_v58  ;;  %4861 = vmatprep.subr.bf16.mxu0 %v10089_v59  ;;  %v10254_v58 = vld [vmem:[%s13091_s12 + $0xa14] ss:$56 sps:$4 sm:$0xff]   ;;  %v10156_v59 = vld [vmem:[%s13091_s12 + $0x1c0] ss:$56 sps:$4 sm:$0xff]  }
 0x2d2   : > { %4902 = vmatprep.subr.bf16.mxu1 %v10092_v61  ;;  %v10161_v61 = vld [vmem:[%s13091_s12 + $0x154] ss:$56 sps:$4 sm:$0xff]  }
 0x2d4   : > { %4862 = vmatpush1.bf16.msra.mxu0 %v10087_v63  ;;  %v10258_v63 = vld [vmem:[%s13091_s12 + $0x9a0] ss:$56 sps:$4 sm:$0xff]  }
 0x2d5   : > { %4903 = vmatpush1.bf16.msra.mxu1 %v10090_v1  ;;  %4863 = vmatprep.subr.bf16.mxu0 %v10095_v2  ;;  %v10260_v1 = vld [vmem:[%s13091_s12 + $0x9a4] ss:$56 sps:$4 sm:$0xff]   ;;  %v10159_v2 = vld [vmem:[%s13091_s12 + $0x150] ss:$56 sps:$4 sm:$0xff]  }
 0x2d6   : > { %4904 = vmatprep.subr.bf16.mxu1 %v10098_v27  ;;  %v10164_v27 = vld [vmem:[%s13091_s12 + $0xe4] ss:$56 sps:$4 sm:$0xff]  }
 0x2d8   : > { %4864 = vmatpush1.bf16.msra.mxu0 %v10093_v17  ;;  %v10264_v17 = vld [vmem:[%s13091_s12 + $0x930] ss:$56 sps:$4 sm:$0xff]  }
 0x2d9   : > { %4905 = vmatpush1.bf16.msra.mxu1 %v10096_v23  ;;  %4865 = vmatprep.subr.bf16.mxu0 %v10101_v4  ;;  %v10266_v23 = vld [vmem:[%s13091_s12 + $0x934] ss:$56 sps:$4 sm:$0xff]   ;;  %v10162_v4 = vld [vmem:[%s13091_s12 + $0xe0] ss:$56 sps:$4 sm:$0xff]  }
 0x2da   : > { %4906 = vmatprep.subr.bf16.mxu1 %v10104_v5  ;;  %v10167_v5 = vld [vmem:[%s13091_s12 + $0x74] ss:$56 sps:$4 sm:$0xff]  }
 0x2dc   : > { %4866 = vmatpush2.bf16.msra.mxu0 %v10099_v7  ;;  %v10270_v7 = vld [vmem:[%s13091_s12 + $0x8c0] ss:$56 sps:$4 sm:$0xff]  }
 0x2dd   : > { %4907 = vmatpush2.bf16.msra.mxu1 %v10102_v37  ;;  %4867 = vmatprep.subr.bf16.mxu0 %v10107_v9  ;;  %v10272_v37 = vld [vmem:[%s13091_s12 + $0x8c4] ss:$56 sps:$4 sm:$0xff]   ;;  %v10165_v9 = vld [vmem:[%s13091_s12 + $0x70] ss:$56 sps:$4 sm:$0xff]  }
 0x2de   : > { %4908 = vmatprep.subr.bf16.mxu1 %v10110_v10  ;;  %v10170_v10 = vld [vmem:[%s13091_s12 + $0x4] ss:$56 sps:$4 sm:$0xff]  }
 0x2e0   : > { %4868 = vmatpush2.bf16.msra.mxu0 %v10105_v11  ;;  %v10276_v11 = vld [vmem:[%s13091_s12 + $0x850] ss:$56 sps:$4 sm:$0xff]  }
 0x2e1   : > { %4909 = vmatpush2.bf16.msra.mxu1 %v10108_v12  ;;  %4869 = vmatprep.subr.bf16.mxu0 %v10113_v14  ;;  %v10278_v12 = vld [vmem:[%s13091_s12 + $0x854] ss:$56 sps:$4 sm:$0xff]   ;;  %v10168_v14 = vld [vmem:[%s13091_s12] ss:$56 sps:$4 sm:$0xff]  }
 0x2e2   : > { %4910 = vmatprep.subr.bf16.mxu1 %v10116_v15  ;;  %v10173_v15 = vld [vmem:[%s13091_s12 + $0x694] ss:$56 sps:$4 sm:$0xff]  }
 0x2e4   : > { %4870 = vmatpush2.bf16.msra.mxu0 %v10111_v16  ;;  %v10282_v16 = vld [vmem:[%s13091_s12 + $0x7e0] ss:$56 sps:$4 sm:$0xff]  }
 0x2e5   : > { %4911 = vmatpush2.bf16.msra.mxu1 %v10114_v19  ;;  %4871 = vmatprep.subr.bf16.mxu0 %v10119_v21  ;;  %v10284_v19 = vld [vmem:[%s13091_s12 + $0x7e4] ss:$56 sps:$4 sm:$0xff]   ;;  %v10171_v21 = vld [vmem:[%s13091_s12 + $0x690] ss:$56 sps:$4 sm:$0xff]  }
 0x2e6   : > { %4912 = vmatprep.subr.bf16.mxu1 %v10122_v22  ;;  %v10176_v22 = vld [vmem:[%s13091_s12 + $0x624] ss:$56 sps:$4 sm:$0xff]  }
 0x2e8   : > { %4872 = vmatpush2.bf16.msra.mxu0 %v10117_v25  ;;  %v10288_v25 = vld [vmem:[%s13091_s12 + $0x770] ss:$56 sps:$4 sm:$0xff]  }
 0x2e9   : > { %4913 = vmatpush2.bf16.msra.mxu1 %v10120_v6  ;;  %4873 = vmatprep.subr.bf16.mxu0 %v10125_v20  ;;  %v10290_v6 = vld [vmem:[%s13091_s12 + $0x774] ss:$56 sps:$4 sm:$0xff]   ;;  %v10174_v20 = vld [vmem:[%s13091_s12 + $0x620] ss:$56 sps:$4 sm:$0xff]  }
 0x2ea   : > { %4914 = vmatprep.subr.bf16.mxu1 %v10128_v26  ;;  %v10179_v26 = vld [vmem:[%s13091_s12 + $0x5b4] ss:$56 sps:$4 sm:$0xff]  }
 0x2ec   : > { %4874 = vmatpush2.bf16.msra.mxu0 %v10123_v28  ;;  %v10294_v28 = vld [vmem:[%s13091_s12 + $0x700] ss:$56 sps:$4 sm:$0xff]  }
 0x2ed   : > { %4915 = vmatpush2.bf16.msra.mxu1 %v10126_v30  ;;  %4875 = vmatprep.subr.bf16.mxu0 %v10131_v62  ;;  %v10296_v30 = vld [vmem:[%s13091_s12 + $0x704] ss:$56 sps:$4 sm:$0xff]   ;;  %v10177_v62 = vld [vmem:[%s13091_s12 + $0x5b0] ss:$56 sps:$4 sm:$0xff]  }
 0x2ee   : > { %4916 = vmatprep.subr.bf16.mxu1 %v10134_v32  ;;  %v10182_v32 = vld [vmem:[%s13091_s12 + $0x544] ss:$56 sps:$4 sm:$0xff]  }
 0x2f0   : > { %4876 = vmatpush2.bf16.msra.mxu0 %v10129_v40  ;;  %v10300_v40 = vld [vmem:[%s13091_s12 + $0xd90] ss:$56 sps:$4 sm:$0xff]  }
 0x2f1   : > { %4917 = vmatpush2.bf16.msra.mxu1 %v10132_v41  ;;  %4877 = vmatprep.subr.bf16.mxu0 %v10137_v33  ;;  %v10302_v41 = vld [vmem:[%s13091_s12 + $0xd94] ss:$56 sps:$4 sm:$0xff]   ;;  %v10180_v33 = vld [vmem:[%s13091_s12 + $0x540] ss:$56 sps:$4 sm:$0xff]  }
 0x2f2   : > { %4918 = vmatprep.subr.bf16.mxu1 %v10140_v35  ;;  %v10185_v35 = vld [vmem:[%s13091_s12 + $0x4d4] ss:$56 sps:$4 sm:$0xff]  }
 0x2f4   : > { %4878 = vmatpush2.bf16.msra.mxu0 %v10135_v36  ;;  %v10306_v36 = vld [vmem:[%s13091_s12 + $0xd20] ss:$56 sps:$4 sm:$0xff]  }
 0x2f5   : > { %4919 = vmatpush2.bf16.msra.mxu1 %v10138_v31  ;;  %4879 = vmatprep.subr.bf16.mxu0 %v10143_v60  ;;  %v10308_v31 = vld [vmem:[%s13091_s12 + $0xd24] ss:$56 sps:$4 sm:$0xff]   ;;  %v10183_v60 = vld [vmem:[%s13091_s12 + $0x4d0] ss:$56 sps:$4 sm:$0xff]  }
 0x2f6   : > { %4920 = vmatprep.subr.bf16.mxu1 %v10146_v0  ;;  %v10188_v0 = vld [vmem:[%s13091_s12 + $0x464] ss:$56 sps:$4 sm:$0xff]  }
 0x2f8   : > { %4880 = vmatpush2.bf16.msra.mxu0 %v10141_v51  ;;  %v10314_v51 = vld [vmem:[%s13091_s12 + $0xcb4] ss:$56 sps:$4 sm:$0xff]  }
 0x2f9   : > { %4921 = vmatpush2.bf16.msra.mxu1 %v10144_v24  ;;  %7623 = vmatprep.subr.bf16.mxu0 %v10149_v43  ;;  %v10186_v24 = vld [vmem:[%s13091_s12 + $0x460] ss:$56 sps:$4 sm:$0xff]   ;;  %v10191_v43 = vld [vmem:[%s13091_s12 + $0x3f4] ss:$56 sps:$4 sm:$0xff]  }
 0x2fa   : > { %7664 = vmatprep.subr.bf16.mxu1 %v10254_v58  ;;  %v10336_v58 = vld [vmem:[%s13091_s12 + $0xaf0] ss:$56 sps:$4 sm:$0xff]  }
 0x2fb   : > { %v4637_v48 = vpop.f32.mrf.mxu0  ;;  %4882 = vmatmul.mubr.bf16.vlgmr.msra.gmra.mxu0 %v12658_v3 }
 0x2fc   : > { %v4678_v34 = vpop.f32.mrf.mxu1  ;;  %4923 = vmatmul.mubr.bf16.vlgmr.msra.gmra.mxu1 %v12674_v8  ;;  %7624 = vmatpush1.bf16.msra.mxu0 %v10147_v46  ;;  %v10320_v46 = vld [vmem:[%s13091_s12 + $0xc44] ss:$56 sps:$4 sm:$0xff]  }
 0x2fd   : > { %v13491_v50 = vadd.f32 %v4678_v34, %v4637_v48  ;;  %7655 = vmatprep.mubr.bf16.mxu0 %v13486_v38  ;;  %v4639_v39 = vpop.f32.mrf.mxu0  ;;  %7625 = vmatprep.subr.bf16.mxu0 %v10152_v29  ;;  %v10189_v29 = vld [vmem:[%s13091_s12 + $0x3f0] ss:$56 sps:$4 sm:$0xff]   ;;  %v10326_v34 = vld [vmem:[%s13091_s12 + $0xbd4] ss:$56 sps:$4 sm:$0xff]  }
 0x2fe   : > { %v4680_v56 = vpop.f32.mrf.mxu1  ;;  %7665 = vmatpush1.bf16.msra.mxu1 %v10252_v18  ;;  %v10324_v48 = vld [vmem:[%s13091_s12 + $0xbd0] ss:$56 sps:$4 sm:$0xff]  }
 0x2ff   : > { %v13495_v53 = vadd.f32 %v4680_v56, %v4639_v39  ;;  %v4641_v3 = vpop.f32.mrf.mxu0  ;;  %7666 = vmatprep.subr.bf16.mxu1 %v10260_v1  ;;  %v10192_v39 = vld [vmem:[%s13091_s12 + $0x380] ss:$56 sps:$4 sm:$0xff]   ;;  %v10197_v56 = vld [vmem:[%s13091_s12 + $0x31c] ss:$56 sps:$4 sm:$0xff]  }
 0x300   : > { %v4682_v8 = vpop.f32.mrf.mxu1  ;;  %7626 = vmatpush1.bf16.msra.mxu0 %v10150_v47  ;;  %v10194_v47 = vld [vmem:[%s13091_s12 + $0x384] ss:$56 sps:$4 sm:$0xff]   ;;  %v10195_v3 = vld [vmem:[%s13091_s12 + $0x318] ss:$56 sps:$4 sm:$0xff]  }
 0x301   : > { %v4642_v55 = vpop.f32.mrf.mxu0  ;;  %7627 = vmatprep.subr.bf16.mxu0 %v10155_v52  ;;  %v10330_v52 = vld [vmem:[%s13091_s12 + $0xb60] ss:$56 sps:$4 sm:$0xff]   ;;  %v13556_v8 = vpack.c.bf16 %v13314_v42, %v13314_v42  ;;  %v10203_v1 = vld [vmem:[%s13091_s12 + $0x23c] ss:$56 sps:$4 sm:$0xff]  }
 0x302   : > { %v4683_v57 = vpop.f32.mrf.mxu1  ;;  %7667 = vmatpush1.bf16.msra.mxu1 %v10258_v63  ;;  %v10200_v55 = vld [vmem:[%s13091_s12 + $0x2ac] ss:$56 sps:$4 sm:$0xff]   ;;  %v10198_v42 = vld [vmem:[%s13091_s12 + $0x2a8] ss:$56 sps:$4 sm:$0xff]  }
 0x303   : > { %7668 = vmatprep.subr.bf16.mxu1 %v10266_v23  ;;  %v10338_v57 = vld [vmem:[%s13091_s12 + $0xaf4] ss:$56 sps:$4 sm:$0xff]  }
 0x304   : > { %7628 = vmatpush1.bf16.msra.mxu0 %v10153_v54  ;;  %v10332_v54 = vld [vmem:[%s13091_s12 + $0xb64] ss:$56 sps:$4 sm:$0xff]  }
 0x305   : > { %7629 = vmatprep.subr.bf16.mxu0 %v10158_v13 }
 0x306   : > { %7669 = vmatpush1.bf16.msra.mxu1 %v10264_v17  ;;  %v10344_v17 = vld [vmem:[%s13091_s12 + $0xa84] ss:$56 sps:$4 sm:$0xff]  }
 0x307   : > { %7670 = vmatprep.subr.bf16.mxu1 %v10272_v37 }
 0x308   : > { %7630 = vmatpush1.bf16.msra.mxu0 %v10156_v59 }
 0x309   : > { %7631 = vmatprep.subr.bf16.mxu0 %v10161_v61 }
 0x30a   : > { %7671 = vmatpush1.bf16.msra.mxu1 %v10270_v7  ;;  %v10201_v7 = vld [vmem:[%s13091_s12 + $0x238] ss:$56 sps:$4 sm:$0xff]  }
 0x30b   : > { %7672 = vmatprep.subr.bf16.mxu1 %v10278_v12  ;;  %v10209_v12 = vld [vmem:[%s13091_s12 + $0x15c] ss:$56 sps:$4 sm:$0xff]  }
 0x30c   : > { %7632 = vmatpush1.bf16.msra.mxu0 %v10159_v2 }
 0x30d   : > { %7633 = vmatprep.subr.bf16.mxu0 %v10164_v27 }
 0x30e   : > { %7673 = vmatpush1.bf16.msra.mxu1 %v10276_v11  ;;  %v10204_v11 = vld [vmem:[%s13091_s12 + $0x1c8] ss:$56 sps:$4 sm:$0xff]  }
 0x30f   : > { %7674 = vmatprep.subr.bf16.mxu1 %v10284_v19  ;;  %v10215_v19 = vld [vmem:[%s13091_s12 + $0x7c] ss:$56 sps:$4 sm:$0xff]  }
 0x310   : > { %7634 = vmatpush1.bf16.msra.mxu0 %v10162_v4  ;;  %v10342_v4 = vld [vmem:[%s13091_s12 + $0xa80] ss:$56 sps:$4 sm:$0xff]  }
 0x311   : > { %7635 = vmatprep.subr.bf16.mxu0 %v10167_v5 }
 0x312   : > { %7675 = vmatpush1.bf16.msra.mxu1 %v10282_v16  ;;  %v10210_v16 = vld [vmem:[%s13091_s12 + $0xe8] ss:$56 sps:$4 sm:$0xff]  }
 0x313   : > { %7676 = vmatprep.subr.bf16.mxu1 %v10290_v6  ;;  %v10221_v6 = vld [vmem:[%s13091_s12 + $0x69c] ss:$56 sps:$4 sm:$0xff]  }
 0x314   : > { %7636 = vmatpush1.bf16.msra.mxu0 %v10165_v9 }
 0x315   : > { %7637 = vmatprep.subr.bf16.mxu0 %v10170_v10  ;;  %v10350_v10 = vld [vmem:[%s13091_s12 + $0xa1c] ss:$56 sps:$4 sm:$0xff]  }
 0x316   : > { %7677 = vmatpush1.bf16.msra.mxu1 %v10288_v25  ;;  %v10216_v25 = vld [vmem:[%s13091_s12 + $0x8] ss:$56 sps:$4 sm:$0xff]  }
 0x317   : > { %7678 = vmatprep.subr.bf16.mxu1 %v10296_v30  ;;  %v10227_v30 = vld [vmem:[%s13091_s12 + $0x5bc] ss:$56 sps:$4 sm:$0xff]  }
 0x318   : > { %7638 = vmatpush1.bf16.msra.mxu0 %v10168_v14  ;;  %v10207_v14 = vld [vmem:[%s13091_s12 + $0x158] ss:$56 sps:$4 sm:$0xff]  }
 0x319   : > { %7639 = vmatprep.subr.bf16.mxu0 %v10173_v15  ;;  %v10212_v15 = vld [vmem:[%s13091_s12 + $0xec] ss:$56 sps:$4 sm:$0xff]  }
 0x31a   : > { %7679 = vmatpush1.bf16.msra.mxu1 %v10294_v28  ;;  %v10222_v28 = vld [vmem:[%s13091_s12 + $0x628] ss:$56 sps:$4 sm:$0xff]  }
 0x31b   : > { %7680 = vmatprep.subr.bf16.mxu1 %v10302_v41  ;;  %v10233_v41 = vld [vmem:[%s13091_s12 + $0x4dc] ss:$56 sps:$4 sm:$0xff]  }
 0x31c   : > { %7640 = vmatpush2.bf16.msra.mxu0 %v10171_v21  ;;  %v10213_v21 = vld [vmem:[%s13091_s12 + $0x78] ss:$56 sps:$4 sm:$0xff]  }
 0x31d   : > { %7641 = vmatprep.subr.bf16.mxu0 %v10176_v22  ;;  %v10218_v22 = vld [vmem:[%s13091_s12 + $0xc] ss:$56 sps:$4 sm:$0xff]  }
 0x31e   : > { %7681 = vmatpush2.bf16.msra.mxu1 %v10300_v40  ;;  %v10228_v40 = vld [vmem:[%s13091_s12 + $0x548] ss:$56 sps:$4 sm:$0xff]  }
 0x31f   : > { %7682 = vmatprep.subr.bf16.mxu1 %v10308_v31  ;;  %v10239_v31 = vld [vmem:[%s13091_s12 + $0x3fc] ss:$56 sps:$4 sm:$0xff]  }
 0x320   : > { %7642 = vmatpush2.bf16.msra.mxu0 %v10174_v20  ;;  %v10219_v20 = vld [vmem:[%s13091_s12 + $0x698] ss:$56 sps:$4 sm:$0xff]  }
 0x321   : > { %7643 = vmatprep.subr.bf16.mxu0 %v10179_v26  ;;  %v10224_v26 = vld [vmem:[%s13091_s12 + $0x62c] ss:$56 sps:$4 sm:$0xff]  }
 0x322   : > { %7683 = vmatpush2.bf16.msra.mxu1 %v10306_v36  ;;  %v10234_v36 = vld [vmem:[%s13091_s12 + $0x468] ss:$56 sps:$4 sm:$0xff]  }
 0x323   : > { %7684 = vmatprep.subr.bf16.mxu1 %v10314_v51  ;;  %v10245_v51 = vld [vmem:[%s13091_s12 + $0x324] ss:$56 sps:$4 sm:$0xff]  }
 0x324   : > { %7644 = vmatpush2.bf16.msra.mxu0 %v10177_v62  ;;  %v10225_v62 = vld [vmem:[%s13091_s12 + $0x5b8] ss:$56 sps:$4 sm:$0xff]  }
 0x325   : > { %7645 = vmatprep.subr.bf16.mxu0 %v10182_v32  ;;  %v10230_v32 = vld [vmem:[%s13091_s12 + $0x54c] ss:$56 sps:$4 sm:$0xff]  }
 0x326   : > { %7685 = vmatpush2.bf16.msra.mxu1 %v10312_v45  ;;  %v10240_v45 = vld [vmem:[%s13091_s12 + $0x388] ss:$56 sps:$4 sm:$0xff]  }
 0x327   : > { %7686 = vmatprep.subr.bf16.mxu1 %v10320_v46 }
 0x328   : > { %7646 = vmatpush2.bf16.msra.mxu0 %v10180_v33  ;;  %v10231_v33 = vld [vmem:[%s13091_s12 + $0x4d8] ss:$56 sps:$4 sm:$0xff]  }
 0x329   : > { %7647 = vmatprep.subr.bf16.mxu0 %v10185_v35  ;;  %v10236_v35 = vld [vmem:[%s13091_s12 + $0x46c] ss:$56 sps:$4 sm:$0xff]  }
 0x32a   : > { %7687 = vmatpush2.bf16.msra.mxu1 %v10318_v44 }
 0x32b   : > { %7688 = vmatprep.subr.bf16.mxu1 %v10326_v34 }
 0x32c   : > { %7648 = vmatpush2.bf16.msra.mxu0 %v10183_v60  ;;  %v10237_v60 = vld [vmem:[%s13091_s12 + $0x3f8] ss:$56 sps:$4 sm:$0xff]  }
 0x32d   : > { %7649 = vmatprep.subr.bf16.mxu0 %v10188_v0  ;;  %v10242_v0 = vld [vmem:[%s13091_s12 + $0x38c] ss:$56 sps:$4 sm:$0xff]  }
 0x32e   : > { %7689 = vmatpush2.bf16.msra.mxu1 %v10324_v48 }
 0x32f   : > { %7690 = vmatprep.subr.bf16.mxu1 %v10332_v54 }
 0x330   : > { %7650 = vmatpush2.bf16.msra.mxu0 %v10186_v24  ;;  %v10243_v24 = vld [vmem:[%s13091_s12 + $0x320] ss:$56 sps:$4 sm:$0xff]  }
 0x331   : > { %7651 = vmatprep.subr.bf16.mxu0 %v10191_v43  ;;  %v10248_v43 = vld [vmem:[%s13091_s12 + $0x2b4] ss:$56 sps:$4 sm:$0xff]  }
 0x332   : > { %7691 = vmatpush2.bf16.msra.mxu1 %v10330_v52 }
 0x333   : > { %7692 = vmatprep.subr.bf16.mxu1 %v10338_v57 }
 0x334   : > { %7652 = vmatpush2.bf16.msra.mxu0 %v10189_v29 }
 0x335   : > { %7653 = vmatprep.subr.bf16.mxu0 %v10194_v47  ;;  %v10246_v47 = vld [vmem:[%s13091_s12 + $0x2b0] ss:$56 sps:$4 sm:$0xff]  }
 0x336   : > { %7693 = vmatpush2.bf16.msra.mxu1 %v10336_v58  ;;  %v10263_v58 = vld [vmem:[%s13091_s12 + $0x164] ss:$56 sps:$4 sm:$0xff]  }
 0x337   : > { %7694 = vmatprep.subr.bf16.mxu1 %v10344_v17  ;;  %v10287_v17 = vld [vmem:[%s13091_s12 + $0x6a4] ss:$56 sps:$4 sm:$0xff]  }
 0x338   : > { %7654 = vmatpush2.bf16.msra.mxu0 %v10192_v39  ;;  %v10251_v39 = vld [vmem:[%s13091_s12 + $0x244] ss:$56 sps:$4 sm:$0xff]  }
 0x339   : > { %7705 = vmatprep.subr.bf16.mxu0 %v10197_v56 }
 0x33a   : > { %7695 = vmatpush2.bf16.msra.mxu1 %v10342_v4  ;;  %v10291_v4 = vld [vmem:[%s13091_s12 + $0x630] ss:$56 sps:$4 sm:$0xff]  }
 0x33b   : > { %v4719_v13 = vpop.f32.mrf.mxu0  ;;  %7656 = vmatmul.mubr.bf16.vlgmr.msra.gmra.mxu0 %v13556_v8  ;;  %7746 = vmatprep.subr.bf16.mxu1 %v10350_v10  ;;  %v10311_v10 = vld [vmem:[%s13091_s12 + $0x4e4] ss:$56 sps:$4 sm:$0xff]  }
 0x33c   : > { %v4760_v18 = vpop.f32.mrf.mxu1  ;;  %v4720_v59 = vadd.f32 %v4719_v13, %v13491_v50  ;;  %7706 = vmatpush1.bf16.msra.mxu0 %v10195_v3  ;;  %7737 = vmatprep.mubr.bf16.mxu0 %v13486_v38  ;;  %v10249_v3 = vld [vmem:[%s13091_s12 + $0x240] ss:$56 sps:$4 sm:$0xff]   ;;  %v10257_v13 = vld [vmem:[%s13091_s12 + $0x1d4] ss:$56 sps:$4 sm:$0xff]  }
 0x33d   : > { %v4721_v61 = vpop.f32.mrf.mxu0  ;;  %7707 = vmatprep.subr.bf16.mxu0 %v10200_v55 }
 0x33e   : > { %v4762_v63 = vpop.f32.mrf.mxu1  ;;  %v13566_v2 = vadd.f32 %v4760_v18, %v4720_v59  ;;  %v4722_v27 = vadd.f32 %v4721_v61, %v13495_v53  ;;  %v10206_v53 = vld [vmem:[%s13091_s12 + $0x1cc] ss:$56 sps:$4 sm:$0xff]   ;;  %v10255_v18 = vld [vmem:[%s13091_s12 + $0x1d0] ss:$56 sps:$4 sm:$0xff]   ;;  %v10261_v59 = vld [vmem:[%s13091_s12 + $0x160] ss:$56 sps:$4 sm:$0xff]  }
 0x33f   : > { %v4723_v50 = vpop.f32.mrf.mxu0  ;;  %v10267_v61 = vld [vmem:[%s13091_s12 + $0xf0] ss:$56 sps:$4 sm:$0xff]  }
 0x340   : > { %v4764_v23 = vpop.f32.mrf.mxu1  ;;  %v13571_v5 = vadd.f32 %v4762_v63, %v4722_v27  ;;  %7708 = vmatpush1.bf16.msra.mxu0 %v10198_v42  ;;  %v10269_v42 = vld [vmem:[%s13091_s12 + $0xf4] ss:$56 sps:$4 sm:$0xff]   ;;  %v10275_v63 = vld [vmem:[%s13091_s12 + $0x84] ss:$56 sps:$4 sm:$0xff]   ;;  %v10279_v27 = vld [vmem:[%s13091_s12 + $0x10] ss:$56 sps:$4 sm:$0xff]  }
 0x341   : > { %v4724_v37 = vpop.f32.mrf.mxu0  ;;  %7709 = vmatprep.subr.bf16.mxu0 %v10203_v1  ;;  %v10273_v1 = vld [vmem:[%s13091_s12 + $0x80] ss:$56 sps:$4 sm:$0xff]   ;;  %v10293_v23 = vld [vmem:[%s13091_s12 + $0x634] ss:$56 sps:$4 sm:$0xff]  }
 0x342   : > { %v4765_v9 = vpop.f32.mrf.mxu1  ;;  %v10285_v50 = vld [vmem:[%s13091_s12 + $0x6a0] ss:$56 sps:$4 sm:$0xff]  }
 0x343   : > { %v10297_v37 = vld [vmem:[%s13091_s12 + $0x5c0] ss:$56 sps:$4 sm:$0xff]   ;;  %v10305_v9 = vld [vmem:[%s13091_s12 + $0x554] ss:$56 sps:$4 sm:$0xff]  }
 0x344   : > { %7710 = vmatpush1.bf16.msra.mxu0 %v10201_v7  ;;  %v10299_v7 = vld [vmem:[%s13091_s12 + $0x5c4] ss:$56 sps:$4 sm:$0xff]  }
 0x345   : > { %7711 = vmatprep.subr.bf16.mxu0 %v10206_v53  ;;  %v10303_v53 = vld [vmem:[%s13091_s12 + $0x550] ss:$56 sps:$4 sm:$0xff]  }
 0x348   : > { %7712 = vmatpush1.bf16.msra.mxu0 %v10204_v11  ;;  %v10309_v11 = vld [vmem:[%s13091_s12 + $0x4e0] ss:$56 sps:$4 sm:$0xff]  }
 0x349   : > { %7713 = vmatprep.subr.bf16.mxu0 %v10209_v12  ;;  %v10317_v12 = vld [vmem:[%s13091_s12 + $0x474] ss:$56 sps:$4 sm:$0xff]  }
 0x34c   : > { %7714 = vmatpush1.bf16.msra.mxu0 %v10207_v14  ;;  %v10315_v14 = vld [vmem:[%s13091_s12 + $0x470] ss:$56 sps:$4 sm:$0xff]  }
 0x34d   : > { %7715 = vmatprep.subr.bf16.mxu0 %v10212_v15  ;;  %v10323_v15 = vld [vmem:[%s13091_s12 + $0x404] ss:$56 sps:$4 sm:$0xff]  }
 0x350   : > { %7716 = vmatpush1.bf16.msra.mxu0 %v10210_v16  ;;  %v10321_v16 = vld [vmem:[%s13091_s12 + $0x400] ss:$56 sps:$4 sm:$0xff]  }
 0x351   : > { %7717 = vmatprep.subr.bf16.mxu0 %v10215_v19  ;;  %v10329_v19 = vld [vmem:[%s13091_s12 + $0x394] ss:$56 sps:$4 sm:$0xff]  }
 0x354   : > { %7718 = vmatpush1.bf16.msra.mxu0 %v10213_v21  ;;  %v10327_v21 = vld [vmem:[%s13091_s12 + $0x390] ss:$56 sps:$4 sm:$0xff]  }
 0x355   : > { %7719 = vmatprep.subr.bf16.mxu0 %v10218_v22  ;;  %v10335_v22 = vld [vmem:[%s13091_s12 + $0x32c] ss:$56 sps:$4 sm:$0xff]  }
 0x358   : > { %7720 = vmatpush1.bf16.msra.mxu0 %v10216_v25 }
 0x359   : > { %7721 = vmatprep.subr.bf16.mxu0 %v10221_v6  ;;  %v10333_v6 = vld [vmem:[%s13091_s12 + $0x328] ss:$56 sps:$4 sm:$0xff]  }
 0x35c   : > { %7722 = vmatpush2.bf16.msra.mxu0 %v10219_v20  ;;  %v10341_v20 = vld [vmem:[%s13091_s12 + $0x2bc] ss:$56 sps:$4 sm:$0xff]  }
 0x35d   : > { %7723 = vmatprep.subr.bf16.mxu0 %v10224_v26 }
 0x360   : > { %7724 = vmatpush2.bf16.msra.mxu0 %v10222_v28 }
 0x361   : > { %7725 = vmatprep.subr.bf16.mxu0 %v10227_v30 }
 0x364   : > { %7726 = vmatpush2.bf16.msra.mxu0 %v10225_v62 }
 0x365   : > { %7727 = vmatprep.subr.bf16.mxu0 %v10230_v32  ;;  %v10339_v32 = vld [vmem:[%s13091_s12 + $0x2b8] ss:$56 sps:$4 sm:$0xff]  }
 0x368   : > { %7728 = vmatpush2.bf16.msra.mxu0 %v10228_v40 }
 0x369   : > { %7729 = vmatprep.subr.bf16.mxu0 %v10233_v41  ;;  %v10347_v41 = vld [vmem:[%s13091_s12 + $0x24c] ss:$56 sps:$4 sm:$0xff]  }
 0x36c   : > { %7730 = vmatpush2.bf16.msra.mxu0 %v10231_v33 }
 0x36d   : > { %7731 = vmatprep.subr.bf16.mxu0 %v10236_v35 }
 0x370   : > { %7732 = vmatpush2.bf16.msra.mxu0 %v10234_v36 }
 0x371   : > { %7733 = vmatprep.subr.bf16.mxu0 %v10239_v31 }
 0x374   : > { %7734 = vmatpush2.bf16.msra.mxu0 %v10237_v60 }
 0x375   : > { %7735 = vmatprep.subr.bf16.mxu0 %v10242_v0  ;;  %v10345_v0 = vld [vmem:[%s13091_s12 + $0x248] ss:$56 sps:$4 sm:$0xff]  }
 0x378   : > { %7736 = vmatpush2.bf16.msra.mxu0 %v10240_v45 }
 0x379   : > { %7787 = vmatprep.subr.bf16.mxu0 %v10245_v51 }
 0x37b   : > { %v4801_v44 = vpop.f32.mrf.mxu0  ;;  %7738 = vmatmul.mubr.bf16.vlgmr.msra.gmra.mxu0 %v13556_v8 }
 0x37c   : > { %v4842_v46 = vpop.f32.mrf.mxu1  ;;  %v4802_v29 = vadd.f32 %v4801_v44, %v13566_v2  ;;  %7788 = vmatpush1.bf16.msra.mxu0 %v10243_v24  ;;  %7819 = vmatprep.mubr.bf16.mxu0 %v13486_v38  ;;  %v10281_v2 = vld [vmem:[%s13091_s12 + $0x14] ss:$56 sps:$4 sm:$0xff]   ;;  %v10348_v44 = vld [vmem:[%s13091_s12 + $0xa18] ss:$56 sps:$4 sm:$0xff]  }
 0x37d   : > { %v13608_v48 = vpop.f32.mrf.mxu0  ;;  %7789 = vmatprep.subr.bf16.mxu0 %v10248_v43  ;;  %v10353_v24 = vld [vmem:[%s13091_s12 + $0x1dc] ss:$56 sps:$4 sm:$0xff]  }
 0x37e   : > { %v13610_v34 = vpop.f32.mrf.mxu1  ;;  %v13613_v56 = vadd.f32 %v4842_v46, %v4802_v29  ;;  %v4804_v25 = vadd.f32 %v13608_v48, %v13571_v5  ;;  %v10356_v29 = vld [vmem:[%s13091_s12 + $0x9ac] ss:$56 sps:$4 sm:$0xff]  }
 0x37f   : > { %v4805_v52 = vpop.f32.mrf.mxu0  ;;  %v10359_v48 = vld [vmem:[%s13091_s12 + $0x16c] ss:$56 sps:$4 sm:$0xff]  }
 0x380   : > { %v4846_v54 = vpop.f32.mrf.mxu1  ;;  %7790 = vmatpush1.bf16.msra.mxu0 %v10246_v47  ;;  %v4845_v30 = vadd.f32 %v13610_v34, %v4804_v25  ;;  %v10351_v47 = vld [vmem:[%s13091_s12 + $0x1d8] ss:$56 sps:$4 sm:$0xff]   ;;  %v10354_v34 = vld [vmem:[%s13091_s12 + $0x9a8] ss:$56 sps:$4 sm:$0xff]   ;;  %v10365_v52 = vld [vmem:[%s13091_s12 + $0xfc] ss:$56 sps:$4 sm:$0xff]  }
 0x381   : > { %v4806_v55 = vpop.f32.mrf.mxu0  ;;  %7791 = vmatprep.subr.bf16.mxu0 %v10251_v39  ;;  %v10362_v39 = vld [vmem:[%s13091_s12 + $0x93c] ss:$56 sps:$4 sm:$0xff]   ;;  %v10360_v54 = vld [vmem:[%s13091_s12 + $0x938] ss:$56 sps:$4 sm:$0xff]  }
 0x382   : > { %v4847_v57 = vpop.f32.mrf.mxu1  ;;  %v10363_v55 = vld [vmem:[%s13091_s12 + $0xf8] ss:$56 sps:$4 sm:$0xff]   ;;  %v10413_v25 = vld [vmem:[%s13091_s12 + $0x47c] ss:$56 sps:$4 sm:$0xff]  }
 0x383   : > { %v10371_v57 = vld [vmem:[%s13091_s12 + $0x8c] ss:$56 sps:$4 sm:$0xff]  }
 0x384   : > { %7792 = vmatpush1.bf16.msra.mxu0 %v10249_v3  ;;  %v10368_v3 = vld [vmem:[%s13091_s12 + $0x8cc] ss:$56 sps:$4 sm:$0xff]  }
 0x385   : > { %7793 = vmatprep.subr.bf16.mxu0 %v10257_v13  ;;  %v10366_v13 = vld [vmem:[%s13091_s12 + $0x8c8] ss:$56 sps:$4 sm:$0xff]  }
 0x388   : > { %7794 = vmatpush1.bf16.msra.mxu0 %v10255_v18  ;;  %v10374_v18 = vld [vmem:[%s13091_s12 + $0x85c] ss:$56 sps:$4 sm:$0xff]  }
 0x389   : > { %7795 = vmatprep.subr.bf16.mxu0 %v10263_v58  ;;  %v10369_v58 = vld [vmem:[%s13091_s12 + $0x88] ss:$56 sps:$4 sm:$0xff]  }
 0x38c   : > { %7796 = vmatpush1.bf16.msra.mxu0 %v10261_v59  ;;  %v10377_v59 = vld [vmem:[%s13091_s12 + $0x1c] ss:$56 sps:$4 sm:$0xff]  }
 0x38d   : > { %7797 = vmatprep.subr.bf16.mxu0 %v10269_v42  ;;  %v10372_v42 = vld [vmem:[%s13091_s12 + $0x858] ss:$56 sps:$4 sm:$0xff]  }
 0x390   : > { %7798 = vmatpush1.bf16.msra.mxu0 %v10267_v61  ;;  %v10380_v61 = vld [vmem:[%s13091_s12 + $0x7ec] ss:$56 sps:$4 sm:$0xff]  }
 0x391   : > { %7799 = vmatprep.subr.bf16.mxu0 %v10275_v63  ;;  %v10375_v63 = vld [vmem:[%s13091_s12 + $0x18] ss:$56 sps:$4 sm:$0xff]  }
 0x394   : > { %7800 = vmatpush1.bf16.msra.mxu0 %v10273_v1  ;;  %v10383_v1 = vld [vmem:[%s13091_s12 + $0x6ac] ss:$56 sps:$4 sm:$0xff]  }
 0x395   : > { %7801 = vmatprep.subr.bf16.mxu0 %v10281_v2  ;;  %v10378_v2 = vld [vmem:[%s13091_s12 + $0x7e8] ss:$56 sps:$4 sm:$0xff]  }
 0x398   : > { %7802 = vmatpush1.bf16.msra.mxu0 %v10279_v27  ;;  %v10386_v27 = vld [vmem:[%s13091_s12 + $0x77c] ss:$56 sps:$4 sm:$0xff]  }
 0x399   : > { %7803 = vmatprep.subr.bf16.mxu0 %v10287_v17  ;;  %v10381_v17 = vld [vmem:[%s13091_s12 + $0x6a8] ss:$56 sps:$4 sm:$0xff]  }
 0x39c   : > { %7804 = vmatpush2.bf16.msra.mxu0 %v10285_v50  ;;  %v10389_v50 = vld [vmem:[%s13091_s12 + $0x63c] ss:$56 sps:$4 sm:$0xff]  }
 0x39d   : > { %7805 = vmatprep.subr.bf16.mxu0 %v10293_v23  ;;  %v10384_v23 = vld [vmem:[%s13091_s12 + $0x778] ss:$56 sps:$4 sm:$0xff]  }
 0x3a0   : > { %7806 = vmatpush2.bf16.msra.mxu0 %v10291_v4  ;;  %v10392_v4 = vld [vmem:[%s13091_s12 + $0x70c] ss:$56 sps:$4 sm:$0xff]  }
 0x3a1   : > { %7807 = vmatprep.subr.bf16.mxu0 %v10299_v7  ;;  %v10387_v7 = vld [vmem:[%s13091_s12 + $0x638] ss:$56 sps:$4 sm:$0xff]  }
 0x3a4   : > { %7808 = vmatpush2.bf16.msra.mxu0 %v10297_v37  ;;  %v10395_v37 = vld [vmem:[%s13091_s12 + $0x5cc] ss:$56 sps:$4 sm:$0xff]  }
 0x3a5   : > { %7809 = vmatprep.subr.bf16.mxu0 %v10305_v9  ;;  %v10390_v9 = vld [vmem:[%s13091_s12 + $0x708] ss:$56 sps:$4 sm:$0xff]  }
 0x3a8   : > { %7810 = vmatpush2.bf16.msra.mxu0 %v10303_v53  ;;  %v10398_v53 = vld [vmem:[%s13091_s12 + $0xd9c] ss:$56 sps:$4 sm:$0xff]  }
 0x3a9   : > { %7811 = vmatprep.subr.bf16.mxu0 %v10311_v10  ;;  %v10393_v10 = vld [vmem:[%s13091_s12 + $0x5c8] ss:$56 sps:$4 sm:$0xff]  }
 0x3ac   : > { %7812 = vmatpush2.bf16.msra.mxu0 %v10309_v11  ;;  %v10401_v11 = vld [vmem:[%s13091_s12 + $0x55c] ss:$56 sps:$4 sm:$0xff]  }
 0x3ad   : > { %7813 = vmatprep.subr.bf16.mxu0 %v10317_v12  ;;  %v10396_v12 = vld [vmem:[%s13091_s12 + $0xd98] ss:$56 sps:$4 sm:$0xff]  }
 0x3b0   : > { %7814 = vmatpush2.bf16.msra.mxu0 %v10315_v14  ;;  %v10404_v14 = vld [vmem:[%s13091_s12 + $0xd2c] ss:$56 sps:$4 sm:$0xff]  }
 0x3b1   : > { %7815 = vmatprep.subr.bf16.mxu0 %v10323_v15  ;;  %v10399_v15 = vld [vmem:[%s13091_s12 + $0x558] ss:$56 sps:$4 sm:$0xff]  }
 0x3b4   : > { %7816 = vmatpush2.bf16.msra.mxu0 %v10321_v16  ;;  %v10407_v16 = vld [vmem:[%s13091_s12 + $0x4ec] ss:$56 sps:$4 sm:$0xff]  }
 0x3b5   : > { %7817 = vmatprep.subr.bf16.mxu0 %v10329_v19  ;;  %v10402_v19 = vld [vmem:[%s13091_s12 + $0xd28] ss:$56 sps:$4 sm:$0xff]  }
 0x3b8   : > { %7818 = vmatpush2.bf16.msra.mxu0 %v10327_v21  ;;  %v10410_v21 = vld [vmem:[%s13091_s12 + $0xcbc] ss:$56 sps:$4 sm:$0xff]  }
 0x3b9   : > { %7869 = vmatprep.subr.bf16.mxu0 %v10335_v22  ;;  %v10405_v22 = vld [vmem:[%s13091_s12 + $0x4e8] ss:$56 sps:$4 sm:$0xff]  }
 0x3bb   : > { %v4883_v26 = vpop.f32.mrf.mxu0  ;;  %7820 = vmatmul.mubr.bf16.vlgmr.msra.gmra.mxu0 %v13556_v8 }
 0x3bc   : > { %v4924_v28 = vpop.f32.mrf.mxu1  ;;  %v4884_v62 = vadd.f32 %v4883_v26, %v13613_v56  ;;  %7870 = vmatpush1.bf16.msra.mxu0 %v10333_v6  ;;  %7901 = vmatprep.mubr.bf16.mxu0 %v13486_v38  ;;  %v10357_v56 = vld [vmem:[%s13091_s12 + $0x168] ss:$56 sps:$4 sm:$0xff]   ;;  %v10408_v6 = vld [vmem:[%s13091_s12 + $0xcb8] ss:$56 sps:$4 sm:$0xff]  }
 0x3bd   : > { %v4885_v5 = vpop.f32.mrf.mxu0  ;;  %7871 = vmatprep.subr.bf16.mxu0 %v10341_v20  ;;  %v10416_v20 = vld [vmem:[%s13091_s12 + $0xc4c] ss:$56 sps:$4 sm:$0xff]   ;;  %v10411_v26 = vld [vmem:[%s13091_s12 + $0x478] ss:$56 sps:$4 sm:$0xff]  }
 0x3be   : > { %v4926_v40 = vpop.f32.mrf.mxu1  ;;  %v4886_v33 = vadd.f32 %v4885_v5, %v4845_v30  ;;  %v4925_v35 = vadd.f32 %v4924_v28, %v4884_v62  ;;  %v10419_v28 = vld [vmem:[%s13091_s12 + $0x40c] ss:$56 sps:$4 sm:$0xff]   ;;  %v10414_v30 = vld [vmem:[%s13091_s12 + $0xc48] ss:$56 sps:$4 sm:$0xff]   ;;  %v10422_v62 = vld [vmem:[%s13091_s12 + $0xbdc] ss:$56 sps:$4 sm:$0xff]  }
 0x3bf   : > { %v4887_v36 = vpop.f32.mrf.mxu0  ;;  %v10425_v5 = vld [vmem:[%s13091_s12 + $0x39c] ss:$56 sps:$4 sm:$0xff]  }
 0x3c0   : > { %v4928_v31 = vpop.f32.mrf.mxu1  ;;  %v4927_v60 = vadd.f32 %v4926_v40, %v4886_v33  ;;  %7872 = vmatpush1.bf16.msra.mxu0 %v10339_v32  ;;  %v13658_v46 = vpack.c.bf16 %v4925_v35, %v4925_v35  ;;  %v10417_v32 = vld [vmem:[%s13091_s12 + $0x408] ss:$56 sps:$4 sm:$0xff]   ;;  %v10420_v40 = vld [vmem:[%s13091_s12 + $0xbd8] ss:$56 sps:$4 sm:$0xff]   ;;  %v10431_v35 = vld [vmem:[%s13091_s12 + $0x334] ss:$56 sps:$4 sm:$0xff]  }
 0x3c1   : > { %v4888_v45 = vpop.f32.mrf.mxu0  ;;  %7873 = vmatprep.subr.bf16.mxu0 %v10347_v41  ;;  %v10428_v41 = vld [vmem:[%s13091_s12 + $0xb6c] ss:$56 sps:$4 sm:$0xff]   ;;  %v10423_v33 = vld [vmem:[%s13091_s12 + $0x398] ss:$56 sps:$4 sm:$0xff]   ;;  %v10426_v36 = vld [vmem:[%s13091_s12 + $0xb68] ss:$56 sps:$4 sm:$0xff]  }
 0x3c2   : > { %v4929_v51 = vpop.f32.mrf.mxu1  ;;  %v13655_v43 = vpack.c.bf16 %v4927_v60, %v4927_v60  ;;  %v10434_v31 = vld [vmem:[%s13091_s12 + $0xafc] ss:$56 sps:$4 sm:$0xff]   ;;  %v10429_v60 = vld [vmem:[%s13091_s12 + $0x330] ss:$56 sps:$4 sm:$0xff]  }
 0x3c3   : > { %v10432_v45 = vld [vmem:[%s13091_s12 + $0xaf8] ss:$56 sps:$4 sm:$0xff]  }
 0x3c4   : > { %7696 = vmatprep.mubr.bf16.mxu1 %v13655_v43  ;;  %7874 = vmatpush1.bf16.msra.mxu0 %v10345_v0  ;;  %v10437_v0 = vld [vmem:[%s13091_s12 + $0x2c4] ss:$56 sps:$4 sm:$0xff]  }
 0x3c5   : > { %7697 = vmatmul.mubr.bf16.vlgmr.msra.gmra.mxu1 %v13658_v46  ;;  %7875 = vmatprep.subr.bf16.mxu0 %v10353_v24  ;;  %v10440_v24 = vld [vmem:[%s13091_s12 + $0xa8c] ss:$56 sps:$4 sm:$0xff]  }
 0x3c6   : > { %7747 = vmatpush1.bf16.msra.mxu1 %v10348_v44  ;;  %7778 = vmatprep.mubr.bf16.mxu1 %v13655_v43  ;;  %v10435_v44 = vld [vmem:[%s13091_s12 + $0x2c0] ss:$56 sps:$4 sm:$0xff]  }
 0x3c7   : > { %7748 = vmatprep.subr.bf16.mxu1 %v10356_v29 }
 0x3c8   : > { %7876 = vmatpush1.bf16.msra.mxu0 %v10351_v47  ;;  %v10443_v47 = vld [vmem:[%s13091_s12 + $0x254] ss:$56 sps:$4 sm:$0xff]  }
 0x3c9   : > { %7877 = vmatprep.subr.bf16.mxu0 %v10359_v48  ;;  %v10438_v48 = vld [vmem:[%s13091_s12 + $0xa88] ss:$56 sps:$4 sm:$0xff]  }
 0x3ca   : > { %7749 = vmatpush1.bf16.msra.mxu1 %v10354_v34 }
 0x3cb   : > { %7750 = vmatprep.subr.bf16.mxu1 %v10362_v39  ;;  %v10446_v39 = vld [vmem:[%s13091_s12 + $0xa24] ss:$56 sps:$4 sm:$0xff]  }
 0x3cc   : > { %7878 = vmatpush1.bf16.msra.mxu0 %v10357_v56  ;;  %v10441_v56 = vld [vmem:[%s13091_s12 + $0x250] ss:$56 sps:$4 sm:$0xff]  }
 0x3cd   : > { %7879 = vmatprep.subr.bf16.mxu0 %v10365_v52 }
 0x3ce   : > { %7751 = vmatpush1.bf16.msra.mxu1 %v10360_v54  ;;  %v10449_v54 = vld [vmem:[%s13091_s12 + $0x1e4] ss:$56 sps:$4 sm:$0xff]  }
 0x3cf   : > { %7752 = vmatprep.subr.bf16.mxu1 %v10368_v3  ;;  %v10444_v3 = vld [vmem:[%s13091_s12 + $0xa20] ss:$56 sps:$4 sm:$0xff]  }
 0x3d0   : > { %7880 = vmatpush1.bf16.msra.mxu0 %v10363_v55  ;;  %v10452_v55 = vld [vmem:[%s13091_s12 + $0x9b4] ss:$56 sps:$4 sm:$0xff]  }
 0x3d1   : > { %7881 = vmatprep.subr.bf16.mxu0 %v10371_v57  ;;  %v10447_v57 = vld [vmem:[%s13091_s12 + $0x1e0] ss:$56 sps:$4 sm:$0xff]  }
 0x3d2   : > { %7753 = vmatpush1.bf16.msra.mxu1 %v10366_v13  ;;  %v10455_v13 = vld [vmem:[%s13091_s12 + $0x174] ss:$56 sps:$4 sm:$0xff]  }
 0x3d3   : > { %7754 = vmatprep.subr.bf16.mxu1 %v10374_v18  ;;  %v10450_v18 = vld [vmem:[%s13091_s12 + $0x9b0] ss:$56 sps:$4 sm:$0xff]  }
 0x3d4   : > { %7882 = vmatpush1.bf16.msra.mxu0 %v10369_v58  ;;  %v10458_v58 = vld [vmem:[%s13091_s12 + $0x944] ss:$56 sps:$4 sm:$0xff]  }
 0x3d5   : > { %7883 = vmatprep.subr.bf16.mxu0 %v10377_v59  ;;  %v10453_v59 = vld [vmem:[%s13091_s12 + $0x170] ss:$56 sps:$4 sm:$0xff]  }
 0x3d6   : > { %7755 = vmatpush1.bf16.msra.mxu1 %v10372_v42  ;;  %v10461_v42 = vld [vmem:[%s13091_s12 + $0x104] ss:$56 sps:$4 sm:$0xff]  }
 0x3d7   : > { %7756 = vmatprep.subr.bf16.mxu1 %v10380_v61  ;;  %v10456_v61 = vld [vmem:[%s13091_s12 + $0x940] ss:$56 sps:$4 sm:$0xff]  }
 0x3d8   : > { %7884 = vmatpush1.bf16.msra.mxu0 %v10375_v63  ;;  %v10464_v63 = vld [vmem:[%s13091_s12 + $0x8d4] ss:$56 sps:$4 sm:$0xff]  }
 0x3d9   : > { %7885 = vmatprep.subr.bf16.mxu0 %v10383_v1  ;;  %v10459_v1 = vld [vmem:[%s13091_s12 + $0x100] ss:$56 sps:$4 sm:$0xff]  }
 0x3da   : > { %7757 = vmatpush1.bf16.msra.mxu1 %v10378_v2  ;;  %v10467_v2 = vld [vmem:[%s13091_s12 + $0x94] ss:$56 sps:$4 sm:$0xff]  }
 0x3db   : > { %7758 = vmatprep.subr.bf16.mxu1 %v10386_v27  ;;  %v10462_v27 = vld [vmem:[%s13091_s12 + $0x8d0] ss:$56 sps:$4 sm:$0xff]  }
 0x3dc   : > { %7886 = vmatpush2.bf16.msra.mxu0 %v10381_v17  ;;  %v10470_v17 = vld [vmem:[%s13091_s12 + $0x864] ss:$56 sps:$4 sm:$0xff]  }
 0x3dd   : > { %7887 = vmatprep.subr.bf16.mxu0 %v10389_v50  ;;  %v10465_v50 = vld [vmem:[%s13091_s12 + $0x90] ss:$56 sps:$4 sm:$0xff]  }
 0x3de   : > { %7759 = vmatpush1.bf16.msra.mxu1 %v10384_v23  ;;  %v10473_v23 = vld [vmem:[%s13091_s12 + $0x24] ss:$56 sps:$4 sm:$0xff]  }
 0x3df   : > { %7760 = vmatprep.subr.bf16.mxu1 %v10392_v4  ;;  %v10468_v4 = vld [vmem:[%s13091_s12 + $0x860] ss:$56 sps:$4 sm:$0xff]  }
 0x3e0   : > { %7888 = vmatpush2.bf16.msra.mxu0 %v10387_v7  ;;  %v10476_v7 = vld [vmem:[%s13091_s12 + $0x7f4] ss:$56 sps:$4 sm:$0xff]  }
 0x3e1   : > { %7889 = vmatprep.subr.bf16.mxu0 %v10395_v37  ;;  %v10471_v37 = vld [vmem:[%s13091_s12 + $0x20] ss:$56 sps:$4 sm:$0xff]  }
 0x3e2   : > { %7761 = vmatpush1.bf16.msra.mxu1 %v10390_v9  ;;  %v10479_v9 = vld [vmem:[%s13091_s12 + $0x6b4] ss:$56 sps:$4 sm:$0xff]  }
 0x3e3   : > { %7762 = vmatprep.subr.bf16.mxu1 %v10398_v53  ;;  %v10474_v53 = vld [vmem:[%s13091_s12 + $0x7f0] ss:$56 sps:$4 sm:$0xff]  }
 0x3e4   : > { %7890 = vmatpush2.bf16.msra.mxu0 %v10393_v10  ;;  %v10482_v10 = vld [vmem:[%s13091_s12 + $0x784] ss:$56 sps:$4 sm:$0xff]  }
 0x3e5   : > { %7891 = vmatprep.subr.bf16.mxu0 %v10401_v11  ;;  %v10477_v11 = vld [vmem:[%s13091_s12 + $0x6b0] ss:$56 sps:$4 sm:$0xff]  }
 0x3e6   : > { %7763 = vmatpush2.bf16.msra.mxu1 %v10396_v12  ;;  %v10485_v12 = vld [vmem:[%s13091_s12 + $0x644] ss:$56 sps:$4 sm:$0xff]  }
 0x3e7   : > { %7764 = vmatprep.subr.bf16.mxu1 %v10404_v14  ;;  %v10480_v14 = vld [vmem:[%s13091_s12 + $0x780] ss:$56 sps:$4 sm:$0xff]  }
 0x3e8   : > { %7892 = vmatpush2.bf16.msra.mxu0 %v10399_v15  ;;  %v10488_v15 = vld [vmem:[%s13091_s12 + $0x714] ss:$56 sps:$4 sm:$0xff]  }
 0x3e9   : > { %7893 = vmatprep.subr.bf16.mxu0 %v10407_v16  ;;  %v10483_v16 = vld [vmem:[%s13091_s12 + $0x640] ss:$56 sps:$4 sm:$0xff]  }
 0x3ea   : > { %7765 = vmatpush2.bf16.msra.mxu1 %v10402_v19  ;;  %v10491_v19 = vld [vmem:[%s13091_s12 + $0x5d4] ss:$56 sps:$4 sm:$0xff]  }
 0x3eb   : > { %7766 = vmatprep.subr.bf16.mxu1 %v10410_v21  ;;  %v10486_v21 = vld [vmem:[%s13091_s12 + $0x710] ss:$56 sps:$4 sm:$0xff]  }
 0x3ec   : > { %7894 = vmatpush2.bf16.msra.mxu0 %v10405_v22  ;;  %v10494_v22 = vld [vmem:[%s13091_s12 + $0xda4] ss:$56 sps:$4 sm:$0xff]  }
 0x3ed   : > { %7895 = vmatprep.subr.bf16.mxu0 %v10413_v25  ;;  %v10489_v25 = vld [vmem:[%s13091_s12 + $0x5d0] ss:$56 sps:$4 sm:$0xff]  }
 0x3ee   : > { %7767 = vmatpush2.bf16.msra.mxu1 %v10408_v6  ;;  %v10497_v6 = vld [vmem:[%s13091_s12 + $0x564] ss:$56 sps:$4 sm:$0xff]  }
 0x3ef   : > { %7768 = vmatprep.subr.bf16.mxu1 %v10416_v20  ;;  %v10492_v20 = vld [vmem:[%s13091_s12 + $0xda0] ss:$56 sps:$4 sm:$0xff]  }
 0x3f0   : > { %7896 = vmatpush2.bf16.msra.mxu0 %v10411_v26  ;;  %v10500_v26 = vld [vmem:[%s13091_s12 + $0xd34] ss:$56 sps:$4 sm:$0xff]  }
 0x3f1   : > { %7897 = vmatprep.subr.bf16.mxu0 %v10419_v28  ;;  %v10495_v28 = vld [vmem:[%s13091_s12 + $0x560] ss:$56 sps:$4 sm:$0xff]  }
 0x3f2   : > { %7769 = vmatpush2.bf16.msra.mxu1 %v10414_v30  ;;  %v10503_v30 = vld [vmem:[%s13091_s12 + $0x4f4] ss:$56 sps:$4 sm:$0xff]  }
 0x3f3   : > { %7770 = vmatprep.subr.bf16.mxu1 %v10422_v62  ;;  %v10498_v62 = vld [vmem:[%s13091_s12 + $0xd30] ss:$56 sps:$4 sm:$0xff]  }
 0x3f4   : > { %7898 = vmatpush2.bf16.msra.mxu0 %v10417_v32  ;;  %v10506_v32 = vld [vmem:[%s13091_s12 + $0xcc4] ss:$56 sps:$4 sm:$0xff]  }
 0x3f5   : > { %7899 = vmatprep.subr.bf16.mxu0 %v10425_v5  ;;  %v10501_v5 = vld [vmem:[%s13091_s12 + $0x4f0] ss:$56 sps:$4 sm:$0xff]  }
 0x3f6   : > { %7771 = vmatpush2.bf16.msra.mxu1 %v10420_v40  ;;  %v10509_v40 = vld [vmem:[%s13091_s12 + $0x484] ss:$56 sps:$4 sm:$0xff]  }
 0x3f7   : > { %7772 = vmatprep.subr.bf16.mxu1 %v10428_v41  ;;  %v10504_v41 = vld [vmem:[%s13091_s12 + $0xcc0] ss:$56 sps:$4 sm:$0xff]  }
 0x3f8   : > { %7900 = vmatpush2.bf16.msra.mxu0 %v10423_v33  ;;  %v10512_v33 = vld [vmem:[%s13091_s12 + $0xc54] ss:$56 sps:$4 sm:$0xff]  }
 0x3f9   : > { %7951 = vmatprep.subr.bf16.mxu0 %v10431_v35  ;;  %v10507_v35 = vld [vmem:[%s13091_s12 + $0x480] ss:$56 sps:$4 sm:$0xff]  }
 0x3fa   : > { %7773 = vmatpush2.bf16.msra.mxu1 %v10426_v36  ;;  %v10515_v36 = vld [vmem:[%s13091_s12 + $0x414] ss:$56 sps:$4 sm:$0xff]  }
 0x3fb   : > { %v13719_v51 = vpop.f32.mrf.mxu0  ;;  %7902 = vmatmul.mubr.bf16.vlgmr.msra.gmra.mxu0 %v13556_v8  ;;  %7774 = vmatprep.subr.bf16.mxu1 %v10434_v31  ;;  %v10510_v31 = vld [vmem:[%s13091_s12 + $0xc50] ss:$56 sps:$4 sm:$0xff]  }
 0x3fc   : > { %7952 = vmatpush1.bf16.msra.mxu0 %v10429_v60  ;;  %7983 = vmatprep.mubr.bf16.mxu0 %v13486_v38  ;;  %v10518_v60 = vld [vmem:[%s13091_s12 + $0xbe4] ss:$56 sps:$4 sm:$0xff]  }
 0x3fd   : > { %v13725_v29 = vpop.f32.mrf.mxu0  ;;  %7953 = vmatprep.subr.bf16.mxu0 %v10437_v0  ;;  %v10513_v0 = vld [vmem:[%s13091_s12 + $0x410] ss:$56 sps:$4 sm:$0xff]  }
 0x3fe   : > { %7775 = vmatpush2.bf16.msra.mxu1 %v10432_v45  ;;  %v10521_v45 = vld [vmem:[%s13091_s12 + $0x3a4] ss:$56 sps:$4 sm:$0xff]  }
 0x3ff   : > { %v7661_v34 = vpop.f32.mrf.mxu0  ;;  %7776 = vmatprep.subr.bf16.mxu1 %v10440_v24  ;;  %v10516_v24 = vld [vmem:[%s13091_s12 + $0xbe0] ss:$56 sps:$4 sm:$0xff]  }
 0x400   : > { %7954 = vmatpush1.bf16.msra.mxu0 %v10435_v44  ;;  %v10524_v44 = vld [vmem:[%s13091_s12 + $0xb74] ss:$56 sps:$4 sm:$0xff]   ;;  %v10522_v34 = vld [vmem:[%s13091_s12 + $0xb70] ss:$56 sps:$4 sm:$0xff]  }
 0x401   : > { %v7662_v52 = vpop.f32.mrf.mxu0  ;;  %7955 = vmatprep.subr.bf16.mxu0 %v10443_v47  ;;  %v10519_v47 = vld [vmem:[%s13091_s12 + $0x3a0] ss:$56 sps:$4 sm:$0xff]  }
 0x402   : > { %7777 = vmatpush2.bf16.msra.mxu1 %v10438_v48  ;;  %v10527_v48 = vld [vmem:[%s13091_s12 + $0x33c] ss:$56 sps:$4 sm:$0xff]   ;;  %v10533_v52 = vld [vmem:[%s13091_s12 + $0x2cc] ss:$56 sps:$4 sm:$0xff]  }
 0x403   : > { %7828 = vmatprep.subr.bf16.mxu1 %v10446_v39  ;;  %v10530_v39 = vld [vmem:[%s13091_s12 + $0xb04] ss:$56 sps:$4 sm:$0xff]  }
 0x404   : > { %7956 = vmatpush1.bf16.msra.mxu0 %v10441_v56  ;;  %v10525_v56 = vld [vmem:[%s13091_s12 + $0x338] ss:$56 sps:$4 sm:$0xff]  }
 0x405   : > { %7779 = vmatmul.mubr.bf16.vlgmr.msra.gmra.mxu1 %v13658_v46  ;;  %7957 = vmatprep.subr.bf16.mxu0 %v10449_v54  ;;  %v10528_v54 = vld [vmem:[%s13091_s12 + $0xb00] ss:$56 sps:$4 sm:$0xff]  }
 0x406   : > { %7829 = vmatpush1.bf16.msra.mxu1 %v10444_v3  ;;  %7860 = vmatprep.mubr.bf16.mxu1 %v13655_v43 }
 0x407   : > { %7830 = vmatprep.subr.bf16.mxu1 %v10452_v55  ;;  %v10536_v55 = vld [vmem:[%s13091_s12 + $0xa94] ss:$56 sps:$4 sm:$0xff]  }
 0x408   : > { %7958 = vmatpush1.bf16.msra.mxu0 %v10447_v57  ;;  %v10531_v57 = vld [vmem:[%s13091_s12 + $0x2c8] ss:$56 sps:$4 sm:$0xff]  }
 0x409   : > { %7959 = vmatprep.subr.bf16.mxu0 %v10455_v13 }
 0x40a   : > { %7831 = vmatpush1.bf16.msra.mxu1 %v10450_v18  ;;  %v10539_v18 = vld [vmem:[%s13091_s12 + $0x25c] ss:$56 sps:$4 sm:$0xff]  }
 0x40b   : > { %7832 = vmatprep.subr.bf16.mxu1 %v10458_v58  ;;  %v10534_v58 = vld [vmem:[%s13091_s12 + $0xa90] ss:$56 sps:$4 sm:$0xff]  }
 0x40c   : > { %7960 = vmatpush1.bf16.msra.mxu0 %v10453_v59 }
 0x40d   : > { %7961 = vmatprep.subr.bf16.mxu0 %v10461_v42  ;;  %v10542_v42 = vld [vmem:[%s13091_s12 + $0xa2c] ss:$56 sps:$4 sm:$0xff]  }
 0x40e   : > { %7833 = vmatpush1.bf16.msra.mxu1 %v10456_v61  ;;  %v10537_v61 = vld [vmem:[%s13091_s12 + $0x258] ss:$56 sps:$4 sm:$0xff]  }
 0x40f   : > { %7834 = vmatprep.subr.bf16.mxu1 %v10464_v63 }
 0x410   : > { %7962 = vmatpush1.bf16.msra.mxu0 %v10459_v1  ;;  %v10545_v1 = vld [vmem:[%s13091_s12 + $0x1ec] ss:$56 sps:$4 sm:$0xff]  }
 0x411   : > { %7963 = vmatprep.subr.bf16.mxu0 %v10467_v2  ;;  %v10540_v2 = vld [vmem:[%s13091_s12 + $0xa28] ss:$56 sps:$4 sm:$0xff]  }
 0x412   : > { %7835 = vmatpush1.bf16.msra.mxu1 %v10462_v27  ;;  %v10548_v27 = vld [vmem:[%s13091_s12 + $0x9bc] ss:$56 sps:$4 sm:$0xff]  }
 0x413   : > { %7836 = vmatprep.subr.bf16.mxu1 %v10470_v17  ;;  %v10543_v17 = vld [vmem:[%s13091_s12 + $0x1e8] ss:$56 sps:$4 sm:$0xff]  }
 0x414   : > { %7964 = vmatpush1.bf16.msra.mxu0 %v10465_v50  ;;  %v10551_v50 = vld [vmem:[%s13091_s12 + $0x17c] ss:$56 sps:$4 sm:$0xff]  }
 0x415   : > { %7965 = vmatprep.subr.bf16.mxu0 %v10473_v23  ;;  %v10546_v23 = vld [vmem:[%s13091_s12 + $0x9b8] ss:$56 sps:$4 sm:$0xff]  }
 0x416   : > { %7837 = vmatpush1.bf16.msra.mxu1 %v10468_v4  ;;  %v10554_v4 = vld [vmem:[%s13091_s12 + $0x94c] ss:$56 sps:$4 sm:$0xff]  }
 0x417   : > { %7838 = vmatprep.subr.bf16.mxu1 %v10476_v7  ;;  %v10549_v7 = vld [vmem:[%s13091_s12 + $0x178] ss:$56 sps:$4 sm:$0xff]  }
 0x418   : > { %7966 = vmatpush1.bf16.msra.mxu0 %v10471_v37  ;;  %v10557_v37 = vld [vmem:[%s13091_s12 + $0x10c] ss:$56 sps:$4 sm:$0xff]  }
 0x419   : > { %7967 = vmatprep.subr.bf16.mxu0 %v10479_v9  ;;  %v10552_v9 = vld [vmem:[%s13091_s12 + $0x948] ss:$56 sps:$4 sm:$0xff]  }
 0x41a   : > { %7839 = vmatpush1.bf16.msra.mxu1 %v10474_v53  ;;  %v10560_v53 = vld [vmem:[%s13091_s12 + $0x8dc] ss:$56 sps:$4 sm:$0xff]  }
 0x41b   : > { %7840 = vmatprep.subr.bf16.mxu1 %v10482_v10  ;;  %v10555_v10 = vld [vmem:[%s13091_s12 + $0x108] ss:$56 sps:$4 sm:$0xff]  }
 0x41c   : > { %7968 = vmatpush2.bf16.msra.mxu0 %v10477_v11  ;;  %v10563_v11 = vld [vmem:[%s13091_s12 + $0x9c] ss:$56 sps:$4 sm:$0xff]  }
 0x41d   : > { %7969 = vmatprep.subr.bf16.mxu0 %v10485_v12  ;;  %v10558_v12 = vld [vmem:[%s13091_s12 + $0x8d8] ss:$56 sps:$4 sm:$0xff]  }
 0x41e   : > { %7841 = vmatpush1.bf16.msra.mxu1 %v10480_v14  ;;  %v10566_v14 = vld [vmem:[%s13091_s12 + $0x86c] ss:$56 sps:$4 sm:$0xff]  }
 0x41f   : > { %7842 = vmatprep.subr.bf16.mxu1 %v10488_v15  ;;  %v10561_v15 = vld [vmem:[%s13091_s12 + $0x98] ss:$56 sps:$4 sm:$0xff]  }
 0x420   : > { %7970 = vmatpush2.bf16.msra.mxu0 %v10483_v16  ;;  %v10569_v16 = vld [vmem:[%s13091_s12 + $0x2c] ss:$56 sps:$4 sm:$0xff]  }
 0x421   : > { %7971 = vmatprep.subr.bf16.mxu0 %v10491_v19  ;;  %v10564_v19 = vld [vmem:[%s13091_s12 + $0x868] ss:$56 sps:$4 sm:$0xff]  }
 0x422   : > { %7843 = vmatpush1.bf16.msra.mxu1 %v10486_v21  ;;  %v10572_v21 = vld [vmem:[%s13091_s12 + $0x7fc] ss:$56 sps:$4 sm:$0xff]  }
 0x423   : > { %7844 = vmatprep.subr.bf16.mxu1 %v10494_v22  ;;  %v10567_v22 = vld [vmem:[%s13091_s12 + $0x28] ss:$56 sps:$4 sm:$0xff]  }
 0x424   : > { %7972 = vmatpush2.bf16.msra.mxu0 %v10489_v25  ;;  %v10575_v25 = vld [vmem:[%s13091_s12 + $0x6bc] ss:$56 sps:$4 sm:$0xff]  }
 0x425   : > { %7973 = vmatprep.subr.bf16.mxu0 %v10497_v6  ;;  %v10570_v6 = vld [vmem:[%s13091_s12 + $0x7f8] ss:$56 sps:$4 sm:$0xff]  }
 0x426   : > { %7845 = vmatpush2.bf16.msra.mxu1 %v10492_v20  ;;  %v10578_v20 = vld [vmem:[%s13091_s12 + $0x78c] ss:$56 sps:$4 sm:$0xff]  }
 0x427   : > { %7846 = vmatprep.subr.bf16.mxu1 %v10500_v26  ;;  %v10573_v26 = vld [vmem:[%s13091_s12 + $0x6b8] ss:$56 sps:$4 sm:$0xff]  }
 0x428   : > { %7974 = vmatpush2.bf16.msra.mxu0 %v10495_v28  ;;  %v10581_v28 = vld [vmem:[%s13091_s12 + $0x64c] ss:$56 sps:$4 sm:$0xff]  }
 0x429   : > { %7975 = vmatprep.subr.bf16.mxu0 %v10503_v30  ;;  %v10576_v30 = vld [vmem:[%s13091_s12 + $0x788] ss:$56 sps:$4 sm:$0xff]  }
 0x42a   : > { %7847 = vmatpush2.bf16.msra.mxu1 %v10498_v62  ;;  %v10584_v62 = vld [vmem:[%s13091_s12 + $0x71c] ss:$56 sps:$4 sm:$0xff]  }
 0x42b   : > { %7848 = vmatprep.subr.bf16.mxu1 %v10506_v32  ;;  %v10579_v32 = vld [vmem:[%s13091_s12 + $0x648] ss:$56 sps:$4 sm:$0xff]  }
 0x42c   : > { %7976 = vmatpush2.bf16.msra.mxu0 %v10501_v5  ;;  %v10587_v5 = vld [vmem:[%s13091_s12 + $0x5dc] ss:$56 sps:$4 sm:$0xff]  }
 0x42d   : > { %7977 = vmatprep.subr.bf16.mxu0 %v10509_v40  ;;  %v10582_v40 = vld [vmem:[%s13091_s12 + $0x718] ss:$56 sps:$4 sm:$0xff]  }
 0x42e   : > { %7849 = vmatpush2.bf16.msra.mxu1 %v10504_v41  ;;  %v10590_v41 = vld [vmem:[%s13091_s12 + $0xdac] ss:$56 sps:$4 sm:$0xff]  }
 0x42f   : > { %7850 = vmatprep.subr.bf16.mxu1 %v10512_v33  ;;  %v10585_v33 = vld [vmem:[%s13091_s12 + $0x5d8] ss:$56 sps:$4 sm:$0xff]  }
 0x430   : > { %7978 = vmatpush2.bf16.msra.mxu0 %v10507_v35  ;;  %v10593_v35 = vld [vmem:[%s13091_s12 + $0x56c] ss:$56 sps:$4 sm:$0xff]  }
 0x431   : > { %7979 = vmatprep.subr.bf16.mxu0 %v10515_v36  ;;  %v10588_v36 = vld [vmem:[%s13091_s12 + $0xda8] ss:$56 sps:$4 sm:$0xff]  }
 0x432   : > { %7851 = vmatpush2.bf16.msra.mxu1 %v10510_v31  ;;  %v10596_v31 = vld [vmem:[%s13091_s12 + $0xd3c] ss:$56 sps:$4 sm:$0xff]  }
 0x433   : > { %7852 = vmatprep.subr.bf16.mxu1 %v10518_v60  ;;  %v10591_v60 = vld [vmem:[%s13091_s12 + $0x568] ss:$56 sps:$4 sm:$0xff]  }
 0x434   : > { %7980 = vmatpush2.bf16.msra.mxu0 %v10513_v0  ;;  %v10599_v0 = vld [vmem:[%s13091_s12 + $0x4fc] ss:$56 sps:$4 sm:$0xff]  }
 0x435   : > { %7981 = vmatprep.subr.bf16.mxu0 %v10521_v45  ;;  %v10594_v45 = vld [vmem:[%s13091_s12 + $0xd38] ss:$56 sps:$4 sm:$0xff]  }
 0x436   : > { %7853 = vmatpush2.bf16.msra.mxu1 %v10516_v24  ;;  %v10602_v24 = vld [vmem:[%s13091_s12 + $0xccc] ss:$56 sps:$4 sm:$0xff]  }
 0x437   : > { %7854 = vmatprep.subr.bf16.mxu1 %v10524_v44  ;;  %v10597_v44 = vld [vmem:[%s13091_s12 + $0x4f8] ss:$56 sps:$4 sm:$0xff]  }
 0x438   : > { %7982 = vmatpush2.bf16.msra.mxu0 %v10519_v47  ;;  %v10605_v47 = vld [vmem:[%s13091_s12 + $0x48c] ss:$56 sps:$4 sm:$0xff]  }
 0x439   : > { %8033 = vmatprep.subr.bf16.mxu0 %v10527_v48  ;;  %v10600_v48 = vld [vmem:[%s13091_s12 + $0xcc8] ss:$56 sps:$4 sm:$0xff]  }
 0x43a   : > { %7855 = vmatpush2.bf16.msra.mxu1 %v10522_v34  ;;  %v10608_v34 = vld [vmem:[%s13091_s12 + $0xc5c] ss:$56 sps:$4 sm:$0xff]  }
 0x43b   : > { %v13791_v3 = vpop.f32.mrf.mxu0  ;;  %7984 = vmatmul.mubr.bf16.vlgmr.msra.gmra.mxu0 %v13556_v8  ;;  %7856 = vmatprep.subr.bf16.mxu1 %v10530_v39  ;;  %v10603_v39 = vld [vmem:[%s13091_s12 + $0x488] ss:$56 sps:$4 sm:$0xff]  }
 0x43c   : > { %8034 = vmatpush1.bf16.msra.mxu0 %v10525_v56  ;;  %8065 = vmatprep.mubr.bf16.mxu0 %v13486_v38  ;;  %v10611_v56 = vld [vmem:[%s13091_s12 + $0x41c] ss:$56 sps:$4 sm:$0xff]  }
 0x43d   : > { %v13797_v13 = vpop.f32.mrf.mxu0  ;;  %8035 = vmatprep.subr.bf16.mxu0 %v10533_v52  ;;  %v10606_v52 = vld [vmem:[%s13091_s12 + $0xc58] ss:$56 sps:$4 sm:$0xff]  }
 0x43e   : > { %7857 = vmatpush2.bf16.msra.mxu1 %v10528_v54  ;;  %v10614_v54 = vld [vmem:[%s13091_s12 + $0xbec] ss:$56 sps:$4 sm:$0xff]  }
 0x43f   : > { %v7743_v59 = vpop.f32.mrf.mxu0  ;;  %7858 = vmatprep.subr.bf16.mxu1 %v10536_v55  ;;  %v10609_v55 = vld [vmem:[%s13091_s12 + $0x418] ss:$56 sps:$4 sm:$0xff]  }
 0x440   : > { %8036 = vmatpush1.bf16.msra.mxu0 %v10531_v57  ;;  %v10617_v57 = vld [vmem:[%s13091_s12 + $0x3ac] ss:$56 sps:$4 sm:$0xff]   ;;  %v10615_v59 = vld [vmem:[%s13091_s12 + $0x3a8] ss:$56 sps:$4 sm:$0xff]  }
 0x441   : > { %v7744_v63 = vpop.f32.mrf.mxu0  ;;  %8037 = vmatprep.subr.bf16.mxu0 %v10539_v18  ;;  %v10612_v18 = vld [vmem:[%s13091_s12 + $0xbe8] ss:$56 sps:$4 sm:$0xff]  }
 0x442   : > { %7859 = vmatpush2.bf16.msra.mxu1 %v10534_v58  ;;  %v10620_v58 = vld [vmem:[%s13091_s12 + $0xb7c] ss:$56 sps:$4 sm:$0xff]   ;;  %v10626_v63 = vld [vmem:[%s13091_s12 + $0xb0c] ss:$56 sps:$4 sm:$0xff]  }
 0x443   : > { %7910 = vmatprep.subr.bf16.mxu1 %v10542_v42  ;;  %v10623_v42 = vld [vmem:[%s13091_s12 + $0x344] ss:$56 sps:$4 sm:$0xff]  }
 0x444   : > { %8038 = vmatpush1.bf16.msra.mxu0 %v10537_v61  ;;  %v10618_v61 = vld [vmem:[%s13091_s12 + $0xb78] ss:$56 sps:$4 sm:$0xff]  }
 0x445   : > { %7861 = vmatmul.mubr.bf16.vlgmr.msra.gmra.mxu1 %v13658_v46  ;;  %8039 = vmatprep.subr.bf16.mxu0 %v10545_v1  ;;  %v10621_v1 = vld [vmem:[%s13091_s12 + $0x340] ss:$56 sps:$4 sm:$0xff]  }
 0x446   : > { %7911 = vmatpush1.bf16.msra.mxu1 %v10540_v2  ;;  %7942 = vmatprep.mubr.bf16.mxu1 %v13655_v43  ;;  %v10629_v2 = vld [vmem:[%s13091_s12 + $0x2d4] ss:$56 sps:$4 sm:$0xff]  }
 0x447   : > { %7912 = vmatprep.subr.bf16.mxu1 %v10548_v27  ;;  %v10624_v27 = vld [vmem:[%s13091_s12 + $0xb08] ss:$56 sps:$4 sm:$0xff]  }
 0x448   : > { %8040 = vmatpush1.bf16.msra.mxu0 %v10543_v17 }
 0x449   : > { %8041 = vmatprep.subr.bf16.mxu0 %v10551_v50  ;;  %v10632_v50 = vld [vmem:[%s13091_s12 + $0xa9c] ss:$56 sps:$4 sm:$0xff]  }
 0x44a   : > { %7913 = vmatpush1.bf16.msra.mxu1 %v10546_v23  ;;  %v10627_v23 = vld [vmem:[%s13091_s12 + $0x2d0] ss:$56 sps:$4 sm:$0xff]  }
 0x44b   : > { %7914 = vmatprep.subr.bf16.mxu1 %v10554_v4 }
 0x44c   : > { %8042 = vmatpush1.bf16.msra.mxu0 %v10549_v7  ;;  %v10635_v7 = vld [vmem:[%s13091_s12 + $0x264] ss:$56 sps:$4 sm:$0xff]  }
 0x44d   : > { %8043 = vmatprep.subr.bf16.mxu0 %v10557_v37  ;;  %v10630_v37 = vld [vmem:[%s13091_s12 + $0xa98] ss:$56 sps:$4 sm:$0xff]  }
 0x44e   : > { %7915 = vmatpush1.bf16.msra.mxu1 %v10552_v9 }
 0x44f   : > { %7916 = vmatprep.subr.bf16.mxu1 %v10560_v53  ;;  %v10638_v53 = vld [vmem:[%s13091_s12 + $0xa34] ss:$56 sps:$4 sm:$0xff]  }
 0x450   : > { %8044 = vmatpush1.bf16.msra.mxu0 %v10555_v10  ;;  %v10633_v10 = vld [vmem:[%s13091_s12 + $0x260] ss:$56 sps:$4 sm:$0xff]  }
 0x451   : > { %8045 = vmatprep.subr.bf16.mxu0 %v10563_v11 }
 0x452   : > { %7917 = vmatpush1.bf16.msra.mxu1 %v10558_v12  ;;  %v10636_v12 = vld [vmem:[%s13091_s12 + $0xa30] ss:$56 sps:$4 sm:$0xff]  }
 0x453   : > { %7918 = vmatprep.subr.bf16.mxu1 %v10566_v14  ;;  %v10644_v14 = vld [vmem:[%s13091_s12 + $0x9c4] ss:$56 sps:$4 sm:$0xff]  }
 0x454   : > { %8046 = vmatpush1.bf16.msra.mxu0 %v10561_v15  ;;  %v10639_v15 = vld [vmem:[%s13091_s12 + $0x1f0] ss:$56 sps:$4 sm:$0xff]  }
 0x455   : > { %8047 = vmatprep.subr.bf16.mxu0 %v10569_v16 }
 0x456   : > { %7919 = vmatpush1.bf16.msra.mxu1 %v10564_v19  ;;  %v10647_v19 = vld [vmem:[%s13091_s12 + $0x184] ss:$56 sps:$4 sm:$0xff]  }
 0x457   : > { %7920 = vmatprep.subr.bf16.mxu1 %v10572_v21  ;;  %v10642_v21 = vld [vmem:[%s13091_s12 + $0x9c0] ss:$56 sps:$4 sm:$0xff]  }
 0x458   : > { %8048 = vmatpush1.bf16.msra.mxu0 %v10567_v22 }
 0x459   : > { %8049 = vmatprep.subr.bf16.mxu0 %v10575_v25  ;;  %v10650_v25 = vld [vmem:[%s13091_s12 + $0x954] ss:$56 sps:$4 sm:$0xff]  }
 0x45a   : > { %7921 = vmatpush1.bf16.msra.mxu1 %v10570_v6 }
 0x45b   : > { %7922 = vmatprep.subr.bf16.mxu1 %v10578_v20 }
 0x45c   : > { %8050 = vmatpush2.bf16.msra.mxu0 %v10573_v26  ;;  %v10645_v26 = vld [vmem:[%s13091_s12 + $0x180] ss:$56 sps:$4 sm:$0xff]  }
 0x45d   : > { %8051 = vmatprep.subr.bf16.mxu0 %v10581_v28 }
 0x45e   : > { %7923 = vmatpush1.bf16.msra.mxu1 %v10576_v30  ;;  %v10653_v30 = vld [vmem:[%s13091_s12 + $0x114] ss:$56 sps:$4 sm:$0xff]  }
 0x45f   : > { %7924 = vmatprep.subr.bf16.mxu1 %v10584_v62 }
 0x460   : > { %8052 = vmatpush2.bf16.msra.mxu0 %v10579_v32  ;;  %v10648_v32 = vld [vmem:[%s13091_s12 + $0x950] ss:$56 sps:$4 sm:$0xff]  }
 0x461   : > { %8053 = vmatprep.subr.bf16.mxu0 %v10587_v5  ;;  %v10656_v5 = vld [vmem:[%s13091_s12 + $0x8e4] ss:$56 sps:$4 sm:$0xff]  }
 0x462   : > { %7925 = vmatpush1.bf16.msra.mxu1 %v10582_v40  ;;  %v10659_v40 = vld [vmem:[%s13091_s12 + $0xa4] ss:$56 sps:$4 sm:$0xff]  }
 0x463   : > { %7926 = vmatprep.subr.bf16.mxu1 %v10590_v41  ;;  %v10654_v41 = vld [vmem:[%s13091_s12 + $0x8e0] ss:$56 sps:$4 sm:$0xff]  }
 0x464   : > { %8054 = vmatpush2.bf16.msra.mxu0 %v10585_v33  ;;  %v10662_v33 = vld [vmem:[%s13091_s12 + $0x874] ss:$56 sps:$4 sm:$0xff]  }
 0x465   : > { %8055 = vmatprep.subr.bf16.mxu0 %v10593_v35  ;;  %v10657_v35 = vld [vmem:[%s13091_s12 + $0xa0] ss:$56 sps:$4 sm:$0xff]  }
 0x466   : > { %7927 = vmatpush2.bf16.msra.mxu1 %v10588_v36  ;;  %v10665_v36 = vld [vmem:[%s13091_s12 + $0x34] ss:$56 sps:$4 sm:$0xff]  }
 0x467   : > { %7928 = vmatprep.subr.bf16.mxu1 %v10596_v31  ;;  %v10660_v31 = vld [vmem:[%s13091_s12 + $0x870] ss:$56 sps:$4 sm:$0xff]  }
 0x468   : > { %8056 = vmatpush2.bf16.msra.mxu0 %v10591_v60  ;;  %v10668_v60 = vld [vmem:[%s13091_s12 + $0x804] ss:$56 sps:$4 sm:$0xff]  }
 0x469   : > { %8057 = vmatprep.subr.bf16.mxu0 %v10599_v0  ;;  %v10663_v0 = vld [vmem:[%s13091_s12 + $0x30] ss:$56 sps:$4 sm:$0xff]  }
 0x46a   : > { %7929 = vmatpush2.bf16.msra.mxu1 %v10594_v45  ;;  %v10671_v45 = vld [vmem:[%s13091_s12 + $0x6c4] ss:$56 sps:$4 sm:$0xff]  }
 0x46b   : > { %7930 = vmatprep.subr.bf16.mxu1 %v10602_v24  ;;  %v10666_v24 = vld [vmem:[%s13091_s12 + $0x800] ss:$56 sps:$4 sm:$0xff]  }
 0x46c   : > { %8058 = vmatpush2.bf16.msra.mxu0 %v10597_v44  ;;  %v10674_v44 = vld [vmem:[%s13091_s12 + $0x794] ss:$56 sps:$4 sm:$0xff]  }
 0x46d   : > { %8059 = vmatprep.subr.bf16.mxu0 %v10605_v47  ;;  %v10669_v47 = vld [vmem:[%s13091_s12 + $0x6c0] ss:$56 sps:$4 sm:$0xff]  }
 0x46e   : > { %7931 = vmatpush2.bf16.msra.mxu1 %v10600_v48  ;;  %v10677_v48 = vld [vmem:[%s13091_s12 + $0x654] ss:$56 sps:$4 sm:$0xff]  }
 0x46f   : > { %7932 = vmatprep.subr.bf16.mxu1 %v10608_v34  ;;  %v10672_v34 = vld [vmem:[%s13091_s12 + $0x790] ss:$56 sps:$4 sm:$0xff]  }
 0x470   : > { %8060 = vmatpush2.bf16.msra.mxu0 %v10603_v39  ;;  %v10680_v39 = vld [vmem:[%s13091_s12 + $0x724] ss:$56 sps:$4 sm:$0xff]  }
 0x471   : > { %8061 = vmatprep.subr.bf16.mxu0 %v10611_v56  ;;  %v10675_v56 = vld [vmem:[%s13091_s12 + $0x650] ss:$56 sps:$4 sm:$0xff]  }
 0x472   : > { %7933 = vmatpush2.bf16.msra.mxu1 %v10606_v52  ;;  %v10683_v52 = vld [vmem:[%s13091_s12 + $0x5e4] ss:$56 sps:$4 sm:$0xff]  }
 0x473   : > { %7934 = vmatprep.subr.bf16.mxu1 %v10614_v54  ;;  %v10678_v54 = vld [vmem:[%s13091_s12 + $0x720] ss:$56 sps:$4 sm:$0xff]  }
 0x474   : > { %8062 = vmatpush2.bf16.msra.mxu0 %v10609_v55  ;;  %v10686_v55 = vld [vmem:[%s13091_s12 + $0xdb4] ss:$56 sps:$4 sm:$0xff]  }
 0x475   : > { %8063 = vmatprep.subr.bf16.mxu0 %v10617_v57  ;;  %v10681_v57 = vld [vmem:[%s13091_s12 + $0x5e0] ss:$56 sps:$4 sm:$0xff]  }
 0x476   : > { %7935 = vmatpush2.bf16.msra.mxu1 %v10612_v18  ;;  %v10689_v18 = vld [vmem:[%s13091_s12 + $0x574] ss:$56 sps:$4 sm:$0xff]  }
 0x477   : > { %7936 = vmatprep.subr.bf16.mxu1 %v10620_v58  ;;  %v10684_v58 = vld [vmem:[%s13091_s12 + $0xdb0] ss:$56 sps:$4 sm:$0xff]  }
 0x478   : > { %8064 = vmatpush2.bf16.msra.mxu0 %v10615_v59  ;;  %v10692_v59 = vld [vmem:[%s13091_s12 + $0xd44] ss:$56 sps:$4 sm:$0xff]  }
 0x479   : > { %8115 = vmatprep.subr.bf16.mxu0 %v10623_v42  ;;  %v10687_v42 = vld [vmem:[%s13091_s12 + $0x570] ss:$56 sps:$4 sm:$0xff]  }
 0x47a   : > { %7937 = vmatpush2.bf16.msra.mxu1 %v10618_v61  ;;  %v10695_v61 = vld [vmem:[%s13091_s12 + $0x504] ss:$56 sps:$4 sm:$0xff]  }
 0x47b   : > { %v13863_v17 = vpop.f32.mrf.mxu0  ;;  %8066 = vmatmul.mubr.bf16.vlgmr.msra.gmra.mxu0 %v13556_v8  ;;  %7938 = vmatprep.subr.bf16.mxu1 %v10626_v63  ;;  %v10690_v63 = vld [vmem:[%s13091_s12 + $0xd40] ss:$56 sps:$4 sm:$0xff]  }
 0x47c   : > { %8116 = vmatpush1.bf16.msra.mxu0 %v10621_v1  ;;  %8147 = vmatprep.mubr.bf16.mxu0 %v13486_v38  ;;  %v10641_v38 = vld [vmem:[%s13091_s12 + $0x1f4] ss:$56 sps:$4 sm:$0xff]  }
 0x47d   : > { %v13869_v4 = vpop.f32.mrf.mxu0  ;;  %8117 = vmatprep.subr.bf16.mxu0 %v10629_v2  ;;  %v10698_v1 = vld [vmem:[%s13091_s12 + $0xcd4] ss:$56 sps:$4 sm:$0xff]   ;;  %v10693_v2 = vld [vmem:[%s13091_s12 + $0x500] ss:$56 sps:$4 sm:$0xff]  }
 0x47e   : > { %7939 = vmatpush2.bf16.msra.mxu1 %v10624_v27  ;;  %v10701_v27 = vld [vmem:[%s13091_s12 + $0x494] ss:$56 sps:$4 sm:$0xff]  }
 0x47f   : > { %v7825_v9 = vpop.f32.mrf.mxu0  ;;  %7940 = vmatprep.subr.bf16.mxu1 %v10632_v50  ;;  %v10696_v50 = vld [vmem:[%s13091_s12 + $0xcd0] ss:$56 sps:$4 sm:$0xff]  }
 0x480   : > { %8118 = vmatpush1.bf16.msra.mxu0 %v10627_v23  ;;  %v10704_v23 = vld [vmem:[%s13091_s12 + $0xc64] ss:$56 sps:$4 sm:$0xff]   ;;  %v10702_v9 = vld [vmem:[%s13091_s12 + $0xc60] ss:$56 sps:$4 sm:$0xff]  }
 0x481   : > { %v7826_v11 = vpop.f32.mrf.mxu0  ;;  %8119 = vmatprep.subr.bf16.mxu0 %v10635_v7  ;;  %v10699_v7 = vld [vmem:[%s13091_s12 + $0x490] ss:$56 sps:$4 sm:$0xff]  }
 0x482   : > { %7941 = vmatpush2.bf16.msra.mxu1 %v10630_v37  ;;  %v10707_v37 = vld [vmem:[%s13091_s12 + $0x424] ss:$56 sps:$4 sm:$0xff]   ;;  %v10713_v11 = vld [vmem:[%s13091_s12 + $0x3b4] ss:$56 sps:$4 sm:$0xff]  }
 0x483   : > { %7992 = vmatprep.subr.bf16.mxu1 %v10638_v53  ;;  %v10710_v53 = vld [vmem:[%s13091_s12 + $0xbf4] ss:$56 sps:$4 sm:$0xff]  }
 0x484   : > { %8120 = vmatpush1.bf16.msra.mxu0 %v10633_v10  ;;  %v10705_v10 = vld [vmem:[%s13091_s12 + $0x420] ss:$56 sps:$4 sm:$0xff]  }
 0x485   : > { %7943 = vmatmul.mubr.bf16.vlgmr.msra.gmra.mxu1 %v13658_v46  ;;  %v7698_v16 = vpop.f32.mrf.mxu1  ;;  %8121 = vmatprep.subr.bf16.mxu0 %v10641_v38  ;;  %v10708_v38 = vld [vmem:[%s13091_s12 + $0xbf0] ss:$56 sps:$4 sm:$0xff]  }
 0x486   : > { %7993 = vmatpush1.bf16.msra.mxu1 %v10636_v12  ;;  %8024 = vmatprep.mubr.bf16.mxu1 %v13655_v43  ;;  %v13885_v6 = vadd.f32 %v7698_v16, %v13719_v51  ;;  %v10716_v12 = vld [vmem:[%s13091_s12 + $0xb84] ss:$56 sps:$4 sm:$0xff]   ;;  %v10719_v16 = vld [vmem:[%s13091_s12 + $0xb14] ss:$56 sps:$4 sm:$0xff]  }
 0x487   : > { %v7700_v22 = vpop.f32.mrf.mxu1  ;;  %7994 = vmatprep.subr.bf16.mxu1 %v10644_v14  ;;  %v10711_v14 = vld [vmem:[%s13091_s12 + $0x3b0] ss:$56 sps:$4 sm:$0xff]  }
 0x488   : > { %v13888_v20 = vadd.f32 %v7700_v22, %v13725_v29  ;;  %8122 = vmatpush1.bf16.msra.mxu0 %v10639_v15  ;;  %v10651_v29 = vld [vmem:[%s13091_s12 + $0x110] ss:$56 sps:$4 sm:$0xff]   ;;  %v10714_v15 = vld [vmem:[%s13091_s12 + $0xb80] ss:$56 sps:$4 sm:$0xff]   ;;  %v10722_v22 = vld [vmem:[%s13091_s12 + $0xaa4] ss:$56 sps:$4 sm:$0xff]  }
 0x489   : > { %v7702_v28 = vpop.f32.mrf.mxu1  ;;  %8123 = vmatprep.subr.bf16.mxu0 %v10647_v19  ;;  %v10717_v19 = vld [vmem:[%s13091_s12 + $0xb10] ss:$56 sps:$4 sm:$0xff]  }
 0x48a   : > { %v9340_v62 = vpack.c.bf16 %v13888_v20, %v13885_v6  ;;  %7995 = vmatpush1.bf16.msra.mxu1 %v10642_v21  ;;  %v10740_v6 = vld [vmem:[%s13091_s12 + $0x80c] ss:$56 sps:$4 sm:$0xff]   ;;  %v10738_v20 = vld [vmem:[%s13091_s12 + $0x808] ss:$56 sps:$4 sm:$0xff]  }
 0x48b   : > { %v7703_v51 = vpop.f32.mrf.mxu1  ;;  %7996 = vmatprep.subr.bf16.mxu1 %v10650_v25 }
 0x48c   : > { %8124 = vmatpush1.bf16.msra.mxu0 %v10645_v26  ;;  %v10720_v26 = vld [vmem:[%s13091_s12 + $0xaa0] ss:$56 sps:$4 sm:$0xff]  }
 0x48d   : > { %8125 = vmatprep.subr.bf16.mxu0 %v10653_v30  ;;  %v10725_v30 = vld [vmem:[%s13091_s12 + $0xa3c] ss:$56 sps:$4 sm:$0xff]   ;;  %v10723_v51 = vld [vmem:[%s13091_s12 + $0xa38] ss:$56 sps:$4 sm:$0xff]  }
 0x48e   : > { %7997 = vmatpush1.bf16.msra.mxu1 %v10648_v32 }
 0x48f   : > { %7998 = vmatprep.subr.bf16.mxu1 %v10656_v5  ;;  %v10728_v5 = vld [vmem:[%s13091_s12 + $0x9cc] ss:$56 sps:$4 sm:$0xff]  }
 0x490   : > { %8126 = vmatpush1.bf16.msra.mxu0 %v10651_v29 }
 0x491   : > { %8127 = vmatprep.subr.bf16.mxu0 %v10659_v40 }
 0x492   : > { %7999 = vmatpush1.bf16.msra.mxu1 %v10654_v41  ;;  %v10731_v41 = vld [vmem:[%s13091_s12 + $0x95c] ss:$56 sps:$4 sm:$0xff]  }
 0x493   : > { %8000 = vmatprep.subr.bf16.mxu1 %v10662_v33 }
 0x494   : > { %8128 = vmatpush1.bf16.msra.mxu0 %v10657_v35 }
 0x495   : > { %8129 = vmatprep.subr.bf16.mxu0 %v10665_v36 }
 0x496   : > { %8001 = vmatpush1.bf16.msra.mxu1 %v10660_v31 }
 0x497   : > { %8002 = vmatprep.subr.bf16.mxu1 %v10668_v60  ;;  %v10729_v60 = vld [vmem:[%s13091_s12 + $0x958] ss:$56 sps:$4 sm:$0xff]  }
 0x498   : > { %8130 = vmatpush1.bf16.msra.mxu0 %v10663_v0 }
 0x499   : > { %8131 = vmatprep.subr.bf16.mxu0 %v10671_v45  ;;  %v10734_v45 = vld [vmem:[%s13091_s12 + $0x8ec] ss:$56 sps:$4 sm:$0xff]  }
 0x49a   : > { %8003 = vmatpush1.bf16.msra.mxu1 %v10666_v24  ;;  %v13962_v24 = vrot.slane %v9340_v62, %v11932_v49  ;;  %v10743_v62 = vld [vmem:[%s13091_s12 + $0x79c] ss:$56 sps:$4 sm:$0xff]  }
 0x49b   : > { %8004 = vmatprep.subr.bf16.mxu1 %v10674_v44  ;;  %v10732_v44 = vld [vmem:[%s13091_s12 + $0x8e8] ss:$56 sps:$4 sm:$0xff]  }
 0x49c   : > { %8132 = vmatpush2.bf16.msra.mxu0 %v10669_v47  ;;  %v10737_v47 = vld [vmem:[%s13091_s12 + $0x87c] ss:$56 sps:$4 sm:$0xff]  }
 0x49d   : > { %8133 = vmatprep.subr.bf16.mxu0 %v10677_v48  ;;  %v10735_v48 = vld [vmem:[%s13091_s12 + $0x878] ss:$56 sps:$4 sm:$0xff]  }
 0x49e   : > { %8005 = vmatpush1.bf16.msra.mxu1 %v10672_v34  ;;  %v10741_v34 = vld [vmem:[%s13091_s12 + $0x798] ss:$56 sps:$4 sm:$0xff]  }
 0x49f   : > { %8006 = vmatprep.subr.bf16.mxu1 %v10680_v39  ;;  %v10746_v39 = vld [vmem:[%s13091_s12 + $0x72c] ss:$56 sps:$4 sm:$0xff]  }
 0x4a0   : > { %8134 = vmatpush2.bf16.msra.mxu0 %v10675_v56  ;;  %v10744_v56 = vld [vmem:[%s13091_s12 + $0x728] ss:$56 sps:$4 sm:$0xff]  }
 0x4a1   : > { %8135 = vmatprep.subr.bf16.mxu0 %v10683_v52  ;;  %v10749_v52 = vld [vmem:[%s13091_s12 + $0xdbc] ss:$56 sps:$4 sm:$0xff]  }
 0x4a2   : > { %8007 = vmatpush1.bf16.msra.mxu1 %v10678_v54  ;;  %v10747_v54 = vld [vmem:[%s13091_s12 + $0xdb8] ss:$56 sps:$4 sm:$0xff]  }
 0x4a3   : > { %8008 = vmatprep.subr.bf16.mxu1 %v10686_v55  ;;  %v10752_v55 = vld [vmem:[%s13091_s12 + $0xd4c] ss:$56 sps:$4 sm:$0xff]  }
 0x4a4   : > { %8136 = vmatpush2.bf16.msra.mxu0 %v10681_v57  ;;  %v10750_v57 = vld [vmem:[%s13091_s12 + $0xd48] ss:$56 sps:$4 sm:$0xff]  }
 0x4a5   : > { %8137 = vmatprep.subr.bf16.mxu0 %v10689_v18  ;;  %v10755_v18 = vld [vmem:[%s13091_s12 + $0xcdc] ss:$56 sps:$4 sm:$0xff]  }
 0x4a6   : > { %8009 = vmatpush2.bf16.msra.mxu1 %v10684_v58  ;;  %v10753_v58 = vld [vmem:[%s13091_s12 + $0xcd8] ss:$56 sps:$4 sm:$0xff]  }
 0x4a7   : > { %8010 = vmatprep.subr.bf16.mxu1 %v10692_v59  ;;  %v10758_v59 = vld [vmem:[%s13091_s12 + $0xc6c] ss:$56 sps:$4 sm:$0xff]  }
 0x4a8   : > { %8138 = vmatpush2.bf16.msra.mxu0 %v10687_v42  ;;  %v10756_v42 = vld [vmem:[%s13091_s12 + $0xc68] ss:$56 sps:$4 sm:$0xff]  }
 0x4a9   : > { %8139 = vmatprep.subr.bf16.mxu0 %v10695_v61  ;;  %v10761_v61 = vld [vmem:[%s13091_s12 + $0xbfc] ss:$56 sps:$4 sm:$0xff]  }
 0x4aa   : > { %8011 = vmatpush2.bf16.msra.mxu1 %v10690_v63  ;;  %v10759_v63 = vld [vmem:[%s13091_s12 + $0xbf8] ss:$56 sps:$4 sm:$0xff]  }
 0x4ab   : > { %8012 = vmatprep.subr.bf16.mxu1 %v10698_v1  ;;  %v10764_v1 = vld [vmem:[%s13091_s12 + $0xb8c] ss:$56 sps:$4 sm:$0xff]  }
 0x4ac   : > { %8140 = vmatpush2.bf16.msra.mxu0 %v10693_v2  ;;  %v10762_v2 = vld [vmem:[%s13091_s12 + $0xb88] ss:$56 sps:$4 sm:$0xff]  }
 0x4ad   : > { %8141 = vmatprep.subr.bf16.mxu0 %v10701_v27  ;;  %v10767_v27 = vld [vmem:[%s13091_s12 + $0xb1c] ss:$56 sps:$4 sm:$0xff]  }
 0x4ae   : > { %8013 = vmatpush2.bf16.msra.mxu1 %v10696_v50  ;;  %v10765_v50 = vld [vmem:[%s13091_s12 + $0xb18] ss:$56 sps:$4 sm:$0xff]  }
 0x4af   : > { %8014 = vmatprep.subr.bf16.mxu1 %v10704_v23 }
 0x4b0   : > { %8142 = vmatpush2.bf16.msra.mxu0 %v10699_v7  ;;  %v10770_v7 = vld [vmem:[%s13091_s12 + $0xaac] ss:$56 sps:$4 sm:$0xff]  }
 0x4b1   : > { %8143 = vmatprep.subr.bf16.mxu0 %v10707_v37 }
 0x4b2   : > { %8015 = vmatpush2.bf16.msra.mxu1 %v10702_v9  ;;  %v10768_v9 = vld [vmem:[%s13091_s12 + $0xaa8] ss:$56 sps:$4 sm:$0xff]  }
 0x4b3   : > { %8016 = vmatprep.subr.bf16.mxu1 %v10710_v53 }
 0x4b4   : > { %8144 = vmatpush2.bf16.msra.mxu0 %v10705_v10  ;;  %v10773_v10 = vld [vmem:[%s13091_s12 + $0xa44] ss:$56 sps:$4 sm:$0xff]  }
 0x4b5   : > { %8145 = vmatprep.subr.bf16.mxu0 %v10713_v11 }
 0x4b6   : > { %8017 = vmatpush2.bf16.msra.mxu1 %v10708_v38  ;;  %v10771_v38 = vld [vmem:[%s13091_s12 + $0xa40] ss:$56 sps:$4 sm:$0xff]  }
 0x4b7   : > { %8018 = vmatprep.subr.bf16.mxu1 %v10716_v12  ;;  %v10776_v12 = vld [vmem:[%s13091_s12 + $0x9d4] ss:$56 sps:$4 sm:$0xff]  }
 0x4b8   : > { %8146 = vmatpush2.bf16.msra.mxu0 %v10711_v14 }
 0x4ba   : > { %8019 = vmatpush2.bf16.msra.mxu1 %v10714_v15  ;;  %v10774_v15 = vld [vmem:[%s13091_s12 + $0x9d0] ss:$56 sps:$4 sm:$0xff]  }
 0x4bb   : > { %v13940_v21 = vpop.f32.mrf.mxu0  ;;  %8148 = vmatmul.mubr.bf16.vlgmr.msra.gmra.mxu0 %v13556_v8  ;;  %8020 = vmatprep.subr.bf16.mxu1 %v10719_v16  ;;  %v10726_v8 = vld [vmem:[%s13091_s12 + $0x9c8] ss:$56 sps:$4 sm:$0xff]  }
 0x4bd   : > { %v13944_v25 = vpop.f32.mrf.mxu0 }
 0x4be   : > { %8021 = vmatpush2.bf16.msra.mxu1 %v10717_v19  ;;  %v10779_v19 = vld [vmem:[%s13091_s12 + $0x964] ss:$56 sps:$4 sm:$0xff]  }
 0x4bf   : > { %v7907_v28 = vpop.f32.mrf.mxu0  ;;  %8022 = vmatprep.subr.bf16.mxu1 %v10722_v22 }
 0x4c1   : > { %v7908_v32 = vpop.f32.mrf.mxu0 }
 0x4c2   : > { %8023 = vmatpush2.bf16.msra.mxu1 %v10720_v26 }
 0x4c3   : > { %8074 = vmatprep.subr.bf16.mxu1 %v10725_v30 }
 0x4c5   : > { %v7780_v29 = vpop.f32.mrf.mxu1  ;;  %8025 = vmatmul.mubr.bf16.vlgmr.msra.gmra.mxu1 %v13658_v46 }
 0x4c6   : > { %8075 = vmatpush1.bf16.msra.mxu1 %v10723_v51  ;;  %8106 = vmatprep.mubr.bf16.mxu1 %v13655_v43  ;;  %v7781_v33 = vadd.f32 %v7780_v29, %v13791_v3  ;;  %v10782_v51 = vld [vmem:[%s13091_s12 + $0x8f4] ss:$56 sps:$4 sm:$0xff]  }
 0x4c7   : > { %v7782_v40 = vpop.f32.mrf.mxu1  ;;  %8076 = vmatprep.subr.bf16.mxu1 %v10728_v5  ;;  %v10785_v5 = vld [vmem:[%s13091_s12 + $0x884] ss:$56 sps:$4 sm:$0xff]   ;;  %v10788_v29 = vld [vmem:[%s13091_s12 + $0x814] ss:$56 sps:$4 sm:$0xff]  }
 0x4c8   : > { %v7783_v35 = vadd.f32 %v7782_v40, %v13797_v13  ;;  %v10791_v40 = vld [vmem:[%s13091_s12 + $0x7a4] ss:$56 sps:$4 sm:$0xff]  }
 0x4c9   : > { %v7784_v36 = vpop.f32.mrf.mxu1 }
 0x4ca   : > { %v9341_v31 = vpack.c.bf16 %v7783_v35, %v7781_v33  ;;  %8077 = vmatpush1.bf16.msra.mxu1 %v10726_v8  ;;  %v10786_v8 = vld [vmem:[%s13091_s12 + $0x810] ss:$56 sps:$4 sm:$0xff]   ;;  %v10794_v33 = vld [vmem:[%s13091_s12 + $0x734] ss:$56 sps:$4 sm:$0xff]   ;;  %v10797_v36 = vld [vmem:[%s13091_s12 + $0xdc4] ss:$56 sps:$4 sm:$0xff]  }
 0x4cb   : > { %v7785_v0 = vpop.f32.mrf.mxu1  ;;  %8078 = vmatprep.subr.bf16.mxu1 %v10731_v41  ;;  %v10789_v41 = vld [vmem:[%s13091_s12 + $0x7a0] ss:$56 sps:$4 sm:$0xff]   ;;  %v10792_v35 = vld [vmem:[%s13091_s12 + $0x730] ss:$56 sps:$4 sm:$0xff]  }
 0x4cc   : > { %v13965_v3 = vrot.slane %v9341_v31, %v11932_v49  ;;  %v10795_v31 = vld [vmem:[%s13091_s12 + $0xdc0] ss:$56 sps:$4 sm:$0xff]   ;;  %v10798_v0 = vld [vmem:[%s13091_s12 + $0xd50] ss:$56 sps:$4 sm:$0xff]  }
 0x4ce   : > { %v8257_v13 = vcombine.low %v13962_v24, %v13965_v3  ;;  %8079 = vmatpush1.bf16.msra.mxu1 %v10729_v60  ;;  %v10800_v60 = vld [vmem:[%s13091_s12 + $0xd54] ss:$56 sps:$4 sm:$0xff]  }
 0x4cf   : > { %8080 = vmatprep.subr.bf16.mxu1 %v10734_v45  ;;  %v10803_v45 = vld [vmem:[%s13091_s12 + $0xce4] ss:$56 sps:$4 sm:$0xff]  }
 0x4d2   : > { %8081 = vmatpush1.bf16.msra.mxu1 %v10732_v44  ;;  %v10801_v44 = vld [vmem:[%s13091_s12 + $0xce0] ss:$56 sps:$4 sm:$0xff]  }
 0x4d3   : > { %8082 = vmatprep.subr.bf16.mxu1 %v10737_v47  ;;  %v10806_v47 = vld [vmem:[%s13091_s12 + $0xc74] ss:$56 sps:$4 sm:$0xff]  }
 0x4d6   : > { %8083 = vmatpush1.bf16.msra.mxu1 %v10735_v48  ;;  %v10804_v48 = vld [vmem:[%s13091_s12 + $0xc70] ss:$56 sps:$4 sm:$0xff]  }
 0x4d7   : > { %8084 = vmatprep.subr.bf16.mxu1 %v10740_v6  ;;  %v10809_v6 = vld [vmem:[%s13091_s12 + $0xc04] ss:$56 sps:$4 sm:$0xff]  }
 0x4da   : > { %8085 = vmatpush1.bf16.msra.mxu1 %v10738_v20  ;;  %v10807_v20 = vld [vmem:[%s13091_s12 + $0xc00] ss:$56 sps:$4 sm:$0xff]  }
 0x4db   : > { %8086 = vmatprep.subr.bf16.mxu1 %v10743_v62  ;;  %v10812_v62 = vld [vmem:[%s13091_s12 + $0xb94] ss:$56 sps:$4 sm:$0xff]  }
 0x4de   : > { %8087 = vmatpush1.bf16.msra.mxu1 %v10741_v34  ;;  %v10810_v34 = vld [vmem:[%s13091_s12 + $0xb90] ss:$56 sps:$4 sm:$0xff]  }
 0x4df   : > { %8088 = vmatprep.subr.bf16.mxu1 %v10746_v39  ;;  %v10815_v39 = vld [vmem:[%s13091_s12 + $0xb24] ss:$56 sps:$4 sm:$0xff]  }
 0x4e2   : > { %8089 = vmatpush1.bf16.msra.mxu1 %v10744_v56  ;;  %v10813_v56 = vld [vmem:[%s13091_s12 + $0xb20] ss:$56 sps:$4 sm:$0xff]  }
 0x4e3   : > { %8090 = vmatprep.subr.bf16.mxu1 %v10749_v52 }
 0x4e6   : > { %8091 = vmatpush2.bf16.msra.mxu1 %v10747_v54  ;;  %v10818_v54 = vld [vmem:[%s13091_s12 + $0xab4] ss:$56 sps:$4 sm:$0xff]  }
 0x4e7   : > { %8092 = vmatprep.subr.bf16.mxu1 %v10752_v55 }
 0x4ea   : > { %8093 = vmatpush2.bf16.msra.mxu1 %v10750_v57  ;;  %v10816_v57 = vld [vmem:[%s13091_s12 + $0xab0] ss:$56 sps:$4 sm:$0xff]  }
 0x4eb   : > { %8094 = vmatprep.subr.bf16.mxu1 %v10755_v18 }
 0x4ee   : > { %8095 = vmatpush2.bf16.msra.mxu1 %v10753_v58 }
 0x4ef   : > { %8096 = vmatprep.subr.bf16.mxu1 %v10758_v59 }
 0x4f2   : > { %8097 = vmatpush2.bf16.msra.mxu1 %v10756_v42 }
 0x4f3   : > { %8098 = vmatprep.subr.bf16.mxu1 %v10761_v61 }
 0x4f6   : > { %8099 = vmatpush2.bf16.msra.mxu1 %v10759_v63 }
 0x4f7   : > { %8100 = vmatprep.subr.bf16.mxu1 %v10764_v1 }
 0x4fa   : > { %8101 = vmatpush2.bf16.msra.mxu1 %v10762_v2 }
 0x4fb   : > { %v13992_v23 = vpop.f32.mrf.mxu0  ;;  %8102 = vmatprep.subr.bf16.mxu1 %v10767_v27 }
 0x4fd   : > { %v13995_v37 = vpop.f32.mrf.mxu0 }
 0x4fe   : > { %8103 = vmatpush2.bf16.msra.mxu1 %v10765_v50 }
 0x4ff   : > { %v7989_v53 = vpop.f32.mrf.mxu0  ;;  %8104 = vmatprep.subr.bf16.mxu1 %v10770_v7 }
 0x501   : > { %v7990_v11 = vpop.f32.mrf.mxu0 }
 0x502   : > { %8105 = vmatpush2.bf16.msra.mxu1 %v10768_v9 }
 0x503   : > { %8156 = vmatprep.subr.bf16.mxu1 %v10773_v10 }
 0x505   : > { %v7862_v14 = vpop.f32.mrf.mxu1  ;;  %8107 = vmatmul.mubr.bf16.vlgmr.msra.gmra.mxu1 %v13658_v46 }
 0x506   : > { %8157 = vmatpush1.bf16.msra.mxu1 %v10771_v38  ;;  %8188 = vmatprep.mubr.bf16.mxu1 %v13655_v43  ;;  %v14006_v22 = vadd.f32 %v7862_v14, %v13863_v17  ;;  %v10777_v43 = vld [vmem:[%s13091_s12 + $0x960] ss:$56 sps:$4 sm:$0xff]   ;;  %v10780_v17 = vld [vmem:[%s13091_s12 + $0x8f0] ss:$56 sps:$4 sm:$0xff]  }
 0x507   : > { %v7864_v16 = vpop.f32.mrf.mxu1  ;;  %8158 = vmatprep.subr.bf16.mxu1 %v10776_v12 }
 0x508   : > { %v14009_v26 = vadd.f32 %v7864_v16, %v13869_v4  ;;  %v10783_v4 = vld [vmem:[%s13091_s12 + $0x880] ss:$56 sps:$4 sm:$0xff]   ;;  %s14058_s12 = scalar_lea.vmem %s14082_s3, %s14087_s28 }
 0x509   : > { %v7866_v28 = vpop.f32.mrf.mxu1 }
 0x50a   : > { %v9342_v30 = vpack.c.bf16 %v14009_v26, %v14006_v22  ;;  %8159 = vmatpush1.bf16.msra.mxu1 %v10774_v15 }
 0x50b   : > { %v7867_v32 = vpop.f32.mrf.mxu1  ;;  %8160 = vmatprep.subr.bf16.mxu1 %v10779_v19 }
 0x50c   : > { %v8249_v50 = vrot.slane %v9342_v30, %v11932_v49 }
 0x50e   : > { %8161 = vmatpush1.bf16.msra.mxu1 %v10777_v43 }
 0x50f   : > { %8162 = vmatprep.subr.bf16.mxu1 %v10782_v51 }
 0x512   : > { %8163 = vmatpush1.bf16.msra.mxu1 %v10780_v17 }
 0x513   : > { %8164 = vmatprep.subr.bf16.mxu1 %v10785_v5 }
 0x516   : > { %8165 = vmatpush1.bf16.msra.mxu1 %v10783_v4 }
 0x517   : > { %8166 = vmatprep.subr.bf16.mxu1 %v10788_v29 }
 0x51a   : > { %8167 = vmatpush1.bf16.msra.mxu1 %v10786_v8 }
 0x51b   : > { %8168 = vmatprep.subr.bf16.mxu1 %v10791_v40 }
 0x51e   : > { %8169 = vmatpush1.bf16.msra.mxu1 %v10789_v41 }
 0x51f   : > { %8170 = vmatprep.subr.bf16.mxu1 %v10794_v33 }
 0x522   : > { %8171 = vmatpush1.bf16.msra.mxu1 %v10792_v35 }
 0x523   : > { %8172 = vmatprep.subr.bf16.mxu1 %v10797_v36 }
 0x526   : > { %8173 = vmatpush2.bf16.msra.mxu1 %v10795_v31 }
 0x527   : > { %8174 = vmatprep.subr.bf16.mxu1 %v10800_v60 }
 0x52a   : > { %8175 = vmatpush2.bf16.msra.mxu1 %v10798_v0 }
 0x52b   : > { %8176 = vmatprep.subr.bf16.mxu1 %v10803_v45 }
 0x52e   : > { %8177 = vmatpush2.bf16.msra.mxu1 %v10801_v44 }
 0x52f   : > { %8178 = vmatprep.subr.bf16.mxu1 %v10806_v47 }
 0x532   : > { %8179 = vmatpush2.bf16.msra.mxu1 %v10804_v48 }
 0x533   : > { %8180 = vmatprep.subr.bf16.mxu1 %v10809_v6 }
 0x536   : > { %8181 = vmatpush2.bf16.msra.mxu1 %v10807_v20 }
 0x537   : > { %8182 = vmatprep.subr.bf16.mxu1 %v10812_v62 }
 0x53a   : > { %8183 = vmatpush2.bf16.msra.mxu1 %v10810_v34 }
 0x53b   : > { %v8067_v52 = vpop.f32.mrf.mxu0  ;;  %8184 = vmatprep.subr.bf16.mxu1 %v10815_v39 }
 0x53d   : > { %v8069_v55 = vpop.f32.mrf.mxu0 }
 0x53e   : > { %8185 = vmatpush2.bf16.msra.mxu1 %v10813_v56 }
 0x53f   : > { %v8071_v18 = vpop.f32.mrf.mxu0  ;;  %8186 = vmatprep.subr.bf16.mxu1 %v10818_v54 }
 0x541   : > { %v8072_v58 = vpop.f32.mrf.mxu0 }
 0x542   : > { %8187 = vmatpush2.bf16.msra.mxu1 %v10816_v57 }
 0x545   : > { %v7944_v59 = vpop.f32.mrf.mxu1  ;;  %8189 = vmatmul.mubr.bf16.vlgmr.msra.gmra.mxu1 %v13658_v46 }
 0x546   : > { %v7945_v61 = vadd.f32 %v7944_v59, %v13940_v21  ;;  %v8265_v21 = vrot.slane %v8257_v13, %v11932_v49 }
 0x547   : > { %v7946_v42 = vpop.f32.mrf.mxu1 }
 0x548   : > { %v7947_v63 = vadd.f32 %v7946_v42, %v13944_v25 }
 0x549   : > { %v7948_v1 = vpop.f32.mrf.mxu1 }
 0x54a   : > { %v9343_v2 = vpack.c.bf16 %v7947_v63, %v7945_v61 }
 0x54b   : > { %v7949_v27 = vpop.f32.mrf.mxu1 }
 0x54c   : > { %v8256_v7 = vrot.slane %v9343_v2, %v11932_v49 }
 0x54e   : > { %v8258_v46 = vcombine.low %v8249_v50, %v8256_v7 }
 0x550   : > { %v8272_v25 = vrot.slane %v8258_v46, %v11932_v49 }
 0x552   : > { %v8273_v9 = vcombine.low %v8265_v21, %v8272_v25 }
 0x554   : > { %8316 = vst [vmem:[%s14058_s12] sm:$0xff] %v8273_v9 }
 0x57b   : > { %v8149_v53 = vpop.f32.mrf.mxu0 }
 0x57d   : > { %v8151_v10 = vpop.f32.mrf.mxu0 }
 0x57f   : > { %v8153_v11 = vpop.f32.mrf.mxu0 }
 0x581   : > { %v8154_v38 = vpop.f32.mrf.mxu0 }
 0x585   : > { %v8026_v12 = vpop.f32.mrf.mxu1 }
 0x586   : > { %v8027_v15 = vadd.f32 %v8026_v12, %v13992_v23 }
 0x587   : > { %v8028_v14 = vpop.f32.mrf.mxu1 }
 0x588   : > { %v8029_v24 = vadd.f32 %v8028_v14, %v13995_v37 }
 0x589   : > { %v8030_v3 = vpop.f32.mrf.mxu1 }
 0x58a   : > { %v9344_v13 = vpack.c.bf16 %v8029_v24, %v8027_v15 }
 0x58b   : > { %v8031_v16 = vpop.f32.mrf.mxu1 }
 0x58c   : > { %v8283_v51 = vrot.slane %v9344_v13, %v11932_v49 }
 0x5c5   : > { %v8108_v19 = vpop.f32.mrf.mxu1 }
 0x5c6   : > { %v8109_v26 = vadd.f32 %v8108_v19, %v8067_v52 }
 0x5c7   : > { %v8110_v22 = vpop.f32.mrf.mxu1 }
 0x5c8   : > { %v8111_v28 = vadd.f32 %v8110_v22, %v8069_v55 }
 0x5c9   : > { %v8112_v30 = vpop.f32.mrf.mxu1 }
 0x5ca   : > { %v9345_v43 = vpack.c.bf16 %v8111_v28, %v8109_v26 }
 0x5cb   : > { %v8113_v32 = vpop.f32.mrf.mxu1 }
 0x5cc   : > { %v8290_v17 = vrot.slane %v9345_v43, %v11932_v49 }
 0x5ce   : > { %v8298_v5 = vcombine.low %v8283_v51, %v8290_v17 }
 0x5d0   : > { %v8305_v35 = vrot.slane %v8298_v5, %v11932_v49 }
 0x605   : > { %v8190_v4 = vpop.f32.mrf.mxu1 }
 0x606   : > { %v8191_v29 = vadd.f32 %v8190_v4, %v8149_v53 }
 0x607   : > { %v8192_v23 = vpop.f32.mrf.mxu1 }
 0x608   : > { %v8193_v37 = vadd.f32 %v8192_v23, %v8151_v10 }
 0x609   : > { %v8194_v8 = vpop.f32.mrf.mxu1 }
 0x60a   : > { %v9346_v40 = vpack.c.bf16 %v8193_v37, %v8191_v29 }
 0x60b   : > { %v8195_v41 = vpop.f32.mrf.mxu1 }
 0x60c   : > { %v8297_v33 = vrot.slane %v9346_v40, %v11932_v49 }
 0x60e   : > { %v8312_v36 = vrot.slane %v8297_v33, %v11932_v49 }
 0x610   : > { %v8313_v31 = vcombine.low %v8305_v35, %v8312_v36 }
 0x612   : > { %8317 = vst [vmem:[%s14058_s12 + $0x8] sm:$0x3f] %v8313_v31 }
 0x613 PF: > { %p10_p9 = scmp.ge.s32.totalorder %s10881_s16, 9   ;;  %s14083_s12 = smov %s10837_s13 }
 0x614   : > { %s14084_s13 = smov %s10890_s19  ;;  %s14085_s14 = smov %s10881_s16 }
 0x615   :  { %12 = sbr.rel (!%p10_p9) target bundleno = 2 (0x2), region = 90 }

// kernel: _device_forward.3
= control target key start
LH: loop header
LB: loop body
LE: loop exit
PB: predicated region body
PF: predicated region fallthrough
CT: control target
= control target key end

     0   :  { %s1614_s18 = smov 0   ;;  %s1616_s19 = smov 0   ;;  %s2087_s0 = inlined_call_operand.vmem [shape: bf16[2,49,32], index: 0, kind: input, shape index: {}]   ;;  %s2088_s1 = inlined_call_operand.vmem [shape: bf16[1,32,256], index: 1, kind: input, shape index: {}]   ;;  %s2089_s2 = inlined_call_operand.vmem [shape: bf16[2,4,256], index: 2, kind: input, shape index: {}]   ;;  %s2090_s3 = inlined_call_operand.vmem [shape: bf16[49,4], index: 3, kind: input, shape index: {}]   ;;  %s2091_s4 = inlined_call_operand.vmem [shape: f32[49,1], index: 4, kind: input, shape index: {}]   ;;  %s2092_s5 = inlined_call_operand.vmem [shape: bf16[2,2,49,256], index: 5, kind: output, shape index: {}]  }
   0x1   :  { %s1618_s20 = smov 0   ;;  %s1620_s21 = smov 0  }
   0x2   :  { %s1622_s22 = smov 0  }
   0x3 LB: > { %s1324_s23 = sadd.s32 4294967295, %s1581_s22   ;;  %s30_s24 = sadd.s32 1, %s1577_s21  ;;  %s1581_s22 = sphi %s1622_s22, %s15_s22   ;;  %s1577_s21 = sphi %s1620_s21, %s2101_s21   ;;  %s1573_s20 = sphi %s1618_s20, %s2100_s20   ;;  %s1569_s19 = sphi %s1616_s19, %s2099_s19   ;;  %s1565_s18 = sphi %s1614_s18, %s2098_s18  }
   0x4   : > { %p32_p0 = scmp.ge.s32.totalorder %s30_s24, 2  ;;  %s167_s25 = sadd.s32 1, %s1569_s19 }
   0x5   : > { %p177_p1 = scmp.ne.s32.totalorder %s1569_s19, %s1565_s18  ;;  %p178_p2 = scmp.eq.s32.totalorder %s1324_s23, 1 }
   0x6   : > { %s2103_s24 = smov (%p32_p0, %s30_s24), 0  ;;  %p1330_p4 = scmp.ge.s32.totalorder %s1581_s22, 1 }
   0x7   : > { %p1646_p3 = por %p178_p2, %p177_p1  ;;  %s161_s27 = ssub.s32 %s1577_s21, %s2103_s24 }
   0x8   : > { %p239_p5 = scmp.lt.s32.totalorder %s1581_s22, 3  ;;  %p165_p6 = scmp.eq.s32.totalorder %s161_s27, 0 }
   0xa   : > { %p240_p7 = pnand %p1330_p4, %p239_p5 }
   0xb   : > { %s1655_s28 = scalar_select %p165_p6, %s1569_s19, %s167_s25  }
   0xc   : > { %243 = sbr.rel (%p240_p7) target bundleno = 373 (0x175), region = 40  ;;  %p294_p8 = scmp.lt.s32.totalorder (!%p240_p7), %s1573_s20, 1 }
  0x11   : > { %v1583_v0 = vmov 0   ;;  %s295_s29 = scalar_select %p294_p8, %s1573_s20, 1  ;;  %vm400_vm0 = vcmask 1041408   ;;  %v1461_v4 = vld [vmem:[%s2090_s3] sm:$0xff]   ;;  %v1465_v5 = vld [vmem:[%s2088_s1 + $0x14] ss:$8 sps:$4 sm:$0xff]  }
  0x12   : > { %439 = vmatprep.mubr.bf16.mxu0 %v1583_v0  ;;  %459 = vmatprep.mubr.bf16.mxu1 %v1583_v0  ;;  %vm387_vm1 = vcmask 31744   ;;  %v1462_v6 = vld [vmem:[%s2090_s3 + $0x10] sm:$0xff]   ;;  %v1470_v8 = vld [vmem:[%s2088_s1 + $0x4] ss:$8 sps:$4 sm:$0xff]   ;;  %v1468_v9 = vld [vmem:[%s2088_s1] ss:$8 sps:$4 sm:$0xff]  }
  0x13   : > { %1459 = vset.pattern.permute.xlu0 %v1583_v0  ;;  %1460 = vset.pattern.permute.xlu1 %v1583_v0  ;;  %s1399_s30 = sshll.u32 %s295_s29, 2  ;;  %v1463_v7 = vld [vmem:[%s2088_s1 + $0x10] ss:$8 sps:$4 sm:$0xff]   ;;  %v318_v10 = vld [vmem:[%s2091_s4] sm:$0xff]  ;;  %v319_v11 = vld [vmem:[%s2091_s4 + $0x8] sm:$0xff]  ;;  %vm555_vm2 = vcmask 261120  }
  0x14   : > { %s301_s8 = scalar_lea.vmem %s2089_s2, %s1399_s30  ;;  %v1466_v12 = vld [vmem:[%s2090_s3 + $0x8] sm:$0xff]   ;;  %v1467_v13 = vld [vmem:[%s2090_s3 + $0x18] ss:$0 sps:$4 sm:$0x11]   ;;  %327 = vperm.xlu0 %1459, %v318_v10   ;;  %332 = vperm.xlu1 %1460, %v319_v11   ;;  %v320_v14 = vld [vmem:[%s2091_s4 + $0x10] sm:$0xff]  ;;  %vm643_vm3 = vcmask 1040384  }
  0x15   : > { %v1337_v1 = vld.sshfl [vmem:[%s301_s8] sm:$0x33 pattern:$0x76325410]  ;;  %v321_v15 = vld [vmem:[%s2091_s4 + $0x18] sm:$0xff]  ;;  %v323_v20 = vld [vmem:[%s2091_s4 + $0x28] sm:$0xff] }
  0x16   : > { %v386_v2 = vcombine.high %v1337_v1, %v1337_v1  ;;  %v402_v3 = vsel %vm400_vm0, %v1337_v1, 0  ;;  %v322_v16 = vld [vmem:[%s2091_s4 + $0x20] sm:$0xff]  ;;  %v324_v17 = vld [vmem:[%s2091_s4 + $0x30] sm:$0x1]  ;;  %v1473_v21 = vld [vmem:[%s2087_s0 + $0x8] sm:$0xff]   ;;  %s278_s29 = sand.u32 1, %s1565_s18  }
  0x17   : > { %v1471_v18 = vld [vmem:[%s2087_s0] sm:$0xff]   ;;  %v1475_v23 = vld [vmem:[%s2087_s0 + $0x10] sm:$0xff]   ;;  %v1477_v25 = vld [vmem:[%s2087_s0 + $0x18] ss:$0 sps:$4 sm:$0x11]   ;;  %s1416_s30 = smul.u32 112, %s278_s29 }
  0x18   : > { %1338 = vmatprep.subr.msk.bf16.mxu0 %vm400_vm0, %v386_v2  ;;  %1414 = vmatprep.subr.msk.bf16.mxu1 %vm400_vm0, %v386_v2  ;;  %v1472_v19 = vld [vmem:[%s2087_s0 + $0x1c] sm:$0xff]   ;;  %v1474_v22 = vld [vmem:[%s2087_s0 + $0x24] sm:$0xff]   ;;  %v1476_v24 = vld [vmem:[%s2087_s0 + $0x2c] sm:$0xff]   ;;  %vm801_vm4 = vsmask.f32 256  ;;  %vm803_vm5 = vcmask 1044484  }
  0x19   : > { %422 = vmatpush1.bf16.msra.mxu0 %v402_v3  ;;  %1415 = vmatpush1.bf16.msra.mxu1 %v402_v3  ;;  %v1478_v26 = vld [vmem:[%s2087_s0 + $0x34] ss:$0 sps:$4 sm:$0x11]   ;;  %vm804_vm6 = vsmask.f32 4352  ;;  %vm1987_vm7 = vmand %vm643_vm3, %vm801_vm4  ;;  %s2010_s18 = scalar_lea.vmem [#allocation3], %s1416_s30 }
  0x1a   : > { %580 = vmatprep.subr.bf16.mxu1 %v1465_v5  ;;  %898 = vmatprep.subr.bf16.mxu0 %v1465_v5  ;;  %vm1995_vm8 = vmand %vm803_vm5, %vm804_vm6  ;;  %s1417_s6 = smul.u32 (%p1646_p3), 56, %s1573_s20 }
  0x1b   : > { %337 = vperm.xlu0 %1459, %v320_v14   ;;  %342 = vperm.xlu1 %1460, %v321_v15   ;;  %vm806_vm9 = vmor %vm1995_vm8, %vm1987_vm7 }
  0x1c   : > { %1339 = vmatmul.mubr.msk.bf16.vlgmr.msra.gmra.mxu0 %vm387_vm1, %v1461_v4  ;;  %1341 = vmatmul.mubr.msk.bf16.vlgmr.msra.gmra.mxu1 %vm387_vm1, %v1462_v6  ;;  %s1135_s8 = scalar_lea.vmem (%p1646_p3), %s2092_s5, %s1417_s6 }
  0x1d   : > { %581 = vmatpush1.bf16.msra.mxu1 %v1463_v7  ;;  %899 = vmatpush1.bf16.msra.mxu0 %v1463_v7 }
  0x1e   : > { %449 = vmatprep.mubr.bf16.mxu0 %v1583_v0  ;;  %469 = vmatprep.mubr.bf16.mxu1 %v1583_v0 }
  0x1f   : > { %582 = vmatprep.subr.bf16.mxu1 %v1470_v8  ;;  %900 = vmatprep.subr.bf16.mxu0 %v1470_v8 }
  0x20   : > { %347 = vperm.xlu0 %1459, %v322_v16   ;;  %357 = vperm.xlu1 %1460, %v324_v17  }
  0x21   : > { %583 = vmatpush1.bf16.msra.mxu1 %v1468_v9  ;;  %901 = vmatpush1.bf16.msra.mxu0 %v1468_v9 }
  0x24   : > { %1340 = vmatmul.mubr.msk.bf16.gmra.mxu0 %vm387_vm1, %v1466_v12  ;;  %1342 = vmatmul.mubr.msk.bf16.gmra.mxu1 %vm387_vm1, %v1467_v13 }
  0x25   : > { %600 = vmatprep.mubr.bf16.mxu1 %v1583_v0  ;;  %918 = vmatprep.mubr.bf16.mxu0 %v1583_v0 }
  0x26   : > { %352 = vperm.xlu0 %1459, %v323_v20  }
  0x2c   : > { %1351 = vmatmul.mubr.msk.bf16.vlgmr.msra.gmra.mxu1 %vm555_vm2, %v1471_v18  ;;  %1377 = vmatmul.mubr.msk.bf16.vlgmr.msra.gmra.mxu0 %vm555_vm2, %v1472_v19 }
  0x2d   : > { %610 = vmatprep.mubr.bf16.mxu1 %v1583_v0  ;;  %928 = vmatprep.mubr.bf16.mxu0 %v1583_v0 }
  0x34   : > { %1352 = vmatmul.mubr.msk.bf16.gmra.mxu1 %vm555_vm2, %v1473_v21  ;;  %1378 = vmatmul.mubr.msk.bf16.gmra.mxu0 %vm555_vm2, %v1474_v22 }
  0x35   : > { %620 = vmatprep.mubr.bf16.mxu1 %v1583_v0  ;;  %938 = vmatprep.mubr.bf16.mxu0 %v1583_v0 }
  0x3c   : > { %1353 = vmatmul.mubr.msk.bf16.gmra.mxu1 %vm555_vm2, %v1475_v23  ;;  %1379 = vmatmul.mubr.msk.bf16.gmra.mxu0 %vm555_vm2, %v1476_v24 }
  0x3d   : > { %630 = vmatprep.mubr.bf16.mxu1 %v1583_v0  ;;  %948 = vmatprep.mubr.bf16.mxu0 %v1583_v0 }
  0x44   : > { %1354 = vmatmul.mubr.msk.bf16.gmra.mxu1 %vm555_vm2, %v1477_v25  ;;  %1380 = vmatmul.mubr.msk.bf16.gmra.mxu0 %vm555_vm2, %v1478_v26 }
  0x8f   : > { %v328_v27 = vpop.permute.xlu0 %327  ;;  %v333_v29 = vpop.permute.xlu1 %332 }
  0x96   : > { %v338_v28 = vpop.permute.xlu0 %337  ;;  %v343_v31 = vpop.permute.xlu1 %342 }
  0x9b   : > { %v348_v30 = vpop.permute.xlu0 %347  ;;  %v358_v45 = vpop.permute.xlu1 %357 }
  0xa1   : > { %v353_v36 = vpop.permute.xlu0 %352 }
  0xdc   : > { %v441_v32 = vpop.f32.mrf.mxu0  ;;  %v461_v33 = vpop.f32.mrf.mxu1 }
  0xdd   : > { %v442_v34 = vadd.f32 %v441_v32, %v328_v27  ;;  %v1757_v35 = vadd.f32 %v461_v33, %v348_v30 }
  0xde   : > { %v443_v37 = vpop.f32.mrf.mxu0  ;;  %v463_v38 = vpop.f32.mrf.mxu1 }
  0xdf   : > { %v444_v39 = vadd.f32 %v443_v37, %v328_v27  ;;  %v1759_v40 = vadd.f32 %v463_v38, %v348_v30 }
  0xe0   : > { %v445_v41 = vpop.f32.mrf.mxu0  ;;  %v465_v42 = vpop.f32.mrf.mxu1 }
  0xe1   : > { %v446_v43 = vadd.f32 %v445_v41, %v333_v29  ;;  %v1761_v44 = vadd.f32 %v465_v42, %v353_v36 }
  0xe2   : > { %v447_v46 = vpop.f32.mrf.mxu0  ;;  %v467_v47 = vpop.f32.mrf.mxu1 }
  0xe3   : > { %v448_v48 = vadd.f32 %v447_v46, %v333_v29  ;;  %v1763_v49 = vadd.f32 %v467_v47, %v353_v36 }
  0xe4   : > { %v451_v50 = vpop.f32.mrf.mxu0  ;;  %v471_v51 = vpop.f32.mrf.mxu1 }
  0xe5   : > { %v452_v52 = vadd.f32 %v451_v50, %v338_v28  ;;  %v472_v53 = vadd.f32 %v471_v51, %v358_v45 }
  0xe6   : > { %v453_v54 = vpop.f32.mrf.mxu0  ;;  %v473_v55 = vpop.f32.mrf.mxu1 }
  0xe7   : > { %490 = vst [vmem:[#allocation2 + $0x60] sm:$0x1] %v472_v53  ;;  %v454_v56 = vadd.f32 %v453_v54, %v338_v28  ;;  %v474_v57 = vadd.f32 %v473_v55, %v358_v45 }
  0xe8   : > { %v455_v58 = vpop.f32.mrf.mxu0  ;;  %v475_v59 = vpop.f32.mrf.mxu1 }
  0xe9   : > { %491 = vst [vmem:[#allocation2 + $0x28] sm:$0x1] %v474_v57  ;;  %v456_v60 = vadd.f32 %v455_v58, %v343_v31 }
  0xea   : > { %v457_v61 = vpop.f32.mrf.mxu0  ;;  %v476_v62 = vpop.f32.mrf.mxu1 }
  0xeb   : > { %v458_v63 = vadd.f32 %v457_v61, %v343_v31 }
  0xec   : > { %v602_v0 = vpop.f32.mrf.mxu1  ;;  %v920_v1 = vpop.f32.mrf.mxu0 }
  0xed   : > { %v1767_v19 = vadd.f32 %v602_v0, %v442_v34  ;;  %v1769_v20 = vadd.f32 %v920_v1, %v442_v34 }
  0xee   : > { %v604_v2 = vpop.f32.mrf.mxu1  ;;  %v922_v3 = vpop.f32.mrf.mxu0  ;;  %v515_v55 = vld [vmem:[#allocation2 + $0x60] sm:$0x1] }
  0xef   : > { %v1771_v21 = vadd.f32 %v604_v2, %v444_v39  ;;  %v1783_v29 = vadd.f32 %v922_v3, %v444_v39  ;;  %v834_v57 = vld [vmem:[#allocation2 + $0x60] sm:$0x1] }
  0xf0   : > { %v606_v4 = vpop.f32.mrf.mxu1  ;;  %v924_v5 = vpop.f32.mrf.mxu0  ;;  %v516_v2 = vld [vmem:[#allocation2 + $0x28] sm:$0x1] }
  0xf1   : > { %v1785_v30 = vadd.f32 %v606_v4, %v446_v43  ;;  %v1787_v31 = vadd.f32 %v924_v5, %v446_v43  ;;  %v835_v4 = vld [vmem:[#allocation2 + $0x28] sm:$0x1] }
  0xf2   : > { %v608_v6 = vpop.f32.mrf.mxu1  ;;  %v926_v7 = vpop.f32.mrf.mxu0 }
  0xf3   : > { %v1791_v36 = vadd.f32 %v608_v6, %v448_v48  ;;  %v1793_v37 = vadd.f32 %v926_v7, %v448_v48 }
  0xf4   : > { %v612_v8 = vpop.f32.mrf.mxu1  ;;  %v930_v9 = vpop.f32.mrf.mxu0 }
  0xf5   : > { %v1765_v18 = vadd.f32 %v612_v8, %v452_v52  ;;  %v1773_v22 = vadd.f32 %v930_v9, %v452_v52 }
  0xf6   : > { %v614_v10 = vpop.f32.mrf.mxu1  ;;  %v932_v11 = vpop.f32.mrf.mxu0 }
  0xf7   : > { %v1775_v25 = vadd.f32 %v614_v10, %v454_v56  ;;  %v1777_v26 = vadd.f32 %v932_v11, %v454_v56  ;;  %v639_v38 = vmax.f32 %v1767_v19, %v1765_v18  ;;  %v957_v39 = vmax.f32 %v1769_v20, %v1773_v22 }
  0xf8   : > { %v616_v12 = vpop.f32.mrf.mxu1  ;;  %v934_v13 = vpop.f32.mrf.mxu0 }
  0xf9   : > { %v1779_v27 = vadd.f32 %v616_v12, %v456_v60  ;;  %v1781_v28 = vadd.f32 %v934_v13, %v456_v60  ;;  %v653_v48 = vmax.f32 %v1771_v21, %v1775_v25  ;;  %v970_v50 = vmax.f32 %v1783_v29, %v1777_v26 }
  0xfa   : > { %v618_v14 = vpop.f32.mrf.mxu1  ;;  %v936_v15 = vpop.f32.mrf.mxu0 }
  0xfb   : > { %v1789_v32 = vadd.f32 %v618_v14, %v458_v63  ;;  %v640_v51 = vmax.f32 %v1785_v30, %v1779_v27  ;;  %v1821_v53 = vadd.f32 %v936_v15, %v458_v63 }
  0xfc   : > { %v622_v16 = vpop.f32.mrf.mxu1  ;;  %v940_v17 = vpop.f32.mrf.mxu0 }
  0xfd   : > { %v1798_v41 = vadd.f32 %v622_v16, %v1757_v35  ;;  %v1803_v42 = vadd.f32 %v940_v17, %v1757_v35  ;;  %v958_v35 = vmax.f32 %v1787_v31, %v1781_v28  ;;  %v654_v52 = vmax.f32 %v1791_v36, %v1789_v32 }
  0xfe   : > { %v624_v23 = vpop.f32.mrf.mxu1  ;;  %v942_v24 = vpop.f32.mrf.mxu0  ;;  %v971_v15 = vmax.f32 %v1793_v37, %v1821_v53 }
  0xff   : > { %v1806_v43 = vadd.f32 %v624_v23, %v1759_v40  ;;  %v1809_v45 = vadd.f32 %v942_v24, %v1759_v40  ;;  %v641_v59 = vmax.f32 %v639_v38, %v1798_v41  ;;  %v959_v63 = vmax.f32 %v957_v39, %v1803_v42 }
 0x100   : > { %v626_v33 = vpop.f32.mrf.mxu1  ;;  %v944_v34 = vpop.f32.mrf.mxu0 }
 0x101   : > { %v1824_v40 = vadd.f32 %v626_v33, %v1761_v44  ;;  %v1827_v54 = vadd.f32 %v944_v34, %v1761_v44  ;;  %v655_v0 = vmax.f32 %v653_v48, %v1806_v43  ;;  %v972_v44 = vmax.f32 %v970_v50, %v1809_v45 }
 0x102   : > { %v628_v46 = vpop.f32.mrf.mxu1  ;;  %v946_v47 = vpop.f32.mrf.mxu0 }
 0x103   : > { %v1831_v60 = vadd.f32 %v628_v46, %v1763_v49  ;;  %v1841_v1 = vadd.f32 %v946_v47, %v1763_v49  ;;  %v642_v10 = vmax.f32 %v640_v51, %v1824_v40  ;;  %v960_v11 = vmax.f32 %v958_v35, %v1827_v54 }
 0x104   : > { %v632_v56 = vpop.f32.mrf.mxu1  ;;  %v950_v58 = vpop.f32.mrf.mxu0 }
 0x105   : > { %v1833_v61 = vadd.f32 %v632_v56, %v515_v55  ;;  %v1835_v62 = vadd.f32 %v950_v58, %v834_v57  ;;  %v656_v16 = vmax.f32 %v654_v52, %v1831_v60  ;;  %v973_v47 = vmax.f32 %v971_v15, %v1841_v1 }
 0x106   : > { %v634_v3 = vpop.f32.mrf.mxu1  ;;  %v952_v5 = vpop.f32.mrf.mxu0 }
 0x107   : > { %v644_v6 = vsel %vm643_vm3, %v1833_v61, -inf  ;;  %v961_v7 = vsel %vm643_vm3, %v1835_v62, -inf  ;;  %v1847_v8 = vadd.f32 %v634_v3, %v516_v2  ;;  %v1849_v9 = vadd.f32 %v952_v5, %v835_v4 }
 0x108   : > { %v645_v49 = vmax.f32 %v641_v59, %v644_v6  ;;  %v962_v12 = vmax.f32 %v959_v63, %v961_v7  ;;  %v636_v13 = vpop.f32.mrf.mxu1  ;;  %v954_v14 = vpop.f32.mrf.mxu0 }
 0x109   : > { %v657_v17 = vsel %vm643_vm3, %v1847_v8, -inf  ;;  %v974_v23 = vsel %vm643_vm3, %v1849_v9, -inf }
 0x10a   : > { %v646_v24 = vmax.f32 %v645_v49, %v642_v10  ;;  %v963_v33 = vmax.f32 %v962_v12, %v960_v11  ;;  %v658_v34 = vmax.f32 %v655_v0, %v657_v17  ;;  %v975_v38 = vmax.f32 %v972_v44, %v974_v23  ;;  %v637_v39 = vpop.f32.mrf.mxu1  ;;  %v955_v46 = vpop.f32.mrf.mxu0 }
 0x10c   : > { %v647_v48 = vrot.slane %v646_v24, 4  ;;  %v964_v50 = vrot.slane %v963_v33, 4  ;;  %v659_v51 = vmax.f32 %v658_v34, %v656_v16  ;;  %v976_v35 = vmax.f32 %v975_v38, %v973_v47 }
 0x10e   : > { %v648_v55 = vmax.f32 %v646_v24, %v647_v48  ;;  %v965_v52 = vmax.f32 %v963_v33, %v964_v50  ;;  %v660_v56 = vrot.slane %v659_v51, 4  ;;  %v977_v63 = vrot.slane %v976_v35, 4 }
 0x110   : > { %v649_v57 = vrot.slane %v648_v55, 2  ;;  %v966_v58 = vrot.slane %v965_v52, 2  ;;  %v661_v59 = vmax.f32 %v659_v51, %v660_v56  ;;  %v978_v5 = vmax.f32 %v976_v35, %v977_v63 }
 0x112   : > { %v650_v2 = vmax.f32 %v648_v55, %v649_v57  ;;  %v967_v3 = vmax.f32 %v965_v52, %v966_v58  ;;  %v662_v4 = vrot.slane %v661_v59, 2  ;;  %v979_v15 = vrot.slane %v978_v5, 2 }
 0x114   : > { %v651_v0 = vrot.slane %v650_v2, 1  ;;  %v968_v44 = vrot.slane %v967_v3, 1  ;;  %v663_v10 = vmax.f32 %v661_v59, %v662_v4 }
 0x116   : > { %v652_v6 = vmax.f32 %v650_v2, %v651_v0  ;;  %v969_v7 = vmax.f32 %v967_v3, %v968_v44  ;;  %v664_v38 = vrot.slane %v663_v10, 1 }
 0x118   : > { %v666_v11 = vsub.f32 %v1767_v19, %v652_v6  ;;  %v668_v49 = vsub.f32 %v1785_v30, %v652_v6  ;;  %v670_v12 = vsub.f32 %v1765_v18, %v652_v6  ;;  %v672_v13 = vsub.f32 %v1779_v27, %v652_v6 }
 0x119   : > { %v674_v14 = vsub.f32 %v1798_v41, %v652_v6  ;;  %v678_v16 = vsub.f32 %v1833_v61, %v652_v6  ;;  %v983_v33 = vsub.f32 %v1769_v20, %v969_v7  ;;  %v985_v19 = vsub.f32 %v1787_v31, %v969_v7 }
 0x11a   : > { %v680_v17 = vmul.f32 1.442695, %v666_v11  ;;  %v684_v23 = vmul.f32 1.442695, %v668_v49  ;;  %v688_v24 = vmul.f32 1.442695, %v670_v12  ;;  %v676_v30 = vsub.f32 %v1824_v40, %v652_v6 }
 0x11b   : > { %v692_v34 = vmul.f32 1.442695, %v672_v13  ;;  %v696_v18 = vmul.f32 1.442695, %v674_v14  ;;  %v980_v27 = vmax.f32 %v978_v5, %v979_v15  ;;  %v704_v39 = vmul.f32 1.442695, %v678_v16 }
 0x11c   : > { %1479 = vpow2.f32 %v680_v17  ;;  %v987_v41 = vsub.f32 %v1773_v22, %v969_v7  ;;  %v989_v61 = vsub.f32 %v1781_v28, %v969_v7  ;;  %v997_v46 = vmul.f32 1.442695, %v983_v33 }
 0x11d   : > { %1481 = vpow2.f32 %v684_v23  ;;  %v991_v20 = vsub.f32 %v1803_v42, %v969_v7  ;;  %v1001_v47 = vmul.f32 1.442695, %v985_v19  ;;  %v665_v48 = vmax.f32 %v663_v10, %v664_v38 }
 0x11e   : > { %1483 = vpow2.f32 %v688_v24  ;;  %v700_v31 = vmul.f32 1.442695, %v676_v30  ;;  %v995_v50 = vsub.f32 %v1835_v62, %v969_v7  ;;  %v981_v40 = vrot.slane %v980_v27, 1 }
 0x11f   : > { %1485 = vpow2.f32 %v692_v34  ;;  %v1005_v51 = vmul.f32 1.442695, %v987_v41  ;;  %v667_v35 = vsub.f32 %v1771_v21, %v665_v48  ;;  %v1009_v22 = vmul.f32 1.442695, %v989_v61 }
 0x120   : > { %1487 = vpow2.f32 %v696_v18  ;;  %v669_v55 = vsub.f32 %v1791_v36, %v665_v48  ;;  %v993_v28 = vsub.f32 %v1827_v54, %v969_v7  ;;  %v1013_v52 = vmul.f32 1.442695, %v991_v20 }
 0x121   : > { %1489 = vpow2.f32 %v704_v39  ;;  %v1021_v42 = vmul.f32 1.442695, %v995_v50  ;;  %v671_v56 = vsub.f32 %v1775_v25, %v665_v48  ;;  %v1878_v57 = vmax.f32 %v980_v27, %v981_v40 }
 0x122   : > { %1491 = vpow2.f32 %v997_v46  ;;  %v673_v62 = vsub.f32 %v1789_v32, %v665_v48  ;;  %v682_v58 = vmul.f32 1.442695, %v667_v35  ;;  %v675_v21 = vsub.f32 %v1806_v43, %v665_v48 }
 0x123   : > { %1493 = vpow2.f32 %v1001_v47  ;;  %v686_v59 = vmul.f32 1.442695, %v669_v55  ;;  %v1017_v36 = vmul.f32 1.442695, %v993_v28  ;;  %v679_v54 = vsub.f32 %v1847_v8, %v665_v48 }
 0x124   : > { %1495 = vpow2.f32 %v700_v31  ;;  %v690_v2 = vmul.f32 1.442695, %v671_v56  ;;  %v984_v25 = vsub.f32 %v1783_v29, %v1878_v57  ;;  %v694_v32 = vmul.f32 1.442695, %v673_v62 }
 0x125   : > { %1497 = vpow2.f32 %v1005_v51  ;;  %v986_v4 = vsub.f32 %v1793_v37, %v1878_v57  ;;  %v677_v0 = vsub.f32 %v1831_v60, %v665_v48  ;;  %v698_v8 = vmul.f32 1.442695, %v675_v21 }
 0x126   : > { %1499 = vpow2.f32 %v1009_v22  ;;  %v706_v5 = vmul.f32 1.442695, %v679_v54  ;;  %v988_v29 = vsub.f32 %v1777_v26, %v1878_v57  ;;  %v999_v37 = vmul.f32 1.442695, %v984_v25 }
 0x127   : > { %1501 = vpow2.f32 %v1013_v52  ;;  %v990_v60 = vsub.f32 %v1821_v53, %v1878_v57  ;;  %v1003_v11 = vmul.f32 1.442695, %v986_v4  ;;  %v702_v13 = vmul.f32 1.442695, %v677_v0 }
 0x128   : > { %1503 = vpow2.f32 %v1021_v42  ;;  %v992_v14 = vsub.f32 %v1809_v45, %v1878_v57  ;;  %v1007_v15 = vmul.f32 1.442695, %v988_v29  ;;  %v996_v53 = vsub.f32 %v1849_v9, %v1878_v57 }
 0x129   : > { %v1883_v63 = vpop.eup %1479  ;;  %1505 = vpow2.f32 %v682_v58  ;;  %v994_v33 = vsub.f32 %v1841_v1, %v1878_v57  ;;  %v1011_v34 = vmul.f32 1.442695, %v990_v60 }
 0x12a   : > { %v1887_v3 = vpop.eup %1481  ;;  %1507 = vpow2.f32 %v686_v59  ;;  %v1015_v18 = vmul.f32 1.442695, %v992_v14  ;;  %v1023_v1 = vmul.f32 1.442695, %v996_v53 }
 0x12b   : > { %v708_v43 = vadd.f32 %v1887_v3, %v1883_v63  ;;  %v1894_v44 = vpop.eup %1483  ;;  %1509 = vpow2.f32 %v1017_v36  ;;  %v1019_v46 = vmul.f32 1.442695, %v994_v33 }
 0x12c   : > { %v1898_v6 = vpop.eup %1485  ;;  %1511 = vpow2.f32 %v690_v2 }
 0x12d   : > { %v709_v7 = vadd.f32 %v1894_v44, %v708_v43  ;;  %v1901_v10 = vpop.eup %1487  ;;  %1513 = vpow2.f32 %v694_v32 }
 0x12e   : > { %v1905_v49 = vpop.eup %1489  ;;  %1515 = vpow2.f32 %v698_v8 }
 0x12f   : > { %v710_v12 = vadd.f32 %v1898_v6, %v709_v7  ;;  %v1908_v26 = vpop.eup %1491  ;;  %1517 = vpow2.f32 %v706_v5  ;;  %v713_v9 = vsel %vm643_vm3, %v1905_v49, 0.0 }
 0x130   : > { %v1912_v16 = vpop.eup %1493  ;;  %1519 = vpow2.f32 %v999_v37 }
 0x131   : > { %v711_v17 = vadd.f32 %v1901_v10, %v710_v12  ;;  %v1917_v23 = vpop.eup %1495  ;;  %v1025_v24 = vadd.f32 %v1912_v16, %v1908_v26  ;;  %1521 = vpow2.f32 %v1003_v11 }
 0x132   : > { %v1923_v45 = vpop.eup %1497  ;;  %1523 = vpow2.f32 %v702_v13 }
 0x133   : > { %v712_v19 = vadd.f32 %v1917_v23, %v711_v17  ;;  %v1926_v38 = vpop.eup %1499  ;;  %v1026_v30 = vadd.f32 %v1923_v45, %v1025_v24  ;;  %1525 = vpow2.f32 %v1007_v15 }
 0x134   : > { %v1931_v27 = vpop.eup %1501  ;;  %1527 = vpow2.f32 %v1011_v34 }
 0x135   : > { %v714_v39 = vadd.f32 %v713_v9, %v712_v19  ;;  %v1933_v41 = vpop.eup %1503  ;;  %v1027_v61 = vadd.f32 %v1926_v38, %v1026_v30  ;;  %1529 = vpow2.f32 %v1015_v18 }
 0x136   : > { %v1936_v20 = vpop.eup %1505  ;;  %1531 = vpow2.f32 %v1023_v1  ;;  %v1030_v28 = vsel %vm643_vm3, %v1933_v41, 0.0 }
 0x137   : > { %v715_v47 = vrot.slane %v714_v39, 4  ;;  %v1938_v48 = vpop.eup %1507  ;;  %v1028_v31 = vadd.f32 %v1931_v27, %v1027_v61  ;;  %1533 = vpow2.f32 %v1019_v46 }
 0x138   : > { %v1941_v50 = vpop.eup %1509  ;;  %v721_v40 = vadd.f32 %v1938_v48, %v1936_v20 }
 0x139   : > { %v1945_v51 = vpop.eup %1511  ;;  %v716_v35 = vadd.f32 %v715_v47, %v714_v39  ;;  %v1029_v22 = vadd.f32 %v1941_v50, %v1028_v31 }
 0x13a   : > { %v1948_v55 = vpop.eup %1513  ;;  %v722_v52 = vadd.f32 %v1945_v51, %v721_v40 }
 0x13b   : > { %v1953_v42 = vpop.eup %1515  ;;  %v1031_v56 = vadd.f32 %v1030_v28, %v1029_v22  ;;  %v717_v21 = vrot.slane %v716_v35, 2 }
 0x13c   : > { %v1955_v57 = vpop.eup %1517  ;;  %v723_v62 = vadd.f32 %v1948_v55, %v722_v52 }
 0x13d   : > { %v1958_v58 = vpop.eup %1519  ;;  %v1032_v59 = vrot.slane %v1031_v56, 4  ;;  %v718_v0 = vadd.f32 %v717_v21, %v716_v35  ;;  %v726_v8 = vsel %vm643_vm3, %v1955_v57, 0.0 }
 0x13e   : > { %v1960_v36 = vpop.eup %1521  ;;  %v724_v54 = vadd.f32 %v1953_v42, %v723_v62 }
 0x13f   : > { %v1524_v2 = vpop.eup %1523  ;;  %v1038_v25 = vadd.f32 %v1960_v36, %v1958_v58  ;;  %v1033_v4 = vadd.f32 %v1032_v59, %v1031_v56  ;;  %v719_v14 = vrot.slane %v718_v0, 1 }
 0x140   : > { %v1965_v32 = vpop.eup %1525  ;;  %v725_v43 = vadd.f32 %v1524_v2, %v724_v54 }
 0x141   : > { %v1039_v5 = vadd.f32 %v1965_v32, %v1038_v25  ;;  %v1970_v29 = vpop.eup %1527  ;;  %v1034_v11 = vrot.slane %v1033_v4, 2  ;;  %v720_v9 = vadd.f32 %v719_v14, %v718_v0 }
 0x142   : > { %v727_v7 = vadd.f32 %v726_v8, %v725_v43  ;;  %v1973_v60 = vpop.eup %1529 }
 0x143   : > { %v1040_v37 = vadd.f32 %v1970_v29, %v1039_v5  ;;  %v1975_v13 = vpop.eup %1531  ;;  %v1035_v33 = vadd.f32 %v1034_v11, %v1033_v4  ;;  %1535 = vrcp.f32 %v720_v9 }
 0x144   : > { %v728_v12 = vrot.slane %v727_v7, 4  ;;  %v1978_v17 = vpop.eup %1533  ;;  %v1043_v19 = vsel %vm643_vm3, %v1975_v13, 0.0 }
 0x145   : > { %v1041_v15 = vadd.f32 %v1973_v60, %v1040_v37  ;;  %v1036_v1 = vrot.slane %v1035_v33, 1 }
 0x146   : > { %v729_v53 = vadd.f32 %v728_v12, %v727_v7 }
 0x147   : > { %v1042_v24 = vadd.f32 %v1978_v17, %v1041_v15  ;;  %v1037_v40 = vadd.f32 %v1036_v1, %v1035_v33 }
 0x148   : > { %v730_v34 = vrot.slane %v729_v53, 2 }
 0x149   : > { %v1044_v30 = vadd.f32 %v1043_v19, %v1042_v24 }
 0x14a   : > { %v731_v18 = vadd.f32 %v730_v34, %v729_v53 }
 0x14b   : > { %v1045_v39 = vrot.slane %v1044_v30, 4 }
 0x14c   : > { %v732_v61 = vrot.slane %v731_v18, 1 }
 0x14d   : > { %v1046_v46 = vadd.f32 %v1045_v39, %v1044_v30 }
 0x14e   : > { %v733_v47 = vadd.f32 %v732_v61, %v731_v18 }
 0x14f   : > { %v1047_v31 = vrot.slane %v1046_v46, 2 }
 0x150   : > { %1537 = vrcp.f32 %v733_v47  ;;  %v1536_v52 = vpop.eup %1535 }
 0x151   : > { %v1048_v35 = vadd.f32 %v1047_v31, %v1046_v46  ;;  %1539 = vrcp.f32 %v1037_v40  ;;  %v735_v56 = vmul.f32 %v1536_v52, %v1883_v63  ;;  %v738_v62 = vmul.f32 %v1536_v52, %v1887_v3 }
 0x152   : > { %v740_v54 = vmul.f32 %v1536_v52, %v1894_v44  ;;  %v742_v25 = vmul.f32 %v1536_v52, %v1898_v6  ;;  %v744_v4 = vmul.f32 %v1536_v52, %v1901_v10  ;;  %v746_v43 = vmul.f32 %v1536_v52, %v1917_v23 }
 0x153   : > { %v1049_v22 = vrot.slane %v1048_v35, 1  ;;  %v748_v44 = vmul.f32 %v1536_v52, %v1905_v49  ;;  %v807_v49 = vld [vmem:[%s2010_s18 + $0x30] sm:$0x11] }
 0x155   : > { %v1050_v28 = vadd.f32 %v1049_v22, %v1048_v35 }
 0x157   : > { %1541 = vrcp.f32 %v1050_v28 }
 0x15d   : > { %v1538_v59 = vpop.eup %1537 }
 0x15e   : > { %v737_v63 = vmul.f32 %v1538_v59, %v1936_v20  ;;  %v739_v3 = vmul.f32 %v1538_v59, %v1938_v48  ;;  %v741_v8 = vmul.f32 %v1538_v59, %v1945_v51  ;;  %v743_v5 = vmul.f32 %v1538_v59, %v1948_v55  ;;  %v1540_v23 = vpop.eup %1539 }
 0x15f   : > { %v745_v6 = vmul.f32 %v1538_v59, %v1953_v42  ;;  %v747_v7 = vmul.f32 %v1538_v59, %v1524_v2  ;;  %v749_v10 = vmul.f32 %v1538_v59, %v1955_v57  ;;  %v1052_v55 = vmul.f32 %v1540_v23, %v1908_v26 }
 0x160   : > { %v1400_v37 = vpack.c.bf16 %v737_v63, %v735_v56  ;;  %v1401_v11 = vpack.c.bf16 %v739_v3, %v738_v62  ;;  %v1402_v12 = vpack.c.bf16 %v741_v8, %v740_v54  ;;  %v1403_v14 = vpack.c.bf16 %v743_v5, %v742_v25 }
 0x161   : > { %v1404_v20 = vpack.c.bf16 %v745_v6, %v744_v4  ;;  %v1405_v48 = vpack.c.bf16 %v747_v7, %v746_v43  ;;  %v1406_v51 = vpack.c.bf16 %v749_v10, %v748_v44  ;;  %v1055_v42 = vmul.f32 %v1540_v23, %v1912_v16 }
 0x162   : > { %794 = vst [vmem:[%s2010_s18] sm:$0xff] %v1400_v37  ;;  %795 = vst [vmem:[%s2010_s18 + $0x8] sm:$0xff] %v1401_v11  ;;  %v1057_v15 = vmul.f32 %v1540_v23, %v1923_v45  ;;  %v1059_v53 = vmul.f32 %v1540_v23, %v1926_v38  ;;  %v1061_v24 = vmul.f32 %v1540_v23, %v1931_v27 }
 0x163   : > { %796 = vst [vmem:[%s2010_s18 + $0x10] sm:$0xff] %v1402_v12  ;;  %797 = vst [vmem:[%s2010_s18 + $0x18] sm:$0xff] %v1403_v14  ;;  %v808_v57 = vsel %vm806_vm9, %v1406_v51, %v807_v49  ;;  %v1063_v26 = vmul.f32 %v1540_v23, %v1941_v50  ;;  %v1065_v45 = vmul.f32 %v1540_v23, %v1933_v41 }
 0x164   : > { %798 = vst [vmem:[%s2010_s18 + $0x20] sm:$0xff] %v1404_v20  ;;  %799 = vst [vmem:[%s2010_s18 + $0x28] sm:$0xff] %v1405_v48  ;;  %v1542_v2 = vpop.eup %1541 }
 0x165   : > { %809 = vst [vmem:[%s2010_s18 + $0x30] sm:$0x11] %v808_v57  ;;  %v1054_v16 = vmul.f32 %v1542_v2, %v1958_v58  ;;  %v1056_v33 = vmul.f32 %v1542_v2, %v1960_v36  ;;  %v1058_v34 = vmul.f32 %v1542_v2, %v1965_v32  ;;  %v1060_v19 = vmul.f32 %v1542_v2, %v1970_v29  ;;  %v1394_v32 = vld [vmem:[%s2010_s18 + $0x68] sm:$0x11] }
 0x166   : > { %v1062_v38 = vmul.f32 %v1542_v2, %v1973_v60  ;;  %v1064_v27 = vmul.f32 %v1542_v2, %v1978_v17  ;;  %v1066_v50 = vmul.f32 %v1542_v2, %v1975_v13 }
 0x167   : > { %v1407_v58 = vpack.c.bf16 %v1054_v16, %v1052_v55  ;;  %v1408_v36 = vpack.c.bf16 %v1056_v33, %v1055_v42  ;;  %v1409_v9 = vpack.c.bf16 %v1058_v34, %v1057_v15  ;;  %v1410_v30 = vpack.c.bf16 %v1060_v19, %v1059_v53 }
 0x168   : > { %v1411_v18 = vpack.c.bf16 %v1062_v38, %v1061_v24  ;;  %v1412_v39 = vpack.c.bf16 %v1064_v27, %v1063_v26  ;;  %v1413_v29 = vpack.c.bf16 %v1066_v50, %v1065_v45  ;;  %1127 = sbr.rel (!%p1646_p3) target bundleno = 373 (0x175), region = 48 }
 0x169   : > { %1388 = vst [vmem:[%s2010_s18 + $0x38] sm:$0xff] %v1407_v58  ;;  %1389 = vst [vmem:[%s2010_s18 + $0x40] sm:$0xff] %v1408_v36  ;;  %v1190_v60 = vld [vmem:[%s2010_s18] sm:$0xff] (%p1646_p3)  ;;  %v1192_v13 = vld [vmem:[%s2010_s18 + $0x8] sm:$0xff] (%p1646_p3) }
 0x16a   : > { %1390 = vst [vmem:[%s2010_s18 + $0x48] sm:$0xff] %v1409_v9  ;;  %1391 = vst [vmem:[%s2010_s18 + $0x50] sm:$0xff] %v1410_v30  ;;  %v1119_v41 = vsel %vm806_vm9, %v1413_v29, %v1394_v32  ;;  %v1194_v17 = vld [vmem:[%s2010_s18 + $0x10] sm:$0xff] (%p1646_p3)  ;;  %v1196_v1 = vld [vmem:[%s2010_s18 + $0x18] sm:$0xff] (%p1646_p3) }
 0x16b   : > { %1392 = vst [vmem:[%s2010_s18 + $0x58] sm:$0xff] %v1411_v18  ;;  %1393 = vst [vmem:[%s2010_s18 + $0x60] sm:$0xff] %v1412_v39  ;;  %v1198_v61 = vld [vmem:[%s2010_s18 + $0x20] sm:$0xff] (%p1646_p3)  ;;  %v1200_v46 = vld [vmem:[%s2010_s18 + $0x28] sm:$0xff] (%p1646_p3) }
 0x16c   : > { %1395 = vst [vmem:[%s2010_s18 + $0x68] sm:$0x11] %v1119_v41  ;;  %v1202_v47 = vld [vmem:[%s2010_s18 + $0x30] sm:$0xff] (%p1646_p3)  ;;  %1191 = vst [vmem:[%s1135_s8] sm:$0xff] (%p1646_p3), %v1190_v60 }
 0x16d   : > { %1193 = vst [vmem:[%s1135_s8 + $0x8] sm:$0xff] %v1192_v13  ;;  %1195 = vst [vmem:[%s1135_s8 + $0x10] sm:$0xff] %v1194_v17 }
 0x16e   : > { %1197 = vst [vmem:[%s1135_s8 + $0x18] sm:$0xff] %v1196_v1  ;;  %1199 = vst [vmem:[%s1135_s8 + $0x20] sm:$0xff] %v1198_v61 }
 0x16f   : > { %1201 = vst [vmem:[%s1135_s8 + $0x28] sm:$0xff] %v1200_v46  ;;  %1203 = vst [vmem:[%s1135_s8 + $0x30] sm:$0xff] %v1202_v47 }
 0x170   : > { %v1204_v31 = vld [vmem:[%s2010_s18 + $0x38] sm:$0xff]  ;;  %v1206_v40 = vld [vmem:[%s2010_s18 + $0x40] sm:$0xff] }
 0x171   : > { %1205 = vst [vmem:[%s1135_s8 + $0x70] sm:$0xff] %v1204_v31  ;;  %1207 = vst [vmem:[%s1135_s8 + $0x78] sm:$0xff] %v1206_v40  ;;  %v1208_v35 = vld [vmem:[%s2010_s18 + $0x48] sm:$0xff]  ;;  %v1210_v22 = vld [vmem:[%s2010_s18 + $0x50] sm:$0xff] }
 0x172   : > { %v1212_v28 = vld [vmem:[%s2010_s18 + $0x58] sm:$0xff]  ;;  %1209 = vst [vmem:[%s1135_s8 + $0x80] sm:$0xff] %v1208_v35  ;;  %1211 = vst [vmem:[%s1135_s8 + $0x88] sm:$0xff] %v1210_v22  ;;  %v1214_v52 = vld [vmem:[%s2010_s18 + $0x60] sm:$0xff] }
 0x173   : > { %1213 = vst [vmem:[%s1135_s8 + $0x90] sm:$0xff] %v1212_v28  ;;  %v1216_v56 = vld [vmem:[%s2010_s18 + $0x68] sm:$0xff]  ;;  %1215 = vst [vmem:[%s1135_s8 + $0x98] sm:$0xff] %v1214_v52 }
 0x174   : > { %1217 = vst [vmem:[%s1135_s8 + $0xa0] sm:$0xff] %v1216_v56 }
 0x175 PF: > { %s15_s22 = sadd.s32 1, %s1581_s22   ;;  %s2098_s18 = smov %s1569_s19 }
 0x176   : > { %p12_p9 = scmp.ge.s32.totalorder %s15_s22, 4   ;;  %s2099_s19 = smov %s1655_s28 }
 0x177   : > { %s2100_s20 = smov %s1577_s21  ;;  %s2101_s21 = smov %s2103_s24 }
 0x178   :  { %14 = sbr.rel (!%p12_p9) target bundleno = 3 (0x3), region = 120 }

</bundles_post_ra>
